<compile_context>
chip_gen: v5e
topology: v5e:2x2
jax: 0.10.0
libtpu: 0.0.40
codegen_flags: <defaults>
</compile_context>

<pallas_src>
import math

import jax
import jax.numpy as jnp
from jax.experimental import pallas as pl
from jax.experimental.pallas import tpu as pltpu

# ---------------- config (small synthetic sizes) ----------------
HIDDEN = 32        # cfg.hidden_size
NHEAD = 4          # cfg.num_attention_heads
NUM_ENC = 2        # cfg.num_encoder_layers
NUM_DEC = 2        # cfg.num_decoder_layers
FFN = 64           # cfg.dim_feedforward
SEQ = 8
BATCH = 2
EPS = 1e-5         # nn.LayerNorm default eps inside nn.Transformer
HEAD_DIM = HIDDEN // NHEAD
LANES = 128        # lane-dense slab width


# ---------------- static parameter-slab layout (shared by init and kernel) ----------------
def _build_layout():
    w_entries = []   # (name, K, M): weight stored pre-transposed, used as x @ W
    v_entries = []   # (name, M, init): bias / LayerNorm vectors

    def mha(p):
        w_entries.append((p + "in", HIDDEN, 3 * HIDDEN))
        w_entries.append((p + "out", HIDDEN, HIDDEN))
        v_entries.append((p + "in_b", 3 * HIDDEN, "randn"))
        v_entries.append((p + "out_b", HIDDEN, "randn"))

    def ffn(p):
        w_entries.append((p + "lin1", HIDDEN, FFN))
        w_entries.append((p + "lin2", FFN, HIDDEN))
        v_entries.append((p + "lin1_b", FFN, "randn"))
        v_entries.append((p + "lin2_b", HIDDEN, "randn"))

    def norm(p):
        v_entries.append((p + "g", HIDDEN, "ones"))
        v_entries.append((p + "b", HIDDEN, "zeros"))

    for i in range(NUM_ENC):
        p = f"enc{i}_"
        mha(p + "attn_"); ffn(p); norm(p + "norm1_"); norm(p + "norm2_")
    for i in range(NUM_DEC):
        p = f"dec{i}_"
        mha(p + "sa_"); mha(p + "ca_"); ffn(p)
        norm(p + "norm1_"); norm(p + "norm2_"); norm(p + "norm3_")
    norm("enc_norm_"); norm("dec_norm_")
    w_entries.append(("fc", HIDDEN, HIDDEN))
    v_entries.append(("fc_b", HIDDEN, "randn"))

    w_off, row = {}, 0
    for name, k, m in w_entries:
        w_off[name] = (row, k, m)
        row += k                                  # all K are multiples of 32 -> aligned
    w_rows = ((row + 15) // 16) * 16              # bf16 sublane-tile aligned

    v_off, vrow = {}, 0
    for name, m, _ in v_entries:
        v_off[name] = (vrow, m)
        vrow += 8                                 # one 8-row sublane tile per vector
    return w_entries, v_entries, w_off, v_off, w_rows, vrow


W_ENTRIES, V_ENTRIES, W_OFF, V_OFF, W_ROWS, V_ROWS = _build_layout()


# ---------------- in-kernel slab accessors (static slices of VMEM refs) ----------------
def _w(w_ref, name):
    off, k, m = W_OFF[name]
    return w_ref[off:off + k, :m]           # bf16 (K, M)


def _v(v_ref, name):
    off, m = V_OFF[name]
    return v_ref[off:off + 1, :m]           # f32 (1, M)


# ---------------- in-kernel building blocks ----------------
def _linear(x, w_ref, v_ref, wname, bname, relu=False):
    # x: (N, K) f32 -> (N, M) f32; bf16 MXU operands, f32 accumulate.
    y = jnp.dot(x.astype(jnp.bfloat16), _w(w_ref, wname),
                preferred_element_type=jnp.float32) + _v(v_ref, bname)
    if relu:
        y = jnp.maximum(y, 0.0)
    return y


def _layernorm(x, v_ref, prefix):
    # x: (N, E) f32; all elementwise math stays in f32.
    g = _v(v_ref, prefix + "g")
    b = _v(v_ref, prefix + "b")
    mean = jnp.mean(x, axis=-1, keepdims=True)
    c = x - mean
    var = jnp.mean(c * c, axis=-1, keepdims=True)
    return c * jax.lax.rsqrt(var + EPS) * g + b


def _attention(xq, xkv, w_ref, v_ref, prefix, self_attn):
    # xq: (B, Sq, E) f32, xkv: (B, Sk, E) f32  ->  (B*Sq, E) f32
    B, Sq, E = xq.shape
    Sk = xkv.shape[1]
    scale = 1.0 / math.sqrt(HEAD_DIM)

    w_in = _w(w_ref, prefix + "in")         # (E, 3E) bf16
    b_in = _v(v_ref, prefix + "in_b")       # (1, 3E) f32
    qf = xq.reshape(B * Sq, E).astype(jnp.bfloat16)

    if self_attn:
        # fused QKV projection: one (B*S, E) @ (E, 3E) GEMM
        qkv = jnp.dot(qf, w_in, preferred_element_type=jnp.float32) + b_in
        q, k, v = qkv[:, :E], qkv[:, E:2 * E], qkv[:, 2 * E:]
    else:
        kvf = xkv.reshape(B * Sk, E).astype(jnp.bfloat16)
        q = jnp.dot(qf, w_in[:, :E], preferred_element_type=jnp.float32) + b_in[:, :E]
        kv = jnp.dot(kvf, w_in[:, E:], preferred_element_type=jnp.float32) + b_in[:, E:]
        k, v = kv[:, :E], kv[:, E:]

    qb = (q * scale).astype(jnp.bfloat16).reshape(B, Sq, E)
    kb = k.astype(jnp.bfloat16).reshape(B, Sk, E)
    vb = v.astype(jnp.bfloat16).reshape(B, Sk, E)

    heads = []
    for h in range(NHEAD):                  # static unroll; lane slices only
        lo = h * HEAD_DIM
        s = jnp.einsum("bqd,bkd->bqk",
                       qb[:, :, lo:lo + HEAD_DIM], kb[:, :, lo:lo + HEAD_DIM],
                       preferred_element_type=jnp.float32)
        m = jnp.max(s, axis=-1, keepdims=True)
        e = jnp.exp(s - m)
        inv = pl.reciprocal(jnp.sum(e, axis=-1, keepdims=True), approx=True)
        p = (e * inv).astype(jnp.bfloat16)
        heads.append(jnp.einsum("bqk,bkd->bqd", p, vb[:, :, lo:lo + HEAD_DIM],
                                preferred_element_type=jnp.float32))

    # lane-concat the head outputs, then ONE output-projection GEMM (E contraction)
    o = jnp.concatenate(heads, axis=-1).reshape(B * Sq, E).astype(jnp.bfloat16)
    out = jnp.dot(o, _w(w_ref, prefix + "out"), preferred_element_type=jnp.float32)
    return out + _v(v_ref, prefix + "out_b")


def _encoder_layer(h, i, w_ref, v_ref):
    # h: (B*S, E) f32; post-norm (norm_first=False), relu FFN — nn.TransformerEncoderLayer defaults
    p = f"enc{i}_"
    x3 = h.reshape(BATCH, SEQ, HIDDEN)
    attn = _attention(x3, x3, w_ref, v_ref, p + "attn_", self_attn=True)
    h = _layernorm(h + attn, v_ref, p + "norm1_")
    ff = _linear(h, w_ref, v_ref, p + "lin1", p + "lin1_b", relu=True)
    ff = _linear(ff, w_ref, v_ref, p + "lin2", p + "lin2_b")
    return _layernorm(h + ff, v_ref, p + "norm2_")


def _decoder_layer(h, mem3, i, w_ref, v_ref):
    # h: (B*S, E) f32; mem3: (B, S, E) f32
    p = f"dec{i}_"
    x3 = h.reshape(BATCH, SEQ, HIDDEN)
    sa = _attention(x3, x3, w_ref, v_ref, p + "sa_", self_attn=True)
    h = _layernorm(h + sa, v_ref, p + "norm1_")
    ca = _attention(h.reshape(BATCH, SEQ, HIDDEN), mem3, w_ref, v_ref, p + "ca_",
                    self_attn=False)
    h = _layernorm(h + ca, v_ref, p + "norm2_")
    ff = _linear(h, w_ref, v_ref, p + "lin1", p + "lin1_b", relu=True)
    ff = _linear(ff, w_ref, v_ref, p + "lin2", p + "lin2_b")
    return _layernorm(h + ff, v_ref, p + "norm3_")


# ---------------- the single fused kernel (whole forward, no grid) ----------------
def _transformer_kernel(x_ref, w_ref, v_ref, out_ref):
    # (S, B, E) -> batch-major (B*S, E) inside the kernel (no host transpose op)
    x = jnp.concatenate([x_ref[:, b, :] for b in range(BATCH)], axis=0)   # (B*S, E) f32

    # encoder stack + final encoder LayerNorm (nn.Transformer attaches one)
    mem = x
    for i in range(NUM_ENC):
        mem = _encoder_layer(mem, i, w_ref, v_ref)
    mem = _layernorm(mem, v_ref, "enc_norm_")
    mem3 = mem.reshape(BATCH, SEQ, HIDDEN)

    # decoder stack (tgt = x) + final decoder LayerNorm
    h = x
    for i in range(NUM_DEC):
        h = _decoder_layer(h, mem3, i, w_ref, v_ref)
    h = _layernorm(h, v_ref, "dec_norm_")

    # self.fc
    out = _linear(h, w_ref, v_ref, "fc", "fc_b")        # (B*S, E) f32

    # write back in the original (S, B, E) layout
    for b in range(BATCH):
        out_ref[:, b, :] = out[b * SEQ:(b + 1) * SEQ, :]


# ---------------- wrapper: one pallas_call, three whole-array VMEM inputs ----------------
def transformer_encoder_forward(obs_dict, w_slab, v_slab):
    x = obs_dict["obs"]                                  # (S, B, E) — PyTorch layout
    S, B, E = x.shape
    assert (S, B, E) == (SEQ, BATCH, HIDDEN)
    vmem = pltpu.MemorySpace.VMEM
    return pl.pallas_call(
        _transformer_kernel,
        out_shape=jax.ShapeDtypeStruct((S, B, E), jnp.float32),
        in_specs=[pl.BlockSpec(memory_space=vmem),       # x (whole array, VMEM resident)
                  pl.BlockSpec(memory_space=vmem),       # bf16 weight slab
                  pl.BlockSpec(memory_space=vmem)],      # f32 bias/norm slab
        out_specs=pl.BlockSpec(memory_space=vmem),
        compiler_params=pltpu.CompilerParams(vmem_limit_bytes=32 * 1024 * 1024),
    )(x, w_slab, v_slab)


# ---------------- deterministic parameter init: pack directly into the two slabs ----------
def init_params(key):
    n_rand = len(W_ENTRIES) + sum(1 for _, _, kind in V_ENTRIES if kind == "randn")
    keys = iter(jax.random.split(key, n_rand))

    w_slab = jnp.zeros((W_ROWS, LANES), jnp.float32)
    for name, k, m in W_ENTRIES:
        off, _, _ = W_OFF[name]
        w = jax.random.normal(next(keys), (k, m), jnp.float32) * 0.02   # pre-transposed
        w_slab = w_slab.at[off:off + k, :m].set(w)

    v_slab = jnp.zeros((V_ROWS, LANES), jnp.float32)
    for name, m, kind in V_ENTRIES:
        off, _ = V_OFF[name]
        if kind == "randn":
            vec = jax.random.normal(next(keys), (1, m), jnp.float32) * 0.02
        elif kind == "ones":
            vec = jnp.ones((1, m), jnp.float32)
        else:
            vec = jnp.zeros((1, m), jnp.float32)
        v_slab = v_slab.at[off:off + 1, :m].set(vec)

    return w_slab.astype(jnp.bfloat16), v_slab


if __name__ == "__main__":
    key = jax.random.PRNGKey(0)
    pkey, xkey = jax.random.split(key)
    w_slab, v_slab = init_params(pkey)

    x = jax.random.normal(xkey, (SEQ, BATCH, HIDDEN), jnp.float32)   # (seq, batch, hidden)
    obs_dict = {"obs": x}

    fwd = jax.jit(transformer_encoder_forward)
    out = fwd(obs_dict, w_slab, v_slab)
    out = jax.block_until_ready(out)

    assert out.shape == (SEQ, BATCH, HIDDEN), out.shape
    assert bool(jnp.all(jnp.isfinite(out)))
    print("KERNEL_OK")
</pallas_src>

<mosaic_0001>
module attributes {stable_mosaic.version = 11 : i64} {
  func.func @_transformer_kernel(%arg0: memref<8x2x32xf32, #tpu.memory_space<vmem>>, %arg1: memref<800x128xbf16, #tpu.memory_space<vmem>>, %arg2: memref<360x128xf32, #tpu.memory_space<vmem>>, %arg3: memref<8x2x32xf32, #tpu.memory_space<vmem>>) attributes {dimension_semantics = [], scalar_prefetch = 0 : i64, scratch_operands = 0 : i64, tpu.core_type = #tpu.core_type<tc>} {
    %c0 = arith.constant 0 : index
    %c0_0 = arith.constant 0 : index
    %c0_1 = arith.constant 0 : index
    %0 = vector.load %arg0[%c0, %c0_0, %c0_1] : memref<8x2x32xf32, #tpu.memory_space<vmem>>, vector<8x1x32xf32>
    %1 = vector.shape_cast %0 : vector<8x1x32xf32> to vector<8x32xf32>
    %c0_2 = arith.constant 0 : index
    %c1 = arith.constant 1 : index
    %c0_3 = arith.constant 0 : index
    %2 = vector.load %arg0[%c0_2, %c1, %c0_3] : memref<8x2x32xf32, #tpu.memory_space<vmem>>, vector<8x1x32xf32>
    %3 = vector.shape_cast %2 : vector<8x1x32xf32> to vector<8x32xf32>
    %4 = tpu.concatenate %1, %3 in 0 : vector<8x32xf32>, vector<8x32xf32> -> vector<16x32xf32>
    %5 = vector.shape_cast %4 : vector<16x32xf32> to vector<2x8x32xf32>
    %c0_4 = arith.constant 0 : index
    %c0_5 = arith.constant 0 : index
    %6 = vector.load %arg1[%c0_4, %c0_5] : memref<800x128xbf16, #tpu.memory_space<vmem>>, vector<32x96xbf16>
    %c0_6 = arith.constant 0 : index
    %c0_7 = arith.constant 0 : index
    %7 = vector.load %arg2[%c0_6, %c0_7] : memref<360x128xf32, #tpu.memory_space<vmem>>, vector<1x96xf32>
    %8 = vector.shape_cast %5 : vector<2x8x32xf32> to vector<16x32xf32>
    %9 = arith.truncf %8 : vector<16x32xf32> to vector<16x32xbf16>
    %cst = arith.constant dense<0.000000e+00> : vector<16x96xf32>
    %10 = tpu.matmul %9, %6, %cst {dimension_numbers = #tpu.dot_dimension_numbers<[1], [0], [0], [1], [0, 0, 1, 1], [], []>} : vector<16x32xbf16>, vector<32x96xbf16>, vector<16x96xf32> -> vector<16x96xf32>
    %11 = vector.broadcast %7 : vector<1x96xf32> to vector<16x96xf32>
    %12 = arith.addf %10, %11 : vector<16x96xf32>
    %13 = vector.extract_strided_slice %12 {offsets = [0, 0], sizes = [16, 32], strides = [1, 1]} : vector<16x96xf32> to vector<16x32xf32>
    %14 = vector.extract_strided_slice %12 {offsets = [0, 32], sizes = [16, 32], strides = [1, 1]} : vector<16x96xf32> to vector<16x32xf32>
    %15 = vector.extract_strided_slice %12 {offsets = [0, 64], sizes = [16, 32], strides = [1, 1]} : vector<16x96xf32> to vector<16x32xf32>
    %cst_8 = arith.constant 0.353553385 : f32
    %16 = vector.broadcast %cst_8 : f32 to vector<16x32xf32>
    %17 = arith.mulf %13, %16 : vector<16x32xf32>
    %18 = arith.truncf %17 : vector<16x32xf32> to vector<16x32xbf16>
    %19 = vector.shape_cast %18 : vector<16x32xbf16> to vector<2x8x32xbf16>
    %20 = arith.truncf %14 : vector<16x32xf32> to vector<16x32xbf16>
    %21 = vector.shape_cast %20 : vector<16x32xbf16> to vector<2x8x32xbf16>
    %22 = arith.truncf %15 : vector<16x32xf32> to vector<16x32xbf16>
    %23 = vector.shape_cast %22 : vector<16x32xbf16> to vector<2x8x32xbf16>
    %24 = vector.extract_strided_slice %19 {offsets = [0, 0, 0], sizes = [2, 8, 8], strides = [1, 1, 1]} : vector<2x8x32xbf16> to vector<2x8x8xbf16>
    %25 = vector.extract_strided_slice %21 {offsets = [0, 0, 0], sizes = [2, 8, 8], strides = [1, 1, 1]} : vector<2x8x32xbf16> to vector<2x8x8xbf16>
    "tpu.trace_start"() <{level = 10 : i32, message = "bqd,bkd->bqk"}> : () -> ()
    %cst_9 = arith.constant dense<0.000000e+00> : vector<2x8x8xf32>
    %26 = tpu.matmul %24, %25, %cst_9 {dimension_numbers = #tpu.dot_dimension_numbers<[2], [2], [1], [1], [0, 0, 0, 1, 1, 1], [0], [0]>} : vector<2x8x8xbf16>, vector<2x8x8xbf16>, vector<2x8x8xf32> -> vector<2x8x8xf32>
    "tpu.trace_stop"() : () -> ()
    %cst_10 = arith.constant dense<0xFF800000> : vector<2x8xf32>
    %27 = vector.multi_reduction <maximumf>, %26, %cst_10 [2] : vector<2x8x8xf32> to vector<2x8xf32>
    %28 = vector.shape_cast %27 : vector<2x8xf32> to vector<2x8x1xf32>
    %29 = vector.broadcast %28 : vector<2x8x1xf32> to vector<2x8x8xf32>
    %30 = arith.subf %26, %29 : vector<2x8x8xf32>
    %31 = math.exp %30 : vector<2x8x8xf32>
    %cst_11 = arith.constant dense<0.000000e+00> : vector<2x8xf32>
    %32 = vector.multi_reduction <add>, %31, %cst_11 [2] : vector<2x8x8xf32> to vector<2x8xf32>
    %33 = vector.shape_cast %32 : vector<2x8xf32> to vector<2x8x1xf32>
    %34 = tpu.reciprocal %33 {approx = true} : vector<2x8x1xf32> -> vector<2x8x1xf32>
    %35 = vector.broadcast %34 : vector<2x8x1xf32> to vector<2x8x8xf32>
    %36 = arith.mulf %31, %35 : vector<2x8x8xf32>
    %37 = arith.truncf %36 : vector<2x8x8xf32> to vector<2x8x8xbf16>
    %38 = vector.extract_strided_slice %23 {offsets = [0, 0, 0], sizes = [2, 8, 8], strides = [1, 1, 1]} : vector<2x8x32xbf16> to vector<2x8x8xbf16>
    "tpu.trace_start"() <{level = 10 : i32, message = "bqk,bkd->bqd"}> : () -> ()
    %cst_12 = arith.constant dense<0.000000e+00> : vector<2x8x8xf32>
    %39 = tpu.matmul %37, %38, %cst_12 {dimension_numbers = #tpu.dot_dimension_numbers<[2], [1], [1], [2], [0, 0, 0, 1, 1, 2], [0], [0]>} : vector<2x8x8xbf16>, vector<2x8x8xbf16>, vector<2x8x8xf32> -> vector<2x8x8xf32>
    "tpu.trace_stop"() : () -> ()
    %40 = vector.extract_strided_slice %19 {offsets = [0, 0, 8], sizes = [2, 8, 8], strides = [1, 1, 1]} : vector<2x8x32xbf16> to vector<2x8x8xbf16>
    %41 = vector.extract_strided_slice %21 {offsets = [0, 0, 8], sizes = [2, 8, 8], strides = [1, 1, 1]} : vector<2x8x32xbf16> to vector<2x8x8xbf16>
    "tpu.trace_start"() <{level = 10 : i32, message = "bqd,bkd->bqk"}> : () -> ()
    %cst_13 = arith.constant dense<0.000000e+00> : vector<2x8x8xf32>
    %42 = tpu.matmul %40, %41, %cst_13 {dimension_numbers = #tpu.dot_dimension_numbers<[2], [2], [1], [1], [0, 0, 0, 1, 1, 1], [0], [0]>} : vector<2x8x8xbf16>, vector<2x8x8xbf16>, vector<2x8x8xf32> -> vector<2x8x8xf32>
    "tpu.trace_stop"() : () -> ()
    %cst_14 = arith.constant dense<0xFF800000> : vector<2x8xf32>
    %43 = vector.multi_reduction <maximumf>, %42, %cst_14 [2] : vector<2x8x8xf32> to vector<2x8xf32>
    %44 = vector.shape_cast %43 : vector<2x8xf32> to vector<2x8x1xf32>
    %45 = vector.broadcast %44 : vector<2x8x1xf32> to vector<2x8x8xf32>
    %46 = arith.subf %42, %45 : vector<2x8x8xf32>
    %47 = math.exp %46 : vector<2x8x8xf32>
    %cst_15 = arith.constant dense<0.000000e+00> : vector<2x8xf32>
    %48 = vector.multi_reduction <add>, %47, %cst_15 [2] : vector<2x8x8xf32> to vector<2x8xf32>
    %49 = vector.shape_cast %48 : vector<2x8xf32> to vector<2x8x1xf32>
    %50 = tpu.reciprocal %49 {approx = true} : vector<2x8x1xf32> -> vector<2x8x1xf32>
    %51 = vector.broadcast %50 : vector<2x8x1xf32> to vector<2x8x8xf32>
    %52 = arith.mulf %47, %51 : vector<2x8x8xf32>
    %53 = arith.truncf %52 : vector<2x8x8xf32> to vector<2x8x8xbf16>
    %54 = vector.extract_strided_slice %23 {offsets = [0, 0, 8], sizes = [2, 8, 8], strides = [1, 1, 1]} : vector<2x8x32xbf16> to vector<2x8x8xbf16>
    "tpu.trace_start"() <{level = 10 : i32, message = "bqk,bkd->bqd"}> : () -> ()
    %cst_16 = arith.constant dense<0.000000e+00> : vector<2x8x8xf32>
    %55 = tpu.matmul %53, %54, %cst_16 {dimension_numbers = #tpu.dot_dimension_numbers<[2], [1], [1], [2], [0, 0, 0, 1, 1, 2], [0], [0]>} : vector<2x8x8xbf16>, vector<2x8x8xbf16>, vector<2x8x8xf32> -> vector<2x8x8xf32>
    "tpu.trace_stop"() : () -> ()
    %56 = vector.extract_strided_slice %19 {offsets = [0, 0, 16], sizes = [2, 8, 8], strides = [1, 1, 1]} : vector<2x8x32xbf16> to vector<2x8x8xbf16>
    %57 = vector.extract_strided_slice %21 {offsets = [0, 0, 16], sizes = [2, 8, 8], strides = [1, 1, 1]} : vector<2x8x32xbf16> to vector<2x8x8xbf16>
    "tpu.trace_start"() <{level = 10 : i32, message = "bqd,bkd->bqk"}> : () -> ()
    %cst_17 = arith.constant dense<0.000000e+00> : vector<2x8x8xf32>
    %58 = tpu.matmul %56, %57, %cst_17 {dimension_numbers = #tpu.dot_dimension_numbers<[2], [2], [1], [1], [0, 0, 0, 1, 1, 1], [0], [0]>} : vector<2x8x8xbf16>, vector<2x8x8xbf16>, vector<2x8x8xf32> -> vector<2x8x8xf32>
    "tpu.trace_stop"() : () -> ()
    %cst_18 = arith.constant dense<0xFF800000> : vector<2x8xf32>
    %59 = vector.multi_reduction <maximumf>, %58, %cst_18 [2] : vector<2x8x8xf32> to vector<2x8xf32>
    %60 = vector.shape_cast %59 : vector<2x8xf32> to vector<2x8x1xf32>
    %61 = vector.broadcast %60 : vector<2x8x1xf32> to vector<2x8x8xf32>
    %62 = arith.subf %58, %61 : vector<2x8x8xf32>
    %63 = math.exp %62 : vector<2x8x8xf32>
    %cst_19 = arith.constant dense<0.000000e+00> : vector<2x8xf32>
    %64 = vector.multi_reduction <add>, %63, %cst_19 [2] : vector<2x8x8xf32> to vector<2x8xf32>
    %65 = vector.shape_cast %64 : vector<2x8xf32> to vector<2x8x1xf32>
    %66 = tpu.reciprocal %65 {approx = true} : vector<2x8x1xf32> -> vector<2x8x1xf32>
    %67 = vector.broadcast %66 : vector<2x8x1xf32> to vector<2x8x8xf32>
    %68 = arith.mulf %63, %67 : vector<2x8x8xf32>
    %69 = arith.truncf %68 : vector<2x8x8xf32> to vector<2x8x8xbf16>
    %70 = vector.extract_strided_slice %23 {offsets = [0, 0, 16], sizes = [2, 8, 8], strides = [1, 1, 1]} : vector<2x8x32xbf16> to vector<2x8x8xbf16>
    "tpu.trace_start"() <{level = 10 : i32, message = "bqk,bkd->bqd"}> : () -> ()
    %cst_20 = arith.constant dense<0.000000e+00> : vector<2x8x8xf32>
    %71 = tpu.matmul %69, %70, %cst_20 {dimension_numbers = #tpu.dot_dimension_numbers<[2], [1], [1], [2], [0, 0, 0, 1, 1, 2], [0], [0]>} : vector<2x8x8xbf16>, vector<2x8x8xbf16>, vector<2x8x8xf32> -> vector<2x8x8xf32>
    "tpu.trace_stop"() : () -> ()
    %72 = vector.extract_strided_slice %19 {offsets = [0, 0, 24], sizes = [2, 8, 8], strides = [1, 1, 1]} : vector<2x8x32xbf16> to vector<2x8x8xbf16>
    %73 = vector.extract_strided_slice %21 {offsets = [0, 0, 24], sizes = [2, 8, 8], strides = [1, 1, 1]} : vector<2x8x32xbf16> to vector<2x8x8xbf16>
    "tpu.trace_start"() <{level = 10 : i32, message = "bqd,bkd->bqk"}> : () -> ()
    %cst_21 = arith.constant dense<0.000000e+00> : vector<2x8x8xf32>
    %74 = tpu.matmul %72, %73, %cst_21 {dimension_numbers = #tpu.dot_dimension_numbers<[2], [2], [1], [1], [0, 0, 0, 1, 1, 1], [0], [0]>} : vector<2x8x8xbf16>, vector<2x8x8xbf16>, vector<2x8x8xf32> -> vector<2x8x8xf32>
    "tpu.trace_stop"() : () -> ()
    %cst_22 = arith.constant dense<0xFF800000> : vector<2x8xf32>
    %75 = vector.multi_reduction <maximumf>, %74, %cst_22 [2] : vector<2x8x8xf32> to vector<2x8xf32>
    %76 = vector.shape_cast %75 : vector<2x8xf32> to vector<2x8x1xf32>
    %77 = vector.broadcast %76 : vector<2x8x1xf32> to vector<2x8x8xf32>
    %78 = arith.subf %74, %77 : vector<2x8x8xf32>
    %79 = math.exp %78 : vector<2x8x8xf32>
    %cst_23 = arith.constant dense<0.000000e+00> : vector<2x8xf32>
    %80 = vector.multi_reduction <add>, %79, %cst_23 [2] : vector<2x8x8xf32> to vector<2x8xf32>
    %81 = vector.shape_cast %80 : vector<2x8xf32> to vector<2x8x1xf32>
    %82 = tpu.reciprocal %81 {approx = true} : vector<2x8x1xf32> -> vector<2x8x1xf32>
    %83 = vector.broadcast %82 : vector<2x8x1xf32> to vector<2x8x8xf32>
    %84 = arith.mulf %79, %83 : vector<2x8x8xf32>
    %85 = arith.truncf %84 : vector<2x8x8xf32> to vector<2x8x8xbf16>
    %86 = vector.extract_strided_slice %23 {offsets = [0, 0, 24], sizes = [2, 8, 8], strides = [1, 1, 1]} : vector<2x8x32xbf16> to vector<2x8x8xbf16>
    "tpu.trace_start"() <{level = 10 : i32, message = "bqk,bkd->bqd"}> : () -> ()
    %cst_24 = arith.constant dense<0.000000e+00> : vector<2x8x8xf32>
    %87 = tpu.matmul %85, %86, %cst_24 {dimension_numbers = #tpu.dot_dimension_numbers<[2], [1], [1], [2], [0, 0, 0, 1, 1, 2], [0], [0]>} : vector<2x8x8xbf16>, vector<2x8x8xbf16>, vector<2x8x8xf32> -> vector<2x8x8xf32>
    "tpu.trace_stop"() : () -> ()
    %88 = tpu.concatenate %39, %55, %71, %87 in 2 : vector<2x8x8xf32>, vector<2x8x8xf32>, vector<2x8x8xf32>, vector<2x8x8xf32> -> vector<2x8x32xf32>
    %89 = vector.shape_cast %88 : vector<2x8x32xf32> to vector<16x32xf32>
    %90 = arith.truncf %89 : vector<16x32xf32> to vector<16x32xbf16>
    %c32 = arith.constant 32 : index
    %c0_25 = arith.constant 0 : index
    %91 = vector.load %arg1[%c32, %c0_25] : memref<800x128xbf16, #tpu.memory_space<vmem>>, vector<32x32xbf16>
    %cst_26 = arith.constant dense<0.000000e+00> : vector<16x32xf32>
    %92 = tpu.matmul %90, %91, %cst_26 {dimension_numbers = #tpu.dot_dimension_numbers<[1], [0], [0], [1], [0, 0, 1, 1], [], []>} : vector<16x32xbf16>, vector<32x32xbf16>, vector<16x32xf32> -> vector<16x32xf32>
    %c8 = arith.constant 8 : index
    %c0_27 = arith.constant 0 : index
    %93 = vector.load %arg2[%c8, %c0_27] : memref<360x128xf32, #tpu.memory_space<vmem>>, vector<1x32xf32>
    %94 = vector.broadcast %93 : vector<1x32xf32> to vector<16x32xf32>
    %95 = arith.addf %92, %94 : vector<16x32xf32>
    %96 = arith.addf %4, %95 : vector<16x32xf32>
    %c32_28 = arith.constant 32 : index
    %c0_29 = arith.constant 0 : index
    %97 = vector.load %arg2[%c32_28, %c0_29] : memref<360x128xf32, #tpu.memory_space<vmem>>, vector<1x32xf32>
    %c40 = arith.constant 40 : index
    %c0_30 = arith.constant 0 : index
    %98 = vector.load %arg2[%c40, %c0_30] : memref<360x128xf32, #tpu.memory_space<vmem>>, vector<1x32xf32>
    %cst_31 = arith.constant dense<0.000000e+00> : vector<16xf32>
    %99 = vector.multi_reduction <add>, %96, %cst_31 [1] : vector<16x32xf32> to vector<16xf32>
    %100 = vector.shape_cast %99 : vector<16xf32> to vector<16x1xf32>
    %cst_32 = arith.constant 3.200000e+01 : f32
    %101 = vector.broadcast %cst_32 : f32 to vector<16x1xf32>
    %102 = arith.divf %100, %101 : vector<16x1xf32>
    %103 = vector.broadcast %102 : vector<16x1xf32> to vector<16x32xf32>
    %104 = arith.subf %96, %103 : vector<16x32xf32>
    %105 = arith.mulf %104, %104 : vector<16x32xf32>
    %cst_33 = arith.constant dense<0.000000e+00> : vector<16xf32>
    %106 = vector.multi_reduction <add>, %105, %cst_33 [1] : vector<16x32xf32> to vector<16xf32>
    %107 = vector.shape_cast %106 : vector<16xf32> to vector<16x1xf32>
    %cst_34 = arith.constant 3.200000e+01 : f32
    %108 = vector.broadcast %cst_34 : f32 to vector<16x1xf32>
    %109 = arith.divf %107, %108 : vector<16x1xf32>
    %cst_35 = arith.constant 9.99999974E-6 : f32
    %110 = vector.broadcast %cst_35 : f32 to vector<16x1xf32>
    %111 = arith.addf %109, %110 : vector<16x1xf32>
    %112 = math.rsqrt %111 : vector<16x1xf32>
    %113 = vector.broadcast %112 : vector<16x1xf32> to vector<16x32xf32>
    %114 = arith.mulf %104, %113 : vector<16x32xf32>
    %115 = vector.broadcast %97 : vector<1x32xf32> to vector<16x32xf32>
    %116 = arith.mulf %114, %115 : vector<16x32xf32>
    %117 = vector.broadcast %98 : vector<1x32xf32> to vector<16x32xf32>
    %118 = arith.addf %116, %117 : vector<16x32xf32>
    %119 = arith.truncf %118 : vector<16x32xf32> to vector<16x32xbf16>
    %c64 = arith.constant 64 : index
    %c0_36 = arith.constant 0 : index
    %120 = vector.load %arg1[%c64, %c0_36] : memref<800x128xbf16, #tpu.memory_space<vmem>>, vector<32x64xbf16>
    %cst_37 = arith.constant dense<0.000000e+00> : vector<16x64xf32>
    %121 = tpu.matmul %119, %120, %cst_37 {dimension_numbers = #tpu.dot_dimension_numbers<[1], [0], [0], [1], [0, 0, 1, 1], [], []>} : vector<16x32xbf16>, vector<32x64xbf16>, vector<16x64xf32> -> vector<16x64xf32>
    %c16 = arith.constant 16 : index
    %c0_38 = arith.constant 0 : index
    %122 = vector.load %arg2[%c16, %c0_38] : memref<360x128xf32, #tpu.memory_space<vmem>>, vector<1x64xf32>
    %123 = vector.broadcast %122 : vector<1x64xf32> to vector<16x64xf32>
    %124 = arith.addf %121, %123 : vector<16x64xf32>
    %cst_39 = arith.constant 0.000000e+00 : f32
    %125 = vector.broadcast %cst_39 : f32 to vector<16x64xf32>
    %126 = arith.maximumf %124, %125 : vector<16x64xf32>
    %127 = arith.truncf %126 : vector<16x64xf32> to vector<16x64xbf16>
    %c96 = arith.constant 96 : index
    %c0_40 = arith.constant 0 : index
    %128 = vector.load %arg1[%c96, %c0_40] : memref<800x128xbf16, #tpu.memory_space<vmem>>, vector<64x32xbf16>
    %cst_41 = arith.constant dense<0.000000e+00> : vector<16x32xf32>
    %129 = tpu.matmul %127, %128, %cst_41 {dimension_numbers = #tpu.dot_dimension_numbers<[1], [0], [0], [1], [0, 0, 1, 1], [], []>} : vector<16x64xbf16>, vector<64x32xbf16>, vector<16x32xf32> -> vector<16x32xf32>
    %c24 = arith.constant 24 : index
    %c0_42 = arith.constant 0 : index
    %130 = vector.load %arg2[%c24, %c0_42] : memref<360x128xf32, #tpu.memory_space<vmem>>, vector<1x32xf32>
    %131 = vector.broadcast %130 : vector<1x32xf32> to vector<16x32xf32>
    %132 = arith.addf %129, %131 : vector<16x32xf32>
    %133 = arith.addf %118, %132 : vector<16x32xf32>
    %c48 = arith.constant 48 : index
    %c0_43 = arith.constant 0 : index
    %134 = vector.load %arg2[%c48, %c0_43] : memref<360x128xf32, #tpu.memory_space<vmem>>, vector<1x32xf32>
    %c56 = arith.constant 56 : index
    %c0_44 = arith.constant 0 : index
    %135 = vector.load %arg2[%c56, %c0_44] : memref<360x128xf32, #tpu.memory_space<vmem>>, vector<1x32xf32>
    %cst_45 = arith.constant dense<0.000000e+00> : vector<16xf32>
    %136 = vector.multi_reduction <add>, %133, %cst_45 [1] : vector<16x32xf32> to vector<16xf32>
    %137 = vector.shape_cast %136 : vector<16xf32> to vector<16x1xf32>
    %cst_46 = arith.constant 3.200000e+01 : f32
    %138 = vector.broadcast %cst_46 : f32 to vector<16x1xf32>
    %139 = arith.divf %137, %138 : vector<16x1xf32>
    %140 = vector.broadcast %139 : vector<16x1xf32> to vector<16x32xf32>
    %141 = arith.subf %133, %140 : vector<16x32xf32>
    %142 = arith.mulf %141, %141 : vector<16x32xf32>
    %cst_47 = arith.constant dense<0.000000e+00> : vector<16xf32>
    %143 = vector.multi_reduction <add>, %142, %cst_47 [1] : vector<16x32xf32> to vector<16xf32>
    %144 = vector.shape_cast %143 : vector<16xf32> to vector<16x1xf32>
    %cst_48 = arith.constant 3.200000e+01 : f32
    %145 = vector.broadcast %cst_48 : f32 to vector<16x1xf32>
    %146 = arith.divf %144, %145 : vector<16x1xf32>
    %cst_49 = arith.constant 9.99999974E-6 : f32
    %147 = vector.broadcast %cst_49 : f32 to vector<16x1xf32>
    %148 = arith.addf %146, %147 : vector<16x1xf32>
    %149 = math.rsqrt %148 : vector<16x1xf32>
    %150 = vector.broadcast %149 : vector<16x1xf32> to vector<16x32xf32>
    %151 = arith.mulf %141, %150 : vector<16x32xf32>
    %152 = vector.broadcast %134 : vector<1x32xf32> to vector<16x32xf32>
    %153 = arith.mulf %151, %152 : vector<16x32xf32>
    %154 = vector.broadcast %135 : vector<1x32xf32> to vector<16x32xf32>
    %155 = arith.addf %153, %154 : vector<16x32xf32>
    %156 = vector.shape_cast %155 : vector<16x32xf32> to vector<2x8x32xf32>
    %c160 = arith.constant 160 : index
    %c0_50 = arith.constant 0 : index
    %157 = vector.load %arg1[%c160, %c0_50] : memref<800x128xbf16, #tpu.memory_space<vmem>>, vector<32x96xbf16>
    %c64_51 = arith.constant 64 : index
    %c0_52 = arith.constant 0 : index
    %158 = vector.load %arg2[%c64_51, %c0_52] : memref<360x128xf32, #tpu.memory_space<vmem>>, vector<1x96xf32>
    %159 = vector.shape_cast %156 : vector<2x8x32xf32> to vector<16x32xf32>
    %160 = arith.truncf %159 : vector<16x32xf32> to vector<16x32xbf16>
    %cst_53 = arith.constant dense<0.000000e+00> : vector<16x96xf32>
    %161 = tpu.matmul %160, %157, %cst_53 {dimension_numbers = #tpu.dot_dimension_numbers<[1], [0], [0], [1], [0, 0, 1, 1], [], []>} : vector<16x32xbf16>, vector<32x96xbf16>, vector<16x96xf32> -> vector<16x96xf32>
    %162 = vector.broadcast %158 : vector<1x96xf32> to vector<16x96xf32>
    %163 = arith.addf %161, %162 : vector<16x96xf32>
    %164 = vector.extract_strided_slice %163 {offsets = [0, 0], sizes = [16, 32], strides = [1, 1]} : vector<16x96xf32> to vector<16x32xf32>
    %165 = vector.extract_strided_slice %163 {offsets = [0, 32], sizes = [16, 32], strides = [1, 1]} : vector<16x96xf32> to vector<16x32xf32>
    %166 = vector.extract_strided_slice %163 {offsets = [0, 64], sizes = [16, 32], strides = [1, 1]} : vector<16x96xf32> to vector<16x32xf32>
    %cst_54 = arith.constant 0.353553385 : f32
    %167 = vector.broadcast %cst_54 : f32 to vector<16x32xf32>
    %168 = arith.mulf %164, %167 : vector<16x32xf32>
    %169 = arith.truncf %168 : vector<16x32xf32> to vector<16x32xbf16>
    %170 = vector.shape_cast %169 : vector<16x32xbf16> to vector<2x8x32xbf16>
    %171 = arith.truncf %165 : vector<16x32xf32> to vector<16x32xbf16>
    %172 = vector.shape_cast %171 : vector<16x32xbf16> to vector<2x8x32xbf16>
    %173 = arith.truncf %166 : vector<16x32xf32> to vector<16x32xbf16>
    %174 = vector.shape_cast %173 : vector<16x32xbf16> to vector<2x8x32xbf16>
    %175 = vector.extract_strided_slice %170 {offsets = [0, 0, 0], sizes = [2, 8, 8], strides = [1, 1, 1]} : vector<2x8x32xbf16> to vector<2x8x8xbf16>
    %176 = vector.extract_strided_slice %172 {offsets = [0, 0, 0], sizes = [2, 8, 8], strides = [1, 1, 1]} : vector<2x8x32xbf16> to vector<2x8x8xbf16>
    "tpu.trace_start"() <{level = 10 : i32, message = "bqd,bkd->bqk"}> : () -> ()
    %cst_55 = arith.constant dense<0.000000e+00> : vector<2x8x8xf32>
    %177 = tpu.matmul %175, %176, %cst_55 {dimension_numbers = #tpu.dot_dimension_numbers<[2], [2], [1], [1], [0, 0, 0, 1, 1, 1], [0], [0]>} : vector<2x8x8xbf16>, vector<2x8x8xbf16>, vector<2x8x8xf32> -> vector<2x8x8xf32>
    "tpu.trace_stop"() : () -> ()
    %cst_56 = arith.constant dense<0xFF800000> : vector<2x8xf32>
    %178 = vector.multi_reduction <maximumf>, %177, %cst_56 [2] : vector<2x8x8xf32> to vector<2x8xf32>
    %179 = vector.shape_cast %178 : vector<2x8xf32> to vector<2x8x1xf32>
    %180 = vector.broadcast %179 : vector<2x8x1xf32> to vector<2x8x8xf32>
    %181 = arith.subf %177, %180 : vector<2x8x8xf32>
    %182 = math.exp %181 : vector<2x8x8xf32>
    %cst_57 = arith.constant dense<0.000000e+00> : vector<2x8xf32>
    %183 = vector.multi_reduction <add>, %182, %cst_57 [2] : vector<2x8x8xf32> to vector<2x8xf32>
    %184 = vector.shape_cast %183 : vector<2x8xf32> to vector<2x8x1xf32>
    %185 = tpu.reciprocal %184 {approx = true} : vector<2x8x1xf32> -> vector<2x8x1xf32>
    %186 = vector.broadcast %185 : vector<2x8x1xf32> to vector<2x8x8xf32>
    %187 = arith.mulf %182, %186 : vector<2x8x8xf32>
    %188 = arith.truncf %187 : vector<2x8x8xf32> to vector<2x8x8xbf16>
    %189 = vector.extract_strided_slice %174 {offsets = [0, 0, 0], sizes = [2, 8, 8], strides = [1, 1, 1]} : vector<2x8x32xbf16> to vector<2x8x8xbf16>
    "tpu.trace_start"() <{level = 10 : i32, message = "bqk,bkd->bqd"}> : () -> ()
    %cst_58 = arith.constant dense<0.000000e+00> : vector<2x8x8xf32>
    %190 = tpu.matmul %188, %189, %cst_58 {dimension_numbers = #tpu.dot_dimension_numbers<[2], [1], [1], [2], [0, 0, 0, 1, 1, 2], [0], [0]>} : vector<2x8x8xbf16>, vector<2x8x8xbf16>, vector<2x8x8xf32> -> vector<2x8x8xf32>
    "tpu.trace_stop"() : () -> ()
    %191 = vector.extract_strided_slice %170 {offsets = [0, 0, 8], sizes = [2, 8, 8], strides = [1, 1, 1]} : vector<2x8x32xbf16> to vector<2x8x8xbf16>
    %192 = vector.extract_strided_slice %172 {offsets = [0, 0, 8], sizes = [2, 8, 8], strides = [1, 1, 1]} : vector<2x8x32xbf16> to vector<2x8x8xbf16>
    "tpu.trace_start"() <{level = 10 : i32, message = "bqd,bkd->bqk"}> : () -> ()
    %cst_59 = arith.constant dense<0.000000e+00> : vector<2x8x8xf32>
    %193 = tpu.matmul %191, %192, %cst_59 {dimension_numbers = #tpu.dot_dimension_numbers<[2], [2], [1], [1], [0, 0, 0, 1, 1, 1], [0], [0]>} : vector<2x8x8xbf16>, vector<2x8x8xbf16>, vector<2x8x8xf32> -> vector<2x8x8xf32>
    "tpu.trace_stop"() : () -> ()
    %cst_60 = arith.constant dense<0xFF800000> : vector<2x8xf32>
    %194 = vector.multi_reduction <maximumf>, %193, %cst_60 [2] : vector<2x8x8xf32> to vector<2x8xf32>
    %195 = vector.shape_cast %194 : vector<2x8xf32> to vector<2x8x1xf32>
    %196 = vector.broadcast %195 : vector<2x8x1xf32> to vector<2x8x8xf32>
    %197 = arith.subf %193, %196 : vector<2x8x8xf32>
    %198 = math.exp %197 : vector<2x8x8xf32>
    %cst_61 = arith.constant dense<0.000000e+00> : vector<2x8xf32>
    %199 = vector.multi_reduction <add>, %198, %cst_61 [2] : vector<2x8x8xf32> to vector<2x8xf32>
    %200 = vector.shape_cast %199 : vector<2x8xf32> to vector<2x8x1xf32>
    %201 = tpu.reciprocal %200 {approx = true} : vector<2x8x1xf32> -> vector<2x8x1xf32>
    %202 = vector.broadcast %201 : vector<2x8x1xf32> to vector<2x8x8xf32>
    %203 = arith.mulf %198, %202 : vector<2x8x8xf32>
    %204 = arith.truncf %203 : vector<2x8x8xf32> to vector<2x8x8xbf16>
    %205 = vector.extract_strided_slice %174 {offsets = [0, 0, 8], sizes = [2, 8, 8], strides = [1, 1, 1]} : vector<2x8x32xbf16> to vector<2x8x8xbf16>
    "tpu.trace_start"() <{level = 10 : i32, message = "bqk,bkd->bqd"}> : () -> ()
    %cst_62 = arith.constant dense<0.000000e+00> : vector<2x8x8xf32>
    %206 = tpu.matmul %204, %205, %cst_62 {dimension_numbers = #tpu.dot_dimension_numbers<[2], [1], [1], [2], [0, 0, 0, 1, 1, 2], [0], [0]>} : vector<2x8x8xbf16>, vector<2x8x8xbf16>, vector<2x8x8xf32> -> vector<2x8x8xf32>
    "tpu.trace_stop"() : () -> ()
    %207 = vector.extract_strided_slice %170 {offsets = [0, 0, 16], sizes = [2, 8, 8], strides = [1, 1, 1]} : vector<2x8x32xbf16> to vector<2x8x8xbf16>
    %208 = vector.extract_strided_slice %172 {offsets = [0, 0, 16], sizes = [2, 8, 8], strides = [1, 1, 1]} : vector<2x8x32xbf16> to vector<2x8x8xbf16>
    "tpu.trace_start"() <{level = 10 : i32, message = "bqd,bkd->bqk"}> : () -> ()
    %cst_63 = arith.constant dense<0.000000e+00> : vector<2x8x8xf32>
    %209 = tpu.matmul %207, %208, %cst_63 {dimension_numbers = #tpu.dot_dimension_numbers<[2], [2], [1], [1], [0, 0, 0, 1, 1, 1], [0], [0]>} : vector<2x8x8xbf16>, vector<2x8x8xbf16>, vector<2x8x8xf32> -> vector<2x8x8xf32>
    "tpu.trace_stop"() : () -> ()
    %cst_64 = arith.constant dense<0xFF800000> : vector<2x8xf32>
    %210 = vector.multi_reduction <maximumf>, %209, %cst_64 [2] : vector<2x8x8xf32> to vector<2x8xf32>
    %211 = vector.shape_cast %210 : vector<2x8xf32> to vector<2x8x1xf32>
    %212 = vector.broadcast %211 : vector<2x8x1xf32> to vector<2x8x8xf32>
    %213 = arith.subf %209, %212 : vector<2x8x8xf32>
    %214 = math.exp %213 : vector<2x8x8xf32>
    %cst_65 = arith.constant dense<0.000000e+00> : vector<2x8xf32>
    %215 = vector.multi_reduction <add>, %214, %cst_65 [2] : vector<2x8x8xf32> to vector<2x8xf32>
    %216 = vector.shape_cast %215 : vector<2x8xf32> to vector<2x8x1xf32>
    %217 = tpu.reciprocal %216 {approx = true} : vector<2x8x1xf32> -> vector<2x8x1xf32>
    %218 = vector.broadcast %217 : vector<2x8x1xf32> to vector<2x8x8xf32>
    %219 = arith.mulf %214, %218 : vector<2x8x8xf32>
    %220 = arith.truncf %219 : vector<2x8x8xf32> to vector<2x8x8xbf16>
    %221 = vector.extract_strided_slice %174 {offsets = [0, 0, 16], sizes = [2, 8, 8], strides = [1, 1, 1]} : vector<2x8x32xbf16> to vector<2x8x8xbf16>
    "tpu.trace_start"() <{level = 10 : i32, message = "bqk,bkd->bqd"}> : () -> ()
    %cst_66 = arith.constant dense<0.000000e+00> : vector<2x8x8xf32>
    %222 = tpu.matmul %220, %221, %cst_66 {dimension_numbers = #tpu.dot_dimension_numbers<[2], [1], [1], [2], [0, 0, 0, 1, 1, 2], [0], [0]>} : vector<2x8x8xbf16>, vector<2x8x8xbf16>, vector<2x8x8xf32> -> vector<2x8x8xf32>
    "tpu.trace_stop"() : () -> ()
    %223 = vector.extract_strided_slice %170 {offsets = [0, 0, 24], sizes = [2, 8, 8], strides = [1, 1, 1]} : vector<2x8x32xbf16> to vector<2x8x8xbf16>
    %224 = vector.extract_strided_slice %172 {offsets = [0, 0, 24], sizes = [2, 8, 8], strides = [1, 1, 1]} : vector<2x8x32xbf16> to vector<2x8x8xbf16>
    "tpu.trace_start"() <{level = 10 : i32, message = "bqd,bkd->bqk"}> : () -> ()
    %cst_67 = arith.constant dense<0.000000e+00> : vector<2x8x8xf32>
    %225 = tpu.matmul %223, %224, %cst_67 {dimension_numbers = #tpu.dot_dimension_numbers<[2], [2], [1], [1], [0, 0, 0, 1, 1, 1], [0], [0]>} : vector<2x8x8xbf16>, vector<2x8x8xbf16>, vector<2x8x8xf32> -> vector<2x8x8xf32>
    "tpu.trace_stop"() : () -> ()
    %cst_68 = arith.constant dense<0xFF800000> : vector<2x8xf32>
    %226 = vector.multi_reduction <maximumf>, %225, %cst_68 [2] : vector<2x8x8xf32> to vector<2x8xf32>
    %227 = vector.shape_cast %226 : vector<2x8xf32> to vector<2x8x1xf32>
    %228 = vector.broadcast %227 : vector<2x8x1xf32> to vector<2x8x8xf32>
    %229 = arith.subf %225, %228 : vector<2x8x8xf32>
    %230 = math.exp %229 : vector<2x8x8xf32>
    %cst_69 = arith.constant dense<0.000000e+00> : vector<2x8xf32>
    %231 = vector.multi_reduction <add>, %230, %cst_69 [2] : vector<2x8x8xf32> to vector<2x8xf32>
    %232 = vector.shape_cast %231 : vector<2x8xf32> to vector<2x8x1xf32>
    %233 = tpu.reciprocal %232 {approx = true} : vector<2x8x1xf32> -> vector<2x8x1xf32>
    %234 = vector.broadcast %233 : vector<2x8x1xf32> to vector<2x8x8xf32>
    %235 = arith.mulf %230, %234 : vector<2x8x8xf32>
    %236 = arith.truncf %235 : vector<2x8x8xf32> to vector<2x8x8xbf16>
    %237 = vector.extract_strided_slice %174 {offsets = [0, 0, 24], sizes = [2, 8, 8], strides = [1, 1, 1]} : vector<2x8x32xbf16> to vector<2x8x8xbf16>
    "tpu.trace_start"() <{level = 10 : i32, message = "bqk,bkd->bqd"}> : () -> ()
    %cst_70 = arith.constant dense<0.000000e+00> : vector<2x8x8xf32>
    %238 = tpu.matmul %236, %237, %cst_70 {dimension_numbers = #tpu.dot_dimension_numbers<[2], [1], [1], [2], [0, 0, 0, 1, 1, 2], [0], [0]>} : vector<2x8x8xbf16>, vector<2x8x8xbf16>, vector<2x8x8xf32> -> vector<2x8x8xf32>
    "tpu.trace_stop"() : () -> ()
    %239 = tpu.concatenate %190, %206, %222, %238 in 2 : vector<2x8x8xf32>, vector<2x8x8xf32>, vector<2x8x8xf32>, vector<2x8x8xf32> -> vector<2x8x32xf32>
    %240 = vector.shape_cast %239 : vector<2x8x32xf32> to vector<16x32xf32>
    %241 = arith.truncf %240 : vector<16x32xf32> to vector<16x32xbf16>
    %c192 = arith.constant 192 : index
    %c0_71 = arith.constant 0 : index
    %242 = vector.load %arg1[%c192, %c0_71] : memref<800x128xbf16, #tpu.memory_space<vmem>>, vector<32x32xbf16>
    %cst_72 = arith.constant dense<0.000000e+00> : vector<16x32xf32>
    %243 = tpu.matmul %241, %242, %cst_72 {dimension_numbers = #tpu.dot_dimension_numbers<[1], [0], [0], [1], [0, 0, 1, 1], [], []>} : vector<16x32xbf16>, vector<32x32xbf16>, vector<16x32xf32> -> vector<16x32xf32>
    %c72 = arith.constant 72 : index
    %c0_73 = arith.constant 0 : index
    %244 = vector.load %arg2[%c72, %c0_73] : memref<360x128xf32, #tpu.memory_space<vmem>>, vector<1x32xf32>
    %245 = vector.broadcast %244 : vector<1x32xf32> to vector<16x32xf32>
    %246 = arith.addf %243, %245 : vector<16x32xf32>
    %247 = arith.addf %155, %246 : vector<16x32xf32>
    %c96_74 = arith.constant 96 : index
    %c0_75 = arith.constant 0 : index
    %248 = vector.load %arg2[%c96_74, %c0_75] : memref<360x128xf32, #tpu.memory_space<vmem>>, vector<1x32xf32>
    %c104 = arith.constant 104 : index
    %c0_76 = arith.constant 0 : index
    %249 = vector.load %arg2[%c104, %c0_76] : memref<360x128xf32, #tpu.memory_space<vmem>>, vector<1x32xf32>
    %cst_77 = arith.constant dense<0.000000e+00> : vector<16xf32>
    %250 = vector.multi_reduction <add>, %247, %cst_77 [1] : vector<16x32xf32> to vector<16xf32>
    %251 = vector.shape_cast %250 : vector<16xf32> to vector<16x1xf32>
    %cst_78 = arith.constant 3.200000e+01 : f32
    %252 = vector.broadcast %cst_78 : f32 to vector<16x1xf32>
    %253 = arith.divf %251, %252 : vector<16x1xf32>
    %254 = vector.broadcast %253 : vector<16x1xf32> to vector<16x32xf32>
    %255 = arith.subf %247, %254 : vector<16x32xf32>
    %256 = arith.mulf %255, %255 : vector<16x32xf32>
    %cst_79 = arith.constant dense<0.000000e+00> : vector<16xf32>
    %257 = vector.multi_reduction <add>, %256, %cst_79 [1] : vector<16x32xf32> to vector<16xf32>
    %258 = vector.shape_cast %257 : vector<16xf32> to vector<16x1xf32>
    %cst_80 = arith.constant 3.200000e+01 : f32
    %259 = vector.broadcast %cst_80 : f32 to vector<16x1xf32>
    %260 = arith.divf %258, %259 : vector<16x1xf32>
    %cst_81 = arith.constant 9.99999974E-6 : f32
    %261 = vector.broadcast %cst_81 : f32 to vector<16x1xf32>
    %262 = arith.addf %260, %261 : vector<16x1xf32>
    %263 = math.rsqrt %262 : vector<16x1xf32>
    %264 = vector.broadcast %263 : vector<16x1xf32> to vector<16x32xf32>
    %265 = arith.mulf %255, %264 : vector<16x32xf32>
    %266 = vector.broadcast %248 : vector<1x32xf32> to vector<16x32xf32>
    %267 = arith.mulf %265, %266 : vector<16x32xf32>
    %268 = vector.broadcast %249 : vector<1x32xf32> to vector<16x32xf32>
    %269 = arith.addf %267, %268 : vector<16x32xf32>
    %270 = arith.truncf %269 : vector<16x32xf32> to vector<16x32xbf16>
    %c224 = arith.constant 224 : index
    %c0_82 = arith.constant 0 : index
    %271 = vector.load %arg1[%c224, %c0_82] : memref<800x128xbf16, #tpu.memory_space<vmem>>, vector<32x64xbf16>
    %cst_83 = arith.constant dense<0.000000e+00> : vector<16x64xf32>
    %272 = tpu.matmul %270, %271, %cst_83 {dimension_numbers = #tpu.dot_dimension_numbers<[1], [0], [0], [1], [0, 0, 1, 1], [], []>} : vector<16x32xbf16>, vector<32x64xbf16>, vector<16x64xf32> -> vector<16x64xf32>
    %c80 = arith.constant 80 : index
    %c0_84 = arith.constant 0 : index
    %273 = vector.load %arg2[%c80, %c0_84] : memref<360x128xf32, #tpu.memory_space<vmem>>, vector<1x64xf32>
    %274 = vector.broadcast %273 : vector<1x64xf32> to vector<16x64xf32>
    %275 = arith.addf %272, %274 : vector<16x64xf32>
    %cst_85 = arith.constant 0.000000e+00 : f32
    %276 = vector.broadcast %cst_85 : f32 to vector<16x64xf32>
    %277 = arith.maximumf %275, %276 : vector<16x64xf32>
    %278 = arith.truncf %277 : vector<16x64xf32> to vector<16x64xbf16>
    %c256 = arith.constant 256 : index
    %c0_86 = arith.constant 0 : index
    %279 = vector.load %arg1[%c256, %c0_86] : memref<800x128xbf16, #tpu.memory_space<vmem>>, vector<64x32xbf16>
    %cst_87 = arith.constant dense<0.000000e+00> : vector<16x32xf32>
    %280 = tpu.matmul %278, %279, %cst_87 {dimension_numbers = #tpu.dot_dimension_numbers<[1], [0], [0], [1], [0, 0, 1, 1], [], []>} : vector<16x64xbf16>, vector<64x32xbf16>, vector<16x32xf32> -> vector<16x32xf32>
    %c88 = arith.constant 88 : index
    %c0_88 = arith.constant 0 : index
    %281 = vector.load %arg2[%c88, %c0_88] : memref<360x128xf32, #tpu.memory_space<vmem>>, vector<1x32xf32>
    %282 = vector.broadcast %281 : vector<1x32xf32> to vector<16x32xf32>
    %283 = arith.addf %280, %282 : vector<16x32xf32>
    %284 = arith.addf %269, %283 : vector<16x32xf32>
    %c112 = arith.constant 112 : index
    %c0_89 = arith.constant 0 : index
    %285 = vector.load %arg2[%c112, %c0_89] : memref<360x128xf32, #tpu.memory_space<vmem>>, vector<1x32xf32>
    %c120 = arith.constant 120 : index
    %c0_90 = arith.constant 0 : index
    %286 = vector.load %arg2[%c120, %c0_90] : memref<360x128xf32, #tpu.memory_space<vmem>>, vector<1x32xf32>
    %cst_91 = arith.constant dense<0.000000e+00> : vector<16xf32>
    %287 = vector.multi_reduction <add>, %284, %cst_91 [1] : vector<16x32xf32> to vector<16xf32>
    %288 = vector.shape_cast %287 : vector<16xf32> to vector<16x1xf32>
    %cst_92 = arith.constant 3.200000e+01 : f32
    %289 = vector.broadcast %cst_92 : f32 to vector<16x1xf32>
    %290 = arith.divf %288, %289 : vector<16x1xf32>
    %291 = vector.broadcast %290 : vector<16x1xf32> to vector<16x32xf32>
    %292 = arith.subf %284, %291 : vector<16x32xf32>
    %293 = arith.mulf %292, %292 : vector<16x32xf32>
    %cst_93 = arith.constant dense<0.000000e+00> : vector<16xf32>
    %294 = vector.multi_reduction <add>, %293, %cst_93 [1] : vector<16x32xf32> to vector<16xf32>
    %295 = vector.shape_cast %294 : vector<16xf32> to vector<16x1xf32>
    %cst_94 = arith.constant 3.200000e+01 : f32
    %296 = vector.broadcast %cst_94 : f32 to vector<16x1xf32>
    %297 = arith.divf %295, %296 : vector<16x1xf32>
    %cst_95 = arith.constant 9.99999974E-6 : f32
    %298 = vector.broadcast %cst_95 : f32 to vector<16x1xf32>
    %299 = arith.addf %297, %298 : vector<16x1xf32>
    %300 = math.rsqrt %299 : vector<16x1xf32>
    %301 = vector.broadcast %300 : vector<16x1xf32> to vector<16x32xf32>
    %302 = arith.mulf %292, %301 : vector<16x32xf32>
    %303 = vector.broadcast %285 : vector<1x32xf32> to vector<16x32xf32>
    %304 = arith.mulf %302, %303 : vector<16x32xf32>
    %305 = vector.broadcast %286 : vector<1x32xf32> to vector<16x32xf32>
    %306 = arith.addf %304, %305 : vector<16x32xf32>
    %c320 = arith.constant 320 : index
    %c0_96 = arith.constant 0 : index
    %307 = vector.load %arg2[%c320, %c0_96] : memref<360x128xf32, #tpu.memory_space<vmem>>, vector<1x32xf32>
    %c328 = arith.constant 328 : index
    %c0_97 = arith.constant 0 : index
    %308 = vector.load %arg2[%c328, %c0_97] : memref<360x128xf32, #tpu.memory_space<vmem>>, vector<1x32xf32>
    %cst_98 = arith.constant dense<0.000000e+00> : vector<16xf32>
    %309 = vector.multi_reduction <add>, %306, %cst_98 [1] : vector<16x32xf32> to vector<16xf32>
    %310 = vector.shape_cast %309 : vector<16xf32> to vector<16x1xf32>
    %cst_99 = arith.constant 3.200000e+01 : f32
    %311 = vector.broadcast %cst_99 : f32 to vector<16x1xf32>
    %312 = arith.divf %310, %311 : vector<16x1xf32>
    %313 = vector.broadcast %312 : vector<16x1xf32> to vector<16x32xf32>
    %314 = arith.subf %306, %313 : vector<16x32xf32>
    %315 = arith.mulf %314, %314 : vector<16x32xf32>
    %cst_100 = arith.constant dense<0.000000e+00> : vector<16xf32>
    %316 = vector.multi_reduction <add>, %315, %cst_100 [1] : vector<16x32xf32> to vector<16xf32>
    %317 = vector.shape_cast %316 : vector<16xf32> to vector<16x1xf32>
    %cst_101 = arith.constant 3.200000e+01 : f32
    %318 = vector.broadcast %cst_101 : f32 to vector<16x1xf32>
    %319 = arith.divf %317, %318 : vector<16x1xf32>
    %cst_102 = arith.constant 9.99999974E-6 : f32
    %320 = vector.broadcast %cst_102 : f32 to vector<16x1xf32>
    %321 = arith.addf %319, %320 : vector<16x1xf32>
    %322 = math.rsqrt %321 : vector<16x1xf32>
    %323 = vector.broadcast %322 : vector<16x1xf32> to vector<16x32xf32>
    %324 = arith.mulf %314, %323 : vector<16x32xf32>
    %325 = vector.broadcast %307 : vector<1x32xf32> to vector<16x32xf32>
    %326 = arith.mulf %324, %325 : vector<16x32xf32>
    %327 = vector.broadcast %308 : vector<1x32xf32> to vector<16x32xf32>
    %328 = arith.addf %326, %327 : vector<16x32xf32>
    %329 = vector.shape_cast %328 : vector<16x32xf32> to vector<2x8x32xf32>
    %330 = vector.shape_cast %4 : vector<16x32xf32> to vector<2x8x32xf32>
    %c320_103 = arith.constant 320 : index
    %c0_104 = arith.constant 0 : index
    %331 = vector.load %arg1[%c320_103, %c0_104] : memref<800x128xbf16, #tpu.memory_space<vmem>>, vector<32x96xbf16>
    %c128 = arith.constant 128 : index
    %c0_105 = arith.constant 0 : index
    %332 = vector.load %arg2[%c128, %c0_105] : memref<360x128xf32, #tpu.memory_space<vmem>>, vector<1x96xf32>
    %333 = vector.shape_cast %330 : vector<2x8x32xf32> to vector<16x32xf32>
    %334 = arith.truncf %333 : vector<16x32xf32> to vector<16x32xbf16>
    %cst_106 = arith.constant dense<0.000000e+00> : vector<16x96xf32>
    %335 = tpu.matmul %334, %331, %cst_106 {dimension_numbers = #tpu.dot_dimension_numbers<[1], [0], [0], [1], [0, 0, 1, 1], [], []>} : vector<16x32xbf16>, vector<32x96xbf16>, vector<16x96xf32> -> vector<16x96xf32>
    %336 = vector.broadcast %332 : vector<1x96xf32> to vector<16x96xf32>
    %337 = arith.addf %335, %336 : vector<16x96xf32>
    %338 = vector.extract_strided_slice %337 {offsets = [0, 0], sizes = [16, 32], strides = [1, 1]} : vector<16x96xf32> to vector<16x32xf32>
    %339 = vector.extract_strided_slice %337 {offsets = [0, 32], sizes = [16, 32], strides = [1, 1]} : vector<16x96xf32> to vector<16x32xf32>
    %340 = vector.extract_strided_slice %337 {offsets = [0, 64], sizes = [16, 32], strides = [1, 1]} : vector<16x96xf32> to vector<16x32xf32>
    %cst_107 = arith.constant 0.353553385 : f32
    %341 = vector.broadcast %cst_107 : f32 to vector<16x32xf32>
    %342 = arith.mulf %338, %341 : vector<16x32xf32>
    %343 = arith.truncf %342 : vector<16x32xf32> to vector<16x32xbf16>
    %344 = vector.shape_cast %343 : vector<16x32xbf16> to vector<2x8x32xbf16>
    %345 = arith.truncf %339 : vector<16x32xf32> to vector<16x32xbf16>
    %346 = vector.shape_cast %345 : vector<16x32xbf16> to vector<2x8x32xbf16>
    %347 = arith.truncf %340 : vector<16x32xf32> to vector<16x32xbf16>
    %348 = vector.shape_cast %347 : vector<16x32xbf16> to vector<2x8x32xbf16>
    %349 = vector.extract_strided_slice %344 {offsets = [0, 0, 0], sizes = [2, 8, 8], strides = [1, 1, 1]} : vector<2x8x32xbf16> to vector<2x8x8xbf16>
    %350 = vector.extract_strided_slice %346 {offsets = [0, 0, 0], sizes = [2, 8, 8], strides = [1, 1, 1]} : vector<2x8x32xbf16> to vector<2x8x8xbf16>
    "tpu.trace_start"() <{level = 10 : i32, message = "bqd,bkd->bqk"}> : () -> ()
    %cst_108 = arith.constant dense<0.000000e+00> : vector<2x8x8xf32>
    %351 = tpu.matmul %349, %350, %cst_108 {dimension_numbers = #tpu.dot_dimension_numbers<[2], [2], [1], [1], [0, 0, 0, 1, 1, 1], [0], [0]>} : vector<2x8x8xbf16>, vector<2x8x8xbf16>, vector<2x8x8xf32> -> vector<2x8x8xf32>
    "tpu.trace_stop"() : () -> ()
    %cst_109 = arith.constant dense<0xFF800000> : vector<2x8xf32>
    %352 = vector.multi_reduction <maximumf>, %351, %cst_109 [2] : vector<2x8x8xf32> to vector<2x8xf32>
    %353 = vector.shape_cast %352 : vector<2x8xf32> to vector<2x8x1xf32>
    %354 = vector.broadcast %353 : vector<2x8x1xf32> to vector<2x8x8xf32>
    %355 = arith.subf %351, %354 : vector<2x8x8xf32>
    %356 = math.exp %355 : vector<2x8x8xf32>
    %cst_110 = arith.constant dense<0.000000e+00> : vector<2x8xf32>
    %357 = vector.multi_reduction <add>, %356, %cst_110 [2] : vector<2x8x8xf32> to vector<2x8xf32>
    %358 = vector.shape_cast %357 : vector<2x8xf32> to vector<2x8x1xf32>
    %359 = tpu.reciprocal %358 {approx = true} : vector<2x8x1xf32> -> vector<2x8x1xf32>
    %360 = vector.broadcast %359 : vector<2x8x1xf32> to vector<2x8x8xf32>
    %361 = arith.mulf %356, %360 : vector<2x8x8xf32>
    %362 = arith.truncf %361 : vector<2x8x8xf32> to vector<2x8x8xbf16>
    %363 = vector.extract_strided_slice %348 {offsets = [0, 0, 0], sizes = [2, 8, 8], strides = [1, 1, 1]} : vector<2x8x32xbf16> to vector<2x8x8xbf16>
    "tpu.trace_start"() <{level = 10 : i32, message = "bqk,bkd->bqd"}> : () -> ()
    %cst_111 = arith.constant dense<0.000000e+00> : vector<2x8x8xf32>
    %364 = tpu.matmul %362, %363, %cst_111 {dimension_numbers = #tpu.dot_dimension_numbers<[2], [1], [1], [2], [0, 0, 0, 1, 1, 2], [0], [0]>} : vector<2x8x8xbf16>, vector<2x8x8xbf16>, vector<2x8x8xf32> -> vector<2x8x8xf32>
    "tpu.trace_stop"() : () -> ()
    %365 = vector.extract_strided_slice %344 {offsets = [0, 0, 8], sizes = [2, 8, 8], strides = [1, 1, 1]} : vector<2x8x32xbf16> to vector<2x8x8xbf16>
    %366 = vector.extract_strided_slice %346 {offsets = [0, 0, 8], sizes = [2, 8, 8], strides = [1, 1, 1]} : vector<2x8x32xbf16> to vector<2x8x8xbf16>
    "tpu.trace_start"() <{level = 10 : i32, message = "bqd,bkd->bqk"}> : () -> ()
    %cst_112 = arith.constant dense<0.000000e+00> : vector<2x8x8xf32>
    %367 = tpu.matmul %365, %366, %cst_112 {dimension_numbers = #tpu.dot_dimension_numbers<[2], [2], [1], [1], [0, 0, 0, 1, 1, 1], [0], [0]>} : vector<2x8x8xbf16>, vector<2x8x8xbf16>, vector<2x8x8xf32> -> vector<2x8x8xf32>
    "tpu.trace_stop"() : () -> ()
    %cst_113 = arith.constant dense<0xFF800000> : vector<2x8xf32>
    %368 = vector.multi_reduction <maximumf>, %367, %cst_113 [2] : vector<2x8x8xf32> to vector<2x8xf32>
    %369 = vector.shape_cast %368 : vector<2x8xf32> to vector<2x8x1xf32>
    %370 = vector.broadcast %369 : vector<2x8x1xf32> to vector<2x8x8xf32>
    %371 = arith.subf %367, %370 : vector<2x8x8xf32>
    %372 = math.exp %371 : vector<2x8x8xf32>
    %cst_114 = arith.constant dense<0.000000e+00> : vector<2x8xf32>
    %373 = vector.multi_reduction <add>, %372, %cst_114 [2] : vector<2x8x8xf32> to vector<2x8xf32>
    %374 = vector.shape_cast %373 : vector<2x8xf32> to vector<2x8x1xf32>
    %375 = tpu.reciprocal %374 {approx = true} : vector<2x8x1xf32> -> vector<2x8x1xf32>
    %376 = vector.broadcast %375 : vector<2x8x1xf32> to vector<2x8x8xf32>
    %377 = arith.mulf %372, %376 : vector<2x8x8xf32>
    %378 = arith.truncf %377 : vector<2x8x8xf32> to vector<2x8x8xbf16>
    %379 = vector.extract_strided_slice %348 {offsets = [0, 0, 8], sizes = [2, 8, 8], strides = [1, 1, 1]} : vector<2x8x32xbf16> to vector<2x8x8xbf16>
    "tpu.trace_start"() <{level = 10 : i32, message = "bqk,bkd->bqd"}> : () -> ()
    %cst_115 = arith.constant dense<0.000000e+00> : vector<2x8x8xf32>
    %380 = tpu.matmul %378, %379, %cst_115 {dimension_numbers = #tpu.dot_dimension_numbers<[2], [1], [1], [2], [0, 0, 0, 1, 1, 2], [0], [0]>} : vector<2x8x8xbf16>, vector<2x8x8xbf16>, vector<2x8x8xf32> -> vector<2x8x8xf32>
    "tpu.trace_stop"() : () -> ()
    %381 = vector.extract_strided_slice %344 {offsets = [0, 0, 16], sizes = [2, 8, 8], strides = [1, 1, 1]} : vector<2x8x32xbf16> to vector<2x8x8xbf16>
    %382 = vector.extract_strided_slice %346 {offsets = [0, 0, 16], sizes = [2, 8, 8], strides = [1, 1, 1]} : vector<2x8x32xbf16> to vector<2x8x8xbf16>
    "tpu.trace_start"() <{level = 10 : i32, message = "bqd,bkd->bqk"}> : () -> ()
    %cst_116 = arith.constant dense<0.000000e+00> : vector<2x8x8xf32>
    %383 = tpu.matmul %381, %382, %cst_116 {dimension_numbers = #tpu.dot_dimension_numbers<[2], [2], [1], [1], [0, 0, 0, 1, 1, 1], [0], [0]>} : vector<2x8x8xbf16>, vector<2x8x8xbf16>, vector<2x8x8xf32> -> vector<2x8x8xf32>
    "tpu.trace_stop"() : () -> ()
    %cst_117 = arith.constant dense<0xFF800000> : vector<2x8xf32>
    %384 = vector.multi_reduction <maximumf>, %383, %cst_117 [2] : vector<2x8x8xf32> to vector<2x8xf32>
    %385 = vector.shape_cast %384 : vector<2x8xf32> to vector<2x8x1xf32>
    %386 = vector.broadcast %385 : vector<2x8x1xf32> to vector<2x8x8xf32>
    %387 = arith.subf %383, %386 : vector<2x8x8xf32>
    %388 = math.exp %387 : vector<2x8x8xf32>
    %cst_118 = arith.constant dense<0.000000e+00> : vector<2x8xf32>
    %389 = vector.multi_reduction <add>, %388, %cst_118 [2] : vector<2x8x8xf32> to vector<2x8xf32>
    %390 = vector.shape_cast %389 : vector<2x8xf32> to vector<2x8x1xf32>
    %391 = tpu.reciprocal %390 {approx = true} : vector<2x8x1xf32> -> vector<2x8x1xf32>
    %392 = vector.broadcast %391 : vector<2x8x1xf32> to vector<2x8x8xf32>
    %393 = arith.mulf %388, %392 : vector<2x8x8xf32>
    %394 = arith.truncf %393 : vector<2x8x8xf32> to vector<2x8x8xbf16>
    %395 = vector.extract_strided_slice %348 {offsets = [0, 0, 16], sizes = [2, 8, 8], strides = [1, 1, 1]} : vector<2x8x32xbf16> to vector<2x8x8xbf16>
    "tpu.trace_start"() <{level = 10 : i32, message = "bqk,bkd->bqd"}> : () -> ()
    %cst_119 = arith.constant dense<0.000000e+00> : vector<2x8x8xf32>
    %396 = tpu.matmul %394, %395, %cst_119 {dimension_numbers = #tpu.dot_dimension_numbers<[2], [1], [1], [2], [0, 0, 0, 1, 1, 2], [0], [0]>} : vector<2x8x8xbf16>, vector<2x8x8xbf16>, vector<2x8x8xf32> -> vector<2x8x8xf32>
    "tpu.trace_stop"() : () -> ()
    %397 = vector.extract_strided_slice %344 {offsets = [0, 0, 24], sizes = [2, 8, 8], strides = [1, 1, 1]} : vector<2x8x32xbf16> to vector<2x8x8xbf16>
    %398 = vector.extract_strided_slice %346 {offsets = [0, 0, 24], sizes = [2, 8, 8], strides = [1, 1, 1]} : vector<2x8x32xbf16> to vector<2x8x8xbf16>
    "tpu.trace_start"() <{level = 10 : i32, message = "bqd,bkd->bqk"}> : () -> ()
    %cst_120 = arith.constant dense<0.000000e+00> : vector<2x8x8xf32>
    %399 = tpu.matmul %397, %398, %cst_120 {dimension_numbers = #tpu.dot_dimension_numbers<[2], [2], [1], [1], [0, 0, 0, 1, 1, 1], [0], [0]>} : vector<2x8x8xbf16>, vector<2x8x8xbf16>, vector<2x8x8xf32> -> vector<2x8x8xf32>
    "tpu.trace_stop"() : () -> ()
    %cst_121 = arith.constant dense<0xFF800000> : vector<2x8xf32>
    %400 = vector.multi_reduction <maximumf>, %399, %cst_121 [2] : vector<2x8x8xf32> to vector<2x8xf32>
    %401 = vector.shape_cast %400 : vector<2x8xf32> to vector<2x8x1xf32>
    %402 = vector.broadcast %401 : vector<2x8x1xf32> to vector<2x8x8xf32>
    %403 = arith.subf %399, %402 : vector<2x8x8xf32>
    %404 = math.exp %403 : vector<2x8x8xf32>
    %cst_122 = arith.constant dense<0.000000e+00> : vector<2x8xf32>
    %405 = vector.multi_reduction <add>, %404, %cst_122 [2] : vector<2x8x8xf32> to vector<2x8xf32>
    %406 = vector.shape_cast %405 : vector<2x8xf32> to vector<2x8x1xf32>
    %407 = tpu.reciprocal %406 {approx = true} : vector<2x8x1xf32> -> vector<2x8x1xf32>
    %408 = vector.broadcast %407 : vector<2x8x1xf32> to vector<2x8x8xf32>
    %409 = arith.mulf %404, %408 : vector<2x8x8xf32>
    %410 = arith.truncf %409 : vector<2x8x8xf32> to vector<2x8x8xbf16>
    %411 = vector.extract_strided_slice %348 {offsets = [0, 0, 24], sizes = [2, 8, 8], strides = [1, 1, 1]} : vector<2x8x32xbf16> to vector<2x8x8xbf16>
    "tpu.trace_start"() <{level = 10 : i32, message = "bqk,bkd->bqd"}> : () -> ()
    %cst_123 = arith.constant dense<0.000000e+00> : vector<2x8x8xf32>
    %412 = tpu.matmul %410, %411, %cst_123 {dimension_numbers = #tpu.dot_dimension_numbers<[2], [1], [1], [2], [0, 0, 0, 1, 1, 2], [0], [0]>} : vector<2x8x8xbf16>, vector<2x8x8xbf16>, vector<2x8x8xf32> -> vector<2x8x8xf32>
    "tpu.trace_stop"() : () -> ()
    %413 = tpu.concatenate %364, %380, %396, %412 in 2 : vector<2x8x8xf32>, vector<2x8x8xf32>, vector<2x8x8xf32>, vector<2x8x8xf32> -> vector<2x8x32xf32>
    %414 = vector.shape_cast %413 : vector<2x8x32xf32> to vector<16x32xf32>
    %415 = arith.truncf %414 : vector<16x32xf32> to vector<16x32xbf16>
    %c352 = arith.constant 352 : index
    %c0_124 = arith.constant 0 : index
    %416 = vector.load %arg1[%c352, %c0_124] : memref<800x128xbf16, #tpu.memory_space<vmem>>, vector<32x32xbf16>
    %cst_125 = arith.constant dense<0.000000e+00> : vector<16x32xf32>
    %417 = tpu.matmul %415, %416, %cst_125 {dimension_numbers = #tpu.dot_dimension_numbers<[1], [0], [0], [1], [0, 0, 1, 1], [], []>} : vector<16x32xbf16>, vector<32x32xbf16>, vector<16x32xf32> -> vector<16x32xf32>
    %c136 = arith.constant 136 : index
    %c0_126 = arith.constant 0 : index
    %418 = vector.load %arg2[%c136, %c0_126] : memref<360x128xf32, #tpu.memory_space<vmem>>, vector<1x32xf32>
    %419 = vector.broadcast %418 : vector<1x32xf32> to vector<16x32xf32>
    %420 = arith.addf %417, %419 : vector<16x32xf32>
    %421 = arith.addf %4, %420 : vector<16x32xf32>
    %c176 = arith.constant 176 : index
    %c0_127 = arith.constant 0 : index
    %422 = vector.load %arg2[%c176, %c0_127] : memref<360x128xf32, #tpu.memory_space<vmem>>, vector<1x32xf32>
    %c184 = arith.constant 184 : index
    %c0_128 = arith.constant 0 : index
    %423 = vector.load %arg2[%c184, %c0_128] : memref<360x128xf32, #tpu.memory_space<vmem>>, vector<1x32xf32>
    %cst_129 = arith.constant dense<0.000000e+00> : vector<16xf32>
    %424 = vector.multi_reduction <add>, %421, %cst_129 [1] : vector<16x32xf32> to vector<16xf32>
    %425 = vector.shape_cast %424 : vector<16xf32> to vector<16x1xf32>
    %cst_130 = arith.constant 3.200000e+01 : f32
    %426 = vector.broadcast %cst_130 : f32 to vector<16x1xf32>
    %427 = arith.divf %425, %426 : vector<16x1xf32>
    %428 = vector.broadcast %427 : vector<16x1xf32> to vector<16x32xf32>
    %429 = arith.subf %421, %428 : vector<16x32xf32>
    %430 = arith.mulf %429, %429 : vector<16x32xf32>
    %cst_131 = arith.constant dense<0.000000e+00> : vector<16xf32>
    %431 = vector.multi_reduction <add>, %430, %cst_131 [1] : vector<16x32xf32> to vector<16xf32>
    %432 = vector.shape_cast %431 : vector<16xf32> to vector<16x1xf32>
    %cst_132 = arith.constant 3.200000e+01 : f32
    %433 = vector.broadcast %cst_132 : f32 to vector<16x1xf32>
    %434 = arith.divf %432, %433 : vector<16x1xf32>
    %cst_133 = arith.constant 9.99999974E-6 : f32
    %435 = vector.broadcast %cst_133 : f32 to vector<16x1xf32>
    %436 = arith.addf %434, %435 : vector<16x1xf32>
    %437 = math.rsqrt %436 : vector<16x1xf32>
    %438 = vector.broadcast %437 : vector<16x1xf32> to vector<16x32xf32>
    %439 = arith.mulf %429, %438 : vector<16x32xf32>
    %440 = vector.broadcast %422 : vector<1x32xf32> to vector<16x32xf32>
    %441 = arith.mulf %439, %440 : vector<16x32xf32>
    %442 = vector.broadcast %423 : vector<1x32xf32> to vector<16x32xf32>
    %443 = arith.addf %441, %442 : vector<16x32xf32>
    %444 = vector.shape_cast %443 : vector<16x32xf32> to vector<2x8x32xf32>
    %c384 = arith.constant 384 : index
    %c0_134 = arith.constant 0 : index
    %445 = vector.load %arg1[%c384, %c0_134] : memref<800x128xbf16, #tpu.memory_space<vmem>>, vector<32x96xbf16>
    %c144 = arith.constant 144 : index
    %c0_135 = arith.constant 0 : index
    %446 = vector.load %arg2[%c144, %c0_135] : memref<360x128xf32, #tpu.memory_space<vmem>>, vector<1x96xf32>
    %447 = vector.shape_cast %444 : vector<2x8x32xf32> to vector<16x32xf32>
    %448 = arith.truncf %447 : vector<16x32xf32> to vector<16x32xbf16>
    %449 = vector.shape_cast %329 : vector<2x8x32xf32> to vector<16x32xf32>
    %450 = arith.truncf %449 : vector<16x32xf32> to vector<16x32xbf16>
    %451 = vector.extract_strided_slice %445 {offsets = [0, 0], sizes = [32, 32], strides = [1, 1]} : vector<32x96xbf16> to vector<32x32xbf16>
    %cst_136 = arith.constant dense<0.000000e+00> : vector<16x32xf32>
    %452 = tpu.matmul %448, %451, %cst_136 {dimension_numbers = #tpu.dot_dimension_numbers<[1], [0], [0], [1], [0, 0, 1, 1], [], []>} : vector<16x32xbf16>, vector<32x32xbf16>, vector<16x32xf32> -> vector<16x32xf32>
    %453 = vector.extract_strided_slice %446 {offsets = [0, 0], sizes = [1, 32], strides = [1, 1]} : vector<1x96xf32> to vector<1x32xf32>
    %454 = vector.broadcast %453 : vector<1x32xf32> to vector<16x32xf32>
    %455 = arith.addf %452, %454 : vector<16x32xf32>
    %456 = vector.extract_strided_slice %445 {offsets = [0, 32], sizes = [32, 64], strides = [1, 1]} : vector<32x96xbf16> to vector<32x64xbf16>
    %cst_137 = arith.constant dense<0.000000e+00> : vector<16x64xf32>
    %457 = tpu.matmul %450, %456, %cst_137 {dimension_numbers = #tpu.dot_dimension_numbers<[1], [0], [0], [1], [0, 0, 1, 1], [], []>} : vector<16x32xbf16>, vector<32x64xbf16>, vector<16x64xf32> -> vector<16x64xf32>
    %458 = vector.extract_strided_slice %446 {offsets = [0, 32], sizes = [1, 64], strides = [1, 1]} : vector<1x96xf32> to vector<1x64xf32>
    %459 = vector.broadcast %458 : vector<1x64xf32> to vector<16x64xf32>
    %460 = arith.addf %457, %459 : vector<16x64xf32>
    %461 = vector.extract_strided_slice %460 {offsets = [0, 0], sizes = [16, 32], strides = [1, 1]} : vector<16x64xf32> to vector<16x32xf32>
    %462 = vector.extract_strided_slice %460 {offsets = [0, 32], sizes = [16, 32], strides = [1, 1]} : vector<16x64xf32> to vector<16x32xf32>
    %cst_138 = arith.constant 0.353553385 : f32
    %463 = vector.broadcast %cst_138 : f32 to vector<16x32xf32>
    %464 = arith.mulf %455, %463 : vector<16x32xf32>
    %465 = arith.truncf %464 : vector<16x32xf32> to vector<16x32xbf16>
    %466 = vector.shape_cast %465 : vector<16x32xbf16> to vector<2x8x32xbf16>
    %467 = arith.truncf %461 : vector<16x32xf32> to vector<16x32xbf16>
    %468 = vector.shape_cast %467 : vector<16x32xbf16> to vector<2x8x32xbf16>
    %469 = arith.truncf %462 : vector<16x32xf32> to vector<16x32xbf16>
    %470 = vector.shape_cast %469 : vector<16x32xbf16> to vector<2x8x32xbf16>
    %471 = vector.extract_strided_slice %466 {offsets = [0, 0, 0], sizes = [2, 8, 8], strides = [1, 1, 1]} : vector<2x8x32xbf16> to vector<2x8x8xbf16>
    %472 = vector.extract_strided_slice %468 {offsets = [0, 0, 0], sizes = [2, 8, 8], strides = [1, 1, 1]} : vector<2x8x32xbf16> to vector<2x8x8xbf16>
    "tpu.trace_start"() <{level = 10 : i32, message = "bqd,bkd->bqk"}> : () -> ()
    %cst_139 = arith.constant dense<0.000000e+00> : vector<2x8x8xf32>
    %473 = tpu.matmul %471, %472, %cst_139 {dimension_numbers = #tpu.dot_dimension_numbers<[2], [2], [1], [1], [0, 0, 0, 1, 1, 1], [0], [0]>} : vector<2x8x8xbf16>, vector<2x8x8xbf16>, vector<2x8x8xf32> -> vector<2x8x8xf32>
    "tpu.trace_stop"() : () -> ()
    %cst_140 = arith.constant dense<0xFF800000> : vector<2x8xf32>
    %474 = vector.multi_reduction <maximumf>, %473, %cst_140 [2] : vector<2x8x8xf32> to vector<2x8xf32>
    %475 = vector.shape_cast %474 : vector<2x8xf32> to vector<2x8x1xf32>
    %476 = vector.broadcast %475 : vector<2x8x1xf32> to vector<2x8x8xf32>
    %477 = arith.subf %473, %476 : vector<2x8x8xf32>
    %478 = math.exp %477 : vector<2x8x8xf32>
    %cst_141 = arith.constant dense<0.000000e+00> : vector<2x8xf32>
    %479 = vector.multi_reduction <add>, %478, %cst_141 [2] : vector<2x8x8xf32> to vector<2x8xf32>
    %480 = vector.shape_cast %479 : vector<2x8xf32> to vector<2x8x1xf32>
    %481 = tpu.reciprocal %480 {approx = true} : vector<2x8x1xf32> -> vector<2x8x1xf32>
    %482 = vector.broadcast %481 : vector<2x8x1xf32> to vector<2x8x8xf32>
    %483 = arith.mulf %478, %482 : vector<2x8x8xf32>
    %484 = arith.truncf %483 : vector<2x8x8xf32> to vector<2x8x8xbf16>
    %485 = vector.extract_strided_slice %470 {offsets = [0, 0, 0], sizes = [2, 8, 8], strides = [1, 1, 1]} : vector<2x8x32xbf16> to vector<2x8x8xbf16>
    "tpu.trace_start"() <{level = 10 : i32, message = "bqk,bkd->bqd"}> : () -> ()
    %cst_142 = arith.constant dense<0.000000e+00> : vector<2x8x8xf32>
    %486 = tpu.matmul %484, %485, %cst_142 {dimension_numbers = #tpu.dot_dimension_numbers<[2], [1], [1], [2], [0, 0, 0, 1, 1, 2], [0], [0]>} : vector<2x8x8xbf16>, vector<2x8x8xbf16>, vector<2x8x8xf32> -> vector<2x8x8xf32>
    "tpu.trace_stop"() : () -> ()
    %487 = vector.extract_strided_slice %466 {offsets = [0, 0, 8], sizes = [2, 8, 8], strides = [1, 1, 1]} : vector<2x8x32xbf16> to vector<2x8x8xbf16>
    %488 = vector.extract_strided_slice %468 {offsets = [0, 0, 8], sizes = [2, 8, 8], strides = [1, 1, 1]} : vector<2x8x32xbf16> to vector<2x8x8xbf16>
    "tpu.trace_start"() <{level = 10 : i32, message = "bqd,bkd->bqk"}> : () -> ()
    %cst_143 = arith.constant dense<0.000000e+00> : vector<2x8x8xf32>
    %489 = tpu.matmul %487, %488, %cst_143 {dimension_numbers = #tpu.dot_dimension_numbers<[2], [2], [1], [1], [0, 0, 0, 1, 1, 1], [0], [0]>} : vector<2x8x8xbf16>, vector<2x8x8xbf16>, vector<2x8x8xf32> -> vector<2x8x8xf32>
    "tpu.trace_stop"() : () -> ()
    %cst_144 = arith.constant dense<0xFF800000> : vector<2x8xf32>
    %490 = vector.multi_reduction <maximumf>, %489, %cst_144 [2] : vector<2x8x8xf32> to vector<2x8xf32>
    %491 = vector.shape_cast %490 : vector<2x8xf32> to vector<2x8x1xf32>
    %492 = vector.broadcast %491 : vector<2x8x1xf32> to vector<2x8x8xf32>
    %493 = arith.subf %489, %492 : vector<2x8x8xf32>
    %494 = math.exp %493 : vector<2x8x8xf32>
    %cst_145 = arith.constant dense<0.000000e+00> : vector<2x8xf32>
    %495 = vector.multi_reduction <add>, %494, %cst_145 [2] : vector<2x8x8xf32> to vector<2x8xf32>
    %496 = vector.shape_cast %495 : vector<2x8xf32> to vector<2x8x1xf32>
    %497 = tpu.reciprocal %496 {approx = true} : vector<2x8x1xf32> -> vector<2x8x1xf32>
    %498 = vector.broadcast %497 : vector<2x8x1xf32> to vector<2x8x8xf32>
    %499 = arith.mulf %494, %498 : vector<2x8x8xf32>
    %500 = arith.truncf %499 : vector<2x8x8xf32> to vector<2x8x8xbf16>
    %501 = vector.extract_strided_slice %470 {offsets = [0, 0, 8], sizes = [2, 8, 8], strides = [1, 1, 1]} : vector<2x8x32xbf16> to vector<2x8x8xbf16>
    "tpu.trace_start"() <{level = 10 : i32, message = "bqk,bkd->bqd"}> : () -> ()
    %cst_146 = arith.constant dense<0.000000e+00> : vector<2x8x8xf32>
    %502 = tpu.matmul %500, %501, %cst_146 {dimension_numbers = #tpu.dot_dimension_numbers<[2], [1], [1], [2], [0, 0, 0, 1, 1, 2], [0], [0]>} : vector<2x8x8xbf16>, vector<2x8x8xbf16>, vector<2x8x8xf32> -> vector<2x8x8xf32>
    "tpu.trace_stop"() : () -> ()
    %503 = vector.extract_strided_slice %466 {offsets = [0, 0, 16], sizes = [2, 8, 8], strides = [1, 1, 1]} : vector<2x8x32xbf16> to vector<2x8x8xbf16>
    %504 = vector.extract_strided_slice %468 {offsets = [0, 0, 16], sizes = [2, 8, 8], strides = [1, 1, 1]} : vector<2x8x32xbf16> to vector<2x8x8xbf16>
    "tpu.trace_start"() <{level = 10 : i32, message = "bqd,bkd->bqk"}> : () -> ()
    %cst_147 = arith.constant dense<0.000000e+00> : vector<2x8x8xf32>
    %505 = tpu.matmul %503, %504, %cst_147 {dimension_numbers = #tpu.dot_dimension_numbers<[2], [2], [1], [1], [0, 0, 0, 1, 1, 1], [0], [0]>} : vector<2x8x8xbf16>, vector<2x8x8xbf16>, vector<2x8x8xf32> -> vector<2x8x8xf32>
    "tpu.trace_stop"() : () -> ()
    %cst_148 = arith.constant dense<0xFF800000> : vector<2x8xf32>
    %506 = vector.multi_reduction <maximumf>, %505, %cst_148 [2] : vector<2x8x8xf32> to vector<2x8xf32>
    %507 = vector.shape_cast %506 : vector<2x8xf32> to vector<2x8x1xf32>
    %508 = vector.broadcast %507 : vector<2x8x1xf32> to vector<2x8x8xf32>
    %509 = arith.subf %505, %508 : vector<2x8x8xf32>
    %510 = math.exp %509 : vector<2x8x8xf32>
    %cst_149 = arith.constant dense<0.000000e+00> : vector<2x8xf32>
    %511 = vector.multi_reduction <add>, %510, %cst_149 [2] : vector<2x8x8xf32> to vector<2x8xf32>
    %512 = vector.shape_cast %511 : vector<2x8xf32> to vector<2x8x1xf32>
    %513 = tpu.reciprocal %512 {approx = true} : vector<2x8x1xf32> -> vector<2x8x1xf32>
    %514 = vector.broadcast %513 : vector<2x8x1xf32> to vector<2x8x8xf32>
    %515 = arith.mulf %510, %514 : vector<2x8x8xf32>
    %516 = arith.truncf %515 : vector<2x8x8xf32> to vector<2x8x8xbf16>
    %517 = vector.extract_strided_slice %470 {offsets = [0, 0, 16], sizes = [2, 8, 8], strides = [1, 1, 1]} : vector<2x8x32xbf16> to vector<2x8x8xbf16>
    "tpu.trace_start"() <{level = 10 : i32, message = "bqk,bkd->bqd"}> : () -> ()
    %cst_150 = arith.constant dense<0.000000e+00> : vector<2x8x8xf32>
    %518 = tpu.matmul %516, %517, %cst_150 {dimension_numbers = #tpu.dot_dimension_numbers<[2], [1], [1], [2], [0, 0, 0, 1, 1, 2], [0], [0]>} : vector<2x8x8xbf16>, vector<2x8x8xbf16>, vector<2x8x8xf32> -> vector<2x8x8xf32>
    "tpu.trace_stop"() : () -> ()
    %519 = vector.extract_strided_slice %466 {offsets = [0, 0, 24], sizes = [2, 8, 8], strides = [1, 1, 1]} : vector<2x8x32xbf16> to vector<2x8x8xbf16>
    %520 = vector.extract_strided_slice %468 {offsets = [0, 0, 24], sizes = [2, 8, 8], strides = [1, 1, 1]} : vector<2x8x32xbf16> to vector<2x8x8xbf16>
    "tpu.trace_start"() <{level = 10 : i32, message = "bqd,bkd->bqk"}> : () -> ()
    %cst_151 = arith.constant dense<0.000000e+00> : vector<2x8x8xf32>
    %521 = tpu.matmul %519, %520, %cst_151 {dimension_numbers = #tpu.dot_dimension_numbers<[2], [2], [1], [1], [0, 0, 0, 1, 1, 1], [0], [0]>} : vector<2x8x8xbf16>, vector<2x8x8xbf16>, vector<2x8x8xf32> -> vector<2x8x8xf32>
    "tpu.trace_stop"() : () -> ()
    %cst_152 = arith.constant dense<0xFF800000> : vector<2x8xf32>
    %522 = vector.multi_reduction <maximumf>, %521, %cst_152 [2] : vector<2x8x8xf32> to vector<2x8xf32>
    %523 = vector.shape_cast %522 : vector<2x8xf32> to vector<2x8x1xf32>
    %524 = vector.broadcast %523 : vector<2x8x1xf32> to vector<2x8x8xf32>
    %525 = arith.subf %521, %524 : vector<2x8x8xf32>
    %526 = math.exp %525 : vector<2x8x8xf32>
    %cst_153 = arith.constant dense<0.000000e+00> : vector<2x8xf32>
    %527 = vector.multi_reduction <add>, %526, %cst_153 [2] : vector<2x8x8xf32> to vector<2x8xf32>
    %528 = vector.shape_cast %527 : vector<2x8xf32> to vector<2x8x1xf32>
    %529 = tpu.reciprocal %528 {approx = true} : vector<2x8x1xf32> -> vector<2x8x1xf32>
    %530 = vector.broadcast %529 : vector<2x8x1xf32> to vector<2x8x8xf32>
    %531 = arith.mulf %526, %530 : vector<2x8x8xf32>
    %532 = arith.truncf %531 : vector<2x8x8xf32> to vector<2x8x8xbf16>
    %533 = vector.extract_strided_slice %470 {offsets = [0, 0, 24], sizes = [2, 8, 8], strides = [1, 1, 1]} : vector<2x8x32xbf16> to vector<2x8x8xbf16>
    "tpu.trace_start"() <{level = 10 : i32, message = "bqk,bkd->bqd"}> : () -> ()
    %cst_154 = arith.constant dense<0.000000e+00> : vector<2x8x8xf32>
    %534 = tpu.matmul %532, %533, %cst_154 {dimension_numbers = #tpu.dot_dimension_numbers<[2], [1], [1], [2], [0, 0, 0, 1, 1, 2], [0], [0]>} : vector<2x8x8xbf16>, vector<2x8x8xbf16>, vector<2x8x8xf32> -> vector<2x8x8xf32>
    "tpu.trace_stop"() : () -> ()
    %535 = tpu.concatenate %486, %502, %518, %534 in 2 : vector<2x8x8xf32>, vector<2x8x8xf32>, vector<2x8x8xf32>, vector<2x8x8xf32> -> vector<2x8x32xf32>
    %536 = vector.shape_cast %535 : vector<2x8x32xf32> to vector<16x32xf32>
    %537 = arith.truncf %536 : vector<16x32xf32> to vector<16x32xbf16>
    %c416 = arith.constant 416 : index
    %c0_155 = arith.constant 0 : index
    %538 = vector.load %arg1[%c416, %c0_155] : memref<800x128xbf16, #tpu.memory_space<vmem>>, vector<32x32xbf16>
    %cst_156 = arith.constant dense<0.000000e+00> : vector<16x32xf32>
    %539 = tpu.matmul %537, %538, %cst_156 {dimension_numbers = #tpu.dot_dimension_numbers<[1], [0], [0], [1], [0, 0, 1, 1], [], []>} : vector<16x32xbf16>, vector<32x32xbf16>, vector<16x32xf32> -> vector<16x32xf32>
    %c152 = arith.constant 152 : index
    %c0_157 = arith.constant 0 : index
    %540 = vector.load %arg2[%c152, %c0_157] : memref<360x128xf32, #tpu.memory_space<vmem>>, vector<1x32xf32>
    %541 = vector.broadcast %540 : vector<1x32xf32> to vector<16x32xf32>
    %542 = arith.addf %539, %541 : vector<16x32xf32>
    %543 = arith.addf %443, %542 : vector<16x32xf32>
    %c192_158 = arith.constant 192 : index
    %c0_159 = arith.constant 0 : index
    %544 = vector.load %arg2[%c192_158, %c0_159] : memref<360x128xf32, #tpu.memory_space<vmem>>, vector<1x32xf32>
    %c200 = arith.constant 200 : index
    %c0_160 = arith.constant 0 : index
    %545 = vector.load %arg2[%c200, %c0_160] : memref<360x128xf32, #tpu.memory_space<vmem>>, vector<1x32xf32>
    %cst_161 = arith.constant dense<0.000000e+00> : vector<16xf32>
    %546 = vector.multi_reduction <add>, %543, %cst_161 [1] : vector<16x32xf32> to vector<16xf32>
    %547 = vector.shape_cast %546 : vector<16xf32> to vector<16x1xf32>
    %cst_162 = arith.constant 3.200000e+01 : f32
    %548 = vector.broadcast %cst_162 : f32 to vector<16x1xf32>
    %549 = arith.divf %547, %548 : vector<16x1xf32>
    %550 = vector.broadcast %549 : vector<16x1xf32> to vector<16x32xf32>
    %551 = arith.subf %543, %550 : vector<16x32xf32>
    %552 = arith.mulf %551, %551 : vector<16x32xf32>
    %cst_163 = arith.constant dense<0.000000e+00> : vector<16xf32>
    %553 = vector.multi_reduction <add>, %552, %cst_163 [1] : vector<16x32xf32> to vector<16xf32>
    %554 = vector.shape_cast %553 : vector<16xf32> to vector<16x1xf32>
    %cst_164 = arith.constant 3.200000e+01 : f32
    %555 = vector.broadcast %cst_164 : f32 to vector<16x1xf32>
    %556 = arith.divf %554, %555 : vector<16x1xf32>
    %cst_165 = arith.constant 9.99999974E-6 : f32
    %557 = vector.broadcast %cst_165 : f32 to vector<16x1xf32>
    %558 = arith.addf %556, %557 : vector<16x1xf32>
    %559 = math.rsqrt %558 : vector<16x1xf32>
    %560 = vector.broadcast %559 : vector<16x1xf32> to vector<16x32xf32>
    %561 = arith.mulf %551, %560 : vector<16x32xf32>
    %562 = vector.broadcast %544 : vector<1x32xf32> to vector<16x32xf32>
    %563 = arith.mulf %561, %562 : vector<16x32xf32>
    %564 = vector.broadcast %545 : vector<1x32xf32> to vector<16x32xf32>
    %565 = arith.addf %563, %564 : vector<16x32xf32>
    %566 = arith.truncf %565 : vector<16x32xf32> to vector<16x32xbf16>
    %c448 = arith.constant 448 : index
    %c0_166 = arith.constant 0 : index
    %567 = vector.load %arg1[%c448, %c0_166] : memref<800x128xbf16, #tpu.memory_space<vmem>>, vector<32x64xbf16>
    %cst_167 = arith.constant dense<0.000000e+00> : vector<16x64xf32>
    %568 = tpu.matmul %566, %567, %cst_167 {dimension_numbers = #tpu.dot_dimension_numbers<[1], [0], [0], [1], [0, 0, 1, 1], [], []>} : vector<16x32xbf16>, vector<32x64xbf16>, vector<16x64xf32> -> vector<16x64xf32>
    %c160_168 = arith.constant 160 : index
    %c0_169 = arith.constant 0 : index
    %569 = vector.load %arg2[%c160_168, %c0_169] : memref<360x128xf32, #tpu.memory_space<vmem>>, vector<1x64xf32>
    %570 = vector.broadcast %569 : vector<1x64xf32> to vector<16x64xf32>
    %571 = arith.addf %568, %570 : vector<16x64xf32>
    %cst_170 = arith.constant 0.000000e+00 : f32
    %572 = vector.broadcast %cst_170 : f32 to vector<16x64xf32>
    %573 = arith.maximumf %571, %572 : vector<16x64xf32>
    %574 = arith.truncf %573 : vector<16x64xf32> to vector<16x64xbf16>
    %c480 = arith.constant 480 : index
    %c0_171 = arith.constant 0 : index
    %575 = vector.load %arg1[%c480, %c0_171] : memref<800x128xbf16, #tpu.memory_space<vmem>>, vector<64x32xbf16>
    %cst_172 = arith.constant dense<0.000000e+00> : vector<16x32xf32>
    %576 = tpu.matmul %574, %575, %cst_172 {dimension_numbers = #tpu.dot_dimension_numbers<[1], [0], [0], [1], [0, 0, 1, 1], [], []>} : vector<16x64xbf16>, vector<64x32xbf16>, vector<16x32xf32> -> vector<16x32xf32>
    %c168 = arith.constant 168 : index
    %c0_173 = arith.constant 0 : index
    %577 = vector.load %arg2[%c168, %c0_173] : memref<360x128xf32, #tpu.memory_space<vmem>>, vector<1x32xf32>
    %578 = vector.broadcast %577 : vector<1x32xf32> to vector<16x32xf32>
    %579 = arith.addf %576, %578 : vector<16x32xf32>
    %580 = arith.addf %565, %579 : vector<16x32xf32>
    %c208 = arith.constant 208 : index
    %c0_174 = arith.constant 0 : index
    %581 = vector.load %arg2[%c208, %c0_174] : memref<360x128xf32, #tpu.memory_space<vmem>>, vector<1x32xf32>
    %c216 = arith.constant 216 : index
    %c0_175 = arith.constant 0 : index
    %582 = vector.load %arg2[%c216, %c0_175] : memref<360x128xf32, #tpu.memory_space<vmem>>, vector<1x32xf32>
    %cst_176 = arith.constant dense<0.000000e+00> : vector<16xf32>
    %583 = vector.multi_reduction <add>, %580, %cst_176 [1] : vector<16x32xf32> to vector<16xf32>
    %584 = vector.shape_cast %583 : vector<16xf32> to vector<16x1xf32>
    %cst_177 = arith.constant 3.200000e+01 : f32
    %585 = vector.broadcast %cst_177 : f32 to vector<16x1xf32>
    %586 = arith.divf %584, %585 : vector<16x1xf32>
    %587 = vector.broadcast %586 : vector<16x1xf32> to vector<16x32xf32>
    %588 = arith.subf %580, %587 : vector<16x32xf32>
    %589 = arith.mulf %588, %588 : vector<16x32xf32>
    %cst_178 = arith.constant dense<0.000000e+00> : vector<16xf32>
    %590 = vector.multi_reduction <add>, %589, %cst_178 [1] : vector<16x32xf32> to vector<16xf32>
    %591 = vector.shape_cast %590 : vector<16xf32> to vector<16x1xf32>
    %cst_179 = arith.constant 3.200000e+01 : f32
    %592 = vector.broadcast %cst_179 : f32 to vector<16x1xf32>
    %593 = arith.divf %591, %592 : vector<16x1xf32>
    %cst_180 = arith.constant 9.99999974E-6 : f32
    %594 = vector.broadcast %cst_180 : f32 to vector<16x1xf32>
    %595 = arith.addf %593, %594 : vector<16x1xf32>
    %596 = math.rsqrt %595 : vector<16x1xf32>
    %597 = vector.broadcast %596 : vector<16x1xf32> to vector<16x32xf32>
    %598 = arith.mulf %588, %597 : vector<16x32xf32>
    %599 = vector.broadcast %581 : vector<1x32xf32> to vector<16x32xf32>
    %600 = arith.mulf %598, %599 : vector<16x32xf32>
    %601 = vector.broadcast %582 : vector<1x32xf32> to vector<16x32xf32>
    %602 = arith.addf %600, %601 : vector<16x32xf32>
    %603 = vector.shape_cast %602 : vector<16x32xf32> to vector<2x8x32xf32>
    %c544 = arith.constant 544 : index
    %c0_181 = arith.constant 0 : index
    %604 = vector.load %arg1[%c544, %c0_181] : memref<800x128xbf16, #tpu.memory_space<vmem>>, vector<32x96xbf16>
    %c224_182 = arith.constant 224 : index
    %c0_183 = arith.constant 0 : index
    %605 = vector.load %arg2[%c224_182, %c0_183] : memref<360x128xf32, #tpu.memory_space<vmem>>, vector<1x96xf32>
    %606 = vector.shape_cast %603 : vector<2x8x32xf32> to vector<16x32xf32>
    %607 = arith.truncf %606 : vector<16x32xf32> to vector<16x32xbf16>
    %cst_184 = arith.constant dense<0.000000e+00> : vector<16x96xf32>
    %608 = tpu.matmul %607, %604, %cst_184 {dimension_numbers = #tpu.dot_dimension_numbers<[1], [0], [0], [1], [0, 0, 1, 1], [], []>} : vector<16x32xbf16>, vector<32x96xbf16>, vector<16x96xf32> -> vector<16x96xf32>
    %609 = vector.broadcast %605 : vector<1x96xf32> to vector<16x96xf32>
    %610 = arith.addf %608, %609 : vector<16x96xf32>
    %611 = vector.extract_strided_slice %610 {offsets = [0, 0], sizes = [16, 32], strides = [1, 1]} : vector<16x96xf32> to vector<16x32xf32>
    %612 = vector.extract_strided_slice %610 {offsets = [0, 32], sizes = [16, 32], strides = [1, 1]} : vector<16x96xf32> to vector<16x32xf32>
    %613 = vector.extract_strided_slice %610 {offsets = [0, 64], sizes = [16, 32], strides = [1, 1]} : vector<16x96xf32> to vector<16x32xf32>
    %cst_185 = arith.constant 0.353553385 : f32
    %614 = vector.broadcast %cst_185 : f32 to vector<16x32xf32>
    %615 = arith.mulf %611, %614 : vector<16x32xf32>
    %616 = arith.truncf %615 : vector<16x32xf32> to vector<16x32xbf16>
    %617 = vector.shape_cast %616 : vector<16x32xbf16> to vector<2x8x32xbf16>
    %618 = arith.truncf %612 : vector<16x32xf32> to vector<16x32xbf16>
    %619 = vector.shape_cast %618 : vector<16x32xbf16> to vector<2x8x32xbf16>
    %620 = arith.truncf %613 : vector<16x32xf32> to vector<16x32xbf16>
    %621 = vector.shape_cast %620 : vector<16x32xbf16> to vector<2x8x32xbf16>
    %622 = vector.extract_strided_slice %617 {offsets = [0, 0, 0], sizes = [2, 8, 8], strides = [1, 1, 1]} : vector<2x8x32xbf16> to vector<2x8x8xbf16>
    %623 = vector.extract_strided_slice %619 {offsets = [0, 0, 0], sizes = [2, 8, 8], strides = [1, 1, 1]} : vector<2x8x32xbf16> to vector<2x8x8xbf16>
    "tpu.trace_start"() <{level = 10 : i32, message = "bqd,bkd->bqk"}> : () -> ()
    %cst_186 = arith.constant dense<0.000000e+00> : vector<2x8x8xf32>
    %624 = tpu.matmul %622, %623, %cst_186 {dimension_numbers = #tpu.dot_dimension_numbers<[2], [2], [1], [1], [0, 0, 0, 1, 1, 1], [0], [0]>} : vector<2x8x8xbf16>, vector<2x8x8xbf16>, vector<2x8x8xf32> -> vector<2x8x8xf32>
    "tpu.trace_stop"() : () -> ()
    %cst_187 = arith.constant dense<0xFF800000> : vector<2x8xf32>
    %625 = vector.multi_reduction <maximumf>, %624, %cst_187 [2] : vector<2x8x8xf32> to vector<2x8xf32>
    %626 = vector.shape_cast %625 : vector<2x8xf32> to vector<2x8x1xf32>
    %627 = vector.broadcast %626 : vector<2x8x1xf32> to vector<2x8x8xf32>
    %628 = arith.subf %624, %627 : vector<2x8x8xf32>
    %629 = math.exp %628 : vector<2x8x8xf32>
    %cst_188 = arith.constant dense<0.000000e+00> : vector<2x8xf32>
    %630 = vector.multi_reduction <add>, %629, %cst_188 [2] : vector<2x8x8xf32> to vector<2x8xf32>
    %631 = vector.shape_cast %630 : vector<2x8xf32> to vector<2x8x1xf32>
    %632 = tpu.reciprocal %631 {approx = true} : vector<2x8x1xf32> -> vector<2x8x1xf32>
    %633 = vector.broadcast %632 : vector<2x8x1xf32> to vector<2x8x8xf32>
    %634 = arith.mulf %629, %633 : vector<2x8x8xf32>
    %635 = arith.truncf %634 : vector<2x8x8xf32> to vector<2x8x8xbf16>
    %636 = vector.extract_strided_slice %621 {offsets = [0, 0, 0], sizes = [2, 8, 8], strides = [1, 1, 1]} : vector<2x8x32xbf16> to vector<2x8x8xbf16>
    "tpu.trace_start"() <{level = 10 : i32, message = "bqk,bkd->bqd"}> : () -> ()
    %cst_189 = arith.constant dense<0.000000e+00> : vector<2x8x8xf32>
    %637 = tpu.matmul %635, %636, %cst_189 {dimension_numbers = #tpu.dot_dimension_numbers<[2], [1], [1], [2], [0, 0, 0, 1, 1, 2], [0], [0]>} : vector<2x8x8xbf16>, vector<2x8x8xbf16>, vector<2x8x8xf32> -> vector<2x8x8xf32>
    "tpu.trace_stop"() : () -> ()
    %638 = vector.extract_strided_slice %617 {offsets = [0, 0, 8], sizes = [2, 8, 8], strides = [1, 1, 1]} : vector<2x8x32xbf16> to vector<2x8x8xbf16>
    %639 = vector.extract_strided_slice %619 {offsets = [0, 0, 8], sizes = [2, 8, 8], strides = [1, 1, 1]} : vector<2x8x32xbf16> to vector<2x8x8xbf16>
    "tpu.trace_start"() <{level = 10 : i32, message = "bqd,bkd->bqk"}> : () -> ()
    %cst_190 = arith.constant dense<0.000000e+00> : vector<2x8x8xf32>
    %640 = tpu.matmul %638, %639, %cst_190 {dimension_numbers = #tpu.dot_dimension_numbers<[2], [2], [1], [1], [0, 0, 0, 1, 1, 1], [0], [0]>} : vector<2x8x8xbf16>, vector<2x8x8xbf16>, vector<2x8x8xf32> -> vector<2x8x8xf32>
    "tpu.trace_stop"() : () -> ()
    %cst_191 = arith.constant dense<0xFF800000> : vector<2x8xf32>
    %641 = vector.multi_reduction <maximumf>, %640, %cst_191 [2] : vector<2x8x8xf32> to vector<2x8xf32>
    %642 = vector.shape_cast %641 : vector<2x8xf32> to vector<2x8x1xf32>
    %643 = vector.broadcast %642 : vector<2x8x1xf32> to vector<2x8x8xf32>
    %644 = arith.subf %640, %643 : vector<2x8x8xf32>
    %645 = math.exp %644 : vector<2x8x8xf32>
    %cst_192 = arith.constant dense<0.000000e+00> : vector<2x8xf32>
    %646 = vector.multi_reduction <add>, %645, %cst_192 [2] : vector<2x8x8xf32> to vector<2x8xf32>
    %647 = vector.shape_cast %646 : vector<2x8xf32> to vector<2x8x1xf32>
    %648 = tpu.reciprocal %647 {approx = true} : vector<2x8x1xf32> -> vector<2x8x1xf32>
    %649 = vector.broadcast %648 : vector<2x8x1xf32> to vector<2x8x8xf32>
    %650 = arith.mulf %645, %649 : vector<2x8x8xf32>
    %651 = arith.truncf %650 : vector<2x8x8xf32> to vector<2x8x8xbf16>
    %652 = vector.extract_strided_slice %621 {offsets = [0, 0, 8], sizes = [2, 8, 8], strides = [1, 1, 1]} : vector<2x8x32xbf16> to vector<2x8x8xbf16>
    "tpu.trace_start"() <{level = 10 : i32, message = "bqk,bkd->bqd"}> : () -> ()
    %cst_193 = arith.constant dense<0.000000e+00> : vector<2x8x8xf32>
    %653 = tpu.matmul %651, %652, %cst_193 {dimension_numbers = #tpu.dot_dimension_numbers<[2], [1], [1], [2], [0, 0, 0, 1, 1, 2], [0], [0]>} : vector<2x8x8xbf16>, vector<2x8x8xbf16>, vector<2x8x8xf32> -> vector<2x8x8xf32>
    "tpu.trace_stop"() : () -> ()
    %654 = vector.extract_strided_slice %617 {offsets = [0, 0, 16], sizes = [2, 8, 8], strides = [1, 1, 1]} : vector<2x8x32xbf16> to vector<2x8x8xbf16>
    %655 = vector.extract_strided_slice %619 {offsets = [0, 0, 16], sizes = [2, 8, 8], strides = [1, 1, 1]} : vector<2x8x32xbf16> to vector<2x8x8xbf16>
    "tpu.trace_start"() <{level = 10 : i32, message = "bqd,bkd->bqk"}> : () -> ()
    %cst_194 = arith.constant dense<0.000000e+00> : vector<2x8x8xf32>
    %656 = tpu.matmul %654, %655, %cst_194 {dimension_numbers = #tpu.dot_dimension_numbers<[2], [2], [1], [1], [0, 0, 0, 1, 1, 1], [0], [0]>} : vector<2x8x8xbf16>, vector<2x8x8xbf16>, vector<2x8x8xf32> -> vector<2x8x8xf32>
    "tpu.trace_stop"() : () -> ()
    %cst_195 = arith.constant dense<0xFF800000> : vector<2x8xf32>
    %657 = vector.multi_reduction <maximumf>, %656, %cst_195 [2] : vector<2x8x8xf32> to vector<2x8xf32>
    %658 = vector.shape_cast %657 : vector<2x8xf32> to vector<2x8x1xf32>
    %659 = vector.broadcast %658 : vector<2x8x1xf32> to vector<2x8x8xf32>
    %660 = arith.subf %656, %659 : vector<2x8x8xf32>
    %661 = math.exp %660 : vector<2x8x8xf32>
    %cst_196 = arith.constant dense<0.000000e+00> : vector<2x8xf32>
    %662 = vector.multi_reduction <add>, %661, %cst_196 [2] : vector<2x8x8xf32> to vector<2x8xf32>
    %663 = vector.shape_cast %662 : vector<2x8xf32> to vector<2x8x1xf32>
    %664 = tpu.reciprocal %663 {approx = true} : vector<2x8x1xf32> -> vector<2x8x1xf32>
    %665 = vector.broadcast %664 : vector<2x8x1xf32> to vector<2x8x8xf32>
    %666 = arith.mulf %661, %665 : vector<2x8x8xf32>
    %667 = arith.truncf %666 : vector<2x8x8xf32> to vector<2x8x8xbf16>
    %668 = vector.extract_strided_slice %621 {offsets = [0, 0, 16], sizes = [2, 8, 8], strides = [1, 1, 1]} : vector<2x8x32xbf16> to vector<2x8x8xbf16>
    "tpu.trace_start"() <{level = 10 : i32, message = "bqk,bkd->bqd"}> : () -> ()
    %cst_197 = arith.constant dense<0.000000e+00> : vector<2x8x8xf32>
    %669 = tpu.matmul %667, %668, %cst_197 {dimension_numbers = #tpu.dot_dimension_numbers<[2], [1], [1], [2], [0, 0, 0, 1, 1, 2], [0], [0]>} : vector<2x8x8xbf16>, vector<2x8x8xbf16>, vector<2x8x8xf32> -> vector<2x8x8xf32>
    "tpu.trace_stop"() : () -> ()
    %670 = vector.extract_strided_slice %617 {offsets = [0, 0, 24], sizes = [2, 8, 8], strides = [1, 1, 1]} : vector<2x8x32xbf16> to vector<2x8x8xbf16>
    %671 = vector.extract_strided_slice %619 {offsets = [0, 0, 24], sizes = [2, 8, 8], strides = [1, 1, 1]} : vector<2x8x32xbf16> to vector<2x8x8xbf16>
    "tpu.trace_start"() <{level = 10 : i32, message = "bqd,bkd->bqk"}> : () -> ()
    %cst_198 = arith.constant dense<0.000000e+00> : vector<2x8x8xf32>
    %672 = tpu.matmul %670, %671, %cst_198 {dimension_numbers = #tpu.dot_dimension_numbers<[2], [2], [1], [1], [0, 0, 0, 1, 1, 1], [0], [0]>} : vector<2x8x8xbf16>, vector<2x8x8xbf16>, vector<2x8x8xf32> -> vector<2x8x8xf32>
    "tpu.trace_stop"() : () -> ()
    %cst_199 = arith.constant dense<0xFF800000> : vector<2x8xf32>
    %673 = vector.multi_reduction <maximumf>, %672, %cst_199 [2] : vector<2x8x8xf32> to vector<2x8xf32>
    %674 = vector.shape_cast %673 : vector<2x8xf32> to vector<2x8x1xf32>
    %675 = vector.broadcast %674 : vector<2x8x1xf32> to vector<2x8x8xf32>
    %676 = arith.subf %672, %675 : vector<2x8x8xf32>
    %677 = math.exp %676 : vector<2x8x8xf32>
    %cst_200 = arith.constant dense<0.000000e+00> : vector<2x8xf32>
    %678 = vector.multi_reduction <add>, %677, %cst_200 [2] : vector<2x8x8xf32> to vector<2x8xf32>
    %679 = vector.shape_cast %678 : vector<2x8xf32> to vector<2x8x1xf32>
    %680 = tpu.reciprocal %679 {approx = true} : vector<2x8x1xf32> -> vector<2x8x1xf32>
    %681 = vector.broadcast %680 : vector<2x8x1xf32> to vector<2x8x8xf32>
    %682 = arith.mulf %677, %681 : vector<2x8x8xf32>
    %683 = arith.truncf %682 : vector<2x8x8xf32> to vector<2x8x8xbf16>
    %684 = vector.extract_strided_slice %621 {offsets = [0, 0, 24], sizes = [2, 8, 8], strides = [1, 1, 1]} : vector<2x8x32xbf16> to vector<2x8x8xbf16>
    "tpu.trace_start"() <{level = 10 : i32, message = "bqk,bkd->bqd"}> : () -> ()
    %cst_201 = arith.constant dense<0.000000e+00> : vector<2x8x8xf32>
    %685 = tpu.matmul %683, %684, %cst_201 {dimension_numbers = #tpu.dot_dimension_numbers<[2], [1], [1], [2], [0, 0, 0, 1, 1, 2], [0], [0]>} : vector<2x8x8xbf16>, vector<2x8x8xbf16>, vector<2x8x8xf32> -> vector<2x8x8xf32>
    "tpu.trace_stop"() : () -> ()
    %686 = tpu.concatenate %637, %653, %669, %685 in 2 : vector<2x8x8xf32>, vector<2x8x8xf32>, vector<2x8x8xf32>, vector<2x8x8xf32> -> vector<2x8x32xf32>
    %687 = vector.shape_cast %686 : vector<2x8x32xf32> to vector<16x32xf32>
    %688 = arith.truncf %687 : vector<16x32xf32> to vector<16x32xbf16>
    %c576 = arith.constant 576 : index
    %c0_202 = arith.constant 0 : index
    %689 = vector.load %arg1[%c576, %c0_202] : memref<800x128xbf16, #tpu.memory_space<vmem>>, vector<32x32xbf16>
    %cst_203 = arith.constant dense<0.000000e+00> : vector<16x32xf32>
    %690 = tpu.matmul %688, %689, %cst_203 {dimension_numbers = #tpu.dot_dimension_numbers<[1], [0], [0], [1], [0, 0, 1, 1], [], []>} : vector<16x32xbf16>, vector<32x32xbf16>, vector<16x32xf32> -> vector<16x32xf32>
    %c232 = arith.constant 232 : index
    %c0_204 = arith.constant 0 : index
    %691 = vector.load %arg2[%c232, %c0_204] : memref<360x128xf32, #tpu.memory_space<vmem>>, vector<1x32xf32>
    %692 = vector.broadcast %691 : vector<1x32xf32> to vector<16x32xf32>
    %693 = arith.addf %690, %692 : vector<16x32xf32>
    %694 = arith.addf %602, %693 : vector<16x32xf32>
    %c272 = arith.constant 272 : index
    %c0_205 = arith.constant 0 : index
    %695 = vector.load %arg2[%c272, %c0_205] : memref<360x128xf32, #tpu.memory_space<vmem>>, vector<1x32xf32>
    %c280 = arith.constant 280 : index
    %c0_206 = arith.constant 0 : index
    %696 = vector.load %arg2[%c280, %c0_206] : memref<360x128xf32, #tpu.memory_space<vmem>>, vector<1x32xf32>
    %cst_207 = arith.constant dense<0.000000e+00> : vector<16xf32>
    %697 = vector.multi_reduction <add>, %694, %cst_207 [1] : vector<16x32xf32> to vector<16xf32>
    %698 = vector.shape_cast %697 : vector<16xf32> to vector<16x1xf32>
    %cst_208 = arith.constant 3.200000e+01 : f32
    %699 = vector.broadcast %cst_208 : f32 to vector<16x1xf32>
    %700 = arith.divf %698, %699 : vector<16x1xf32>
    %701 = vector.broadcast %700 : vector<16x1xf32> to vector<16x32xf32>
    %702 = arith.subf %694, %701 : vector<16x32xf32>
    %703 = arith.mulf %702, %702 : vector<16x32xf32>
    %cst_209 = arith.constant dense<0.000000e+00> : vector<16xf32>
    %704 = vector.multi_reduction <add>, %703, %cst_209 [1] : vector<16x32xf32> to vector<16xf32>
    %705 = vector.shape_cast %704 : vector<16xf32> to vector<16x1xf32>
    %cst_210 = arith.constant 3.200000e+01 : f32
    %706 = vector.broadcast %cst_210 : f32 to vector<16x1xf32>
    %707 = arith.divf %705, %706 : vector<16x1xf32>
    %cst_211 = arith.constant 9.99999974E-6 : f32
    %708 = vector.broadcast %cst_211 : f32 to vector<16x1xf32>
    %709 = arith.addf %707, %708 : vector<16x1xf32>
    %710 = math.rsqrt %709 : vector<16x1xf32>
    %711 = vector.broadcast %710 : vector<16x1xf32> to vector<16x32xf32>
    %712 = arith.mulf %702, %711 : vector<16x32xf32>
    %713 = vector.broadcast %695 : vector<1x32xf32> to vector<16x32xf32>
    %714 = arith.mulf %712, %713 : vector<16x32xf32>
    %715 = vector.broadcast %696 : vector<1x32xf32> to vector<16x32xf32>
    %716 = arith.addf %714, %715 : vector<16x32xf32>
    %717 = vector.shape_cast %716 : vector<16x32xf32> to vector<2x8x32xf32>
    %c608 = arith.constant 608 : index
    %c0_212 = arith.constant 0 : index
    %718 = vector.load %arg1[%c608, %c0_212] : memref<800x128xbf16, #tpu.memory_space<vmem>>, vector<32x96xbf16>
    %c240 = arith.constant 240 : index
    %c0_213 = arith.constant 0 : index
    %719 = vector.load %arg2[%c240, %c0_213] : memref<360x128xf32, #tpu.memory_space<vmem>>, vector<1x96xf32>
    %720 = vector.shape_cast %717 : vector<2x8x32xf32> to vector<16x32xf32>
    %721 = arith.truncf %720 : vector<16x32xf32> to vector<16x32xbf16>
    %722 = vector.shape_cast %329 : vector<2x8x32xf32> to vector<16x32xf32>
    %723 = arith.truncf %722 : vector<16x32xf32> to vector<16x32xbf16>
    %724 = vector.extract_strided_slice %718 {offsets = [0, 0], sizes = [32, 32], strides = [1, 1]} : vector<32x96xbf16> to vector<32x32xbf16>
    %cst_214 = arith.constant dense<0.000000e+00> : vector<16x32xf32>
    %725 = tpu.matmul %721, %724, %cst_214 {dimension_numbers = #tpu.dot_dimension_numbers<[1], [0], [0], [1], [0, 0, 1, 1], [], []>} : vector<16x32xbf16>, vector<32x32xbf16>, vector<16x32xf32> -> vector<16x32xf32>
    %726 = vector.extract_strided_slice %719 {offsets = [0, 0], sizes = [1, 32], strides = [1, 1]} : vector<1x96xf32> to vector<1x32xf32>
    %727 = vector.broadcast %726 : vector<1x32xf32> to vector<16x32xf32>
    %728 = arith.addf %725, %727 : vector<16x32xf32>
    %729 = vector.extract_strided_slice %718 {offsets = [0, 32], sizes = [32, 64], strides = [1, 1]} : vector<32x96xbf16> to vector<32x64xbf16>
    %cst_215 = arith.constant dense<0.000000e+00> : vector<16x64xf32>
    %730 = tpu.matmul %723, %729, %cst_215 {dimension_numbers = #tpu.dot_dimension_numbers<[1], [0], [0], [1], [0, 0, 1, 1], [], []>} : vector<16x32xbf16>, vector<32x64xbf16>, vector<16x64xf32> -> vector<16x64xf32>
    %731 = vector.extract_strided_slice %719 {offsets = [0, 32], sizes = [1, 64], strides = [1, 1]} : vector<1x96xf32> to vector<1x64xf32>
    %732 = vector.broadcast %731 : vector<1x64xf32> to vector<16x64xf32>
    %733 = arith.addf %730, %732 : vector<16x64xf32>
    %734 = vector.extract_strided_slice %733 {offsets = [0, 0], sizes = [16, 32], strides = [1, 1]} : vector<16x64xf32> to vector<16x32xf32>
    %735 = vector.extract_strided_slice %733 {offsets = [0, 32], sizes = [16, 32], strides = [1, 1]} : vector<16x64xf32> to vector<16x32xf32>
    %cst_216 = arith.constant 0.353553385 : f32
    %736 = vector.broadcast %cst_216 : f32 to vector<16x32xf32>
    %737 = arith.mulf %728, %736 : vector<16x32xf32>
    %738 = arith.truncf %737 : vector<16x32xf32> to vector<16x32xbf16>
    %739 = vector.shape_cast %738 : vector<16x32xbf16> to vector<2x8x32xbf16>
    %740 = arith.truncf %734 : vector<16x32xf32> to vector<16x32xbf16>
    %741 = vector.shape_cast %740 : vector<16x32xbf16> to vector<2x8x32xbf16>
    %742 = arith.truncf %735 : vector<16x32xf32> to vector<16x32xbf16>
    %743 = vector.shape_cast %742 : vector<16x32xbf16> to vector<2x8x32xbf16>
    %744 = vector.extract_strided_slice %739 {offsets = [0, 0, 0], sizes = [2, 8, 8], strides = [1, 1, 1]} : vector<2x8x32xbf16> to vector<2x8x8xbf16>
    %745 = vector.extract_strided_slice %741 {offsets = [0, 0, 0], sizes = [2, 8, 8], strides = [1, 1, 1]} : vector<2x8x32xbf16> to vector<2x8x8xbf16>
    "tpu.trace_start"() <{level = 10 : i32, message = "bqd,bkd->bqk"}> : () -> ()
    %cst_217 = arith.constant dense<0.000000e+00> : vector<2x8x8xf32>
    %746 = tpu.matmul %744, %745, %cst_217 {dimension_numbers = #tpu.dot_dimension_numbers<[2], [2], [1], [1], [0, 0, 0, 1, 1, 1], [0], [0]>} : vector<2x8x8xbf16>, vector<2x8x8xbf16>, vector<2x8x8xf32> -> vector<2x8x8xf32>
    "tpu.trace_stop"() : () -> ()
    %cst_218 = arith.constant dense<0xFF800000> : vector<2x8xf32>
    %747 = vector.multi_reduction <maximumf>, %746, %cst_218 [2] : vector<2x8x8xf32> to vector<2x8xf32>
    %748 = vector.shape_cast %747 : vector<2x8xf32> to vector<2x8x1xf32>
    %749 = vector.broadcast %748 : vector<2x8x1xf32> to vector<2x8x8xf32>
    %750 = arith.subf %746, %749 : vector<2x8x8xf32>
    %751 = math.exp %750 : vector<2x8x8xf32>
    %cst_219 = arith.constant dense<0.000000e+00> : vector<2x8xf32>
    %752 = vector.multi_reduction <add>, %751, %cst_219 [2] : vector<2x8x8xf32> to vector<2x8xf32>
    %753 = vector.shape_cast %752 : vector<2x8xf32> to vector<2x8x1xf32>
    %754 = tpu.reciprocal %753 {approx = true} : vector<2x8x1xf32> -> vector<2x8x1xf32>
    %755 = vector.broadcast %754 : vector<2x8x1xf32> to vector<2x8x8xf32>
    %756 = arith.mulf %751, %755 : vector<2x8x8xf32>
    %757 = arith.truncf %756 : vector<2x8x8xf32> to vector<2x8x8xbf16>
    %758 = vector.extract_strided_slice %743 {offsets = [0, 0, 0], sizes = [2, 8, 8], strides = [1, 1, 1]} : vector<2x8x32xbf16> to vector<2x8x8xbf16>
    "tpu.trace_start"() <{level = 10 : i32, message = "bqk,bkd->bqd"}> : () -> ()
    %cst_220 = arith.constant dense<0.000000e+00> : vector<2x8x8xf32>
    %759 = tpu.matmul %757, %758, %cst_220 {dimension_numbers = #tpu.dot_dimension_numbers<[2], [1], [1], [2], [0, 0, 0, 1, 1, 2], [0], [0]>} : vector<2x8x8xbf16>, vector<2x8x8xbf16>, vector<2x8x8xf32> -> vector<2x8x8xf32>
    "tpu.trace_stop"() : () -> ()
    %760 = vector.extract_strided_slice %739 {offsets = [0, 0, 8], sizes = [2, 8, 8], strides = [1, 1, 1]} : vector<2x8x32xbf16> to vector<2x8x8xbf16>
    %761 = vector.extract_strided_slice %741 {offsets = [0, 0, 8], sizes = [2, 8, 8], strides = [1, 1, 1]} : vector<2x8x32xbf16> to vector<2x8x8xbf16>
    "tpu.trace_start"() <{level = 10 : i32, message = "bqd,bkd->bqk"}> : () -> ()
    %cst_221 = arith.constant dense<0.000000e+00> : vector<2x8x8xf32>
    %762 = tpu.matmul %760, %761, %cst_221 {dimension_numbers = #tpu.dot_dimension_numbers<[2], [2], [1], [1], [0, 0, 0, 1, 1, 1], [0], [0]>} : vector<2x8x8xbf16>, vector<2x8x8xbf16>, vector<2x8x8xf32> -> vector<2x8x8xf32>
    "tpu.trace_stop"() : () -> ()
    %cst_222 = arith.constant dense<0xFF800000> : vector<2x8xf32>
    %763 = vector.multi_reduction <maximumf>, %762, %cst_222 [2] : vector<2x8x8xf32> to vector<2x8xf32>
    %764 = vector.shape_cast %763 : vector<2x8xf32> to vector<2x8x1xf32>
    %765 = vector.broadcast %764 : vector<2x8x1xf32> to vector<2x8x8xf32>
    %766 = arith.subf %762, %765 : vector<2x8x8xf32>
    %767 = math.exp %766 : vector<2x8x8xf32>
    %cst_223 = arith.constant dense<0.000000e+00> : vector<2x8xf32>
    %768 = vector.multi_reduction <add>, %767, %cst_223 [2] : vector<2x8x8xf32> to vector<2x8xf32>
    %769 = vector.shape_cast %768 : vector<2x8xf32> to vector<2x8x1xf32>
    %770 = tpu.reciprocal %769 {approx = true} : vector<2x8x1xf32> -> vector<2x8x1xf32>
    %771 = vector.broadcast %770 : vector<2x8x1xf32> to vector<2x8x8xf32>
    %772 = arith.mulf %767, %771 : vector<2x8x8xf32>
    %773 = arith.truncf %772 : vector<2x8x8xf32> to vector<2x8x8xbf16>
    %774 = vector.extract_strided_slice %743 {offsets = [0, 0, 8], sizes = [2, 8, 8], strides = [1, 1, 1]} : vector<2x8x32xbf16> to vector<2x8x8xbf16>
    "tpu.trace_start"() <{level = 10 : i32, message = "bqk,bkd->bqd"}> : () -> ()
    %cst_224 = arith.constant dense<0.000000e+00> : vector<2x8x8xf32>
    %775 = tpu.matmul %773, %774, %cst_224 {dimension_numbers = #tpu.dot_dimension_numbers<[2], [1], [1], [2], [0, 0, 0, 1, 1, 2], [0], [0]>} : vector<2x8x8xbf16>, vector<2x8x8xbf16>, vector<2x8x8xf32> -> vector<2x8x8xf32>
    "tpu.trace_stop"() : () -> ()
    %776 = vector.extract_strided_slice %739 {offsets = [0, 0, 16], sizes = [2, 8, 8], strides = [1, 1, 1]} : vector<2x8x32xbf16> to vector<2x8x8xbf16>
    %777 = vector.extract_strided_slice %741 {offsets = [0, 0, 16], sizes = [2, 8, 8], strides = [1, 1, 1]} : vector<2x8x32xbf16> to vector<2x8x8xbf16>
    "tpu.trace_start"() <{level = 10 : i32, message = "bqd,bkd->bqk"}> : () -> ()
    %cst_225 = arith.constant dense<0.000000e+00> : vector<2x8x8xf32>
    %778 = tpu.matmul %776, %777, %cst_225 {dimension_numbers = #tpu.dot_dimension_numbers<[2], [2], [1], [1], [0, 0, 0, 1, 1, 1], [0], [0]>} : vector<2x8x8xbf16>, vector<2x8x8xbf16>, vector<2x8x8xf32> -> vector<2x8x8xf32>
    "tpu.trace_stop"() : () -> ()
    %cst_226 = arith.constant dense<0xFF800000> : vector<2x8xf32>
    %779 = vector.multi_reduction <maximumf>, %778, %cst_226 [2] : vector<2x8x8xf32> to vector<2x8xf32>
    %780 = vector.shape_cast %779 : vector<2x8xf32> to vector<2x8x1xf32>
    %781 = vector.broadcast %780 : vector<2x8x1xf32> to vector<2x8x8xf32>
    %782 = arith.subf %778, %781 : vector<2x8x8xf32>
    %783 = math.exp %782 : vector<2x8x8xf32>
    %cst_227 = arith.constant dense<0.000000e+00> : vector<2x8xf32>
    %784 = vector.multi_reduction <add>, %783, %cst_227 [2] : vector<2x8x8xf32> to vector<2x8xf32>
    %785 = vector.shape_cast %784 : vector<2x8xf32> to vector<2x8x1xf32>
    %786 = tpu.reciprocal %785 {approx = true} : vector<2x8x1xf32> -> vector<2x8x1xf32>
    %787 = vector.broadcast %786 : vector<2x8x1xf32> to vector<2x8x8xf32>
    %788 = arith.mulf %783, %787 : vector<2x8x8xf32>
    %789 = arith.truncf %788 : vector<2x8x8xf32> to vector<2x8x8xbf16>
    %790 = vector.extract_strided_slice %743 {offsets = [0, 0, 16], sizes = [2, 8, 8], strides = [1, 1, 1]} : vector<2x8x32xbf16> to vector<2x8x8xbf16>
    "tpu.trace_start"() <{level = 10 : i32, message = "bqk,bkd->bqd"}> : () -> ()
    %cst_228 = arith.constant dense<0.000000e+00> : vector<2x8x8xf32>
    %791 = tpu.matmul %789, %790, %cst_228 {dimension_numbers = #tpu.dot_dimension_numbers<[2], [1], [1], [2], [0, 0, 0, 1, 1, 2], [0], [0]>} : vector<2x8x8xbf16>, vector<2x8x8xbf16>, vector<2x8x8xf32> -> vector<2x8x8xf32>
    "tpu.trace_stop"() : () -> ()
    %792 = vector.extract_strided_slice %739 {offsets = [0, 0, 24], sizes = [2, 8, 8], strides = [1, 1, 1]} : vector<2x8x32xbf16> to vector<2x8x8xbf16>
    %793 = vector.extract_strided_slice %741 {offsets = [0, 0, 24], sizes = [2, 8, 8], strides = [1, 1, 1]} : vector<2x8x32xbf16> to vector<2x8x8xbf16>
    "tpu.trace_start"() <{level = 10 : i32, message = "bqd,bkd->bqk"}> : () -> ()
    %cst_229 = arith.constant dense<0.000000e+00> : vector<2x8x8xf32>
    %794 = tpu.matmul %792, %793, %cst_229 {dimension_numbers = #tpu.dot_dimension_numbers<[2], [2], [1], [1], [0, 0, 0, 1, 1, 1], [0], [0]>} : vector<2x8x8xbf16>, vector<2x8x8xbf16>, vector<2x8x8xf32> -> vector<2x8x8xf32>
    "tpu.trace_stop"() : () -> ()
    %cst_230 = arith.constant dense<0xFF800000> : vector<2x8xf32>
    %795 = vector.multi_reduction <maximumf>, %794, %cst_230 [2] : vector<2x8x8xf32> to vector<2x8xf32>
    %796 = vector.shape_cast %795 : vector<2x8xf32> to vector<2x8x1xf32>
    %797 = vector.broadcast %796 : vector<2x8x1xf32> to vector<2x8x8xf32>
    %798 = arith.subf %794, %797 : vector<2x8x8xf32>
    %799 = math.exp %798 : vector<2x8x8xf32>
    %cst_231 = arith.constant dense<0.000000e+00> : vector<2x8xf32>
    %800 = vector.multi_reduction <add>, %799, %cst_231 [2] : vector<2x8x8xf32> to vector<2x8xf32>
    %801 = vector.shape_cast %800 : vector<2x8xf32> to vector<2x8x1xf32>
    %802 = tpu.reciprocal %801 {approx = true} : vector<2x8x1xf32> -> vector<2x8x1xf32>
    %803 = vector.broadcast %802 : vector<2x8x1xf32> to vector<2x8x8xf32>
    %804 = arith.mulf %799, %803 : vector<2x8x8xf32>
    %805 = arith.truncf %804 : vector<2x8x8xf32> to vector<2x8x8xbf16>
    %806 = vector.extract_strided_slice %743 {offsets = [0, 0, 24], sizes = [2, 8, 8], strides = [1, 1, 1]} : vector<2x8x32xbf16> to vector<2x8x8xbf16>
    "tpu.trace_start"() <{level = 10 : i32, message = "bqk,bkd->bqd"}> : () -> ()
    %cst_232 = arith.constant dense<0.000000e+00> : vector<2x8x8xf32>
    %807 = tpu.matmul %805, %806, %cst_232 {dimension_numbers = #tpu.dot_dimension_numbers<[2], [1], [1], [2], [0, 0, 0, 1, 1, 2], [0], [0]>} : vector<2x8x8xbf16>, vector<2x8x8xbf16>, vector<2x8x8xf32> -> vector<2x8x8xf32>
    "tpu.trace_stop"() : () -> ()
    %808 = tpu.concatenate %759, %775, %791, %807 in 2 : vector<2x8x8xf32>, vector<2x8x8xf32>, vector<2x8x8xf32>, vector<2x8x8xf32> -> vector<2x8x32xf32>
    %809 = vector.shape_cast %808 : vector<2x8x32xf32> to vector<16x32xf32>
    %810 = arith.truncf %809 : vector<16x32xf32> to vector<16x32xbf16>
    %c640 = arith.constant 640 : index
    %c0_233 = arith.constant 0 : index
    %811 = vector.load %arg1[%c640, %c0_233] : memref<800x128xbf16, #tpu.memory_space<vmem>>, vector<32x32xbf16>
    %cst_234 = arith.constant dense<0.000000e+00> : vector<16x32xf32>
    %812 = tpu.matmul %810, %811, %cst_234 {dimension_numbers = #tpu.dot_dimension_numbers<[1], [0], [0], [1], [0, 0, 1, 1], [], []>} : vector<16x32xbf16>, vector<32x32xbf16>, vector<16x32xf32> -> vector<16x32xf32>
    %c248 = arith.constant 248 : index
    %c0_235 = arith.constant 0 : index
    %813 = vector.load %arg2[%c248, %c0_235] : memref<360x128xf32, #tpu.memory_space<vmem>>, vector<1x32xf32>
    %814 = vector.broadcast %813 : vector<1x32xf32> to vector<16x32xf32>
    %815 = arith.addf %812, %814 : vector<16x32xf32>
    %816 = arith.addf %716, %815 : vector<16x32xf32>
    %c288 = arith.constant 288 : index
    %c0_236 = arith.constant 0 : index
    %817 = vector.load %arg2[%c288, %c0_236] : memref<360x128xf32, #tpu.memory_space<vmem>>, vector<1x32xf32>
    %c296 = arith.constant 296 : index
    %c0_237 = arith.constant 0 : index
    %818 = vector.load %arg2[%c296, %c0_237] : memref<360x128xf32, #tpu.memory_space<vmem>>, vector<1x32xf32>
    %cst_238 = arith.constant dense<0.000000e+00> : vector<16xf32>
    %819 = vector.multi_reduction <add>, %816, %cst_238 [1] : vector<16x32xf32> to vector<16xf32>
    %820 = vector.shape_cast %819 : vector<16xf32> to vector<16x1xf32>
    %cst_239 = arith.constant 3.200000e+01 : f32
    %821 = vector.broadcast %cst_239 : f32 to vector<16x1xf32>
    %822 = arith.divf %820, %821 : vector<16x1xf32>
    %823 = vector.broadcast %822 : vector<16x1xf32> to vector<16x32xf32>
    %824 = arith.subf %816, %823 : vector<16x32xf32>
    %825 = arith.mulf %824, %824 : vector<16x32xf32>
    %cst_240 = arith.constant dense<0.000000e+00> : vector<16xf32>
    %826 = vector.multi_reduction <add>, %825, %cst_240 [1] : vector<16x32xf32> to vector<16xf32>
    %827 = vector.shape_cast %826 : vector<16xf32> to vector<16x1xf32>
    %cst_241 = arith.constant 3.200000e+01 : f32
    %828 = vector.broadcast %cst_241 : f32 to vector<16x1xf32>
    %829 = arith.divf %827, %828 : vector<16x1xf32>
    %cst_242 = arith.constant 9.99999974E-6 : f32
    %830 = vector.broadcast %cst_242 : f32 to vector<16x1xf32>
    %831 = arith.addf %829, %830 : vector<16x1xf32>
    %832 = math.rsqrt %831 : vector<16x1xf32>
    %833 = vector.broadcast %832 : vector<16x1xf32> to vector<16x32xf32>
    %834 = arith.mulf %824, %833 : vector<16x32xf32>
    %835 = vector.broadcast %817 : vector<1x32xf32> to vector<16x32xf32>
    %836 = arith.mulf %834, %835 : vector<16x32xf32>
    %837 = vector.broadcast %818 : vector<1x32xf32> to vector<16x32xf32>
    %838 = arith.addf %836, %837 : vector<16x32xf32>
    %839 = arith.truncf %838 : vector<16x32xf32> to vector<16x32xbf16>
    %c672 = arith.constant 672 : index
    %c0_243 = arith.constant 0 : index
    %840 = vector.load %arg1[%c672, %c0_243] : memref<800x128xbf16, #tpu.memory_space<vmem>>, vector<32x64xbf16>
    %cst_244 = arith.constant dense<0.000000e+00> : vector<16x64xf32>
    %841 = tpu.matmul %839, %840, %cst_244 {dimension_numbers = #tpu.dot_dimension_numbers<[1], [0], [0], [1], [0, 0, 1, 1], [], []>} : vector<16x32xbf16>, vector<32x64xbf16>, vector<16x64xf32> -> vector<16x64xf32>
    %c256_245 = arith.constant 256 : index
    %c0_246 = arith.constant 0 : index
    %842 = vector.load %arg2[%c256_245, %c0_246] : memref<360x128xf32, #tpu.memory_space<vmem>>, vector<1x64xf32>
    %843 = vector.broadcast %842 : vector<1x64xf32> to vector<16x64xf32>
    %844 = arith.addf %841, %843 : vector<16x64xf32>
    %cst_247 = arith.constant 0.000000e+00 : f32
    %845 = vector.broadcast %cst_247 : f32 to vector<16x64xf32>
    %846 = arith.maximumf %844, %845 : vector<16x64xf32>
    %847 = arith.truncf %846 : vector<16x64xf32> to vector<16x64xbf16>
    %c704 = arith.constant 704 : index
    %c0_248 = arith.constant 0 : index
    %848 = vector.load %arg1[%c704, %c0_248] : memref<800x128xbf16, #tpu.memory_space<vmem>>, vector<64x32xbf16>
    %cst_249 = arith.constant dense<0.000000e+00> : vector<16x32xf32>
    %849 = tpu.matmul %847, %848, %cst_249 {dimension_numbers = #tpu.dot_dimension_numbers<[1], [0], [0], [1], [0, 0, 1, 1], [], []>} : vector<16x64xbf16>, vector<64x32xbf16>, vector<16x32xf32> -> vector<16x32xf32>
    %c264 = arith.constant 264 : index
    %c0_250 = arith.constant 0 : index
    %850 = vector.load %arg2[%c264, %c0_250] : memref<360x128xf32, #tpu.memory_space<vmem>>, vector<1x32xf32>
    %851 = vector.broadcast %850 : vector<1x32xf32> to vector<16x32xf32>
    %852 = arith.addf %849, %851 : vector<16x32xf32>
    %853 = arith.addf %838, %852 : vector<16x32xf32>
    %c304 = arith.constant 304 : index
    %c0_251 = arith.constant 0 : index
    %854 = vector.load %arg2[%c304, %c0_251] : memref<360x128xf32, #tpu.memory_space<vmem>>, vector<1x32xf32>
    %c312 = arith.constant 312 : index
    %c0_252 = arith.constant 0 : index
    %855 = vector.load %arg2[%c312, %c0_252] : memref<360x128xf32, #tpu.memory_space<vmem>>, vector<1x32xf32>
    %cst_253 = arith.constant dense<0.000000e+00> : vector<16xf32>
    %856 = vector.multi_reduction <add>, %853, %cst_253 [1] : vector<16x32xf32> to vector<16xf32>
    %857 = vector.shape_cast %856 : vector<16xf32> to vector<16x1xf32>
    %cst_254 = arith.constant 3.200000e+01 : f32
    %858 = vector.broadcast %cst_254 : f32 to vector<16x1xf32>
    %859 = arith.divf %857, %858 : vector<16x1xf32>
    %860 = vector.broadcast %859 : vector<16x1xf32> to vector<16x32xf32>
    %861 = arith.subf %853, %860 : vector<16x32xf32>
    %862 = arith.mulf %861, %861 : vector<16x32xf32>
    %cst_255 = arith.constant dense<0.000000e+00> : vector<16xf32>
    %863 = vector.multi_reduction <add>, %862, %cst_255 [1] : vector<16x32xf32> to vector<16xf32>
    %864 = vector.shape_cast %863 : vector<16xf32> to vector<16x1xf32>
    %cst_256 = arith.constant 3.200000e+01 : f32
    %865 = vector.broadcast %cst_256 : f32 to vector<16x1xf32>
    %866 = arith.divf %864, %865 : vector<16x1xf32>
    %cst_257 = arith.constant 9.99999974E-6 : f32
    %867 = vector.broadcast %cst_257 : f32 to vector<16x1xf32>
    %868 = arith.addf %866, %867 : vector<16x1xf32>
    %869 = math.rsqrt %868 : vector<16x1xf32>
    %870 = vector.broadcast %869 : vector<16x1xf32> to vector<16x32xf32>
    %871 = arith.mulf %861, %870 : vector<16x32xf32>
    %872 = vector.broadcast %854 : vector<1x32xf32> to vector<16x32xf32>
    %873 = arith.mulf %871, %872 : vector<16x32xf32>
    %874 = vector.broadcast %855 : vector<1x32xf32> to vector<16x32xf32>
    %875 = arith.addf %873, %874 : vector<16x32xf32>
    %c336 = arith.constant 336 : index
    %c0_258 = arith.constant 0 : index
    %876 = vector.load %arg2[%c336, %c0_258] : memref<360x128xf32, #tpu.memory_space<vmem>>, vector<1x32xf32>
    %c344 = arith.constant 344 : index
    %c0_259 = arith.constant 0 : index
    %877 = vector.load %arg2[%c344, %c0_259] : memref<360x128xf32, #tpu.memory_space<vmem>>, vector<1x32xf32>
    %cst_260 = arith.constant dense<0.000000e+00> : vector<16xf32>
    %878 = vector.multi_reduction <add>, %875, %cst_260 [1] : vector<16x32xf32> to vector<16xf32>
    %879 = vector.shape_cast %878 : vector<16xf32> to vector<16x1xf32>
    %cst_261 = arith.constant 3.200000e+01 : f32
    %880 = vector.broadcast %cst_261 : f32 to vector<16x1xf32>
    %881 = arith.divf %879, %880 : vector<16x1xf32>
    %882 = vector.broadcast %881 : vector<16x1xf32> to vector<16x32xf32>
    %883 = arith.subf %875, %882 : vector<16x32xf32>
    %884 = arith.mulf %883, %883 : vector<16x32xf32>
    %cst_262 = arith.constant dense<0.000000e+00> : vector<16xf32>
    %885 = vector.multi_reduction <add>, %884, %cst_262 [1] : vector<16x32xf32> to vector<16xf32>
    %886 = vector.shape_cast %885 : vector<16xf32> to vector<16x1xf32>
    %cst_263 = arith.constant 3.200000e+01 : f32
    %887 = vector.broadcast %cst_263 : f32 to vector<16x1xf32>
    %888 = arith.divf %886, %887 : vector<16x1xf32>
    %cst_264 = arith.constant 9.99999974E-6 : f32
    %889 = vector.broadcast %cst_264 : f32 to vector<16x1xf32>
    %890 = arith.addf %888, %889 : vector<16x1xf32>
    %891 = math.rsqrt %890 : vector<16x1xf32>
    %892 = vector.broadcast %891 : vector<16x1xf32> to vector<16x32xf32>
    %893 = arith.mulf %883, %892 : vector<16x32xf32>
    %894 = vector.broadcast %876 : vector<1x32xf32> to vector<16x32xf32>
    %895 = arith.mulf %893, %894 : vector<16x32xf32>
    %896 = vector.broadcast %877 : vector<1x32xf32> to vector<16x32xf32>
    %897 = arith.addf %895, %896 : vector<16x32xf32>
    %898 = arith.truncf %897 : vector<16x32xf32> to vector<16x32xbf16>
    %c768 = arith.constant 768 : index
    %c0_265 = arith.constant 0 : index
    %899 = vector.load %arg1[%c768, %c0_265] : memref<800x128xbf16, #tpu.memory_space<vmem>>, vector<32x32xbf16>
    %cst_266 = arith.constant dense<0.000000e+00> : vector<16x32xf32>
    %900 = tpu.matmul %898, %899, %cst_266 {dimension_numbers = #tpu.dot_dimension_numbers<[1], [0], [0], [1], [0, 0, 1, 1], [], []>} : vector<16x32xbf16>, vector<32x32xbf16>, vector<16x32xf32> -> vector<16x32xf32>
    %c352_267 = arith.constant 352 : index
    %c0_268 = arith.constant 0 : index
    %901 = vector.load %arg2[%c352_267, %c0_268] : memref<360x128xf32, #tpu.memory_space<vmem>>, vector<1x32xf32>
    %902 = vector.broadcast %901 : vector<1x32xf32> to vector<16x32xf32>
    %903 = arith.addf %900, %902 : vector<16x32xf32>
    %904 = vector.extract_strided_slice %903 {offsets = [0, 0], sizes = [8, 32], strides = [1, 1]} : vector<16x32xf32> to vector<8x32xf32>
    %c0_269 = arith.constant 0 : index
    %c0_270 = arith.constant 0 : index
    %c0_271 = arith.constant 0 : index
    %905 = vector.load %arg3[%c0_269, %c0_270, %c0_271] : memref<8x2x32xf32, #tpu.memory_space<vmem>>, vector<8x1x32xf32>
    %906 = vector.shape_cast %905 : vector<8x1x32xf32> to vector<8x32xf32>
    %907 = vector.shape_cast %904 : vector<8x32xf32> to vector<8x1x32xf32>
    tpu.vector_store %arg3[%c0_269, %c0_270, %c0_271], %907 {strides = array<i32>} : memref<8x2x32xf32, #tpu.memory_space<vmem>>, vector<8x1x32xf32>,
    %908 = vector.extract_strided_slice %903 {offsets = [8, 0], sizes = [8, 32], strides = [1, 1]} : vector<16x32xf32> to vector<8x32xf32>
    %c0_272 = arith.constant 0 : index
    %c1_273 = arith.constant 1 : index
    %c0_274 = arith.constant 0 : index
    %909 = vector.load %arg3[%c0_272, %c1_273, %c0_274] : memref<8x2x32xf32, #tpu.memory_space<vmem>>, vector<8x1x32xf32>
    %910 = vector.shape_cast %909 : vector<8x1x32xf32> to vector<8x32xf32>
    %911 = vector.shape_cast %908 : vector<8x32xf32> to vector<8x1x32xf32>
    tpu.vector_store %arg3[%c0_272, %c1_273, %c0_274], %911 {strides = array<i32>} : memref<8x2x32xf32, #tpu.memory_space<vmem>>, vector<8x1x32xf32>,
    return
  }
}

</mosaic_0001>

<bundles_post_ra>
// kernel: transformer_encoder_forward.1
= control target key start
LH: loop header
LB: loop body
LE: loop exit
PB: predicated region body
PF: predicated region fallthrough
CT: control target
= control target key end

     0   :  { %8 = vsyncpa [#allocation3], 0  ;;  %s6600_s0 = inlined_call_operand.hbm [shape: f32[8,2,32], index: 0, kind: input, shape index: {}]   ;;  %s6601_s1 = inlined_call_operand.hbm [shape: bf16[800,128], index: 1, kind: input, shape index: {}]   ;;  %s6602_s2 = inlined_call_operand.hbm [shape: f32[360,128], index: 2, kind: input, shape index: {}]   ;;  %s6603_s3 = inlined_call_operand.hbm [shape: f32[8,2,32], index: 3, kind: output, shape index: {}]  }
   0x1   :  { %9 = vsyncpa [#allocation6], 0  ;;  %s28_s14 = sshll.u32 %s6601_s1, 4  ;;  %s29_s14 = int_to_ptr.hbm [resolvable:$true] %s28_s14 }
   0x2   :  { %10 = vsyncpa [#allocation4], 0  ;;  %s5547_s15 = smov [#allocation5]   ;;  %s15_s19 = sshll.u32 %s6600_s0, 4  ;;  %s16_s19 = int_to_ptr.hbm [resolvable:$true] %s15_s19 }
   0x3   :  { %s30_s16 = sshll.u32 %s5547_s15, 4  ;;  %s5548_s20 = smov 64   ;;  %s31_s16 = int_to_ptr.vmem [resolvable:$true] %s30_s16 }
   0x4   :  { %s5549_s21 = smov 4   ;;  %s5550_s22 = smov [#allocation2]  }
   0x5   :  { %36 = dma.hbm_to_vmem [thread:$0]  %s29_s14, 6400, %s31_s16, [#allocation6], %s5548_s20, %s5548_s20, %s5549_s21  }
   0x6   :  { %s17_s23 = sshll.u32 %s5550_s22, 4  ;;  %s5551_s24 = smov 32   ;;  %s18_s23 = int_to_ptr.vmem [resolvable:$true] %s17_s23 }
   0x7   :  { %s5552_s1 = smov 2   ;;  %s41_s27 = sshll.u32 %s6602_s2, 4  ;;  %s42_s27 = int_to_ptr.hbm [resolvable:$true] %s41_s27 }
   0x8   :  { %23 = dma.hbm_to_vmem [thread:$0]  %s16_s19, 256, %s18_s23, [#allocation3], %s5551_s24, %s5551_s24, %s5552_s1  }
   0x9   :  { %s5553_s0 = smov [#allocation7]   ;;  %s5554_s29 = smov 128  }
   0xa   :  { %s43_s28 = sshll.u32 %s5553_s0, 4  ;;  %s5555_s30 = smov 8   ;;  %s44_s28 = int_to_ptr.vmem [resolvable:$true] %s43_s28 }
   0xb   :  { %49 = dma.hbm_to_vmem [thread:$0]  %s42_s27, 5760, %s44_s28, [#allocation6], %s5554_s29, %s5554_s29, %s5555_s30  }
   0xc   :  { %5541 = dma.done.wait [#allocation3], 256  }
   0xd   :  { %5542 = vsyncadd [#allocation3], 4294967040 }
   0xe   :  { %5543 = dma.done.wait [#allocation6], 12160  }
   0xf   :  { %5544 = vsyncadd [#allocation6], 4294955136  ;;  %v4996_v0 = vld [vmem:[#allocation5 + $0x8] sm:$0xff]  ;;  %vm88_vm0 = vcmask 1041409   ;;  %v4995_v1 = vld [vmem:[#allocation5] sm:$0xff]  ;;  %vm91_vm1 = vcmask 1042434  }
  0x10   :  { %vm94_vm2 = vcmask 1043459   ;;  %vm97_vm3 = vcmask 1044484   ;;  %vm100_vm4 = vcmask 1045509   ;;  %161 = vmatpush.bf16.msra.mxu0 %v4996_v0  ;;  %v64_v2 = vld [vmem:[#allocation2 + $0x2] sm:$0x1]  ;;  %vm103_vm5 = vcmask 1046534  }
  0x11   :  { %v65_v3 = vld [vmem:[#allocation2 + $0x4] sm:$0x1]  ;;  %v66_v4 = vld [vmem:[#allocation2 + $0x6] sm:$0x1]  ;;  %v63_v5 = vld [vmem:[#allocation2] sm:$0x1] }
  0x12   :  { %v67_v6 = vld [vmem:[#allocation2 + $0x8] sm:$0x1]  ;;  %v68_v7 = vld [vmem:[#allocation2 + $0xa] sm:$0x1]  ;;  %v69_v8 = vld [vmem:[#allocation2 + $0xc] sm:$0x1] }
  0x13   :  { %v70_v9 = vld [vmem:[#allocation2 + $0xe] sm:$0x1]  ;;  %v71_v10 = vld [vmem:[#allocation2 + $0x1] sm:$0x1]  ;;  %v72_v11 = vld [vmem:[#allocation2 + $0x3] sm:$0x1] }
  0x14   :  { %v73_v12 = vld [vmem:[#allocation2 + $0x5] sm:$0x1]  ;;  %v74_v13 = vld [vmem:[#allocation2 + $0x7] sm:$0x1]  ;;  %v75_v14 = vld [vmem:[#allocation2 + $0x9] sm:$0x1]  ;;  %162 = vmatpush.bf16.msra.mxu0 %v4995_v1 }
  0x15   :  { %v76_v15 = vld [vmem:[#allocation2 + $0xb] sm:$0x1]  ;;  %v77_v16 = vld [vmem:[#allocation2 + $0xd] sm:$0x1]  ;;  %v87_v17 = vrot.slane %v64_v2, 7  ;;  %v90_v18 = vrot.slane %v65_v3, 6 }
  0x16   :  { %v93_v19 = vrot.slane %v66_v4, 5  ;;  %vm106_vm6 = vcmask 1047559   ;;  %v78_v20 = vld [vmem:[#allocation2 + $0xf] sm:$0x1]  ;;  %v96_v21 = vrot.slane %v67_v6, 4  ;;  %v99_v22 = vrot.slane %v68_v7, 3 }
  0x17   :  { %v102_v23 = vrot.slane %v69_v8, 2  ;;  %v117_v24 = vrot.slane %v72_v11, 7  ;;  %vm151_vm7 = vcmask 261120   ;;  %v89_v25 = vsel %vm88_vm0, %v87_v17, %v63_v5  ;;  %v5158_v47 = vld [vmem:[#allocation7] ss:$0 sm:$0xff]  ;;  %s5556_s2 = smov 88  }
  0x18   :  { %v119_v26 = vrot.slane %v73_v12, 6  ;;  %v121_v27 = vrot.slane %v74_v13, 5  ;;  %v123_v28 = vrot.slane %v75_v14, 4  ;;  %v92_v29 = vsel %vm91_vm1, %v90_v18, %v89_v25  ;;  %s5557_s4 = smov 96   ;;  %s5558_s5 = smov 120  }
  0x19   :  { %v105_v30 = vrot.slane %v70_v9, 1  ;;  %v118_v31 = vsel %vm88_vm0, %v117_v24, %v71_v10  ;;  %v125_v32 = vrot.slane %v76_v15, 3  ;;  %v95_v33 = vsel %vm94_vm2, %v93_v19, %v92_v29  ;;  %s5559_s6 = smov 80   ;;  %s5560_s7 = smov 112  }
  0x1a   :  { %v120_v34 = vsel %vm91_vm1, %v119_v26, %v118_v31  ;;  %v127_v35 = vrot.slane %v77_v16, 2  ;;  %v129_v36 = vrot.slane %v78_v20, 1  ;;  %v98_v37 = vsel %vm97_vm3, %v96_v21, %v95_v33  ;;  %s5561_s8 = smov 72   ;;  %s5562_s9 = smov 104  }
  0x1b   :  { %v122_v38 = vsel %vm94_vm2, %v121_v27, %v120_v34  ;;  %v101_v39 = vsel %vm100_vm4, %v99_v22, %v98_v37  ;;  %vm180_vm8 = vcmask 64512   ;;  %s5563_s10 = smov 56   ;;  %vm253_vm9 = vcmask 1043456   ;;  %s5564_s11 = smov 48  }
  0x1c   :  { %v124_v40 = vsel %vm97_vm3, %v123_v28, %v122_v38  ;;  %v104_v41 = vsel %vm103_vm5, %v102_v23, %v101_v39  ;;  %s5565_s12 = smov 40   ;;  %s5566_s13 = smov 16   ;;  %vm659_vm10 = vcmask 130048   ;;  %vm662_vm11 = vcmask 195584  }
  0x1d   :  { %v126_v42 = vsel %vm100_vm4, %v125_v32, %v124_v40  ;;  %v5617_v43 = vsel %vm106_vm6, %v105_v30, %v104_v41  ;;  %s5567_s14 = smov 24   ;;  %vm835_vm3 = vcmask 523264   ;;  %s5569_s15 = smov [#allocation8]  }
  0x1e   :  { %v128_v44 = vsel %vm103_vm5, %v127_v35, %v126_v42  ;;  %s4660_s16 = sshll.u32 %s5569_s15, 4  ;;  %s4662_s19 = sshll.u32 %s6603_s3, 4  ;;  %s4661_s16 = int_to_ptr.vmem [resolvable:$true] %s4660_s16  ;;  %s4663_s19 = int_to_ptr.hbm [resolvable:$true] %s4662_s19 }
  0x1f   :  { %v5621_v45 = vsel %vm106_vm6, %v129_v36, %v128_v44 }
  0x20   :  { %v5625_v46 = vpack.c.bf16 %v5621_v45, %v5617_v43 }
  0x22   :  { %4684 = vmatmul.msk.bf16.vlgmr.msra.gmra.mxu0 %vm151_vm7, %v5625_v46 }
  0x9f   :  { %v164_v48 = vpop.f32.mrf.mxu0 }
  0xa0   :  { %v165_v49 = vadd.f32 %v5158_v47, %v164_v48 }
  0xa2   :  { %v169_v50 = vmul.f32 0.35355338, %v165_v49  ;;  %v173_v51 = vpack.c.bf16 %v165_v49, %v165_v49 }
  0xa4   :  { %v171_v52 = vpack.c.bf16 %v169_v50, %v169_v50  ;;  %v176_v53 = vunpack.c.l.b16 %v173_v51 }
  0xa6   :  { %v5629_v54 = vpack.c.b16 %v176_v53, %v176_v53  ;;  %v292_v55 = vunpack.c.l.b16 %v171_v52 }
  0xa7   :  { %v166_v56 = vpop.f32.mrf.mxu0 }
  0xa8   :  { %v167_v57 = vadd.f32 %v5158_v47, %v166_v56  ;;  %296 = vrot.lane.b32.xlu1 %v5629_v54, %s5556_s2  ;;  %178 = vrot.lane.b32.xlu0 %v5629_v54, %s5557_s4  ;;  %v293_v58 = vpack.c.b16 %v292_v55, %v292_v55 }
  0xaa   :  { %v170_v59 = vmul.f32 0.35355338, %v167_v57  ;;  %v174_v60 = vpack.c.bf16 %v167_v57, %v167_v57  ;;  %294 = vrot.lane.b32.xlu2 %v293_v58, %s5558_s5 }
  0xac   :  { %v172_v61 = vpack.c.bf16 %v170_v59, %v170_v59  ;;  %v201_v62 = vunpack.c.l.b16 %v174_v60 }
  0xae   :  { %v5636_v63 = vpack.c.b16 %v201_v62, %v201_v62  ;;  %v318_v0 = vunpack.c.l.b16 %v172_v61 }
  0xb0   :  { %322 = vrot.lane.b32.xlu1 %v5636_v63, %s5556_s2  ;;  %203 = vrot.lane.b32.xlu0 %v5636_v63, %s5557_s4  ;;  %v319_v1 = vpack.c.b16 %v318_v0, %v318_v0 }
  0xb2   :  { %320 = vrot.lane.b32.xlu2 %v319_v1, %s5558_s5 }
  0xb8   :  { %434 = vrot.lane.b32.xlu1 %v5636_v63, %s5559_s6  ;;  %411 = vrot.lane.b32.xlu0 %v5629_v54, %s5559_s6 }
  0xba   :  { %409 = vrot.lane.b32.xlu2 %v293_v58, %s5560_s7 }
  0xc0   :  { %523 = vrot.lane.b32.xlu1 %v5629_v54, %s5561_s8  ;;  %432 = vrot.lane.b32.xlu0 %v319_v1, %s5560_s7 }
  0xc2   :  { %546 = vrot.lane.b32.xlu2 %v5636_v63, %s5561_s8 }
  0xc8   :  { %544 = vrot.lane.b32.xlu1 %v319_v1, %s5562_s9  ;;  %521 = vrot.lane.b32.xlu0 %v293_v58, %s5562_s9 }
 0x104   :  { %v295_v2 = vpop.permute.xlu2 %294 }
 0x10c   :  { %v321_v7 = vpop.permute.xlu2 %320 }
 0x114   :  { %v410_v12 = vpop.permute.xlu2 %409 }
 0x11a   :  { %v297_v3 = vpop.permute.xlu1 %296  ;;  %v179_v4 = vpop.permute.xlu0 %178 }
 0x11b   :  { %v185_v5 = vsel %vm180_vm8, %v179_v4, 0  ;;  %v302_v6 = vsel %vm180_vm8, %v297_v3, 0 }
 0x11c   :  { %194 = vmatpush.bf16.xpose.msra.mxu1 %v185_v5  ;;  %311 = vmatpush.bf16.xpose.msrb.mxu0 %v302_v6  ;;  %v547_v17 = vpop.permute.xlu2 %546 }
 0x11d   :  { %v552_v19 = vsel %vm180_vm8, %v547_v17, 0 }
 0x122   :  { %v323_v8 = vpop.permute.xlu1 %322  ;;  %v204_v9 = vpop.permute.xlu0 %203 }
 0x123   :  { %4685 = vmatmul.msk.bf16.vlgmr.msra.gmra.mxu1 %vm180_vm8, %v171_v52  ;;  %4689 = vmatmul.msk.bf16.vlgmr.msrb.gmra.mxu0 %vm180_vm8, %v295_v2  ;;  %v209_v10 = vsel %vm180_vm8, %v204_v9, 0  ;;  %v328_v11 = vsel %vm180_vm8, %v323_v8, 0 }
 0x124   :  { %218 = vmatpush.bf16.xpose.msra.mxu2 %v209_v10  ;;  %337 = vmatpush.bf16.xpose.msrb.mxu1 %v328_v11 }
 0x12a   :  { %v435_v13 = vpop.permute.xlu1 %434  ;;  %v412_v14 = vpop.permute.xlu0 %411 }
 0x12b   :  { %v440_v15 = vsel %vm180_vm8, %v435_v13, 0  ;;  %v417_v16 = vsel %vm180_vm8, %v412_v14, 0  ;;  %4686 = vmatmul.msk.bf16.vlgmr.msra.gmra.mxu2 %vm180_vm8, %v172_v61 }
 0x12c   :  { %426 = vmatpush.bf16.xpose.msra.mxu0 %v417_v16  ;;  %449 = vmatpush.bf16.xpose.msra.mxu1 %v440_v15 }
 0x132   :  { %v524_v18 = vpop.permute.xlu1 %523  ;;  %v433_v21 = vpop.permute.xlu0 %432 }
 0x133   :  { %v529_v20 = vsel %vm180_vm8, %v524_v18, 0  ;;  %4690 = vmatmul.msk.bf16.vlgmr.msrb.gmra.mxu1 %vm180_vm8, %v321_v7  ;;  %4693 = vmatmul.msk.bf16.vlgmr.msra.gmra.mxu0 %vm180_vm8, %v410_v12 }
 0x134   :  { %561 = vmatpush.bf16.xpose.msrb.mxu1 %v552_v19  ;;  %538 = vmatpush.bf16.xpose.msrb.mxu0 %v529_v20 }
 0x13a   :  { %v522_v22 = vpop.permute.xlu0 %521  ;;  %v545_v23 = vpop.permute.xlu1 %544 }
 0x143   :  { %4694 = vmatmul.msk.bf16.vlgmr.msra.gmra.mxu1 %vm180_vm8, %v433_v21  ;;  %4697 = vmatmul.msk.bf16.vlgmr.msrb.gmra.mxu0 %vm180_vm8, %v522_v22 }
 0x153   :  { %4698 = vmatmul.msk.bf16.vlgmr.msrb.gmra.mxu1 %vm180_vm8, %v545_v23 }
 0x1a0   :  { %v196_v24 = vpop.f32.mrf.mxu1  ;;  %v313_v25 = vpop.f32.mrf.mxu0 }
 0x1a1   :  { %v343_v26 = vsel %vm180_vm8, %v313_v25, -inf  ;;  %v224_v27 = vsel %vm180_vm8, %v196_v24, -inf }
 0x1a2   :  { %344 = vmax.xlane.f32.xlu1 %v343_v26  ;;  %225 = vmax.xlane.f32.xlu2 %v224_v27 }
 0x1a8   :  { %v198_v28 = vpop.f32.mrf.mxu1  ;;  %v315_v29 = vpop.f32.mrf.mxu0 }
 0x1ae   :  { %v220_v30 = vpop.f32.mrf.mxu2 }
 0x1af   :  { %v227_v31 = vsel %vm180_vm8, %v220_v30, -inf }
 0x1b0   :  { %228 = vmax.xlane.f32.xlu0 %v227_v31  ;;  %v339_v32 = vpop.f32.mrf.mxu1  ;;  %v5674_v33 = vpop.f32.mrf.mxu0 }
 0x1b1   :  { %v346_v34 = vsel %vm180_vm8, %v339_v32, -inf  ;;  %v455_v49 = vsel %vm180_vm8, %v5674_v33, -inf }
 0x1b2   :  { %347 = vmax.xlane.f32.xlu2 %v346_v34 }
 0x1b6   :  { %v222_v35 = vpop.f32.mrf.mxu2 }
 0x1b8   :  { %v341_v36 = vpop.f32.mrf.mxu1  ;;  %v430_v37 = vpop.f32.mrf.mxu0 }
 0x1bb   :  { %270 = vrot.lane.b32.xlu1 %v5636_v63, %s5548_s20 }
 0x1c0   :  { %v5679_v38 = vpop.f32.mrf.mxu1  ;;  %v5681_v39 = vpop.f32.mrf.mxu0 }
 0x1c1   :  { %v458_v48 = vsel %vm180_vm8, %v5679_v38, -inf  ;;  %v567_v50 = vsel %vm180_vm8, %v5681_v39, -inf }
 0x1c3   :  { %388 = vrot.lane.b32.xlu1 %v5636_v63, %s5563_s10 }
 0x1c4   :  { %367 = vrot.lane.b32.xlu0 %v5629_v54, %s5563_s10 }
 0x1c8   :  { %v453_v40 = vpop.f32.mrf.mxu1  ;;  %v542_v41 = vpop.f32.mrf.mxu0 }
 0x1ca   :  { %248 = vrot.lane.b32.xlu2 %v5629_v54, %s5548_s20 }
 0x1d0   :  { %v563_v42 = vpop.f32.mrf.mxu1 }
 0x1d1   :  { %v570_v47 = vsel %vm180_vm8, %v563_v42, -inf }
 0x1d8   :  { %v565_v44 = vpop.f32.mrf.mxu1 }
 0x1ed   :  { %571 = vmax.xlane.f32.xlu1 %v570_v47 }
 0x1ee   :  { %459 = vmax.xlane.f32.xlu0 %v458_v48 }
 0x1f3   :  { %456 = vmax.xlane.f32.xlu2 %v455_v49 }
 0x1f6   :  { %568 = vmax.xlane.f32.xlu0 %v567_v50 }
 0x215   :  { %v345_v51 = vpop.xlane.xlu1 %344  ;;  %v226_v52 = vpop.xlane.xlu2 %225 }
 0x216   :  { %v349_v53 = vsub.f32 %v313_v25, %v345_v51  ;;  %v230_v55 = vsub.f32 %v196_v24, %v226_v52 }
 0x218   :  { %v351_v56 = vmul.f32 1.442695, %v349_v53  ;;  %v232_v57 = vmul.f32 1.442695, %v230_v55 }
 0x21a   :  { %5203 = vpow2.f32 %v351_v56 }
 0x21b   :  { %5205 = vpow2.f32 %v232_v57 }
 0x220   :  { %v5696_v58 = vpop.eup %5203 }
 0x221   :  { %v5698_v59 = vpop.eup %5205  ;;  %v355_v60 = vsel %vm180_vm8, %v5696_v58, 0.0 }
 0x222   :  { %356 = vadd.xlane.f32.xlu0 %v355_v60  ;;  %v236_v61 = vsel %vm180_vm8, %v5698_v59, 0.0 }
 0x223   :  { %237 = vadd.xlane.f32.xlu1 %v236_v61  ;;  %v229_v62 = vpop.xlane.xlu0 %228 }
 0x224   :  { %v231_v0 = vsub.f32 %v220_v30, %v229_v62 }
 0x225   :  { %v348_v1 = vpop.xlane.xlu2 %347 }
 0x226   :  { %v234_v2 = vmul.f32 1.442695, %v231_v0  ;;  %v350_v3 = vsub.f32 %v339_v32, %v348_v1 }
 0x228   :  { %5207 = vpow2.f32 %v234_v2  ;;  %v353_v4 = vmul.f32 1.442695, %v350_v3 }
 0x22a   :  { %5209 = vpow2.f32 %v353_v4 }
 0x22d   :  { %v271_v5 = vpop.permute.xlu1 %270  ;;  %v249_v6 = vpop.permute.xlu2 %248 }
 0x22e   :  { %v5704_v7 = vpop.eup %5207  ;;  %v255_v8 = vsel %vm253_vm9, %v249_v6, 0  ;;  %v276_v9 = vsel %vm253_vm9, %v271_v5, 0 }
 0x22f   :  { %264 = vmatpush.bf16.msra.mxu3 %v255_v8  ;;  %v239_v10 = vsel %vm180_vm8, %v5704_v7, 0.0 }
 0x230   :  { %v5710_v11 = vpop.eup %5209  ;;  %240 = vadd.xlane.f32.xlu0 %v239_v10 }
 0x231   :  { %v358_v12 = vsel %vm180_vm8, %v5710_v11, 0.0 }
 0x232   :  { %359 = vadd.xlane.f32.xlu2 %v358_v12 }
 0x233   :  { %285 = vmatpush.bf16.msrb.mxu3 %v276_v9 }
 0x235   :  { %v389_v15 = vpop.permute.xlu1 %388 }
 0x236   :  { %v368_v13 = vpop.permute.xlu0 %367  ;;  %v394_v47 = vsel %vm253_vm9, %v389_v15, 0 }
 0x237   :  { %v373_v14 = vsel %vm253_vm9, %v368_v13, 0 }
 0x238   :  { %382 = vmatpush.bf16.msrb.mxu2 %v373_v14 }
 0x23c   :  { %500 = vrot.lane.b32.xlu1 %v5636_v63, %s5564_s11 }
 0x24a   :  { %479 = vrot.lane.b32.xlu2 %v5629_v54, %s5564_s11 }
 0x260   :  { %v572_v16 = vpop.xlane.xlu1 %571 }
 0x261   :  { %v574_v17 = vsub.f32 %v563_v42, %v572_v16  ;;  %v460_v18 = vpop.xlane.xlu0 %459 }
 0x262   :  { %v462_v19 = vsub.f32 %v5679_v38, %v460_v18 }
 0x263   :  { %v577_v21 = vmul.f32 1.442695, %v574_v17 }
 0x264   :  { %v465_v20 = vmul.f32 1.442695, %v462_v19 }
 0x266   :  { %5211 = vpow2.f32 %v465_v20  ;;  %v457_v22 = vpop.xlane.xlu2 %456 }
 0x267   :  { %v461_v23 = vsub.f32 %v5674_v33, %v457_v22  ;;  %5213 = vpow2.f32 %v577_v21 }
 0x269   :  { %v463_v24 = vmul.f32 1.442695, %v461_v23  ;;  %v569_v25 = vpop.xlane.xlu0 %568 }
 0x26a   :  { %v573_v26 = vsub.f32 %v5681_v39, %v569_v25 }
 0x26b   :  { %5215 = vpow2.f32 %v463_v24 }
 0x26c   :  { %v5212_v27 = vpop.eup %5211  ;;  %v575_v28 = vmul.f32 1.442695, %v573_v26 }
 0x26d   :  { %v470_v29 = vsel %vm180_vm8, %v5212_v27, 0.0  ;;  %v5723_v30 = vpop.eup %5213 }
 0x26e   :  { %5217 = vpow2.f32 %v575_v28  ;;  %471 = vadd.xlane.f32.xlu0 %v470_v29  ;;  %v582_v33 = vsel %vm180_vm8, %v5723_v30, 0.0 }
 0x271   :  { %v5216_v31 = vpop.eup %5215 }
 0x272   :  { %v467_v32 = vsel %vm180_vm8, %v5216_v31, 0.0 }
 0x273   :  { %468 = vadd.xlane.f32.xlu1 %v467_v32  ;;  %583 = vadd.xlane.f32.xlu2 %v582_v33 }
 0x274   :  { %v5218_v34 = vpop.eup %5217 }
 0x275   :  { %v579_v35 = vsel %vm180_vm8, %v5218_v34, 0.0 }
 0x276   :  { %580 = vadd.xlane.f32.xlu0 %v579_v35  ;;  %v4998_v35 = vld [vmem:[#allocation5 + $0x18] sm:$0xff] }
 0x277   :  { %693 = vmatpush.bf16.msra.mxu0 %v4998_v35 }
 0x28a   :  { %591 = vrot.lane.b32.xlu0 %v5629_v54, %s5565_s12 }
 0x28c   :  { %612 = vrot.lane.b32.xlu1 %v5636_v63, %s5565_s12 }
 0x295   :  { %v357_v36 = vpop.xlane.xlu0 %356 }
 0x296   :  { %5219 = vrcp.f32 %v357_v36  ;;  %v238_v37 = vpop.xlane.xlu1 %237  ;;  %v4997_v36 = vld [vmem:[#allocation5 + $0x10] sm:$0xff] }
 0x297   :  { %5221 = vrcp.f32 %v238_v37  ;;  %694 = vmatpush.bf16.msra.mxu0 %v4997_v36 }
 0x29c   :  { %v5220_v38 = vpop.eup %5219 }
 0x29d   :  { %v5222_v39 = vpop.eup %5221  ;;  %v363_v40 = vmul.f32 %v5220_v38, %v5696_v58 }
 0x29e   :  { %v244_v41 = vmul.f32 %v5222_v39, %v5698_v59 }
 0x29f   :  { %v365_v42 = vpack.c.bf16 %v363_v40, %v363_v40 }
 0x2a0   :  { %v246_v44 = vpack.c.bf16 %v244_v41, %v244_v41 }
 0x2a1   :  { %4691 = vmatmul.msk.bf16.vlgmr.msrb.gmra.mxu2 %vm180_vm8, %v365_v42 }
 0x2a2   :  { %4687 = vmatmul.msk.bf16.vlgmr.msra.gmra.mxu3 %vm180_vm8, %v246_v44 }
 0x2a3   :  { %403 = vmatpush.bf16.msra.mxu3 %v394_v47  ;;  %v241_v54 = vpop.xlane.xlu0 %240 }
 0x2a4   :  { %5223 = vrcp.f32 %v241_v54 }
 0x2a5   :  { %v360_v63 = vpop.xlane.xlu2 %359 }
 0x2a6   :  { %5225 = vrcp.f32 %v360_v63 }
 0x2aa   :  { %v5224_v48 = vpop.eup %5223 }
 0x2ab   :  { %v245_v49 = vmul.f32 %v5224_v48, %v5704_v7 }
 0x2ac   :  { %v5226_v56 = vpop.eup %5225 }
 0x2ad   :  { %v480_v50 = vpop.permute.xlu2 %479  ;;  %v247_v53 = vpack.c.bf16 %v245_v49, %v245_v49  ;;  %v364_v57 = vmul.f32 %v5226_v56, %v5710_v11 }
 0x2ae   :  { %v485_v51 = vsel %vm253_vm9, %v480_v50, 0  ;;  %v501_v52 = vpop.permute.xlu1 %500 }
 0x2af   :  { %494 = vmatpush.bf16.msra.mxu2 %v485_v51  ;;  %v506_v55 = vsel %vm253_vm9, %v501_v52, 0  ;;  %v366_v58 = vpack.c.bf16 %v364_v57, %v364_v57 }
 0x2b2   :  { %4688 = vmatmul.msk.bf16.vlgmr.msrb.gmra.mxu3 %vm180_vm8, %v247_v53 }
 0x2b3   :  { %515 = vmatpush.bf16.msrb.mxu3 %v506_v55  ;;  %v5159_v55 = vld [vmem:[#allocation7 + $0x8] ss:$0 sm:$0xff] }
 0x2c2   :  { %4692 = vmatmul.msk.bf16.vlgmr.msra.gmra.mxu3 %vm180_vm8, %v366_v58 }
 0x2e1   :  { %v472_v59 = vpop.xlane.xlu0 %471 }
 0x2e2   :  { %5227 = vrcp.f32 %v472_v59 }
 0x2e6   :  { %v469_v60 = vpop.xlane.xlu1 %468  ;;  %v584_v3 = vpop.xlane.xlu2 %583 }
 0x2e7   :  { %5229 = vrcp.f32 %v469_v60 }
 0x2e8   :  { %v5228_v61 = vpop.eup %5227  ;;  %5231 = vrcp.f32 %v584_v3 }
 0x2e9   :  { %v476_v62 = vmul.f32 %v5228_v61, %v5212_v27  ;;  %v581_v5 = vpop.xlane.xlu0 %580 }
 0x2ea   :  { %5233 = vrcp.f32 %v581_v5 }
 0x2eb   :  { %v478_v0 = vpack.c.bf16 %v476_v62, %v476_v62 }
 0x2ed   :  { %4696 = vmatmul.msk.bf16.vlgmr.msrb.gmra.mxu3 %vm180_vm8, %v478_v0  ;;  %v5230_v1 = vpop.eup %5229 }
 0x2ee   :  { %v475_v2 = vmul.f32 %v5230_v1, %v5216_v31  ;;  %v5232_v6 = vpop.eup %5231  ;;  %v5568_v1 = vmov 32.0  }
 0x2ef   :  { %v588_v9 = vmul.f32 %v5232_v6, %v5723_v30  ;;  %5235 = vrcp.f32 %v5568_v1 }
 0x2f0   :  { %v477_v4 = vpack.c.bf16 %v475_v2, %v475_v2  ;;  %v5234_v7 = vpop.eup %5233 }
 0x2f1   :  { %v587_v10 = vmul.f32 %v5234_v7, %v5218_v34  ;;  %v590_v14 = vpack.c.bf16 %v588_v9, %v588_v9 }
 0x2f2   :  { %4695 = vmatmul.msk.bf16.vlgmr.msra.gmra.mxu2 %vm180_vm8, %v477_v4 }
 0x2f3   :  { %v589_v15 = vpack.c.bf16 %v587_v10, %v587_v10 }
 0x2f5   :  { %v5236_v2 = vpop.eup %5235 }
 0x2f6   :  { %v712_v3 = vmul.f32 32.0, %v5236_v2  ;;  %vm716_vm12 = vweird.f32 %v5236_v2 }
 0x2f8   :  { %v713_v4 = vsub.f32 1.0, %v712_v3 }
 0x2fa   :  { %v714_v5 = vmul.f32 %v5236_v2, %v713_v4 }
 0x2fc   :  { %v592_v8 = vpop.permute.xlu0 %591  ;;  %v715_v6 = vadd.f32 %v5236_v2, %v714_v5 }
 0x2fd   :  { %v597_v11 = vsel %vm253_vm9, %v592_v8, 0 }
 0x2fe   :  { %606 = vmatpush.bf16.msrb.mxu2 %v597_v11  ;;  %v613_v12 = vpop.permute.xlu1 %612  ;;  %v5765_v7 = vsel %vm716_vm12, %v5236_v2, %v715_v6 }
 0x2ff   :  { %v618_v13 = vsel %vm253_vm9, %v613_v12, 0 }
 0x300   :  { %627 = vmatpush.bf16.msra.mxu3 %v618_v13 }
 0x302   :  { %4699 = vmatmul.msk.bf16.vlgmr.msrb.gmra.mxu2 %vm180_vm8, %v589_v15 }
 0x303   :  { %4700 = vmatmul.msk.bf16.vlgmr.msra.gmra.mxu3 %vm180_vm8, %v590_v14 }
 0x324   :  { %v384_v16 = vpop.f32.mrf.mxu2 }
 0x325   :  { %v266_v17 = vpop.f32.mrf.mxu3 }
 0x32c   :  { %v386_v18 = vpop.f32.mrf.mxu2 }
 0x32d   :  { %v268_v19 = vpop.f32.mrf.mxu3 }
 0x32e   :  { %v5000_v19 = vld [vmem:[#allocation5 + $0x28] sm:$0xff] }
 0x32f   :  { %790 = vmatpush.bf16.msra.mxu1 %v5000_v19 }
 0x335   :  { %v287_v20 = vpop.f32.mrf.mxu3 }
 0x33d   :  { %v289_v21 = vpop.f32.mrf.mxu3 }
 0x33e   :  { %v4999_v21 = vld [vmem:[#allocation5 + $0x20] sm:$0xff] }
 0x33f   :  { %791 = vmatpush.bf16.msra.mxu1 %v4999_v21  ;;  %v5006_v21 = vld [vmem:[#allocation5 + $0x58] sm:$0xff] }
 0x340   :  { %935 = vmatpush.bf16.msrb.mxu3 %v5006_v21 }
 0x345   :  { %v405_v22 = vpop.f32.mrf.mxu3 }
 0x346   :  { %v5068_v23 = vpack.i.bf16 %v405_v22, %v384_v16 }
 0x348   :  { %5069 = vrot.lane.b32.xlu0 %v5068_v23, %s5555_s30 }
 0x34d   :  { %v407_v24 = vpop.f32.mrf.mxu3 }
 0x370   :  { %v517_v25 = vpop.f32.mrf.mxu3 }
 0x375   :  { %v496_v26 = vpop.f32.mrf.mxu2 }
 0x376   :  { %v5073_v27 = vpack.i.bf16 %v517_v25, %v496_v26 }
 0x378   :  { %v519_v28 = vpop.f32.mrf.mxu3  ;;  %5074 = vrot.lane.b32.xlu1 %v5073_v27, %s5566_s13 }
 0x37d   :  { %v498_v29 = vpop.f32.mrf.mxu2 }
 0x385   :  { %v608_v30 = vpop.f32.mrf.mxu2 }
 0x386   :  { %v629_v31 = vpop.f32.mrf.mxu3 }
 0x387   :  { %v5078_v32 = vpack.i.bf16 %v629_v31, %v608_v30 }
 0x389   :  { %5079 = vrot.lane.b32.xlu0 %v5078_v32, %s5567_s14 }
 0x38d   :  { %v610_v33 = vpop.f32.mrf.mxu2 }
 0x38e   :  { %v631_v34 = vpop.f32.mrf.mxu3 }
 0x3ba   :  { %v5070_v37 = vpop.permute.xlu0 %5069 }
 0x3bb   :  { %v5072_v39 = vunpack.i.h.bf16 %v5070_v37  ;;  %v5071_v40 = vunpack.i.l.bf16 %v5070_v37 }
 0x3bd   :  { %v658_v47 = vsel %vm180_vm8, %v287_v20, %v5072_v39  ;;  %v657_v54 = vsel %vm180_vm8, %v266_v17, %v5071_v40 }
 0x3ea   :  { %v5075_v38 = vpop.permute.xlu1 %5074 }
 0x3eb   :  { %v5077_v41 = vunpack.i.h.bf16 %v5075_v38  ;;  %v5076_v42 = vunpack.i.l.bf16 %v5075_v38  ;;  %v5160_v38 = vld [vmem:[#allocation7 + $0x20] ss:$0 sm:$0xff] }
 0x3ed   :  { %v661_v49 = vsel %vm659_vm10, %v658_v47, %v5077_v41  ;;  %v660_v50 = vsel %vm659_vm10, %v657_v54, %v5076_v42  ;;  %v5161_v47 = vld [vmem:[#allocation7 + $0x28] ss:$0 sm:$0xff] }
 0x3fb   :  { %v5080_v44 = vpop.permute.xlu0 %5079 }
 0x3fc   :  { %v5082_v63 = vunpack.i.h.bf16 %v5080_v44  ;;  %v5081_v48 = vunpack.i.l.bf16 %v5080_v44 }
 0x3fe   :  { %v663_v51 = vsel %vm662_vm11, %v660_v50, %v5081_v48  ;;  %v664_v52 = vsel %vm662_vm11, %v661_v49, %v5082_v63  ;;  %v5004_v50 = vld [vmem:[#allocation5 + $0x48] sm:$0xff] }
 0x3ff   :  { %v665_v53 = vpack.c.bf16 %v664_v52, %v663_v51  ;;  %843 = vmatpush.bf16.msra.mxu2 %v5004_v50  ;;  %v5003_v51 = vld [vmem:[#allocation5 + $0x40] sm:$0xff]  ;;  %v5002_v52 = vld [vmem:[#allocation5 + $0x38] sm:$0xff] }
 0x401   :  { %4709 = vmatmul.msk.bf16.vlgmr.msra.gmra.mxu0 %vm151_vm7, %v665_v53  ;;  %v5001_v53 = vld [vmem:[#allocation5 + $0x30] sm:$0xff] }
 0x403   :  { %844 = vmatpush.bf16.msra.mxu2 %v5003_v51 }
 0x407   :  { %845 = vmatpush.bf16.msra.mxu2 %v5002_v52  ;;  %v5166_v52 = vld [vmem:[#allocation7 + $0x40] ss:$0 sm:$0xff] }
 0x40b   :  { %846 = vmatpush.bf16.msra.mxu2 %v5001_v53 }
 0x47e   :  { %v696_v56 = vpop.f32.mrf.mxu0 }
 0x47f   :  { %v697_v57 = vadd.f32 %v5159_v55, %v696_v56  ;;  %v5162_v56 = vld [vmem:[#allocation7 + $0x10] ss:$0 sm:$0xff] }
 0x481   :  { %v701_v58 = vadd.f32 %v697_v57, %v5617_v43 }
 0x483   :  { %v705_v59 = vsel %vm151_vm7, %v701_v58, 0.0 }
 0x484   :  { %706 = vadd.xlane.f32.xlu1 %v705_v59 }
 0x486   :  { %v698_v60 = vpop.f32.mrf.mxu0 }
 0x487   :  { %v699_v61 = vadd.f32 %v5159_v55, %v698_v60 }
 0x489   :  { %v702_v62 = vadd.f32 %v699_v61, %v5621_v45 }
 0x48b   :  { %v708_v0 = vsel %vm151_vm7, %v702_v62, 0.0 }
 0x48c   :  { %709 = vadd.xlane.f32.xlu2 %v708_v0  ;;  %v5163_v0 = vld [vmem:[#allocation7 + $0x18] ss:$0 sm:$0xff] }
 0x4f7   :  { %v707_v8 = vpop.xlane.xlu1 %706 }
 0x4f8   :  { %v718_v9 = vmul.f32 %v5765_v7, %v707_v8 }
 0x4fa   :  { %v720_v10 = vsub.f32 %v701_v58, %v718_v9 }
 0x4fc   :  { %v722_v11 = vmul.f32 %v720_v10, %v720_v10 }
 0x4fe   :  { %v724_v12 = vsel %vm151_vm7, %v722_v11, 0.0 }
 0x4ff   :  { %v710_v13 = vpop.xlane.xlu2 %709  ;;  %725 = vadd.xlane.f32.xlu0 %v724_v12 }
 0x500   :  { %v719_v14 = vmul.f32 %v5765_v7, %v710_v13 }
 0x502   :  { %v721_v15 = vsub.f32 %v702_v62, %v719_v14 }
 0x504   :  { %v723_v16 = vmul.f32 %v721_v15, %v721_v15 }
 0x506   :  { %v727_v17 = vsel %vm151_vm7, %v723_v16, 0.0 }
 0x507   :  { %728 = vadd.xlane.f32.xlu2 %v727_v17 }
 0x572   :  { %v726_v18 = vpop.xlane.xlu0 %725 }
 0x573   :  { %v730_v20 = vmul.f32 %v726_v18, %v5765_v7 }
 0x575   :  { %v732_v22 = vadd.f32 1e-05, %v730_v20 }
 0x577   :  { %5237 = vrsqrt.f32 %v732_v22  ;;  %vm740_vm14 = vweird.f32 %v732_v22 }
 0x57a   :  { %v729_v23 = vpop.xlane.xlu2 %728 }
 0x57b   :  { %v731_v24 = vmul.f32 %v729_v23, %v5765_v7  ;;  %v5005_v23 = vld [vmem:[#allocation5 + $0x50] sm:$0xff] }
 0x57c   :  { %936 = vmatpush.bf16.msrb.mxu3 %v5005_v23 }
 0x57d   :  { %v5238_v25 = vpop.eup %5237  ;;  %v733_v26 = vadd.f32 1e-05, %v731_v24 }
 0x57e   :  { %v735_v27 = vmul.f32 %v5238_v25, %v732_v22  ;;  %vm741_vm13 = vweird.f32 %v5238_v25 }
 0x57f   :  { %5239 = vrsqrt.f32 %v733_v26  ;;  %vm742_vm15 = vmor %vm740_vm14, %vm741_vm13  ;;  %vm750_vm1 = vweird.f32 %v733_v26 }
 0x580   :  { %v736_v28 = vmul.f32 %v5238_v25, %v735_v27 }
 0x582   :  { %v737_v29 = vmul.f32 0.5, %v736_v28 }
 0x584   :  { %v738_v30 = vsub.f32 1.5, %v737_v29 }
 0x585   :  { %v5240_v31 = vpop.eup %5239 }
 0x586   :  { %v739_v32 = vmul.f32 %v5238_v25, %v738_v30  ;;  %v745_v33 = vmul.f32 %v5240_v31, %v733_v26  ;;  %vm751_vm0 = vweird.f32 %v5240_v31 }
 0x587   :  { %vm752_vm2 = vmor %vm750_vm1, %vm751_vm0 }
 0x588   :  { %v746_v34 = vmul.f32 %v5240_v31, %v745_v33  ;;  %v743_v35 = vsel %vm742_vm15, %v5238_v25, %v739_v32 }
 0x589   :  { %v754_v39 = vmul.f32 %v743_v35, %v720_v10 }
 0x58a   :  { %v747_v36 = vmul.f32 0.5, %v746_v34 }
 0x58b   :  { %v757_v42 = vmul.f32 %v5160_v38, %v754_v39 }
 0x58c   :  { %v748_v37 = vsub.f32 1.5, %v747_v36 }
 0x58d   :  { %v760_v63 = vadd.f32 %v5161_v47, %v757_v42 }
 0x58e   :  { %v749_v40 = vmul.f32 %v5240_v31, %v748_v37 }
 0x590   :  { %v753_v41 = vsel %vm752_vm2, %v5240_v31, %v749_v40  ;;  %v5164_v40 = vld [vmem:[#allocation7 + $0x30] ss:$0 sm:$0xff] }
 0x591   :  { %v755_v44 = vmul.f32 %v753_v41, %v721_v15 }
 0x593   :  { %v758_v54 = vmul.f32 %v5160_v38, %v755_v44 }
 0x595   :  { %v761_v48 = vadd.f32 %v5161_v47, %v758_v54 }
 0x597   :  { %v762_v49 = vpack.c.bf16 %v761_v48, %v760_v63 }
 0x599   :  { %4718 = vmatmul.msk.bf16.vlgmr.msra.gmra.mxu1 %vm151_vm7, %v762_v49 }
 0x616   :  { %v793_v55 = vpop.f32.mrf.mxu1 }
 0x617   :  { %v794_v57 = vadd.f32 %v5162_v56, %v793_v55 }
 0x619   :  { %v798_v60 = vmax.f32 %v794_v57, 0.0 }
 0x61e   :  { %v795_v58 = vpop.f32.mrf.mxu1 }
 0x61f   :  { %v796_v59 = vadd.f32 %v5162_v56, %v795_v58 }
 0x621   :  { %v799_v61 = vmax.f32 %v796_v59, 0.0 }
 0x623   :  { %v800_v62 = vpack.c.bf16 %v799_v61, %v798_v60 }
 0x625   :  { %4735 = vmatmul.msk.bf16.vlgmr.msra.gmra.mxu2 %vm835_vm3, %v800_v62 }
 0x6a8   :  { %v848_v1 = vpop.f32.mrf.mxu2 }
 0x6a9   :  { %v849_v2 = vadd.f32 %v5163_v0, %v848_v1 }
 0x6ab   :  { %v853_v3 = vadd.f32 %v849_v2, %v760_v63  ;;  %v5165_v63 = vld [vmem:[#allocation7 + $0x38] ss:$0 sm:$0xff] }
 0x6ad   :  { %v857_v4 = vsel %vm151_vm7, %v853_v3, 0.0 }
 0x6ae   :  { %858 = vadd.xlane.f32.xlu2 %v857_v4 }
 0x6b0   :  { %v850_v5 = vpop.f32.mrf.mxu2 }
 0x6b1   :  { %v851_v6 = vadd.f32 %v5163_v0, %v850_v5 }
 0x6b3   :  { %v854_v8 = vadd.f32 %v851_v6, %v761_v48 }
 0x6b5   :  { %v860_v9 = vsel %vm151_vm7, %v854_v8, 0.0 }
 0x6b6   :  { %861 = vadd.xlane.f32.xlu2 %v860_v9 }
 0x721   :  { %v859_v10 = vpop.xlane.xlu2 %858 }
 0x722   :  { %v863_v11 = vmul.f32 %v859_v10, %v5765_v7 }
 0x724   :  { %v865_v12 = vsub.f32 %v853_v3, %v863_v11 }
 0x726   :  { %v867_v13 = vmul.f32 %v865_v12, %v865_v12 }
 0x728   :  { %v869_v14 = vsel %vm151_vm7, %v867_v13, 0.0 }
 0x729   :  { %870 = vadd.xlane.f32.xlu2 %v869_v14  ;;  %v862_v15 = vpop.xlane.xlu2 %861 }
 0x72a   :  { %v864_v16 = vmul.f32 %v862_v15, %v5765_v7 }
 0x72c   :  { %v866_v17 = vsub.f32 %v854_v8, %v864_v16 }
 0x72e   :  { %v868_v18 = vmul.f32 %v866_v17, %v866_v17 }
 0x730   :  { %v872_v19 = vsel %vm151_vm7, %v868_v18, 0.0 }
 0x731   :  { %873 = vadd.xlane.f32.xlu1 %v872_v19 }
 0x79c   :  { %v871_v20 = vpop.xlane.xlu2 %870 }
 0x79d   :  { %v875_v22 = vmul.f32 %v871_v20, %v5765_v7 }
 0x79f   :  { %v877_v24 = vadd.f32 1e-05, %v875_v22 }
 0x7a1   :  { %5241 = vrsqrt.f32 %v877_v24  ;;  %vm885_vm5 = vweird.f32 %v877_v24 }
 0x7a4   :  { %v874_v25 = vpop.xlane.xlu1 %873 }
 0x7a5   :  { %v876_v26 = vmul.f32 %v874_v25, %v5765_v7 }
 0x7a7   :  { %v5242_v27 = vpop.eup %5241  ;;  %v878_v28 = vadd.f32 1e-05, %v876_v26 }
 0x7a8   :  { %v880_v29 = vmul.f32 %v5242_v27, %v877_v24  ;;  %vm886_vm4 = vweird.f32 %v5242_v27 }
 0x7a9   :  { %5243 = vrsqrt.f32 %v878_v28  ;;  %vm887_vm6 = vmor %vm885_vm5, %vm886_vm4  ;;  %vm895_vm13 = vweird.f32 %v878_v28 }
 0x7aa   :  { %v881_v30 = vmul.f32 %v5242_v27, %v880_v29 }
 0x7ac   :  { %v882_v31 = vmul.f32 0.5, %v881_v30 }
 0x7ae   :  { %v883_v32 = vsub.f32 1.5, %v882_v31 }
 0x7af   :  { %v5244_v33 = vpop.eup %5243 }
 0x7b0   :  { %v884_v34 = vmul.f32 %v5242_v27, %v883_v32  ;;  %v890_v35 = vmul.f32 %v5244_v33, %v878_v28  ;;  %vm896_vm12 = vweird.f32 %v5244_v33 }
 0x7b1   :  { %vm897_vm14 = vmor %vm895_vm13, %vm896_vm12 }
 0x7b2   :  { %v891_v36 = vmul.f32 %v5244_v33, %v890_v35  ;;  %v888_v37 = vsel %vm887_vm6, %v5242_v27, %v884_v34 }
 0x7b3   :  { %v899_v41 = vmul.f32 %v888_v37, %v865_v12 }
 0x7b4   :  { %v892_v38 = vmul.f32 0.5, %v891_v36 }
 0x7b5   :  { %v902_v47 = vmul.f32 %v5164_v40, %v899_v41 }
 0x7b6   :  { %v893_v39 = vsub.f32 1.5, %v892_v38 }
 0x7b7   :  { %v5783_v49 = vadd.f32 %v5165_v63, %v902_v47 }
 0x7b8   :  { %v894_v42 = vmul.f32 %v5244_v33, %v893_v39 }
 0x7ba   :  { %v898_v44 = vsel %vm897_vm14, %v5244_v33, %v894_v42 }
 0x7bb   :  { %v900_v54 = vmul.f32 %v898_v44, %v866_v17 }
 0x7bd   :  { %v903_v48 = vmul.f32 %v5164_v40, %v900_v54 }
 0x7bf   :  { %v5785_v50 = vadd.f32 %v5165_v63, %v903_v48 }
 0x7c1   :  { %v912_v51 = vpack.c.bf16 %v5785_v50, %v5783_v49 }
 0x7c3   :  { %4744 = vmatmul.msk.bf16.vlgmr.msrb.gmra.mxu3 %vm151_vm7, %v912_v51 }
 0x846   :  { %v938_v53 = vpop.f32.mrf.mxu3 }
 0x847   :  { %v939_v55 = vadd.f32 %v5166_v52, %v938_v53 }
 0x849   :  { %v943_v56 = vmul.f32 0.35355338, %v939_v55  ;;  %v947_v57 = vpack.c.bf16 %v939_v55, %v939_v55 }
 0x84b   :  { %v950_v58 = vunpack.c.l.b16 %v947_v57  ;;  %v945_v59 = vpack.c.bf16 %v943_v56, %v943_v56 }
 0x84d   :  { %v5790_v60 = vpack.c.b16 %v950_v58, %v950_v58  ;;  %v1064_v2 = vunpack.c.l.b16 %v945_v59 }
 0x84e   :  { %v940_v61 = vpop.f32.mrf.mxu3 }
 0x84f   :  { %v941_v62 = vadd.f32 %v5166_v52, %v940_v61  ;;  %1068 = vrot.lane.b32.xlu1 %v5790_v60, %s5556_s2  ;;  %952 = vrot.lane.b32.xlu2 %v5790_v60, %s5557_s4  ;;  %v1065_v6 = vpack.c.b16 %v1064_v2, %v1064_v2 }
 0x851   :  { %v944_v0 = vmul.f32 0.35355338, %v941_v62  ;;  %v948_v1 = vpack.c.bf16 %v941_v62, %v941_v62 }
 0x853   :  { %v946_v3 = vpack.c.bf16 %v944_v0, %v944_v0  ;;  %v974_v4 = vunpack.c.l.b16 %v948_v1 }
 0x855   :  { %v5796_v5 = vpack.c.b16 %v974_v4, %v974_v4  ;;  %v1090_v8 = vunpack.c.l.b16 %v946_v3 }
 0x857   :  { %976 = vrot.lane.b32.xlu0 %v5796_v5, %s5557_s4  ;;  %1066 = vrot.lane.b32.xlu2 %v1065_v6, %s5558_s5  ;;  %v1091_v9 = vpack.c.b16 %v1090_v8, %v1090_v8 }
 0x859   :  { %1092 = vrot.lane.b32.xlu1 %v1091_v9, %s5558_s5 }
 0x85f   :  { %1094 = vrot.lane.b32.xlu0 %v5796_v5, %s5556_s2  ;;  %1206 = vrot.lane.b32.xlu2 %v5796_v5, %s5559_s6 }
 0x861   :  { %1181 = vrot.lane.b32.xlu1 %v1065_v6, %s5560_s7 }
 0x867   :  { %1183 = vrot.lane.b32.xlu0 %v5790_v60, %s5559_s6  ;;  %1295 = vrot.lane.b32.xlu2 %v5790_v60, %s5561_s8 }
 0x869   :  { %1318 = vrot.lane.b32.xlu1 %v5796_v5, %s5561_s8 }
 0x86f   :  { %1204 = vrot.lane.b32.xlu0 %v1091_v9, %s5560_s7  ;;  %1316 = vrot.lane.b32.xlu2 %v1091_v9, %s5562_s9 }
 0x877   :  { %1293 = vrot.lane.b32.xlu0 %v1065_v6, %s5562_s9 }
 0x87f   :  { %1021 = vrot.lane.b32.xlu0 %v5790_v60, %s5548_s20 }
 0x8a9   :  { %v953_v10 = vpop.permute.xlu2 %952 }
 0x8aa   :  { %v958_v11 = vsel %vm180_vm8, %v953_v10, 0 }
 0x8ab   :  { %967 = vmatpush.bf16.xpose.msrb.mxu0 %v958_v11 }
 0x8b1   :  { %v1067_v14 = vpop.permute.xlu2 %1066 }
 0x8b2   :  { %4745 = vmatmul.msk.bf16.vlgmr.msrb.gmra.mxu0 %vm180_vm8, %v945_v59 }
 0x8b9   :  { %v1207_v18 = vpop.permute.xlu2 %1206 }
 0x8ba   :  { %v1212_v21 = vsel %vm180_vm8, %v1207_v18, 0 }
 0x8c1   :  { %v1069_v12 = vpop.permute.xlu1 %1068  ;;  %v1296_v23 = vpop.permute.xlu2 %1295 }
 0x8c2   :  { %v1074_v13 = vsel %vm180_vm8, %v1069_v12, 0  ;;  %v1301_v26 = vsel %vm180_vm8, %v1296_v23, 0 }
 0x8c3   :  { %1083 = vmatpush.bf16.xpose.msra.mxu0 %v1074_v13 }
 0x8c9   :  { %v977_v15 = vpop.permute.xlu0 %976  ;;  %v1317_v33 = vpop.permute.xlu2 %1316 }
 0x8ca   :  { %v982_v16 = vsel %vm180_vm8, %v977_v15, 0  ;;  %4749 = vmatmul.msk.bf16.vlgmr.msra.gmra.mxu0 %vm180_vm8, %v1067_v14 }
 0x8cb   :  { %991 = vmatpush.bf16.xpose.msrb.mxu1 %v982_v16  ;;  %v1093_v17 = vpop.permute.xlu1 %1092 }
 0x8d1   :  { %v1095_v19 = vpop.permute.xlu0 %1094 }
 0x8d2   :  { %v1100_v20 = vsel %vm180_vm8, %v1095_v19, 0  ;;  %4746 = vmatmul.msk.bf16.vlgmr.msrb.gmra.mxu1 %vm180_vm8, %v946_v3 }
 0x8d3   :  { %1109 = vmatpush.bf16.xpose.msra.mxu1 %v1100_v20  ;;  %v1182_v22 = vpop.permute.xlu1 %1181 }
 0x8d9   :  { %v1184_v24 = vpop.permute.xlu0 %1183 }
 0x8da   :  { %v1189_v25 = vsel %vm180_vm8, %v1184_v24, 0 }
 0x8db   :  { %1221 = vmatpush.bf16.xpose.msrb.mxu1 %v1212_v21  ;;  %1198 = vmatpush.bf16.xpose.msrb.mxu0 %v1189_v25  ;;  %v1319_v27 = vpop.permute.xlu1 %1318 }
 0x8dc   :  { %v1324_v29 = vsel %vm180_vm8, %v1319_v27, 0 }
 0x8e1   :  { %v1205_v28 = vpop.permute.xlu0 %1204 }
 0x8e2   :  { %4750 = vmatmul.msk.bf16.vlgmr.msra.gmra.mxu1 %vm180_vm8, %v1093_v17  ;;  %4753 = vmatmul.msk.bf16.vlgmr.msrb.gmra.mxu0 %vm180_vm8, %v1182_v22 }
 0x8e3   :  { %1310 = vmatpush.bf16.xpose.msra.mxu0 %v1301_v26  ;;  %1333 = vmatpush.bf16.xpose.msra.mxu1 %v1324_v29 }
 0x8e9   :  { %v1294_v30 = vpop.permute.xlu0 %1293 }
 0x8f1   :  { %v1022_v31 = vpop.permute.xlu0 %1021 }
 0x8f2   :  { %v1027_v32 = vsel %vm253_vm9, %v1022_v31, 0  ;;  %4754 = vmatmul.msk.bf16.vlgmr.msrb.gmra.mxu1 %vm180_vm8, %v1205_v28  ;;  %4757 = vmatmul.msk.bf16.vlgmr.msra.gmra.mxu0 %vm180_vm8, %v1294_v30 }
 0x8f3   :  { %1036 = vmatpush.bf16.msrb.mxu2 %v1027_v32 }
 0x902   :  { %4758 = vmatmul.msk.bf16.vlgmr.msra.gmra.mxu1 %vm180_vm8, %v1317_v33 }
 0x92f   :  { %v969_v34 = vpop.f32.mrf.mxu0 }
 0x930   :  { %v997_v35 = vsel %vm180_vm8, %v969_v34, -inf }
 0x931   :  { %998 = vmax.xlane.f32.xlu1 %v997_v35 }
 0x937   :  { %v971_v36 = vpop.f32.mrf.mxu0 }
 0x947   :  { %v1085_v37 = vpop.f32.mrf.mxu0 }
 0x948   :  { %v1115_v38 = vsel %vm180_vm8, %v1085_v37, -inf }
 0x949   :  { %1116 = vmax.xlane.f32.xlu2 %v1115_v38 }
 0x94f   :  { %v993_v39 = vpop.f32.mrf.mxu1  ;;  %v1087_v40 = vpop.f32.mrf.mxu0 }
 0x950   :  { %v1000_v41 = vsel %vm180_vm8, %v993_v39, -inf }
 0x951   :  { %1001 = vmax.xlane.f32.xlu0 %v1000_v41 }
 0x957   :  { %v995_v42 = vpop.f32.mrf.mxu1 }
 0x95f   :  { %v1111_v44 = vpop.f32.mrf.mxu1  ;;  %v1200_v47 = vpop.f32.mrf.mxu0 }
 0x960   :  { %v1118_v54 = vsel %vm180_vm8, %v1111_v44, -inf  ;;  %v1227_v63 = vsel %vm180_vm8, %v1200_v47, -inf }
 0x961   :  { %1119 = vmax.xlane.f32.xlu1 %v1118_v54  ;;  %1228 = vmax.xlane.f32.xlu0 %v1227_v63 }
 0x967   :  { %v1113_v48 = vpop.f32.mrf.mxu1  ;;  %v1202_v51 = vpop.f32.mrf.mxu0 }
 0x96f   :  { %v1223_v52 = vpop.f32.mrf.mxu1  ;;  %v5840_v53 = vpop.f32.mrf.mxu0 }
 0x970   :  { %v1230_v55 = vsel %vm180_vm8, %v1223_v52, -inf  ;;  %v1339_v56 = vsel %vm180_vm8, %v5840_v53, -inf }
 0x971   :  { %1231 = vmax.xlane.f32.xlu2 %v1230_v55  ;;  %1340 = vmax.xlane.f32.xlu1 %v1339_v56 }
 0x977   :  { %v1225_v57 = vpop.f32.mrf.mxu1  ;;  %v1314_v58 = vpop.f32.mrf.mxu0 }
 0x97f   :  { %v1335_v59 = vpop.f32.mrf.mxu1 }
 0x980   :  { %v1342_v61 = vsel %vm180_vm8, %v1335_v59, -inf }
 0x981   :  { %1343 = vmax.xlane.f32.xlu0 %v1342_v61 }
 0x987   :  { %v1337_v62 = vpop.f32.mrf.mxu1 }
 0x989   :  { %1042 = vrot.lane.b32.xlu2 %v5796_v5, %s5548_s20 }
 0x98a   :  { %1160 = vrot.lane.b32.xlu1 %v5796_v5, %s5563_s10 }
 0x992   :  { %1251 = vrot.lane.b32.xlu1 %v5790_v60, %s5564_s11 }
 0x995   :  { %1139 = vrot.lane.b32.xlu0 %v5790_v60, %s5563_s10 }
 0x9a4   :  { %v999_v0 = vpop.xlane.xlu1 %998 }
 0x9a5   :  { %v1003_v1 = vsub.f32 %v969_v34, %v999_v0 }
 0x9a7   :  { %v1005_v2 = vmul.f32 1.442695, %v1003_v1 }
 0x9a9   :  { %5245 = vpow2.f32 %v1005_v2 }
 0x9af   :  { %v5854_v3 = vpop.eup %5245 }
 0x9b0   :  { %v1009_v4 = vsel %vm180_vm8, %v5854_v3, 0.0 }
 0x9b2   :  { %1010 = vadd.xlane.f32.xlu2 %v1009_v4 }
 0x9bc   :  { %v1117_v6 = vpop.xlane.xlu2 %1116 }
 0x9bd   :  { %v1121_v10 = vsub.f32 %v1085_v37, %v1117_v6 }
 0x9bf   :  { %v1123_v12 = vmul.f32 1.442695, %v1121_v10 }
 0x9c4   :  { %v1002_v8 = vpop.xlane.xlu0 %1001 }
 0x9c5   :  { %v1004_v9 = vsub.f32 %v993_v39, %v1002_v8 }
 0x9c7   :  { %v1007_v11 = vmul.f32 1.442695, %v1004_v9 }
 0x9c9   :  { %5247 = vpow2.f32 %v1007_v11 }
 0x9ca   :  { %5249 = vpow2.f32 %v1123_v12 }
 0x9cf   :  { %v5858_v13 = vpop.eup %5247 }
 0x9d0   :  { %v1012_v14 = vsel %vm180_vm8, %v5858_v13, 0.0  ;;  %v5862_v17 = vpop.eup %5249 }
 0x9d1   :  { %1013 = vadd.xlane.f32.xlu1 %v1012_v14  ;;  %v1127_v22 = vsel %vm180_vm8, %v5862_v17, 0.0 }
 0x9d4   :  { %v1120_v15 = vpop.xlane.xlu1 %1119  ;;  %v1229_v16 = vpop.xlane.xlu0 %1228 }
 0x9d5   :  { %v1122_v18 = vsub.f32 %v1111_v44, %v1120_v15  ;;  %v1233_v19 = vsub.f32 %v1200_v47, %v1229_v16 }
 0x9d7   :  { %v1125_v20 = vmul.f32 1.442695, %v1122_v18  ;;  %v1235_v21 = vmul.f32 1.442695, %v1233_v19 }
 0x9d9   :  { %5251 = vpow2.f32 %v1125_v20  ;;  %1128 = vadd.xlane.f32.xlu1 %v1127_v22 }
 0x9da   :  { %5253 = vpow2.f32 %v1235_v21 }
 0x9df   :  { %v5866_v23 = vpop.eup %5251 }
 0x9e0   :  { %v5868_v24 = vpop.eup %5253  ;;  %v1130_v25 = vsel %vm180_vm8, %v5866_v23, 0.0 }
 0x9e1   :  { %v1239_v26 = vsel %vm180_vm8, %v5868_v24, 0.0  ;;  %1131 = vadd.xlane.f32.xlu1 %v1130_v25 }
 0x9e2   :  { %1240 = vadd.xlane.f32.xlu2 %v1239_v26 }
 0x9e4   :  { %v1232_v27 = vpop.xlane.xlu2 %1231  ;;  %v1341_v34 = vpop.xlane.xlu1 %1340 }
 0x9e5   :  { %v1234_v28 = vsub.f32 %v1223_v52, %v1232_v27  ;;  %v1345_v47 = vsub.f32 %v5840_v53, %v1341_v34 }
 0x9e7   :  { %v1237_v29 = vmul.f32 1.442695, %v1234_v28  ;;  %v1347_v54 = vmul.f32 1.442695, %v1345_v47 }
 0x9e9   :  { %5255 = vpow2.f32 %v1237_v29 }
 0x9ec   :  { %v1043_v30 = vpop.permute.xlu2 %1042 }
 0x9ed   :  { %v1048_v31 = vsel %vm253_vm9, %v1043_v30, 0 }
 0x9ee   :  { %1057 = vmatpush.bf16.msra.mxu3 %v1048_v31 }
 0x9ef   :  { %v5256_v32 = vpop.eup %5255 }
 0x9f0   :  { %v1242_v33 = vsel %vm180_vm8, %v5256_v32, 0.0 }
 0x9f1   :  { %1243 = vadd.xlane.f32.xlu0 %v1242_v33 }
 0x9f4   :  { %v1344_v35 = vpop.xlane.xlu0 %1343 }
 0x9f5   :  { %v1346_v36 = vsub.f32 %v1335_v59, %v1344_v35 }
 0x9f7   :  { %v1349_v37 = vmul.f32 1.442695, %v1346_v36 }
 0x9f9   :  { %5257 = vpow2.f32 %v1349_v37 }
 0x9fa   :  { %1272 = vrot.lane.b32.xlu1 %v5796_v5, %s5564_s11  ;;  %5259 = vpow2.f32 %v1347_v54 }
 0x9fc   :  { %v1161_v38 = vpop.permute.xlu1 %1160 }
 0x9fd   :  { %v1166_v39 = vsel %vm253_vm9, %v1161_v38, 0 }
 0x9fe   :  { %1175 = vmatpush.bf16.msrb.mxu3 %v1166_v39 }
 0x9ff   :  { %v5258_v40 = vpop.eup %5257 }
 0xa00   :  { %v1354_v41 = vsel %vm180_vm8, %v5258_v40, 0.0  ;;  %v5260_v63 = vpop.eup %5259 }
 0xa01   :  { %1355 = vadd.xlane.f32.xlu2 %v1354_v41  ;;  %v1351_v48 = vsel %vm180_vm8, %v5260_v63, 0.0 }
 0xa04   :  { %v1252_v55 = vpop.permute.xlu1 %1251 }
 0xa05   :  { %1363 = vrot.lane.b32.xlu0 %v5790_v60, %s5565_s12  ;;  %v1257_v57 = vsel %vm253_vm9, %v1252_v55, 0  ;;  %v5016_v55 = vld [vmem:[#allocation5 + $0xa8] sm:$0xff] }
 0xa07   :  { %v1140_v42 = vpop.permute.xlu0 %1139 }
 0xa08   :  { %v1145_v44 = vsel %vm253_vm9, %v1140_v42, 0 }
 0xa09   :  { %1154 = vmatpush.bf16.msra.mxu2 %v1145_v44 }
 0xa19   :  { %1384 = vrot.lane.b32.xlu2 %v5796_v5, %s5565_s12 }
 0xa24   :  { %1352 = vadd.xlane.f32.xlu1 %v1351_v48 }
 0xa25   :  { %v1011_v51 = vpop.xlane.xlu2 %1010 }
 0xa26   :  { %5261 = vrcp.f32 %v1011_v51 }
 0xa2c   :  { %v5262_v52 = vpop.eup %5261 }
 0xa2d   :  { %v1017_v60 = vmul.f32 %v5262_v52, %v5854_v3  ;;  %v5008_v52 = vld [vmem:[#allocation5 + $0x68] sm:$0xff] }
 0xa2e   :  { %1463 = vmatpush.bf16.msrb.mxu0 %v5008_v52  ;;  %v5009_v52 = vld [vmem:[#allocation5 + $0x70] sm:$0xff] }
 0xa2f   :  { %v1019_v56 = vpack.c.bf16 %v1017_v60, %v1017_v60  ;;  %v5007_v60 = vld [vmem:[#allocation5 + $0x60] sm:$0xff] }
 0xa31   :  { %4747 = vmatmul.msk.bf16.vlgmr.msrb.gmra.mxu2 %vm180_vm8, %v1019_v56  ;;  %v5015_v56 = vld [vmem:[#allocation5 + $0xa0] sm:$0xff] }
 0xa32   :  { %1266 = vmatpush.bf16.msrb.mxu2 %v1257_v57  ;;  %1464 = vmatpush.bf16.msrb.mxu0 %v5007_v60 }
 0xa44   :  { %v1014_v53 = vpop.xlane.xlu1 %1013 }
 0xa45   :  { %5263 = vrcp.f32 %v1014_v53 }
 0xa4b   :  { %v5264_v5 = vpop.eup %5263 }
 0xa4c   :  { %v1018_v58 = vmul.f32 %v5264_v5, %v5858_v13  ;;  %v1129_v59 = vpop.xlane.xlu1 %1128 }
 0xa4d   :  { %5265 = vrcp.f32 %v1129_v59 }
 0xa4e   :  { %v1020_v61 = vpack.c.bf16 %v1018_v58, %v1018_v58 }
 0xa50   :  { %4748 = vmatmul.msk.bf16.vlgmr.msra.gmra.mxu3 %vm180_vm8, %v1020_v61 }
 0xa53   :  { %v5266_v62 = vpop.eup %5265 }
 0xa54   :  { %v1135_v0 = vmul.f32 %v5266_v62, %v5862_v17  ;;  %v1132_v1 = vpop.xlane.xlu1 %1131 }
 0xa55   :  { %5267 = vrcp.f32 %v1132_v1  ;;  %v1241_v3 = vpop.xlane.xlu2 %1240 }
 0xa56   :  { %v1137_v2 = vpack.c.bf16 %v1135_v0, %v1135_v0  ;;  %5269 = vrcp.f32 %v1241_v3 }
 0xa58   :  { %4751 = vmatmul.msk.bf16.vlgmr.msra.gmra.mxu2 %vm180_vm8, %v1137_v2 }
 0xa5b   :  { %v5268_v4 = vpop.eup %5267 }
 0xa5c   :  { %v1136_v6 = vmul.f32 %v5268_v4, %v5866_v23  ;;  %v5270_v9 = vpop.eup %5269 }
 0xa5d   :  { %v1247_v10 = vmul.f32 %v5270_v9, %v5868_v24 }
 0xa5e   :  { %v1138_v8 = vpack.c.bf16 %v1136_v6, %v1136_v6 }
 0xa5f   :  { %v1249_v12 = vpack.c.bf16 %v1247_v10, %v1247_v10  ;;  %v5167_v10 = vld [vmem:[#allocation7 + $0x48] ss:$0 sm:$0xff] }
 0xa60   :  { %4752 = vmatmul.msk.bf16.vlgmr.msrb.gmra.mxu3 %vm180_vm8, %v1138_v8 }
 0xa64   :  { %v1244_v11 = vpop.xlane.xlu0 %1243 }
 0xa65   :  { %5271 = vrcp.f32 %v1244_v11 }
 0xa68   :  { %4755 = vmatmul.msk.bf16.vlgmr.msrb.gmra.mxu2 %vm180_vm8, %v1249_v12 }
 0xa6b   :  { %v5272_v13 = vpop.eup %5271 }
 0xa6c   :  { %v1248_v14 = vmul.f32 %v5272_v13, %v5256_v32  ;;  %v1273_v15 = vpop.permute.xlu1 %1272 }
 0xa6d   :  { %v1278_v16 = vsel %vm253_vm9, %v1273_v15, 0 }
 0xa6e   :  { %v1250_v17 = vpack.c.bf16 %v1248_v14, %v1248_v14  ;;  %1287 = vmatpush.bf16.msra.mxu3 %v1278_v16 }
 0xa71   :  { %4756 = vmatmul.msk.bf16.vlgmr.msra.gmra.mxu3 %vm180_vm8, %v1250_v17 }
 0xa74   :  { %v1356_v18 = vpop.xlane.xlu2 %1355 }
 0xa75   :  { %5273 = vrcp.f32 %v1356_v18 }
 0xa77   :  { %v1364_v19 = vpop.permute.xlu0 %1363 }
 0xa78   :  { %v1369_v20 = vsel %vm253_vm9, %v1364_v19, 0 }
 0xa79   :  { %1378 = vmatpush.bf16.msra.mxu2 %v1369_v20  ;;  %v5168_v20 = vld [vmem:[#allocation7 + $0x80] ss:$0 sm:$0xff] }
 0xa7b   :  { %v5274_v21 = vpop.eup %5273 }
 0xa7c   :  { %v1360_v22 = vmul.f32 %v5274_v21, %v5258_v40  ;;  %v1385_v23 = vpop.permute.xlu2 %1384 }
 0xa7d   :  { %v1390_v24 = vsel %vm253_vm9, %v1385_v23, 0 }
 0xa7e   :  { %v1362_v25 = vpack.c.bf16 %v1360_v22, %v1360_v22  ;;  %1399 = vmatpush.bf16.msrb.mxu3 %v1390_v24 }
 0xa81   :  { %4760 = vmatmul.msk.bf16.vlgmr.msrb.gmra.mxu3 %vm180_vm8, %v1362_v25 }
 0xa82   :  { %1745 = vmatpush.bf16.msra.mxu3 %v5016_v55 }
 0xa86   :  { %1746 = vmatpush.bf16.msra.mxu3 %v5015_v56 }
 0xa91   :  { %4804 = vmatmul.msk.bf16.vlgmr.msra.gmra.mxu3 %vm151_vm7, %v5625_v46 }
 0xa97   :  { %v1353_v26 = vpop.xlane.xlu1 %1352 }
 0xa98   :  { %5275 = vrcp.f32 %v1353_v26 }
 0xa9e   :  { %v5276_v27 = vpop.eup %5275 }
 0xa9f   :  { %v1359_v28 = vmul.f32 %v5276_v27, %v5260_v63 }
 0xaa1   :  { %v1361_v29 = vpack.c.bf16 %v1359_v28, %v1359_v28 }
 0xaa3   :  { %4759 = vmatmul.msk.bf16.vlgmr.msra.gmra.mxu2 %vm180_vm8, %v1361_v29 }
 0xab4   :  { %v1038_v30 = vpop.f32.mrf.mxu2 }
 0xabc   :  { %v1040_v31 = vpop.f32.mrf.mxu2 }
 0xad3   :  { %v1059_v32 = vpop.f32.mrf.mxu3 }
 0xadb   :  { %v1061_v33 = vpop.f32.mrf.mxu3  ;;  %v1156_v34 = vpop.f32.mrf.mxu2 }
 0xae3   :  { %v1158_v35 = vpop.f32.mrf.mxu2  ;;  %v1177_v36 = vpop.f32.mrf.mxu3 }
 0xae4   :  { %v5083_v37 = vpack.i.bf16 %v1177_v36, %v1156_v34 }
 0xae6   :  { %5084 = vrot.lane.b32.xlu0 %v5083_v37, %s5555_s30 }
 0xaeb   :  { %v1179_v38 = vpop.f32.mrf.mxu3  ;;  %v1268_v39 = vpop.f32.mrf.mxu2 }
 0xaf3   :  { %v1270_v40 = vpop.f32.mrf.mxu2 }
 0xaf4   :  { %v1289_v41 = vpop.f32.mrf.mxu3 }
 0xaf5   :  { %v5088_v42 = vpack.i.bf16 %v1289_v41, %v1268_v39 }
 0xaf7   :  { %5089 = vrot.lane.b32.xlu2 %v5088_v42, %s5566_s13 }
 0xafc   :  { %v1291_v44 = vpop.f32.mrf.mxu3 }
 0xb04   :  { %v1401_v47 = vpop.f32.mrf.mxu3 }
 0xb0c   :  { %v1403_v54 = vpop.f32.mrf.mxu3 }
 0xb14   :  { %v1748_v19 = vpop.f32.mrf.mxu3 }
 0xb15   :  { %v1749_v22 = vadd.f32 %v5168_v20, %v1748_v19 }
 0xb17   :  { %v1757_v25 = vpack.c.bf16 %v1749_v22, %v1749_v22  ;;  %v1753_v34 = vmul.f32 0.35355338, %v1749_v22 }
 0xb19   :  { %v5939_v36 = vpack.c.bf16 %v1753_v34, %v1753_v34 }
 0xb1b   :  { %v1874_v41 = vunpack.c.l.b16 %v5939_v36 }
 0xb1c   :  { %v1750_v21 = vpop.f32.mrf.mxu3 }
 0xb1d   :  { %v1751_v23 = vadd.f32 %v5168_v20, %v1750_v21  ;;  %v1875_v44 = vpack.c.b16 %v1874_v41, %v1874_v41  ;;  %v5013_v41 = vld [vmem:[#allocation5 + $0x90] sm:$0xff] }
 0xb1f   :  { %v1758_v24 = vpack.c.bf16 %v1751_v23, %v1751_v23  ;;  %v1754_v28 = vmul.f32 0.35355338, %v1751_v23 }
 0xb21   :  { %v1784_v26 = vunpack.c.l.b16 %v1758_v24  ;;  %v5928_v29 = vpack.c.bf16 %v1754_v28, %v1754_v28 }
 0xb23   :  { %v5920_v27 = vpack.c.b16 %v1784_v26, %v1784_v26 }
 0xb26   :  { %v1380_v63 = vpop.f32.mrf.mxu2 }
 0xb27   :  { %v5093_v48 = vpack.i.bf16 %v1401_v47, %v1380_v63  ;;  %v5010_v63 = vld [vmem:[#allocation5 + $0x78] sm:$0xff] }
 0xb28   :  { %1553 = vmatpush.bf16.msrb.mxu1 %v5010_v63  ;;  %v5171_v63 = vld [vmem:[#allocation7 + $0x50] ss:$0 sm:$0xff] }
 0xb29   :  { %5094 = vrot.lane.b32.xlu0 %v5093_v48, %s5567_s14 }
 0xb2c   :  { %1554 = vmatpush.bf16.msrb.mxu1 %v5009_v52 }
 0xb2e   :  { %v1382_v51 = vpop.f32.mrf.mxu2 }
 0xb51   :  { %v5090_v58 = vpop.permute.xlu2 %5089 }
 0xb52   :  { %v5092_v62 = vunpack.i.h.bf16 %v5090_v58  ;;  %v5091_v0 = vunpack.i.l.bf16 %v5090_v58 }
 0xb58   :  { %v5085_v57 = vpop.permute.xlu0 %5084 }
 0xb59   :  { %v5087_v53 = vunpack.i.h.bf16 %v5085_v57  ;;  %v5086_v5 = vunpack.i.l.bf16 %v5085_v57 }
 0xb5b   :  { %v1430_v59 = vsel %vm180_vm8, %v1059_v32, %v5087_v53  ;;  %v1429_v61 = vsel %vm180_vm8, %v1038_v30, %v5086_v5  ;;  %v1900_v30 = vunpack.c.l.b16 %v5928_v29 }
 0xb5c   :  { %v1431_v4 = vsel %vm659_vm10, %v1429_v61, %v5091_v0  ;;  %v1432_v6 = vsel %vm659_vm10, %v1430_v59, %v5092_v62 }
 0xb5d   :  { %v1901_v32 = vpack.c.b16 %v1900_v30, %v1900_v30 }
 0xb9b   :  { %v5095_v1 = vpop.permute.xlu0 %5094 }
 0xb9c   :  { %v5097_v2 = vunpack.i.h.bf16 %v5095_v1  ;;  %v5096_v3 = vunpack.i.l.bf16 %v5095_v1 }
 0xb9e   :  { %v1434_v8 = vsel %vm662_vm11, %v1432_v6, %v5097_v2  ;;  %v1433_v46 = vsel %vm662_vm11, %v1431_v4, %v5096_v3 }
 0xb9f   :  { %v1435_v9 = vpack.c.bf16 %v1434_v8, %v1433_v46 }
 0xba1   :  { %4769 = vmatmul.msk.bf16.vlgmr.msrb.gmra.mxu0 %vm151_vm7, %v1435_v9  ;;  %v5169_v9 = vld [vmem:[#allocation7 + $0x60] ss:$0 sm:$0xff] }
 0xc1e   :  { %v1466_v11 = vpop.f32.mrf.mxu0 }
 0xc1f   :  { %v1467_v12 = vadd.f32 %v5167_v10, %v1466_v11 }
 0xc21   :  { %v1471_v13 = vadd.f32 %v1467_v12, %v5783_v49  ;;  %v1760_v49 = vunpack.c.l.b16 %v1757_v25 }
 0xc23   :  { %v1475_v14 = vsel %vm151_vm7, %v1471_v13, 0.0 }
 0xc24   :  { %1476 = vadd.xlane.f32.xlu2 %v1475_v14 }
 0xc26   :  { %v1468_v15 = vpop.f32.mrf.mxu0 }
 0xc27   :  { %v1469_v16 = vadd.f32 %v5167_v10, %v1468_v15 }
 0xc29   :  { %v1472_v17 = vadd.f32 %v1469_v16, %v5785_v50  ;;  %v5926_v50 = vpack.c.b16 %v1760_v49, %v1760_v49  ;;  %v5170_v16 = vld [vmem:[#allocation7 + $0x68] ss:$0 sm:$0xff] }
 0xc2b   :  { %v1478_v18 = vsel %vm151_vm7, %v1472_v17, 0.0 }
 0xc2c   :  { %1479 = vadd.xlane.f32.xlu0 %v1478_v18 }
 0xc3c   :  { %1786 = vrot.lane.b32.xlu2 %v5920_v27, %s5557_s4 }
 0xc40   :  { %1904 = vrot.lane.b32.xlu0 %v5920_v27, %s5556_s2 }
 0xc44   :  { %2016 = vrot.lane.b32.xlu2 %v5920_v27, %s5559_s6 }
 0xc48   :  { %1993 = vrot.lane.b32.xlu0 %v5926_v50, %s5559_s6 }
 0xc4c   :  { %2105 = vrot.lane.b32.xlu2 %v5926_v50, %s5561_s8 }
 0xc50   :  { %2014 = vrot.lane.b32.xlu0 %v1901_v32, %s5560_s7 }
 0xc54   :  { %2126 = vrot.lane.b32.xlu2 %v1901_v32, %s5562_s9 }
 0xc58   :  { %2103 = vrot.lane.b32.xlu0 %v1875_v44, %s5562_s9 }
 0xc97   :  { %v1477_v31 = vpop.xlane.xlu2 %1476 }
 0xc98   :  { %v1481_v33 = vmul.f32 %v1477_v31, %v5765_v7 }
 0xc9a   :  { %v1483_v35 = vsub.f32 %v1471_v13, %v1481_v33 }
 0xc9c   :  { %v1485_v37 = vmul.f32 %v1483_v35, %v1483_v35 }
 0xc9e   :  { %v1487_v38 = vsel %vm151_vm7, %v1485_v37, 0.0 }
 0xc9f   :  { %v1480_v39 = vpop.xlane.xlu0 %1479  ;;  %1488 = vadd.xlane.f32.xlu1 %v1487_v38  ;;  %v1787_v48 = vpop.permute.xlu2 %1786 }
 0xca0   :  { %v1482_v40 = vmul.f32 %v1480_v39, %v5765_v7  ;;  %v1792_v51 = vsel %vm180_vm8, %v1787_v48, 0 }
 0xca1   :  { %1801 = vmatpush.bf16.xpose.msra.mxu1 %v1792_v51 }
 0xca2   :  { %v1484_v42 = vsub.f32 %v1472_v17, %v1482_v40  ;;  %v5014_v40 = vld [vmem:[#allocation5 + $0x98] sm:$0xff] }
 0xca3   :  { %1605 = vmatpush.bf16.msrb.mxu2 %v5014_v40 }
 0xca4   :  { %v1486_v47 = vmul.f32 %v1484_v42, %v1484_v42 }
 0xca6   :  { %v1490_v54 = vsel %vm151_vm7, %v1486_v47, 0.0 }
 0xca7   :  { %1491 = vadd.xlane.f32.xlu1 %v1490_v54  ;;  %v2017_v28 = vpop.permute.xlu2 %2016  ;;  %1606 = vmatpush.bf16.msrb.mxu2 %v5013_v41 }
 0xca8   :  { %v2022_v31 = vsel %vm180_vm8, %v2017_v28, 0 }
 0xcb2   :  { %v1905_v15 = vpop.permute.xlu0 %1904 }
 0xcb3   :  { %v1910_v23 = vsel %vm180_vm8, %v1905_v15, 0 }
 0xcba   :  { %v1994_v25 = vpop.permute.xlu0 %1993 }
 0xcbb   :  { %v1999_v49 = vsel %vm180_vm8, %v1994_v25, 0 }
 0xcc0   :  { %1762 = vrot.lane.b32.xlu1 %v5926_v50, %s5557_s4 }
 0xcc2   :  { %v2015_v38 = vpop.permute.xlu0 %2014 }
 0xcc8   :  { %1878 = vrot.lane.b32.xlu1 %v5926_v50, %s5556_s2 }
 0xcd0   :  { %1876 = vrot.lane.b32.xlu1 %v1875_v44, %s5558_s5 }
 0xcd8   :  { %1902 = vrot.lane.b32.xlu1 %v1901_v32, %s5558_s5  ;;  %v2106_v32 = vpop.permute.xlu2 %2105 }
 0xcd9   :  { %v2111_v34 = vsel %vm180_vm8, %v2106_v32, 0 }
 0xce0   :  { %1991 = vrot.lane.b32.xlu1 %v1875_v44, %s5560_s7  ;;  %v2127_v39 = vpop.permute.xlu2 %2126  ;;  %v5011_v44 = vld [vmem:[#allocation5 + $0x80] sm:$0xff] }
 0xce8   :  { %2128 = vrot.lane.b32.xlu1 %v5920_v27, %s5561_s8 }
 0xd12   :  { %v1489_v60 = vpop.xlane.xlu1 %1488 }
 0xd13   :  { %v1493_v55 = vmul.f32 %v1489_v60, %v5765_v7 }
 0xd15   :  { %v1495_v56 = vadd.f32 1e-05, %v1493_v55 }
 0xd17   :  { %5277 = vrsqrt.f32 %v1495_v56  ;;  %vm1503_vm0 = vweird.f32 %v1495_v56 }
 0xd1a   :  { %v1492_v57 = vpop.xlane.xlu1 %1491 }
 0xd1b   :  { %v1494_v53 = vmul.f32 %v1492_v57, %v5765_v7 }
 0xd1d   :  { %v5278_v5 = vpop.eup %5277  ;;  %v1496_v58 = vadd.f32 1e-05, %v1494_v53 }
 0xd1e   :  { %v1498_v59 = vmul.f32 %v5278_v5, %v1495_v56  ;;  %vm1504_vm15 = vweird.f32 %v5278_v5 }
 0xd1f   :  { %5279 = vrsqrt.f32 %v1496_v58  ;;  %vm1505_vm1 = vmor %vm1503_vm0, %vm1504_vm15  ;;  %vm1513_vm4 = vweird.f32 %v1496_v58 }
 0xd20   :  { %v1499_v61 = vmul.f32 %v5278_v5, %v1498_v59 }
 0xd22   :  { %v1500_v62 = vmul.f32 0.5, %v1499_v61 }
 0xd24   :  { %v1501_v0 = vsub.f32 1.5, %v1500_v62 }
 0xd25   :  { %v5280_v1 = vpop.eup %5279 }
 0xd26   :  { %v1502_v2 = vmul.f32 %v5278_v5, %v1501_v0  ;;  %v1508_v3 = vmul.f32 %v5280_v1, %v1496_v58  ;;  %vm1514_vm2 = vweird.f32 %v5280_v1 }
 0xd27   :  { %vm1515_vm5 = vmor %vm1513_vm4, %vm1514_vm2 }
 0xd28   :  { %v1509_v4 = vmul.f32 %v5280_v1, %v1508_v3  ;;  %v1506_v6 = vsel %vm1505_vm1, %v5278_v5, %v1502_v2 }
 0xd29   :  { %v1517_v10 = vmul.f32 %v1506_v6, %v1483_v35 }
 0xd2a   :  { %v1510_v8 = vmul.f32 0.5, %v1509_v4 }
 0xd2b   :  { %v1520_v13 = vmul.f32 %v5169_v9, %v1517_v10 }
 0xd2c   :  { %v1511_v46 = vsub.f32 1.5, %v1510_v8 }
 0xd2d   :  { %v5960_v20 = vadd.f32 %v5170_v16, %v1520_v13 }
 0xd2e   :  { %v1512_v11 = vmul.f32 %v5280_v1, %v1511_v46 }
 0xd30   :  { %v1516_v12 = vsel %vm1515_vm5, %v5280_v1, %v1512_v11 }
 0xd31   :  { %v1518_v14 = vmul.f32 %v1516_v12, %v1484_v42  ;;  %v5012_v42 = vld [vmem:[#allocation5 + $0x88] sm:$0xff] }
 0xd32   :  { %v1763_v17 = vpop.permute.xlu1 %1762  ;;  %1607 = vmatpush.bf16.msrb.mxu2 %v5012_v42 }
 0xd33   :  { %v1521_v18 = vmul.f32 %v5169_v9, %v1518_v14  ;;  %v1768_v19 = vsel %vm180_vm8, %v1763_v17, 0 }
 0xd34   :  { %1777 = vmatpush.bf16.xpose.msra.mxu0 %v1768_v19 }
 0xd35   :  { %v5962_v21 = vadd.f32 %v5170_v16, %v1521_v18 }
 0xd36   :  { %1608 = vmatpush.bf16.msrb.mxu2 %v5011_v44 }
 0xd37   :  { %v1525_v22 = vpack.c.bf16 %v5962_v21, %v5960_v20 }
 0xd39   :  { %4778 = vmatmul.msk.bf16.vlgmr.msrb.gmra.mxu1 %vm151_vm7, %v1525_v22 }
 0xd3a   :  { %1919 = vmatpush.bf16.xpose.msrb.mxu1 %v1910_v23  ;;  %v1879_v24 = vpop.permute.xlu1 %1878 }
 0xd3b   :  { %v1884_v26 = vsel %vm180_vm8, %v1879_v24, 0  ;;  %4805 = vmatmul.msk.bf16.vlgmr.msra.gmra.mxu0 %vm180_vm8, %v5939_v36 }
 0xd3c   :  { %1893 = vmatpush.bf16.xpose.msrb.mxu0 %v1884_v26 }
 0xd42   :  { %v1877_v30 = vpop.permute.xlu1 %1876 }
 0xd44   :  { %2008 = vmatpush.bf16.xpose.msra.mxu0 %v1999_v49 }
 0xd49   :  { %4806 = vmatmul.msk.bf16.vlgmr.msra.gmra.mxu1 %vm180_vm8, %v5928_v29  ;;  %v2104_v29 = vpop.permute.xlu0 %2103 }
 0xd4a   :  { %2031 = vmatpush.bf16.xpose.msra.mxu1 %v2022_v31  ;;  %v1903_v33 = vpop.permute.xlu1 %1902 }
 0xd4b   :  { %4809 = vmatmul.msk.bf16.vlgmr.msrb.gmra.mxu0 %vm180_vm8, %v1877_v30 }
 0xd4c   :  { %2120 = vmatpush.bf16.xpose.msrb.mxu0 %v2111_v34 }
 0xd52   :  { %v1992_v35 = vpop.permute.xlu1 %1991 }
 0xd59   :  { %4810 = vmatmul.msk.bf16.vlgmr.msrb.gmra.mxu1 %vm180_vm8, %v1903_v33 }
 0xd5a   :  { %v2129_v36 = vpop.permute.xlu1 %2128 }
 0xd5b   :  { %v2134_v37 = vsel %vm180_vm8, %v2129_v36, 0  ;;  %4813 = vmatmul.msk.bf16.vlgmr.msra.gmra.mxu0 %vm180_vm8, %v1992_v35 }
 0xd5c   :  { %2143 = vmatpush.bf16.xpose.msrb.mxu1 %v2134_v37 }
 0xd69   :  { %4814 = vmatmul.msk.bf16.vlgmr.msra.gmra.mxu1 %vm180_vm8, %v2015_v38 }
 0xd6b   :  { %4817 = vmatmul.msk.bf16.vlgmr.msrb.gmra.mxu0 %vm180_vm8, %v2104_v29 }
 0xd79   :  { %4818 = vmatmul.msk.bf16.vlgmr.msrb.gmra.mxu1 %vm180_vm8, %v2127_v39 }
 0xdb6   :  { %v1556_v47 = vpop.f32.mrf.mxu1 }
 0xdb7   :  { %v1557_v51 = vadd.f32 %v5171_v63, %v1556_v47 }
 0xdb8   :  { %v1779_v54 = vpop.f32.mrf.mxu0 }
 0xdb9   :  { %v1807_v48 = vsel %vm180_vm8, %v1779_v54, -inf  ;;  %v1561_v56 = vmax.f32 %v1557_v51, 0.0 }
 0xdba   :  { %1808 = vmax.xlane.f32.xlu1 %v1807_v48 }
 0xdbe   :  { %v1558_v52 = vpop.f32.mrf.mxu1 }
 0xdbf   :  { %v1559_v60 = vadd.f32 %v5171_v63, %v1558_v52 }
 0xdc0   :  { %v1781_v55 = vpop.f32.mrf.mxu0 }
 0xdc1   :  { %v1562_v57 = vmax.f32 %v1559_v60, 0.0 }
 0xdc3   :  { %v1563_v53 = vpack.c.bf16 %v1562_v57, %v1561_v56 }
 0xdc5   :  { %4795 = vmatmul.msk.bf16.vlgmr.msrb.gmra.mxu2 %vm835_vm3, %v1563_v53 }
 0xdc6   :  { %v1803_v5 = vpop.f32.mrf.mxu1 }
 0xdc7   :  { %v1810_v14 = vsel %vm180_vm8, %v1803_v5, -inf }
 0xdc8   :  { %v1895_v58 = vpop.f32.mrf.mxu0 }
 0xdc9   :  { %v1925_v59 = vsel %vm180_vm8, %v1895_v58, -inf }
 0xdca   :  { %1926 = vmax.xlane.f32.xlu2 %v1925_v59 }
 0xdce   :  { %v1805_v61 = vpop.f32.mrf.mxu1 }
 0xdd0   :  { %v1897_v62 = vpop.f32.mrf.mxu0 }
 0xdd6   :  { %v1921_v0 = vpop.f32.mrf.mxu1 }
 0xdd7   :  { %v1928_v11 = vsel %vm180_vm8, %v1921_v0, -inf }
 0xdd8   :  { %v2010_v1 = vpop.f32.mrf.mxu0 }
 0xdd9   :  { %v2037_v2 = vsel %vm180_vm8, %v2010_v1, -inf }
 0xdda   :  { %2038 = vmax.xlane.f32.xlu0 %v2037_v2 }
 0xdde   :  { %v1923_v3 = vpop.f32.mrf.mxu1 }
 0xde0   :  { %v2012_v4 = vpop.f32.mrf.mxu0 }
 0xde6   :  { %v5987_v6 = vpop.f32.mrf.mxu1 }
 0xde7   :  { %v2040_v26 = vsel %vm180_vm8, %v5987_v6, -inf }
 0xde8   :  { %v5989_v8 = vpop.f32.mrf.mxu0 }
 0xde9   :  { %v2149_v46 = vsel %vm180_vm8, %v5989_v8, -inf }
 0xdea   :  { %2150 = vmax.xlane.f32.xlu1 %v2149_v46 }
 0xdee   :  { %1831 = vrot.lane.b32.xlu0 %v5926_v50, %s5548_s20  ;;  %v2035_v9 = vpop.f32.mrf.mxu1 }
 0xdf0   :  { %v2124_v10 = vpop.f32.mrf.mxu0 }
 0xdf2   :  { %1929 = vmax.xlane.f32.xlu1 %v1928_v11 }
 0xdf6   :  { %v2145_v12 = vpop.f32.mrf.mxu1 }
 0xdf7   :  { %v2152_v15 = vsel %vm180_vm8, %v2145_v12, -inf }
 0xdfe   :  { %v2147_v13 = vpop.f32.mrf.mxu1 }
 0xe18   :  { %1811 = vmax.xlane.f32.xlu0 %v1810_v14 }
 0xe20   :  { %2153 = vmax.xlane.f32.xlu0 %v2152_v15  ;;  %v6045_v15 = vld [vmem:[#allocation7 + $0x58] ss:$0 sm:$0xff] }
 0xe2d   :  { %v1809_v16 = vpop.xlane.xlu1 %1808 }
 0xe2e   :  { %v1813_v17 = vsub.f32 %v1779_v54, %v1809_v16 }
 0xe30   :  { %v1815_v18 = vmul.f32 1.442695, %v1813_v17 }
 0xe32   :  { %5281 = vpow2.f32 %v1815_v18 }
 0xe34   :  { %1970 = vrot.lane.b32.xlu0 %v5920_v27, %s5563_s10 }
 0xe38   :  { %v5282_v19 = vpop.eup %5281 }
 0xe39   :  { %v1819_v22 = vsel %vm180_vm8, %v5282_v19, 0.0 }
 0xe3a   :  { %1820 = vadd.xlane.f32.xlu2 %v1819_v22 }
 0xe3d   :  { %v1927_v23 = vpop.xlane.xlu2 %1926 }
 0xe3e   :  { %v1931_v24 = vsub.f32 %v1895_v58, %v1927_v23 }
 0xe40   :  { %v1933_v25 = vmul.f32 1.442695, %v1931_v24 }
 0xe42   :  { %5283 = vpow2.f32 %v1933_v25  ;;  %2041 = vmax.xlane.f32.xlu2 %v2040_v26 }
 0xe48   :  { %v6003_v49 = vpop.eup %5283  ;;  %v1610_v17 = vpop.f32.mrf.mxu2 }
 0xe49   :  { %v1937_v28 = vsel %vm180_vm8, %v6003_v49, 0.0  ;;  %v1611_v18 = vadd.f32 %v6045_v15, %v1610_v17 }
 0xe4a   :  { %1938 = vadd.xlane.f32.xlu1 %v1937_v28 }
 0xe4d   :  { %v2039_v30 = vpop.xlane.xlu0 %2038 }
 0xe4e   :  { %v2043_v33 = vsub.f32 %v2010_v1, %v2039_v30 }
 0xe50   :  { %v2045_v34 = vmul.f32 1.442695, %v2043_v33 }
 0xe52   :  { %5285 = vpow2.f32 %v2045_v34 }
 0xe58   :  { %v6014_v35 = vpop.eup %5285 }
 0xe59   :  { %v2049_v37 = vsel %vm180_vm8, %v6014_v35, 0.0 }
 0xe5a   :  { %1852 = vrot.lane.b32.xlu2 %v5920_v27, %s5548_s20 }
 0xe5d   :  { %v2151_v36 = vpop.xlane.xlu1 %2150 }
 0xe60   :  { %v1832_v31 = vpop.permute.xlu0 %1831 }
 0xe61   :  { %v1837_v32 = vsel %vm253_vm9, %v1832_v31, 0 }
 0xe62   :  { %1846 = vmatpush.bf16.msra.mxu2 %v1837_v32 }
 0xe63   :  { %1949 = vrot.lane.b32.xlu1 %v5926_v50, %s5563_s10 }
 0xe65   :  { %v1930_v38 = vpop.xlane.xlu1 %1929 }
 0xe66   :  { %v1932_v40 = vsub.f32 %v1921_v0, %v1930_v38 }
 0xe68   :  { %v1935_v42 = vmul.f32 1.442695, %v1932_v40 }
 0xe6b   :  { %2061 = vrot.lane.b32.xlu1 %v5926_v50, %s5564_s11 }
 0xe83   :  { %2050 = vadd.xlane.f32.xlu2 %v2049_v37 }
 0xe8b   :  { %v1812_v29 = vpop.xlane.xlu0 %1811 }
 0xe8c   :  { %v1814_v39 = vsub.f32 %v1803_v5, %v1812_v29 }
 0xe8e   :  { %v1817_v41 = vmul.f32 1.442695, %v1814_v39  ;;  %v1612_v39 = vpop.f32.mrf.mxu2 }
 0xe90   :  { %5287 = vpow2.f32 %v1817_v41 }
 0xe91   :  { %5289 = vpow2.f32 %v1935_v42 }
 0xe93   :  { %v2154_v44 = vpop.xlane.xlu0 %2153 }
 0xe94   :  { %v2156_v47 = vsub.f32 %v2145_v12, %v2154_v44 }
 0xe96   :  { %v6018_v54 = vpop.eup %5287  ;;  %v2159_v63 = vmul.f32 1.442695, %v2156_v47 }
 0xe97   :  { %v1822_v48 = vsel %vm180_vm8, %v6018_v54, 0.0  ;;  %v6022_v51 = vpop.eup %5289 }
 0xe98   :  { %5291 = vpow2.f32 %v2159_v63  ;;  %1823 = vadd.xlane.f32.xlu1 %v1822_v48  ;;  %v1940_v55 = vsel %vm180_vm8, %v6022_v51, 0.0 }
 0xe9e   :  { %v6024_v52 = vpop.eup %5291 }
 0xe9f   :  { %v2164_v60 = vsel %vm180_vm8, %v6024_v52, 0.0 }
 0xea0   :  { %2165 = vadd.xlane.f32.xlu2 %v2164_v60  ;;  %1941 = vadd.xlane.f32.xlu1 %v1940_v55 }
 0xea6   :  { %v1971_v62 = vpop.permute.xlu0 %1970 }
 0xea7   :  { %v1976_v2 = vsel %vm253_vm9, %v1971_v62, 0 }
 0xead   :  { %v1821_v56 = vpop.xlane.xlu2 %1820 }
 0xeae   :  { %5293 = vrcp.f32 %v1821_v56 }
 0xeb4   :  { %v5294_v57 = vpop.eup %5293 }
 0xeb5   :  { %v1827_v53 = vmul.f32 %v5294_v57, %v5282_v19  ;;  %v2042_v5 = vpop.xlane.xlu2 %2041 }
 0xeb6   :  { %v2044_v58 = vsub.f32 %v5987_v6, %v2042_v5 }
 0xeb7   :  { %v1829_v59 = vpack.c.bf16 %v1827_v53, %v1827_v53 }
 0xeb8   :  { %v2047_v61 = vmul.f32 1.442695, %v2044_v58  ;;  %2194 = vrot.lane.b32.xlu2 %v5920_v27, %s5565_s12 }
 0xeb9   :  { %2082 = vrot.lane.b32.xlu1 %v5920_v27, %s5564_s11  ;;  %4807 = vmatmul.msk.bf16.vlgmr.msra.gmra.mxu2 %vm180_vm8, %v1829_v59  ;;  %v2155_v27 = vsub.f32 %v5989_v8, %v2151_v36 }
 0xeba   :  { %5295 = vpow2.f32 %v2047_v61 }
 0xebb   :  { %v2157_v10 = vmul.f32 1.442695, %v2155_v27 }
 0xebd   :  { %v1853_v0 = vpop.permute.xlu2 %1852  ;;  %v1939_v6 = vpop.xlane.xlu1 %1938 }
 0xebe   :  { %v1858_v1 = vsel %vm253_vm9, %v1853_v0, 0  ;;  %5297 = vrcp.f32 %v1939_v6 }
 0xebf   :  { %1867 = vmatpush.bf16.msrb.mxu3 %v1858_v1  ;;  %5299 = vpow2.f32 %v2157_v10 }
 0xec0   :  { %v5296_v3 = vpop.eup %5295 }
 0xec1   :  { %v2052_v4 = vsel %vm180_vm8, %v5296_v3, 0.0 }
 0xec2   :  { %2053 = vadd.xlane.f32.xlu0 %v2052_v4 }
 0xec3   :  { %1985 = vmatpush.bf16.msra.mxu3 %v1976_v2 }
 0xec4   :  { %v5298_v46 = vpop.eup %5297 }
 0xec5   :  { %v1945_v9 = vmul.f32 %v5298_v46, %v6003_v49  ;;  %v5300_v8 = vpop.eup %5299 }
 0xec6   :  { %v2161_v19 = vsel %vm180_vm8, %v5300_v8, 0.0 }
 0xec7   :  { %v1947_v13 = vpack.c.bf16 %v1945_v9, %v1945_v9 }
 0xed5   :  { %v1950_v11 = vpop.permute.xlu1 %1949 }
 0xed6   :  { %v1955_v12 = vsel %vm253_vm9, %v1950_v11, 0  ;;  %2173 = vrot.lane.b32.xlu0 %v5926_v50, %s5565_s12  ;;  %v6051_v50 = vadd.f32 %v1611_v18, %v5960_v20 }
 0xed7   :  { %1964 = vmatpush.bf16.msrb.mxu2 %v1955_v12  ;;  %v1613_v12 = vadd.f32 %v6045_v15, %v1612_v39  ;;  %v5017_v15 = vld [vmem:[#allocation5 + $0xb0] sm:$0xff] }
 0xed8   :  { %v1619_v22 = vsel %vm151_vm7, %v6051_v50, 0.0 }
 0xeda   :  { %4811 = vmatmul.msk.bf16.vlgmr.msrb.gmra.mxu2 %vm180_vm8, %v1947_v13  ;;  %v1616_v13 = vadd.f32 %v1613_v12, %v5962_v21 }
 0xedd   :  { %v2062_v14 = vpop.permute.xlu1 %2061 }
 0xede   :  { %v2067_v16 = vsel %vm253_vm9, %v2062_v14, 0 }
 0xedf   :  { %2076 = vmatpush.bf16.msra.mxu2 %v2067_v16  ;;  %v1622_v16 = vsel %vm151_vm7, %v1616_v13, 0.0 }
 0xee3   :  { %2162 = vadd.xlane.f32.xlu1 %v2161_v19 }
 0xeeb   :  { %1620 = vadd.xlane.f32.xlu1 %v1619_v22 }
 0xef6   :  { %v2051_v23 = vpop.xlane.xlu2 %2050 }
 0xef7   :  { %5301 = vrcp.f32 %v2051_v23  ;;  %v5018_v23 = vld [vmem:[#allocation5 + $0xb8] sm:$0xff] }
 0xef8   :  { %2273 = vmatpush.bf16.msra.mxu0 %v5018_v23 }
 0xefc   :  { %2274 = vmatpush.bf16.msra.mxu0 %v5017_v15 }
 0xefd   :  { %v5302_v24 = vpop.eup %5301 }
 0xefe   :  { %v2057_v25 = vmul.f32 %v5302_v24, %v6014_v35 }
 0xf00   :  { %v2059_v26 = vpack.c.bf16 %v2057_v25, %v2057_v25 }
 0xf02   :  { %4815 = vmatmul.msk.bf16.vlgmr.msra.gmra.mxu2 %vm180_vm8, %v2059_v26 }
 0xf0b   :  { %v1824_v49 = vpop.xlane.xlu1 %1823 }
 0xf0c   :  { %5303 = vrcp.f32 %v1824_v49 }
 0xf12   :  { %v5304_v28 = vpop.eup %5303 }
 0xf13   :  { %v1828_v30 = vmul.f32 %v5304_v28, %v6018_v54  ;;  %v1942_v20 = vpop.xlane.xlu1 %1941  ;;  %v2166_v33 = vpop.xlane.xlu2 %2165 }
 0xf14   :  { %5305 = vrcp.f32 %v1942_v20 }
 0xf15   :  { %v1830_v31 = vpack.c.bf16 %v1828_v30, %v1828_v30 }
 0xf17   :  { %4808 = vmatmul.msk.bf16.vlgmr.msrb.gmra.mxu3 %vm180_vm8, %v1830_v31 }
 0xf1a   :  { %v5306_v32 = vpop.eup %5305 }
 0xf1b   :  { %v1946_v34 = vmul.f32 %v5306_v32, %v6022_v51  ;;  %v2195_v35 = vpop.permute.xlu2 %2194 }
 0xf1c   :  { %v2200_v29 = vsel %vm253_vm9, %v2195_v35, 0 }
 0xf1d   :  { %v1948_v36 = vpack.c.bf16 %v1946_v34, %v1946_v34 }
 0xf27   :  { %4812 = vmatmul.msk.bf16.vlgmr.msra.gmra.mxu3 %vm180_vm8, %v1948_v36 }
 0xf2b   :  { %v2083_v37 = vpop.permute.xlu1 %2082 }
 0xf2c   :  { %v2088_v38 = vsel %vm253_vm9, %v2083_v37, 0 }
 0xf2d   :  { %2097 = vmatpush.bf16.msrb.mxu3 %v2088_v38 }
 0xf31   :  { %2209 = vmatpush.bf16.msra.mxu3 %v2200_v29 }
 0xf35   :  { %v2054_v40 = vpop.xlane.xlu0 %2053 }
 0xf36   :  { %5307 = vrcp.f32 %v2054_v40 }
 0xf37   :  { %5309 = vrcp.f32 %v2166_v33 }
 0xf3c   :  { %v5308_v41 = vpop.eup %5307  ;;  %v1848_v42 = vpop.f32.mrf.mxu2 }
 0xf3d   :  { %v2058_v44 = vmul.f32 %v5308_v41, %v5296_v3  ;;  %v5310_v63 = vpop.eup %5309 }
 0xf3e   :  { %v2170_v60 = vmul.f32 %v5310_v63, %v6024_v52 }
 0xf3f   :  { %v2060_v47 = vpack.c.bf16 %v2058_v44, %v2058_v44 }
 0xf40   :  { %v2172_v55 = vpack.c.bf16 %v2170_v60, %v2170_v60 }
 0xf41   :  { %4816 = vmatmul.msk.bf16.vlgmr.msrb.gmra.mxu3 %vm180_vm8, %v2060_v47 }
 0xf44   :  { %v1850_v54 = vpop.f32.mrf.mxu2 }
 0xf48   :  { %v2174_v48 = vpop.permute.xlu0 %2173 }
 0xf49   :  { %v2179_v51 = vsel %vm253_vm9, %v2174_v48, 0 }
 0xf4a   :  { %2188 = vmatpush.bf16.msrb.mxu2 %v2179_v51 }
 0xf51   :  { %4820 = vmatmul.msk.bf16.vlgmr.msra.gmra.mxu3 %vm180_vm8, %v2172_v55 }
 0xf56   :  { %v2163_v56 = vpop.xlane.xlu1 %2162 }
 0xf57   :  { %5311 = vrcp.f32 %v2163_v56  ;;  %v5173_v56 = vld [vmem:[#allocation7 + $0x70] ss:$0 sm:$0xff] }
 0xf5d   :  { %v5312_v57 = vpop.eup %5311  ;;  %v1966_v53 = vpop.f32.mrf.mxu2 }
 0xf5e   :  { %v2169_v5 = vmul.f32 %v5312_v57, %v5300_v8  ;;  %v1621_v8 = vpop.xlane.xlu1 %1620 }
 0xf5f   :  { %v1625_v17 = vmul.f32 %v1621_v8, %v5765_v7 }
 0xf60   :  { %v2171_v58 = vpack.c.bf16 %v2169_v5, %v2169_v5  ;;  %v5174_v5 = vld [vmem:[#allocation7 + $0x78] ss:$0 sm:$0xff] }
 0xf61   :  { %v1627_v18 = vsub.f32 %v6051_v50, %v1625_v17 }
 0xf62   :  { %4819 = vmatmul.msk.bf16.vlgmr.msrb.gmra.mxu2 %vm180_vm8, %v2171_v58 }
 0xf63   :  { %v1629_v19 = vmul.f32 %v1627_v18, %v1627_v18 }
 0xf65   :  { %v1968_v59 = vpop.f32.mrf.mxu2  ;;  %v1631_v22 = vsel %vm151_vm7, %v1629_v19, 0.0 }
 0xf85   :  { %v2078_v61 = vpop.f32.mrf.mxu2 }
 0xf8d   :  { %v2080_v62 = vpop.f32.mrf.mxu2 }
 0xf9a   :  { %v1869_v0 = vpop.f32.mrf.mxu3 }
 0xfa2   :  { %v1871_v1 = vpop.f32.mrf.mxu3 }
 0xfaa   :  { %v1987_v2 = vpop.f32.mrf.mxu3 }
 0xfab   :  { %v5098_v3 = vpack.i.bf16 %v1987_v2, %v1966_v53 }
 0xfad   :  { %5099 = vrot.lane.b32.xlu0 %v5098_v3, %s5555_s30 }
 0xfb2   :  { %v1989_v52 = vpop.f32.mrf.mxu3 }
 0xfc4   :  { %v2099_v4 = vpop.f32.mrf.mxu3 }
 0xfc5   :  { %v5103_v6 = vpack.i.bf16 %v2099_v4, %v2078_v61 }
 0xfc7   :  { %5104 = vrot.lane.b32.xlu0 %v5103_v6, %s5566_s13 }
 0xfcc   :  { %v2101_v46 = vpop.f32.mrf.mxu3 }
 0xfd4   :  { %v2211_v27 = vpop.f32.mrf.mxu3 }
 0xfdc   :  { %v2213_v9 = vpop.f32.mrf.mxu3 }
 0xfe5   :  { %v2190_v10 = vpop.f32.mrf.mxu2 }
 0xfe6   :  { %v5108_v11 = vpack.i.bf16 %v2211_v27, %v2190_v10 }
 0xfe8   :  { %5109 = vrot.lane.b32.xlu2 %v5108_v11, %s5567_s14  ;;  %v5175_v11 = vld [vmem:[#allocation7 + $0x88] ss:$0 sm:$0xff] }
 0xfed   :  { %v2192_v14 = vpop.f32.mrf.mxu2 }
 0xff1   :  { %1623 = vadd.xlane.f32.xlu0 %v1622_v16 }
0x1011   :  { %1632 = vadd.xlane.f32.xlu2 %v1631_v22 }
0x101f   :  { %v5100_v24 = vpop.permute.xlu0 %5099 }
0x1020   :  { %v5102_v21 = vunpack.i.h.bf16 %v5100_v24  ;;  %v5101_v26 = vunpack.i.l.bf16 %v5100_v24 }
0x1022   :  { %v2240_v31 = vsel %vm180_vm8, %v1869_v0, %v5102_v21  ;;  %v2239_v20 = vsel %vm180_vm8, %v1848_v42, %v5101_v26 }
0x1039   :  { %v5105_v25 = vpop.permute.xlu0 %5104 }
0x103a   :  { %v5107_v49 = vunpack.i.h.bf16 %v5105_v25  ;;  %v5106_v28 = vunpack.i.l.bf16 %v5105_v25 }
0x103c   :  { %v2242_v33 = vsel %vm659_vm10, %v2240_v31, %v5107_v49  ;;  %v2241_v34 = vsel %vm659_vm10, %v2239_v20, %v5106_v28 }
0x1042   :  { %v5110_v30 = vpop.permute.xlu2 %5109 }
0x1043   :  { %v5112_v50 = vunpack.i.h.bf16 %v5110_v30  ;;  %v5111_v32 = vunpack.i.l.bf16 %v5110_v30  ;;  %v5020_v30 = vld [vmem:[#allocation5 + $0xc8] sm:$0xff] }
0x1044   :  { %2364 = vmatpush.bf16.msra.mxu1 %v5020_v30 }
0x1045   :  { %v2244_v36 = vsel %vm662_vm11, %v2242_v33, %v5112_v50  ;;  %v2243_v35 = vsel %vm662_vm11, %v2241_v34, %v5111_v32  ;;  %v5019_v32 = vld [vmem:[#allocation5 + $0xc0] sm:$0xff] }
0x1046   :  { %v2245_v37 = vpack.c.bf16 %v2244_v36, %v2243_v35 }
0x1048   :  { %4829 = vmatmul.msk.bf16.vlgmr.msra.gmra.mxu0 %vm151_vm7, %v2245_v37  ;;  %2365 = vmatpush.bf16.msra.mxu1 %v5019_v32 }
0x1064   :  { %v1624_v38 = vpop.xlane.xlu0 %1623 }
0x1065   :  { %v1626_v29 = vmul.f32 %v1624_v38, %v5765_v7 }
0x1067   :  { %v1628_v39 = vsub.f32 %v1616_v13, %v1626_v29 }
0x1069   :  { %v1630_v40 = vmul.f32 %v1628_v39, %v1628_v39 }
0x106b   :  { %v1634_v41 = vsel %vm151_vm7, %v1630_v40, 0.0 }
0x106c   :  { %1635 = vadd.xlane.f32.xlu1 %v1634_v41 }
0x1084   :  { %v1633_v42 = vpop.xlane.xlu2 %1632 }
0x1085   :  { %v1637_v44 = vmul.f32 %v1633_v42, %v5765_v7 }
0x1087   :  { %v1639_v47 = vadd.f32 1e-05, %v1637_v44 }
0x1089   :  { %5313 = vrsqrt.f32 %v1639_v47  ;;  %vm1647_vm12 = vweird.f32 %v1639_v47 }
0x108f   :  { %v5314_v54 = vpop.eup %5313 }
0x1090   :  { %v1642_v63 = vmul.f32 %v5314_v54, %v1639_v47  ;;  %vm1648_vm6 = vweird.f32 %v5314_v54 }
0x1091   :  { %vm1649_vm13 = vmor %vm1647_vm12, %vm1648_vm6 }
0x1092   :  { %v1643_v48 = vmul.f32 %v5314_v54, %v1642_v63 }
0x1094   :  { %v1644_v51 = vmul.f32 0.5, %v1643_v48 }
0x1096   :  { %v1645_v60 = vsub.f32 1.5, %v1644_v51 }
0x1098   :  { %v1646_v55 = vmul.f32 %v5314_v54, %v1645_v60 }
0x109a   :  { %v1650_v57 = vsel %vm1649_vm13, %v5314_v54, %v1646_v55 }
0x109b   :  { %v1661_v53 = vmul.f32 %v1650_v57, %v1627_v18 }
0x109d   :  { %v1664_v58 = vmul.f32 %v5173_v56, %v1661_v53 }
0x109f   :  { %v1667_v59 = vadd.f32 %v5174_v5, %v1664_v58 }
0x10a1   :  { %v1671_v61 = vsel %vm151_vm7, %v1667_v59, 0.0 }
0x10a2   :  { %1672 = vadd.xlane.f32.xlu1 %v1671_v61  ;;  %v6123_v61 = vld [vmem:[#allocation7 + $0x90] ss:$0 sm:$0xff] }
0x10c5   :  { %v2276_v10 = vpop.f32.mrf.mxu0 }
0x10c6   :  { %v2277_v14 = vadd.f32 %v5175_v11, %v2276_v10 }
0x10c8   :  { %v2281_v8 = vadd.f32 %v2277_v14, %v5617_v43 }
0x10ca   :  { %v2285_v19 = vsel %vm151_vm7, %v2281_v8, 0.0 }
0x10cd   :  { %v2278_v17 = vpop.f32.mrf.mxu0 }
0x10ce   :  { %v2279_v18 = vadd.f32 %v5175_v11, %v2278_v17 }
0x10d0   :  { %v2282_v22 = vadd.f32 %v2279_v18, %v5621_v45 }
0x10d2   :  { %v2288_v23 = vsel %vm151_vm7, %v2282_v22, 0.0 }
0x10df   :  { %v1636_v62 = vpop.xlane.xlu1 %1635 }
0x10e0   :  { %v1638_v0 = vmul.f32 %v1636_v62, %v5765_v7 }
0x10e2   :  { %v1640_v1 = vadd.f32 1e-05, %v1638_v0 }
0x10e4   :  { %5315 = vrsqrt.f32 %v1640_v1  ;;  %vm1657_vm15 = vweird.f32 %v1640_v1 }
0x10ea   :  { %v5316_v2 = vpop.eup %5315 }
0x10eb   :  { %v1652_v3 = vmul.f32 %v5316_v2, %v1640_v1  ;;  %vm1658_vm14 = vweird.f32 %v5316_v2 }
0x10ec   :  { %vm1659_vm0 = vmor %vm1657_vm15, %vm1658_vm14 }
0x10ed   :  { %v1653_v52 = vmul.f32 %v5316_v2, %v1652_v3 }
0x10ef   :  { %v1654_v4 = vmul.f32 0.5, %v1653_v52 }
0x10f1   :  { %v1655_v6 = vsub.f32 1.5, %v1654_v4 }
0x10f3   :  { %v1656_v46 = vmul.f32 %v5316_v2, %v1655_v6 }
0x10f5   :  { %v1660_v27 = vsel %vm1659_vm0, %v5316_v2, %v1656_v46 }
0x10f6   :  { %v1662_v9 = vmul.f32 %v1660_v27, %v1628_v39 }
0x10f8   :  { %v1665_v12 = vmul.f32 %v5173_v56, %v1662_v9 }
0x10fa   :  { %v1668_v13 = vadd.f32 %v5174_v5, %v1665_v12 }
0x10fc   :  { %v1674_v16 = vsel %vm151_vm7, %v1668_v13, 0.0 }
0x10fd   :  { %1675 = vadd.xlane.f32.xlu1 %v1674_v16 }
0x1105   :  { %2286 = vadd.xlane.f32.xlu1 %v2285_v19  ;;  %v5177_v19 = vld [vmem:[#allocation7 + $0x148] ss:$0 sm:$0xff] }
0x110d   :  { %2289 = vadd.xlane.f32.xlu1 %v2288_v23 }
0x1115   :  { %v1673_v15 = vpop.xlane.xlu1 %1672 }
0x1116   :  { %v1677_v24 = vmul.f32 %v1673_v15, %v5765_v7 }
0x1118   :  { %v6095_v25 = vsub.f32 %v1667_v59, %v1677_v24 }
0x111a   :  { %v1681_v21 = vmul.f32 %v6095_v25, %v6095_v25 }
0x111c   :  { %v1683_v43 = vsel %vm151_vm7, %v1681_v21, 0.0 }
0x111d   :  { %1684 = vadd.xlane.f32.xlu2 %v1683_v43 }
0x1170   :  { %v1676_v26 = vpop.xlane.xlu1 %1675 }
0x1171   :  { %v1678_v49 = vmul.f32 %v1676_v26, %v5765_v7 }
0x1173   :  { %v6101_v28 = vsub.f32 %v1668_v13, %v1678_v49  ;;  %v5176_v13 = vld [vmem:[#allocation7 + $0x140] ss:$0 sm:$0xff] }
0x1175   :  { %v1682_v45 = vmul.f32 %v6101_v28, %v6101_v28 }
0x1177   :  { %v1686_v31 = vsel %vm151_vm7, %v1682_v45, 0.0 }
0x1178   :  { %1687 = vadd.xlane.f32.xlu0 %v1686_v31  ;;  %v2287_v20 = vpop.xlane.xlu1 %2286 }
0x1179   :  { %v2291_v50 = vmul.f32 %v2287_v20, %v5765_v7 }
0x117b   :  { %v6107_v33 = vsub.f32 %v2281_v8, %v2291_v50 }
0x117d   :  { %v2295_v34 = vmul.f32 %v6107_v33, %v6107_v33 }
0x117f   :  { %v2297_v36 = vsel %vm151_vm7, %v2295_v34, 0.0 }
0x1180   :  { %2298 = vadd.xlane.f32.xlu1 %v2297_v36  ;;  %v2290_v35 = vpop.xlane.xlu1 %2289 }
0x1181   :  { %v2292_v37 = vmul.f32 %v2290_v35, %v5765_v7 }
0x1183   :  { %v6113_v38 = vsub.f32 %v2282_v22, %v2292_v37 }
0x1185   :  { %v2296_v29 = vmul.f32 %v6113_v38, %v6113_v38 }
0x1187   :  { %v2300_v39 = vsel %vm151_vm7, %v2296_v29, 0.0 }
0x1188   :  { %2301 = vadd.xlane.f32.xlu2 %v2300_v39 }
0x118c   :  { %2374 = vrot.lane.b32.xlu0 %v5020_v30, %s5557_s4  ;;  %v5178_v30 = vld [vmem:[#allocation7 + $0xb0] ss:$0 sm:$0xff] }
0x1190   :  { %v1685_v40 = vpop.xlane.xlu2 %1684 }
0x1191   :  { %v1689_v41 = vmul.f32 %v1685_v40, %v5765_v7 }
0x1193   :  { %v1691_v42 = vadd.f32 1e-05, %v1689_v41 }
0x1195   :  { %5317 = vrsqrt.f32 %v1691_v42  ;;  %vm1699_vm4 = vweird.f32 %v1691_v42 }
0x1199   :  { %2372 = vrot.lane.b32.xlu1 %v5019_v32, %s5557_s4  ;;  %v5179_v32 = vld [vmem:[#allocation7 + $0xb8] ss:$0 sm:$0xff] }
0x119b   :  { %v5318_v44 = vpop.eup %5317 }
0x119c   :  { %v1694_v54 = vmul.f32 %v5318_v44, %v1691_v42  ;;  %vm1700_vm1 = vweird.f32 %v5318_v44 }
0x119d   :  { %vm1701_vm5 = vmor %vm1699_vm4, %vm1700_vm1 }
0x119e   :  { %v1695_v51 = vmul.f32 %v5318_v44, %v1694_v54 }
0x11a0   :  { %v1696_v55 = vmul.f32 0.5, %v1695_v51  ;;  %2379 = vrot.lane.b32.xlu2 %v6123_v61, %s5557_s4 }
0x11a2   :  { %v1697_v58 = vsub.f32 1.5, %v1696_v55 }
0x11a4   :  { %v1698_v1 = vmul.f32 %v5318_v44, %v1697_v58 }
0x11a6   :  { %v1702_v9 = vsel %vm1701_vm5, %v5318_v44, %v1698_v1 }
0x11a7   :  { %v1713_v14 = vmul.f32 %v1702_v9, %v6095_v25 }
0x11a9   :  { %v1716_v22 = vmul.f32 %v5176_v13, %v1713_v14 }
0x11ab   :  { %v1719_v43 = vadd.f32 %v5177_v19, %v1716_v22 }
0x11eb   :  { %v1688_v47 = vpop.xlane.xlu0 %1687 }
0x11ec   :  { %v1690_v63 = vmul.f32 %v1688_v47, %v5765_v7 }
0x11ee   :  { %v1692_v48 = vadd.f32 1e-05, %v1690_v63 }
0x11f0   :  { %5319 = vrsqrt.f32 %v1692_v48  ;;  %vm1709_vm6 = vweird.f32 %v1692_v48 }
0x11f3   :  { %v2299_v60 = vpop.xlane.xlu1 %2298 }
0x11f4   :  { %v2303_v56 = vmul.f32 %v2299_v60, %v5765_v7 }
0x11f6   :  { %v5320_v57 = vpop.eup %5319  ;;  %v2305_v53 = vadd.f32 1e-05, %v2303_v56 }
0x11f7   :  { %v1704_v5 = vmul.f32 %v5320_v57, %v1692_v48  ;;  %vm1710_vm2 = vweird.f32 %v5320_v57 }
0x11f8   :  { %5321 = vrsqrt.f32 %v2305_v53  ;;  %vm1711_vm12 = vmor %vm1709_vm6, %vm1710_vm2  ;;  %vm2313_vm14 = vweird.f32 %v2305_v53 }
0x11f9   :  { %v1705_v59 = vmul.f32 %v5320_v57, %v1704_v5 }
0x11fb   :  { %v1706_v62 = vmul.f32 0.5, %v1705_v59  ;;  %v2302_v0 = vpop.xlane.xlu2 %2301 }
0x11fc   :  { %v2304_v2 = vmul.f32 %v2302_v0, %v5765_v7 }
0x11fd   :  { %v1707_v3 = vsub.f32 1.5, %v1706_v62 }
0x11fe   :  { %v5322_v52 = vpop.eup %5321  ;;  %v2306_v4 = vadd.f32 1e-05, %v2304_v2  ;;  %v2375_v6 = vpop.permute.xlu0 %2374 }
0x11ff   :  { %v1708_v46 = vmul.f32 %v5320_v57, %v1707_v3  ;;  %v2308_v27 = vmul.f32 %v5322_v52, %v2305_v53  ;;  %2391 = vmatpush.bf16.msra.mxu2 %v2375_v6  ;;  %vm2314_vm13 = vweird.f32 %v5322_v52 }
0x1200   :  { %5323 = vrsqrt.f32 %v2306_v4  ;;  %vm2315_vm15 = vmor %vm2313_vm14, %vm2314_vm13  ;;  %vm2323_vm1 = vweird.f32 %v2306_v4 }
0x1201   :  { %v1712_v10 = vsel %vm1711_vm12, %v5320_v57, %v1708_v46  ;;  %v2309_v11 = vmul.f32 %v5322_v52, %v2308_v27 }
0x1202   :  { %v1714_v12 = vmul.f32 %v1712_v10, %v6101_v28 }
0x1203   :  { %v2310_v16 = vmul.f32 0.5, %v2309_v11 }
0x1204   :  { %v1717_v8 = vmul.f32 %v5176_v13, %v1714_v12 }
0x1205   :  { %v2311_v17 = vsub.f32 1.5, %v2310_v16 }
0x1206   :  { %v5324_v18 = vpop.eup %5323  ;;  %v1720_v24 = vadd.f32 %v5177_v19, %v1717_v8 }
0x1207   :  { %v2312_v23 = vmul.f32 %v5322_v52, %v2311_v17  ;;  %v2318_v15 = vmul.f32 %v5324_v18, %v2306_v4  ;;  %vm2324_vm0 = vweird.f32 %v5324_v18 }
0x1208   :  { %v6130_v45 = vpack.c.bf16 %v1720_v24, %v1719_v43  ;;  %vm2325_vm2 = vmor %vm2323_vm1, %vm2324_vm0 }
0x1209   :  { %v2319_v21 = vmul.f32 %v5324_v18, %v2318_v15  ;;  %v2316_v26 = vsel %vm2315_vm15, %v5322_v52, %v2312_v23 }
0x120a   :  { %v2327_v31 = vmul.f32 %v2316_v26, %v6107_v33  ;;  %v2380_v33 = vpop.permute.xlu2 %2379 }
0x120b   :  { %v2320_v49 = vmul.f32 0.5, %v2319_v21  ;;  %v2373_v28 = vpop.permute.xlu1 %2372 }
0x120c   :  { %2392 = vmatpush.bf16.msra.mxu2 %v2373_v28  ;;  %v2330_v34 = vmul.f32 %v5178_v30, %v2327_v31 }
0x120d   :  { %v2321_v25 = vsub.f32 1.5, %v2320_v49 }
0x120e   :  { %v6136_v37 = vadd.f32 %v5179_v32, %v2330_v34 }
0x120f   :  { %v2322_v20 = vmul.f32 %v5324_v18, %v2321_v25  ;;  %4839 = vmatmul.msk.bf16.vlgmr.msra.gmra.mxu2 %vm151_vm7, %v6130_v45 }
0x1211   :  { %v2326_v50 = vsel %vm2325_vm2, %v5324_v18, %v2322_v20 }
0x1212   :  { %v2328_v36 = vmul.f32 %v2326_v50, %v6113_v38 }
0x1214   :  { %v2331_v35 = vmul.f32 %v5178_v30, %v2328_v36 }
0x1216   :  { %v6138_v29 = vadd.f32 %v5179_v32, %v2331_v35 }
0x1218   :  { %v2340_v39 = vpack.c.bf16 %v6138_v29, %v6136_v37 }
0x121a   :  { %4838 = vmatmul.msk.bf16.vlgmr.msra.gmra.mxu1 %vm151_vm7, %v2340_v39 }
0x1292   :  { %v2394_v40 = vpop.f32.mrf.mxu2 }
0x1293   :  { %v2395_v41 = vadd.f32 %v2394_v40, %v2380_v33 }
0x1295   :  { %v2403_v42 = vpack.c.bf16 %v2395_v41, %v2395_v41 }
0x1297   :  { %v2409_v44 = vsel %vm180_vm8, %v2403_v42, 0  ;;  %v2468_v47 = vunpack.c.l.b16 %v2403_v42  ;;  %v2367_v54 = vpop.f32.mrf.mxu1 }
0x1298   :  { %v2368_v38 = vadd.f32 %v6123_v61, %v2367_v54  ;;  %2418 = vmatpush.bf16.xpose.msrb.mxu3 %v2409_v44 }
0x1299   :  { %v6145_v63 = vpack.c.b16 %v2468_v47, %v2468_v47 }
0x129a   :  { %v2399_v48 = vmul.f32 0.35355338, %v2368_v38  ;;  %v2396_v51 = vpop.f32.mrf.mxu2 }
0x129b   :  { %v2397_v60 = vadd.f32 %v2396_v51, %v2380_v33  ;;  %2520 = vrot.lane.b32.xlu0 %v6145_v63, %s5558_s5 }
0x129c   :  { %v2401_v55 = vpack.c.bf16 %v2399_v48, %v2399_v48 }
0x129d   :  { %v2404_v56 = vpack.c.bf16 %v2397_v60, %v2397_v60 }
0x129e   :  { %v2516_v57 = vunpack.c.l.b16 %v2401_v55 }
0x129f   :  { %v2492_v53 = vunpack.c.l.b16 %v2404_v56  ;;  %v2369_v5 = vpop.f32.mrf.mxu1  ;;  %4840 = vmatmul.msk.bf16.vlgmr.msrb.gmra.mxu3 %vm180_vm8, %v2401_v55  ;;  %v2428_v58 = vsel %vm180_vm8, %v2404_v56, 0 }
0x12a0   :  { %v2517_v59 = vpack.c.b16 %v2516_v57, %v2516_v57  ;;  %v2370_v62 = vadd.f32 %v6123_v61, %v2369_v5  ;;  %2437 = vmatpush.bf16.xpose.msrb.mxu0 %v2428_v58 }
0x12a1   :  { %v6152_v0 = vpack.c.b16 %v2492_v53, %v2492_v53 }
0x12a2   :  { %v2400_v1 = vmul.f32 0.35355338, %v2370_v62 }
0x12a3   :  { %2546 = vrot.lane.b32.xlu1 %v6152_v0, %s5558_s5  ;;  %2518 = vrot.lane.b32.xlu0 %v2517_v59, %s5558_s5 }
0x12a4   :  { %v2402_v2 = vpack.c.bf16 %v2400_v1, %v2400_v1 }
0x12a6   :  { %v2542_v3 = vunpack.c.l.b16 %v2402_v2 }
0x12a7   :  { %4841 = vmatmul.msk.bf16.vlgmr.msrb.gmra.mxu0 %vm180_vm8, %v2402_v2 }
0x12a8   :  { %v2543_v52 = vpack.c.b16 %v2542_v3, %v2542_v3 }
0x12aa   :  { %2544 = vrot.lane.b32.xlu2 %v2543_v52, %s5558_s5 }
0x12ab   :  { %2635 = vrot.lane.b32.xlu1 %v6145_v63, %s5560_s7  ;;  %2658 = vrot.lane.b32.xlu0 %v6152_v0, %s5560_s7 }
0x12b2   :  { %2633 = vrot.lane.b32.xlu2 %v2517_v59, %s5560_s7 }
0x12b3   :  { %2656 = vrot.lane.b32.xlu1 %v2543_v52, %s5560_s7  ;;  %2747 = vrot.lane.b32.xlu0 %v6145_v63, %s5562_s9 }
0x12ba   :  { %2770 = vrot.lane.b32.xlu2 %v6152_v0, %s5562_s9 }
0x12bb   :  { %2745 = vrot.lane.b32.xlu1 %v2517_v59, %s5562_s9  ;;  %2768 = vrot.lane.b32.xlu0 %v2543_v52, %s5562_s9 }
0x1304   :  { %v2545_v61 = vpop.permute.xlu2 %2544 }
0x130c   :  { %v2634_v46 = vpop.permute.xlu2 %2633 }
0x130d   :  { %v2521_v4 = vpop.permute.xlu0 %2520 }
0x130e   :  { %v2526_v6 = vsel %vm180_vm8, %v2521_v4, 0 }
0x130f   :  { %2535 = vmatpush.bf16.xpose.msra.mxu3 %v2526_v6 }
0x1314   :  { %v2771_v11 = vpop.permute.xlu2 %2770 }
0x1315   :  { %v2547_v27 = vpop.permute.xlu1 %2546  ;;  %v2519_v9 = vpop.permute.xlu0 %2518  ;;  %v2776_v8 = vsel %vm180_vm8, %v2771_v11, 0 }
0x1316   :  { %v2552_v10 = vsel %vm180_vm8, %v2547_v27, 0  ;;  %4844 = vmatmul.msk.bf16.vlgmr.msra.gmra.mxu3 %vm180_vm8, %v2519_v9 }
0x1317   :  { %2561 = vmatpush.bf16.xpose.msra.mxu0 %v2552_v10 }
0x131d   :  { %v2636_v12 = vpop.permute.xlu1 %2635  ;;  %v2659_v13 = vpop.permute.xlu0 %2658 }
0x131e   :  { %v2641_v14 = vsel %vm180_vm8, %v2636_v12, 0  ;;  %v2664_v16 = vsel %vm180_vm8, %v2659_v13, 0  ;;  %4845 = vmatmul.msk.bf16.vlgmr.msra.gmra.mxu0 %vm180_vm8, %v2545_v61 }
0x131f   :  { %2650 = vmatpush.bf16.xpose.msrb.mxu3 %v2641_v14  ;;  %2673 = vmatpush.bf16.xpose.msrb.mxu0 %v2664_v16 }
0x1322   :  { %v2420_v17 = vpop.f32.mrf.mxu3 }
0x1323   :  { %v2443_v18 = vsel %vm180_vm8, %v2420_v17, -inf }
0x1324   :  { %v2439_v19 = vpop.f32.mrf.mxu0  ;;  %2444 = vmax.xlane.f32.xlu1 %v2443_v18 }
0x1325   :  { %v2748_v22 = vpop.permute.xlu0 %2747  ;;  %v2446_v23 = vsel %vm180_vm8, %v2439_v19, -inf  ;;  %v2657_v21 = vpop.permute.xlu1 %2656 }
0x1326   :  { %v2753_v15 = vsel %vm180_vm8, %v2748_v22, 0  ;;  %2447 = vmax.xlane.f32.xlu2 %v2446_v23  ;;  %4848 = vmatmul.msk.bf16.vlgmr.msrb.gmra.mxu3 %vm180_vm8, %v2634_v46 }
0x1327   :  { %2785 = vmatpush.bf16.xpose.msra.mxu0 %v2776_v8  ;;  %2762 = vmatpush.bf16.xpose.msra.mxu3 %v2753_v15 }
0x132a   :  { %v2422_v24 = vpop.f32.mrf.mxu3 }
0x132c   :  { %v2441_v43 = vpop.f32.mrf.mxu0 }
0x132d   :  { %v2746_v26 = vpop.permute.xlu1 %2745  ;;  %v2769_v49 = vpop.permute.xlu0 %2768 }
0x132e   :  { %4849 = vmatmul.msk.bf16.vlgmr.msrb.gmra.mxu0 %vm180_vm8, %v2657_v21 }
0x1336   :  { %4852 = vmatmul.msk.bf16.vlgmr.msra.gmra.mxu3 %vm180_vm8, %v2746_v26 }
0x133e   :  { %4853 = vmatmul.msk.bf16.vlgmr.msra.gmra.mxu0 %vm180_vm8, %v2769_v49 }
0x1397   :  { %v2445_v28 = vpop.xlane.xlu1 %2444 }
0x1398   :  { %v2449_v25 = vsub.f32 %v2420_v17, %v2445_v28 }
0x1399   :  { %v2448_v30 = vpop.xlane.xlu2 %2447  ;;  %v2537_v31 = vpop.f32.mrf.mxu3 }
0x139a   :  { %v2451_v20 = vmul.f32 1.442695, %v2449_v25  ;;  %v2450_v50 = vsub.f32 %v2439_v19, %v2448_v30  ;;  %v2567_v32 = vsel %vm180_vm8, %v2537_v31, -inf }
0x139b   :  { %v2563_v34 = vpop.f32.mrf.mxu0  ;;  %2568 = vmax.xlane.f32.xlu2 %v2567_v32 }
0x139c   :  { %5325 = vpow2.f32 %v2451_v20  ;;  %v2453_v36 = vmul.f32 1.442695, %v2450_v50  ;;  %v2570_v35 = vsel %vm180_vm8, %v2563_v34, -inf }
0x139d   :  { %2571 = vmax.xlane.f32.xlu0 %v2570_v35 }
0x139e   :  { %5327 = vpow2.f32 %v2453_v36 }
0x13a1   :  { %v2539_v39 = vpop.f32.mrf.mxu3 }
0x13a2   :  { %v5326_v33 = vpop.eup %5325 }
0x13a3   :  { %v2565_v40 = vpop.f32.mrf.mxu0  ;;  %v2455_v41 = vsel %vm180_vm8, %v5326_v33, 0.0 }
0x13a4   :  { %v6188_v42 = vpop.eup %5327  ;;  %2456 = vadd.xlane.f32.xlu2 %v2455_v41 }
0x13a5   :  { %v2458_v44 = vsel %vm180_vm8, %v6188_v42, 0.0 }
0x13a6   :  { %2459 = vadd.xlane.f32.xlu1 %v2458_v44 }
0x13a9   :  { %v2652_v47 = vpop.f32.mrf.mxu3 }
0x13aa   :  { %v2679_v54 = vsel %vm180_vm8, %v2652_v47, -inf }
0x13ab   :  { %v2675_v38 = vpop.f32.mrf.mxu0  ;;  %2680 = vmax.xlane.f32.xlu0 %v2679_v54 }
0x13ac   :  { %v2682_v48 = vsel %vm180_vm8, %v2675_v38, -inf }
0x13ae   :  { %2683 = vmax.xlane.f32.xlu1 %v2682_v48 }
0x13b1   :  { %v2654_v51 = vpop.f32.mrf.mxu3 }
0x13b3   :  { %v2677_v60 = vpop.f32.mrf.mxu0 }
0x13b9   :  { %v6194_v55 = vpop.f32.mrf.mxu3 }
0x13ba   :  { %v2791_v5 = vsel %vm180_vm8, %v6194_v55, -inf }
0x13bb   :  { %v6196_v56 = vpop.f32.mrf.mxu0 }
0x13bc   :  { %2612 = vrot.lane.b32.xlu2 %v6152_v0, %s5556_s2  ;;  %v2794_v58 = vsel %vm180_vm8, %v6196_v56, -inf }
0x13bf   :  { %2470 = vrot.lane.b32.xlu0 %v6145_v63, %s5557_s4 }
0x13c1   :  { %v2766_v57 = vpop.f32.mrf.mxu3 }
0x13c3   :  { %v2789_v53 = vpop.f32.mrf.mxu0 }
0x13c4   :  { %2724 = vrot.lane.b32.xlu2 %v6152_v0, %s5559_s6 }
0x13c7   :  { %2494 = vrot.lane.b32.xlu1 %v6152_v0, %s5557_s4 }
0x13e9   :  { %2792 = vmax.xlane.f32.xlu0 %v2791_v5 }
0x13ed   :  { %2795 = vmax.xlane.f32.xlu2 %v2794_v58 }
0x13fd   :  { %2591 = vrot.lane.b32.xlu0 %v6145_v63, %s5556_s2 }
0x140e   :  { %v2569_v59 = vpop.xlane.xlu2 %2568 }
0x140f   :  { %v2573_v62 = vsub.f32 %v2537_v31, %v2569_v59 }
0x1410   :  { %v2572_v1 = vpop.xlane.xlu0 %2571 }
0x1411   :  { %v2575_v2 = vmul.f32 1.442695, %v2573_v62  ;;  %v2574_v3 = vsub.f32 %v2563_v34, %v2572_v1 }
0x1413   :  { %5329 = vpow2.f32 %v2575_v2  ;;  %v2577_v52 = vmul.f32 1.442695, %v2574_v3 }
0x1415   :  { %5331 = vpow2.f32 %v2577_v52 }
0x1417   :  { %v2457_v14 = vpop.xlane.xlu2 %2456 }
0x1419   :  { %v6212_v61 = vpop.eup %5329  ;;  %v2460_v4 = vpop.xlane.xlu1 %2459 }
0x141a   :  { %v2579_v6 = vsel %vm180_vm8, %v6212_v61, 0.0 }
0x141b   :  { %2580 = vadd.xlane.f32.xlu2 %v2579_v6  ;;  %v6216_v27 = vpop.eup %5331 }
0x141c   :  { %v2582_v13 = vsel %vm180_vm8, %v6216_v27, 0.0 }
0x141e   :  { %v2681_v46 = vpop.xlane.xlu0 %2680 }
0x141f   :  { %v2685_v9 = vsub.f32 %v2652_v47, %v2681_v46  ;;  %v2613_v15 = vpop.permute.xlu2 %2612 }
0x1420   :  { %v2618_v30 = vsel %vm253_vm9, %v2613_v15, 0 }
0x1421   :  { %v2687_v10 = vmul.f32 1.442695, %v2685_v9  ;;  %v2684_v11 = vpop.xlane.xlu1 %2683 }
0x1422   :  { %v2686_v12 = vsub.f32 %v2675_v38, %v2684_v11 }
0x1423   :  { %5333 = vpow2.f32 %v2687_v10  ;;  %2583 = vadd.xlane.f32.xlu2 %v2582_v13 }
0x1424   :  { %v2689_v16 = vmul.f32 1.442695, %v2686_v12 }
0x1426   :  { %5335 = vpow2.f32 %v2689_v16 }
0x1427   :  { %5337 = vrcp.f32 %v2457_v14  ;;  %v2725_v31 = vpop.permute.xlu2 %2724 }
0x1428   :  { %5339 = vrcp.f32 %v2460_v4  ;;  %v2730_v50 = vsel %vm253_vm9, %v2725_v31, 0 }
0x1429   :  { %v6220_v8 = vpop.eup %5333 }
0x142a   :  { %v2691_v17 = vsel %vm180_vm8, %v6220_v8, 0.0 }
0x142b   :  { %2692 = vadd.xlane.f32.xlu0 %v2691_v17 }
0x142c   :  { %v6224_v18 = vpop.eup %5335 }
0x142d   :  { %v5338_v19 = vpop.eup %5337  ;;  %v2694_v22 = vsel %vm180_vm8, %v6224_v18, 0.0 }
0x142e   :  { %2695 = vadd.xlane.f32.xlu1 %v2694_v22  ;;  %v2463_v23 = vmul.f32 %v5338_v19, %v5326_v33  ;;  %v5340_v26 = vpop.eup %5339 }
0x142f   :  { %v2464_v49 = vmul.f32 %v5340_v26, %v6188_v42 }
0x1430   :  { %v2465_v43 = vpack.c.bf16 %v2463_v23, %v2463_v23 }
0x1431   :  { %v2471_v24 = vpop.permute.xlu0 %2470  ;;  %v2466_v20 = vpack.c.bf16 %v2464_v49, %v2464_v49 }
0x1432   :  { %v2476_v21 = vsel %vm253_vm9, %v2471_v24, 0 }
0x1433   :  { %2485 = vmatpush.bf16.msrb.mxu1 %v2476_v21 }
0x1436   :  { %4842 = vmatmul.msk.bf16.vlgmr.msrb.gmra.mxu1 %vm180_vm8, %v2465_v43 }
0x1439   :  { %v2495_v28 = vpop.permute.xlu1 %2494 }
0x143a   :  { %v2500_v25 = vsel %vm253_vm9, %v2495_v28, 0 }
0x143b   :  { %2509 = vmatpush.bf16.msrb.mxu2 %v2500_v25  ;;  %2703 = vrot.lane.b32.xlu2 %v6145_v63, %s5559_s6 }
0x143e   :  { %4843 = vmatmul.msk.bf16.vlgmr.msrb.gmra.mxu2 %vm180_vm8, %v2466_v20 }
0x143f   :  { %2627 = vmatpush.bf16.msra.mxu2 %v2618_v30  ;;  %2836 = vrot.lane.b32.xlu0 %v6152_v0, %s5561_s8 }
0x1443   :  { %2739 = vmatpush.bf16.msrb.mxu2 %v2730_v50 }
0x145c   :  { %v2793_v32 = vpop.xlane.xlu0 %2792 }
0x145d   :  { %v2797_v34 = vsub.f32 %v6194_v55, %v2793_v32 }
0x145f   :  { %v2799_v36 = vmul.f32 1.442695, %v2797_v34  ;;  %v5022_v34 = vld [vmem:[#allocation5 + $0xd8] sm:$0xff] }
0x1460   :  { %v2796_v35 = vpop.xlane.xlu2 %2795  ;;  %2915 = vmatpush.bf16.msrb.mxu3 %v5022_v34 }
0x1461   :  { %5341 = vpow2.f32 %v2799_v36  ;;  %v2798_v39 = vsub.f32 %v6196_v56, %v2796_v35  ;;  %v5021_v36 = vld [vmem:[#allocation5 + $0xd0] sm:$0xff] }
0x1463   :  { %v2801_v33 = vmul.f32 1.442695, %v2798_v39 }
0x1464   :  { %2916 = vmatpush.bf16.msrb.mxu3 %v5021_v36 }
0x1465   :  { %5343 = vpow2.f32 %v2801_v33 }
0x1467   :  { %v5342_v40 = vpop.eup %5341 }
0x1468   :  { %v2803_v41 = vsel %vm180_vm8, %v5342_v40, 0.0 }
0x1469   :  { %2804 = vadd.xlane.f32.xlu1 %v2803_v41 }
0x146b   :  { %v5344_v42 = vpop.eup %5343 }
0x146c   :  { %v2806_v44 = vsel %vm180_vm8, %v5344_v42, 0.0 }
0x146d   :  { %2807 = vadd.xlane.f32.xlu2 %v2806_v44 }
0x146f   :  { %v2592_v47 = vpop.permute.xlu0 %2591 }
0x1470   :  { %v2597_v0 = vsel %vm253_vm9, %v2592_v47, 0 }
0x1471   :  { %2606 = vmatpush.bf16.msra.mxu1 %v2597_v0 }
0x1482   :  { %2815 = vrot.lane.b32.xlu1 %v6145_v63, %s5561_s8 }
0x148e   :  { %v2581_v54 = vpop.xlane.xlu2 %2580 }
0x148f   :  { %5345 = vrcp.f32 %v2581_v54 }
0x1495   :  { %v5346_v38 = vpop.eup %5345 }
0x1496   :  { %v2587_v48 = vmul.f32 %v5346_v38, %v6212_v61  ;;  %v2584_v51 = vpop.xlane.xlu2 %2583 }
0x1497   :  { %5347 = vrcp.f32 %v2584_v51 }
0x1498   :  { %v2589_v60 = vpack.c.bf16 %v2587_v48, %v2587_v48 }
0x149a   :  { %4846 = vmatmul.msk.bf16.vlgmr.msra.gmra.mxu1 %vm180_vm8, %v2589_v60 }
0x149d   :  { %v5348_v55 = vpop.eup %5347 }
0x149e   :  { %v2588_v56 = vmul.f32 %v5348_v55, %v6216_v27  ;;  %v2704_v57 = vpop.permute.xlu2 %2703  ;;  %v2693_v53 = vpop.xlane.xlu0 %2692 }
0x149f   :  { %v2709_v5 = vsel %vm253_vm9, %v2704_v57, 0  ;;  %5349 = vrcp.f32 %v2693_v53  ;;  %v5181_v57 = vld [vmem:[#allocation7 + $0x98] ss:$0 sm:$0xff] }
0x14a0   :  { %v2590_v58 = vpack.c.bf16 %v2588_v56, %v2588_v56  ;;  %2718 = vmatpush.bf16.msrb.mxu1 %v2709_v5 }
0x14a1   :  { %v2696_v63 = vpop.xlane.xlu1 %2695 }
0x14a2   :  { %4847 = vmatmul.msk.bf16.vlgmr.msra.gmra.mxu2 %vm180_vm8, %v2590_v58  ;;  %5351 = vrcp.f32 %v2696_v63 }
0x14a5   :  { %v5350_v59 = vpop.eup %5349 }
0x14a6   :  { %v2699_v62 = vmul.f32 %v5350_v59, %v6220_v8 }
0x14a8   :  { %v2701_v1 = vpack.c.bf16 %v2699_v62, %v2699_v62  ;;  %v5352_v2 = vpop.eup %5351 }
0x14a9   :  { %v2700_v3 = vmul.f32 %v5352_v2, %v6224_v18 }
0x14aa   :  { %4850 = vmatmul.msk.bf16.vlgmr.msrb.gmra.mxu1 %vm180_vm8, %v2701_v1 }
0x14ab   :  { %v2702_v52 = vpack.c.bf16 %v2700_v3, %v2700_v3 }
0x14b1   :  { %v2837_v61 = vpop.permute.xlu0 %2836 }
0x14b2   :  { %v2842_v4 = vsel %vm253_vm9, %v2837_v61, 0  ;;  %4851 = vmatmul.msk.bf16.vlgmr.msrb.gmra.mxu2 %vm180_vm8, %v2702_v52 }
0x14b3   :  { %v2487_v6 = vpop.f32.mrf.mxu1  ;;  %2851 = vmatpush.bf16.msra.mxu2 %v2842_v4 }
0x14bb   :  { %v2489_v46 = vpop.f32.mrf.mxu1 }
0x14c1   :  { %v2511_v27 = vpop.f32.mrf.mxu2 }
0x14c9   :  { %v2513_v9 = vpop.f32.mrf.mxu2 }
0x14dc   :  { %v2805_v12 = vpop.xlane.xlu1 %2804 }
0x14e0   :  { %v2808_v10 = vpop.xlane.xlu2 %2807 }
0x14e1   :  { %5353 = vrcp.f32 %v2808_v10 }
0x14e2   :  { %5355 = vrcp.f32 %v2805_v12 }
0x14e7   :  { %v5354_v11 = vpop.eup %5353 }
0x14e8   :  { %v2812_v13 = vmul.f32 %v5354_v11, %v5344_v42  ;;  %v5356_v16 = vpop.eup %5355  ;;  %v5024_v11 = vld [vmem:[#allocation5 + $0xe8] sm:$0xff] }
0x14e9   :  { %v2811_v8 = vmul.f32 %v5356_v16, %v5342_v40  ;;  %3005 = vmatpush.bf16.msrb.mxu0 %v5024_v11  ;;  %v5030_v11 = vld [vmem:[#allocation5 + $0x118] sm:$0xff] }
0x14ea   :  { %v2814_v14 = vpack.c.bf16 %v2812_v13, %v2812_v13  ;;  %3149 = vmatpush.bf16.msrb.mxu2 %v5030_v11 }
0x14eb   :  { %v2813_v19 = vpack.c.bf16 %v2811_v8, %v2811_v8 }
0x14ec   :  { %4855 = vmatmul.msk.bf16.vlgmr.msra.gmra.mxu2 %vm180_vm8, %v2814_v14  ;;  %v5023_v14 = vld [vmem:[#allocation5 + $0xe0] sm:$0xff] }
0x14ed   :  { %3006 = vmatpush.bf16.msrb.mxu0 %v5023_v14  ;;  %v5029_v14 = vld [vmem:[#allocation5 + $0x110] sm:$0xff] }
0x14ee   :  { %3150 = vmatpush.bf16.msrb.mxu2 %v5029_v14 }
0x14f4   :  { %v2816_v17 = vpop.permute.xlu1 %2815 }
0x14f5   :  { %v2821_v18 = vsel %vm253_vm9, %v2816_v17, 0 }
0x14f6   :  { %2830 = vmatpush.bf16.msra.mxu1 %v2821_v18 }
0x14f9   :  { %4854 = vmatmul.msk.bf16.vlgmr.msra.gmra.mxu1 %vm180_vm8, %v2813_v19 }
0x1517   :  { %v2608_v22 = vpop.f32.mrf.mxu1 }
0x151f   :  { %v2610_v23 = vpop.f32.mrf.mxu1 }
0x1525   :  { %v2629_v15 = vpop.f32.mrf.mxu2 }
0x1526   :  { %v5113_v24 = vpack.i.bf16 %v2629_v15, %v2608_v22 }
0x1527   :  { %v2720_v21 = vpop.f32.mrf.mxu1 }
0x1528   :  { %5114 = vrot.lane.b32.xlu0 %v5113_v24, %s5555_s30 }
0x152d   :  { %v2631_v43 = vpop.f32.mrf.mxu2 }
0x152f   :  { %v2722_v26 = vpop.f32.mrf.mxu1 }
0x1535   :  { %v2741_v49 = vpop.f32.mrf.mxu2 }
0x1536   :  { %v5118_v28 = vpack.i.bf16 %v2741_v49, %v2720_v21 }
0x1538   :  { %5119 = vrot.lane.b32.xlu0 %v5118_v28, %s5566_s13 }
0x153d   :  { %v2743_v25 = vpop.f32.mrf.mxu2 }
0x156f   :  { %v2853_v30 = vpop.f32.mrf.mxu2 }
0x1576   :  { %v2832_v31 = vpop.f32.mrf.mxu1 }
0x1577   :  { %v5123_v20 = vpack.i.bf16 %v2853_v30, %v2832_v31  ;;  %v2855_v50 = vpop.f32.mrf.mxu2  ;;  %v5182_v30 = vld [vmem:[#allocation7 + $0xc0] ss:$0 sm:$0xff] }
0x1579   :  { %5124 = vrot.lane.b32.xlu1 %v5123_v20, %s5567_s14 }
0x157e   :  { %v2834_v32 = vpop.f32.mrf.mxu1 }
0x157f   :  { %v5183_v32 = vld [vmem:[#allocation7 + $0xc8] ss:$0 sm:$0xff] }
0x159a   :  { %v5115_v35 = vpop.permute.xlu0 %5114 }
0x159b   :  { %v5117_v33 = vunpack.i.h.bf16 %v5115_v35  ;;  %v5116_v40 = vunpack.i.l.bf16 %v5115_v35 }
0x159d   :  { %v2882_v47 = vsel %vm180_vm8, %v2511_v27, %v5117_v33  ;;  %v2881_v0 = vsel %vm180_vm8, %v2487_v6, %v5116_v40 }
0x15aa   :  { %v5120_v39 = vpop.permute.xlu0 %5119 }
0x15ab   :  { %v5122_v41 = vunpack.i.h.bf16 %v5120_v39  ;;  %v5121_v42 = vunpack.i.l.bf16 %v5120_v39 }
0x15ad   :  { %v2883_v48 = vsel %vm659_vm10, %v2881_v0, %v5121_v42  ;;  %v2884_v51 = vsel %vm659_vm10, %v2882_v47, %v5122_v41  ;;  %v5028_v41 = vld [vmem:[#allocation5 + $0x108] sm:$0xff]  ;;  %v5027_v42 = vld [vmem:[#allocation5 + $0x100] sm:$0xff]  ;;  %v5025_v47 = vld [vmem:[#allocation5 + $0xf0] sm:$0xff] }
0x15ae   :  { %3057 = vmatpush.bf16.msrb.mxu1 %v5028_v41  ;;  %v5188_v41 = vld [vmem:[#allocation7 + $0xe0] ss:$0 sm:$0xff] }
0x15b2   :  { %3058 = vmatpush.bf16.msrb.mxu1 %v5027_v42 }
0x15eb   :  { %v5125_v44 = vpop.permute.xlu1 %5124 }
0x15ec   :  { %v5127_v54 = vunpack.i.h.bf16 %v5125_v44  ;;  %v5126_v38 = vunpack.i.l.bf16 %v5125_v44  ;;  %v5026_v44 = vld [vmem:[#allocation5 + $0xf8] sm:$0xff] }
0x15ed   :  { %3059 = vmatpush.bf16.msrb.mxu1 %v5026_v44 }
0x15ee   :  { %v2885_v60 = vsel %vm662_vm11, %v2883_v48, %v5126_v38  ;;  %v2886_v55 = vsel %vm662_vm11, %v2884_v51, %v5127_v54  ;;  %v5184_v54 = vld [vmem:[#allocation7 + $0xa0] ss:$0 sm:$0xff] }
0x15ef   :  { %v2887_v56 = vpack.c.bf16 %v2886_v55, %v2885_v60 }
0x15f1   :  { %4864 = vmatmul.msk.bf16.vlgmr.msrb.gmra.mxu3 %vm151_vm7, %v2887_v56  ;;  %3060 = vmatpush.bf16.msrb.mxu1 %v5025_v47 }
0x1674   :  { %v2918_v53 = vpop.f32.mrf.mxu3 }
0x1675   :  { %v2919_v5 = vadd.f32 %v5181_v57, %v2918_v53 }
0x1677   :  { %v2923_v58 = vadd.f32 %v2919_v5, %v6136_v37 }
0x1679   :  { %v2927_v63 = vsel %vm151_vm7, %v2923_v58, 0.0 }
0x167a   :  { %2928 = vadd.xlane.f32.xlu2 %v2927_v63 }
0x167c   :  { %v2920_v59 = vpop.f32.mrf.mxu3 }
0x167d   :  { %v2921_v62 = vadd.f32 %v5181_v57, %v2920_v59  ;;  %v5185_v57 = vld [vmem:[#allocation7 + $0xa8] ss:$0 sm:$0xff] }
0x167f   :  { %v2924_v1 = vadd.f32 %v2921_v62, %v6138_v29 }
0x1681   :  { %v2930_v2 = vsel %vm151_vm7, %v2924_v1, 0.0 }
0x1682   :  { %2931 = vadd.xlane.f32.xlu0 %v2930_v2 }
0x16ed   :  { %v2929_v3 = vpop.xlane.xlu2 %2928 }
0x16ee   :  { %v2933_v52 = vmul.f32 %v2929_v3, %v5765_v7 }
0x16f0   :  { %v2935_v61 = vsub.f32 %v2923_v58, %v2933_v52 }
0x16f2   :  { %v2937_v4 = vmul.f32 %v2935_v61, %v2935_v61 }
0x16f4   :  { %v2939_v6 = vsel %vm151_vm7, %v2937_v4, 0.0 }
0x16f5   :  { %v2932_v46 = vpop.xlane.xlu0 %2931  ;;  %2940 = vadd.xlane.f32.xlu1 %v2939_v6 }
0x16f6   :  { %v2934_v37 = vmul.f32 %v2932_v46, %v5765_v7 }
0x16f8   :  { %v2936_v27 = vsub.f32 %v2924_v1, %v2934_v37 }
0x16fa   :  { %v2938_v9 = vmul.f32 %v2936_v27, %v2936_v27 }
0x16fc   :  { %v2942_v10 = vsel %vm151_vm7, %v2938_v9, 0.0 }
0x16fd   :  { %2943 = vadd.xlane.f32.xlu2 %v2942_v10 }
0x1768   :  { %v2941_v29 = vpop.xlane.xlu1 %2940 }
0x1769   :  { %v2945_v12 = vmul.f32 %v2941_v29, %v5765_v7 }
0x176b   :  { %v2947_v13 = vadd.f32 1e-05, %v2945_v12 }
0x176d   :  { %5357 = vrsqrt.f32 %v2947_v13  ;;  %vm2955_vm5 = vweird.f32 %v2947_v13 }
0x1770   :  { %v2944_v16 = vpop.xlane.xlu2 %2943 }
0x1771   :  { %v2946_v8 = vmul.f32 %v2944_v16, %v5765_v7 }
0x1773   :  { %v5358_v17 = vpop.eup %5357  ;;  %v2948_v18 = vadd.f32 1e-05, %v2946_v8 }
0x1774   :  { %v2950_v19 = vmul.f32 %v5358_v17, %v2947_v13  ;;  %vm2956_vm4 = vweird.f32 %v5358_v17 }
0x1775   :  { %5359 = vrsqrt.f32 %v2948_v18  ;;  %vm2957_vm6 = vmor %vm2955_vm5, %vm2956_vm4  ;;  %vm2965_vm13 = vweird.f32 %v2948_v18 }
0x1776   :  { %v2951_v22 = vmul.f32 %v5358_v17, %v2950_v19 }
0x1778   :  { %v2952_v23 = vmul.f32 0.5, %v2951_v22 }
0x177a   :  { %v2953_v15 = vsub.f32 1.5, %v2952_v23 }
0x177b   :  { %v5360_v24 = vpop.eup %5359 }
0x177c   :  { %v2954_v21 = vmul.f32 %v5358_v17, %v2953_v15  ;;  %v2960_v43 = vmul.f32 %v5360_v24, %v2948_v18  ;;  %vm2966_vm12 = vweird.f32 %v5360_v24 }
0x177d   :  { %vm2967_vm14 = vmor %vm2965_vm13, %vm2966_vm12 }
0x177e   :  { %v2961_v26 = vmul.f32 %v5360_v24, %v2960_v43  ;;  %v2958_v49 = vsel %vm2957_vm6, %v5358_v17, %v2954_v21 }
0x177f   :  { %v2969_v31 = vmul.f32 %v2958_v49, %v2935_v61 }
0x1780   :  { %v2962_v28 = vmul.f32 0.5, %v2961_v26 }
0x1781   :  { %v2972_v34 = vmul.f32 %v5182_v30, %v2969_v31 }
0x1782   :  { %v2963_v25 = vsub.f32 1.5, %v2962_v28 }
0x1783   :  { %v2975_v39 = vadd.f32 %v5183_v32, %v2972_v34 }
0x1784   :  { %v2964_v20 = vmul.f32 %v5360_v24, %v2963_v25 }
0x1786   :  { %v2968_v50 = vsel %vm2967_vm14, %v5360_v24, %v2964_v20 }
0x1787   :  { %v2970_v36 = vmul.f32 %v2968_v50, %v2936_v27 }
0x1789   :  { %v2973_v35 = vmul.f32 %v5182_v30, %v2970_v36  ;;  %v5186_v30 = vld [vmem:[#allocation7 + $0xd0] ss:$0 sm:$0xff] }
0x178b   :  { %v2976_v33 = vadd.f32 %v5183_v32, %v2973_v35  ;;  %v5187_v32 = vld [vmem:[#allocation7 + $0xd8] ss:$0 sm:$0xff] }
0x178d   :  { %v2977_v40 = vpack.c.bf16 %v2976_v33, %v2975_v39 }
0x178f   :  { %4873 = vmatmul.msk.bf16.vlgmr.msrb.gmra.mxu0 %vm151_vm7, %v2977_v40 }
0x180c   :  { %v3008_v0 = vpop.f32.mrf.mxu0 }
0x180d   :  { %v3009_v38 = vadd.f32 %v5184_v54, %v3008_v0 }
0x180f   :  { %v3013_v60 = vmax.f32 %v3009_v38, 0.0 }
0x1814   :  { %v3010_v48 = vpop.f32.mrf.mxu0 }
0x1815   :  { %v3011_v51 = vadd.f32 %v5184_v54, %v3010_v48 }
0x1817   :  { %v3014_v55 = vmax.f32 %v3011_v51, 0.0 }
0x1819   :  { %v3015_v56 = vpack.c.bf16 %v3014_v55, %v3013_v60 }
0x181b   :  { %4890 = vmatmul.msk.bf16.vlgmr.msrb.gmra.mxu1 %vm835_vm3, %v3015_v56 }
0x1898   :  { %v3062_v53 = vpop.f32.mrf.mxu1 }
0x1899   :  { %v3063_v5 = vadd.f32 %v5185_v57, %v3062_v53 }
0x189b   :  { %v3067_v58 = vadd.f32 %v3063_v5, %v2975_v39 }
0x189d   :  { %v3071_v63 = vsel %vm151_vm7, %v3067_v58, 0.0 }
0x189e   :  { %3072 = vadd.xlane.f32.xlu2 %v3071_v63 }
0x18a0   :  { %v3064_v59 = vpop.f32.mrf.mxu1 }
0x18a1   :  { %v3065_v62 = vadd.f32 %v5185_v57, %v3064_v59 }
0x18a3   :  { %v3068_v1 = vadd.f32 %v3065_v62, %v2976_v33 }
0x18a5   :  { %v3074_v2 = vsel %vm151_vm7, %v3068_v1, 0.0 }
0x18a6   :  { %3075 = vadd.xlane.f32.xlu2 %v3074_v2 }
0x1911   :  { %v3073_v3 = vpop.xlane.xlu2 %3072 }
0x1912   :  { %v3077_v52 = vmul.f32 %v3073_v3, %v5765_v7 }
0x1914   :  { %v3079_v61 = vsub.f32 %v3067_v58, %v3077_v52 }
0x1916   :  { %v3081_v4 = vmul.f32 %v3079_v61, %v3079_v61 }
0x1918   :  { %v3083_v6 = vsel %vm151_vm7, %v3081_v4, 0.0 }
0x1919   :  { %3084 = vadd.xlane.f32.xlu2 %v3083_v6  ;;  %v3076_v46 = vpop.xlane.xlu2 %3075 }
0x191a   :  { %v3078_v37 = vmul.f32 %v3076_v46, %v5765_v7 }
0x191c   :  { %v3080_v27 = vsub.f32 %v3068_v1, %v3078_v37 }
0x191e   :  { %v3082_v9 = vmul.f32 %v3080_v27, %v3080_v27 }
0x1920   :  { %v3086_v10 = vsel %vm151_vm7, %v3082_v9, 0.0 }
0x1921   :  { %3087 = vadd.xlane.f32.xlu2 %v3086_v10 }
0x198c   :  { %v3085_v29 = vpop.xlane.xlu2 %3084 }
0x198d   :  { %v3089_v12 = vmul.f32 %v3085_v29, %v5765_v7 }
0x198f   :  { %v3091_v13 = vadd.f32 1e-05, %v3089_v12 }
0x1991   :  { %5361 = vrsqrt.f32 %v3091_v13  ;;  %vm3099_vm0 = vweird.f32 %v3091_v13 }
0x1994   :  { %v3088_v16 = vpop.xlane.xlu2 %3087 }
0x1995   :  { %v3090_v8 = vmul.f32 %v3088_v16, %v5765_v7 }
0x1997   :  { %v5362_v17 = vpop.eup %5361  ;;  %v3092_v18 = vadd.f32 1e-05, %v3090_v8 }
0x1998   :  { %v3094_v19 = vmul.f32 %v5362_v17, %v3091_v13  ;;  %vm3100_vm15 = vweird.f32 %v5362_v17 }
0x1999   :  { %5363 = vrsqrt.f32 %v3092_v18  ;;  %vm3101_vm1 = vmor %vm3099_vm0, %vm3100_vm15  ;;  %vm3109_vm4 = vweird.f32 %v3092_v18 }
0x199a   :  { %v3095_v22 = vmul.f32 %v5362_v17, %v3094_v19 }
0x199c   :  { %v3096_v23 = vmul.f32 0.5, %v3095_v22 }
0x199e   :  { %v3097_v15 = vsub.f32 1.5, %v3096_v23 }
0x199f   :  { %v5364_v24 = vpop.eup %5363 }
0x19a0   :  { %v3098_v21 = vmul.f32 %v5362_v17, %v3097_v15  ;;  %v3104_v43 = vmul.f32 %v5364_v24, %v3092_v18  ;;  %vm3110_vm2 = vweird.f32 %v5364_v24 }
0x19a1   :  { %vm3111_vm5 = vmor %vm3109_vm4, %vm3110_vm2 }
0x19a2   :  { %v3105_v26 = vmul.f32 %v5364_v24, %v3104_v43  ;;  %v3102_v49 = vsel %vm3101_vm1, %v5362_v17, %v3098_v21 }
0x19a3   :  { %v3113_v31 = vmul.f32 %v3102_v49, %v3079_v61 }
0x19a4   :  { %v3106_v28 = vmul.f32 0.5, %v3105_v26 }
0x19a5   :  { %v3116_v34 = vmul.f32 %v5186_v30, %v3113_v31 }
0x19a6   :  { %v3107_v25 = vsub.f32 1.5, %v3106_v28 }
0x19a7   :  { %v6289_v39 = vadd.f32 %v5187_v32, %v3116_v34 }
0x19a8   :  { %v3108_v20 = vmul.f32 %v5364_v24, %v3107_v25 }
0x19aa   :  { %v3112_v50 = vsel %vm3111_vm5, %v5364_v24, %v3108_v20 }
0x19ab   :  { %v3114_v36 = vmul.f32 %v3112_v50, %v3080_v27 }
0x19ad   :  { %v3117_v35 = vmul.f32 %v5186_v30, %v3114_v36 }
0x19af   :  { %v6291_v33 = vadd.f32 %v5187_v32, %v3117_v35 }
0x19b1   :  { %v3126_v40 = vpack.c.bf16 %v6291_v33, %v6289_v39 }
0x19b3   :  { %4899 = vmatmul.msk.bf16.vlgmr.msrb.gmra.mxu2 %vm151_vm7, %v3126_v40 }
0x1a36   :  { %v3152_v42 = vpop.f32.mrf.mxu2 }
0x1a37   :  { %v3153_v44 = vadd.f32 %v5188_v41, %v3152_v42 }
0x1a39   :  { %v3157_v47 = vmul.f32 0.35355338, %v3153_v44  ;;  %v3161_v0 = vpack.c.bf16 %v3153_v44, %v3153_v44 }
0x1a3b   :  { %v3164_v54 = vunpack.c.l.b16 %v3161_v0  ;;  %v3159_v38 = vpack.c.bf16 %v3157_v47, %v3157_v47 }
0x1a3d   :  { %v6296_v48 = vpack.c.b16 %v3164_v54, %v3164_v54  ;;  %v3278_v55 = vunpack.c.l.b16 %v3159_v38 }
0x1a3e   :  { %v3154_v51 = vpop.f32.mrf.mxu2 }
0x1a3f   :  { %v3155_v60 = vadd.f32 %v5188_v41, %v3154_v51  ;;  %3282 = vrot.lane.b32.xlu1 %v6296_v48, %s5556_s2  ;;  %3166 = vrot.lane.b32.xlu2 %v6296_v48, %s5557_s4  ;;  %v3279_v58 = vpack.c.b16 %v3278_v55, %v3278_v55 }
0x1a41   :  { %v3158_v56 = vmul.f32 0.35355338, %v3155_v60  ;;  %v3162_v57 = vpack.c.bf16 %v3155_v60, %v3155_v60 }
0x1a43   :  { %v3160_v53 = vpack.c.bf16 %v3158_v56, %v3158_v56  ;;  %v3188_v5 = vunpack.c.l.b16 %v3162_v57 }
0x1a45   :  { %v6302_v63 = vpack.c.b16 %v3188_v5, %v3188_v5  ;;  %v3304_v59 = vunpack.c.l.b16 %v3160_v53 }
0x1a47   :  { %v3305_v62 = vpack.c.b16 %v3304_v59, %v3304_v59  ;;  %3190 = vrot.lane.b32.xlu0 %v6302_v63, %s5557_s4  ;;  %3280 = vrot.lane.b32.xlu2 %v3279_v58, %s5558_s5 }
0x1a49   :  { %3306 = vrot.lane.b32.xlu1 %v3305_v62, %s5558_s5 }
0x1a4f   :  { %3308 = vrot.lane.b32.xlu0 %v6302_v63, %s5556_s2  ;;  %3420 = vrot.lane.b32.xlu2 %v6302_v63, %s5559_s6 }
0x1a51   :  { %3395 = vrot.lane.b32.xlu1 %v3279_v58, %s5560_s7 }
0x1a57   :  { %3397 = vrot.lane.b32.xlu0 %v6296_v48, %s5559_s6  ;;  %3509 = vrot.lane.b32.xlu2 %v6296_v48, %s5561_s8 }
0x1a59   :  { %3532 = vrot.lane.b32.xlu1 %v6302_v63, %s5561_s8 }
0x1a5f   :  { %3418 = vrot.lane.b32.xlu0 %v3305_v62, %s5560_s7  ;;  %3530 = vrot.lane.b32.xlu2 %v3305_v62, %s5562_s9 }
0x1a67   :  { %3507 = vrot.lane.b32.xlu0 %v3279_v58, %s5562_s9 }
0x1a6f   :  { %3256 = vrot.lane.b32.xlu0 %v6302_v63, %s5548_s20 }
0x1a99   :  { %v3167_v1 = vpop.permute.xlu2 %3166 }
0x1a9a   :  { %v3172_v2 = vsel %vm180_vm8, %v3167_v1, 0 }
0x1a9b   :  { %3181 = vmatpush.bf16.xpose.msra.mxu3 %v3172_v2 }
0x1aa1   :  { %v3281_v61 = vpop.permute.xlu2 %3280 }
0x1aa2   :  { %4900 = vmatmul.msk.bf16.vlgmr.msra.gmra.mxu3 %vm180_vm8, %v3159_v38 }
0x1aa9   :  { %v3421_v37 = vpop.permute.xlu2 %3420 }
0x1aaa   :  { %v3426_v10 = vsel %vm180_vm8, %v3421_v37, 0 }
0x1ab1   :  { %v3283_v3 = vpop.permute.xlu1 %3282  ;;  %v3510_v11 = vpop.permute.xlu2 %3509 }
0x1ab2   :  { %v3288_v52 = vsel %vm180_vm8, %v3283_v3, 0  ;;  %v3515_v14 = vsel %vm180_vm8, %v3510_v11, 0 }
0x1ab3   :  { %3297 = vmatpush.bf16.xpose.msrb.mxu3 %v3288_v52 }
0x1ab9   :  { %v3191_v4 = vpop.permute.xlu0 %3190  ;;  %v3531_v23 = vpop.permute.xlu2 %3530 }
0x1aba   :  { %v3196_v6 = vsel %vm180_vm8, %v3191_v4, 0  ;;  %4904 = vmatmul.msk.bf16.vlgmr.msrb.gmra.mxu3 %vm180_vm8, %v3281_v61 }
0x1abb   :  { %3205 = vmatpush.bf16.xpose.msra.mxu0 %v3196_v6  ;;  %v3307_v46 = vpop.permute.xlu1 %3306 }
0x1ac1   :  { %v3309_v27 = vpop.permute.xlu0 %3308 }
0x1ac2   :  { %v3314_v9 = vsel %vm180_vm8, %v3309_v27, 0  ;;  %4901 = vmatmul.msk.bf16.vlgmr.msra.gmra.mxu0 %vm180_vm8, %v3160_v53 }
0x1ac3   :  { %3323 = vmatpush.bf16.xpose.msrb.mxu0 %v3314_v9  ;;  %v3396_v29 = vpop.permute.xlu1 %3395 }
0x1ac9   :  { %v3398_v12 = vpop.permute.xlu0 %3397 }
0x1aca   :  { %v3403_v13 = vsel %vm180_vm8, %v3398_v12, 0 }
0x1acb   :  { %3435 = vmatpush.bf16.xpose.msra.mxu0 %v3426_v10  ;;  %3412 = vmatpush.bf16.xpose.msra.mxu3 %v3403_v13  ;;  %v3533_v16 = vpop.permute.xlu1 %3532 }
0x1acc   :  { %v3538_v17 = vsel %vm180_vm8, %v3533_v16, 0 }
0x1ad1   :  { %v3419_v8 = vpop.permute.xlu0 %3418 }
0x1ad2   :  { %4905 = vmatmul.msk.bf16.vlgmr.msrb.gmra.mxu0 %vm180_vm8, %v3307_v46  ;;  %4908 = vmatmul.msk.bf16.vlgmr.msra.gmra.mxu3 %vm180_vm8, %v3396_v29 }
0x1ad3   :  { %3524 = vmatpush.bf16.xpose.msrb.mxu3 %v3515_v14  ;;  %3547 = vmatpush.bf16.xpose.msrb.mxu0 %v3538_v17 }
0x1ad9   :  { %v3508_v18 = vpop.permute.xlu0 %3507 }
0x1ae1   :  { %v3257_v19 = vpop.permute.xlu0 %3256 }
0x1ae2   :  { %v3262_v22 = vsel %vm253_vm9, %v3257_v19, 0  ;;  %4909 = vmatmul.msk.bf16.vlgmr.msra.gmra.mxu0 %vm180_vm8, %v3419_v8  ;;  %4912 = vmatmul.msk.bf16.vlgmr.msrb.gmra.mxu3 %vm180_vm8, %v3508_v18 }
0x1ae3   :  { %3271 = vmatpush.bf16.msra.mxu2 %v3262_v22 }
0x1af2   :  { %4913 = vmatmul.msk.bf16.vlgmr.msrb.gmra.mxu0 %vm180_vm8, %v3531_v23 }
0x1b25   :  { %v3183_v15 = vpop.f32.mrf.mxu3 }
0x1b26   :  { %v3211_v24 = vsel %vm180_vm8, %v3183_v15, -inf }
0x1b27   :  { %3212 = vmax.xlane.f32.xlu0 %v3211_v24 }
0x1b2d   :  { %v3185_v21 = vpop.f32.mrf.mxu3 }
0x1b3d   :  { %v6342_v43 = vpop.f32.mrf.mxu3 }
0x1b3e   :  { %v3329_v30 = vsel %vm180_vm8, %v6342_v43, -inf }
0x1b3f   :  { %v3207_v26 = vpop.f32.mrf.mxu0 }
0x1b40   :  { %v3214_v49 = vsel %vm180_vm8, %v3207_v26, -inf }
0x1b41   :  { %3215 = vmax.xlane.f32.xlu1 %v3214_v49 }
0x1b45   :  { %v3301_v28 = vpop.f32.mrf.mxu3 }
0x1b47   :  { %v3209_v25 = vpop.f32.mrf.mxu0 }
0x1b49   :  { %3330 = vmax.xlane.f32.xlu1 %v3329_v30 }
0x1b4f   :  { %v3325_v31 = vpop.f32.mrf.mxu0 }
0x1b50   :  { %v3332_v20 = vsel %vm180_vm8, %v3325_v31, -inf }
0x1b51   :  { %3333 = vmax.xlane.f32.xlu2 %v3332_v20 }
0x1b55   :  { %v6348_v50 = vpop.f32.mrf.mxu3 }
0x1b56   :  { %v3441_v34 = vsel %vm180_vm8, %v6348_v50, -inf }
0x1b57   :  { %v3327_v32 = vpop.f32.mrf.mxu0 }
0x1b59   :  { %3442 = vmax.xlane.f32.xlu2 %v3441_v34 }
0x1b5d   :  { %v3416_v36 = vpop.f32.mrf.mxu3 }
0x1b5f   :  { %v3437_v35 = vpop.f32.mrf.mxu0 }
0x1b60   :  { %v3444_v40 = vsel %vm180_vm8, %v3437_v35, -inf }
0x1b61   :  { %3445 = vmax.xlane.f32.xlu0 %v3444_v40 }
0x1b65   :  { %v3526_v41 = vpop.f32.mrf.mxu3 }
0x1b66   :  { %v3553_v42 = vsel %vm180_vm8, %v3526_v41, -inf }
0x1b67   :  { %v3439_v44 = vpop.f32.mrf.mxu0  ;;  %3554 = vmax.xlane.f32.xlu2 %v3553_v42 }
0x1b6d   :  { %v3528_v47 = vpop.f32.mrf.mxu3 }
0x1b6f   :  { %v6354_v0 = vpop.f32.mrf.mxu0 }
0x1b70   :  { %v3556_v54 = vsel %vm180_vm8, %v6354_v0, -inf }
0x1b71   :  { %3557 = vmax.xlane.f32.xlu1 %v3556_v54 }
0x1b77   :  { %v3551_v38 = vpop.f32.mrf.mxu0 }
0x1b7f   :  { %3235 = vrot.lane.b32.xlu2 %v6296_v48, %s5548_s20 }
0x1b9a   :  { %v3213_v51 = vpop.xlane.xlu0 %3212 }
0x1b9b   :  { %v3217_v60 = vsub.f32 %v3183_v15, %v3213_v51 }
0x1b9d   :  { %v3219_v55 = vmul.f32 1.442695, %v3217_v60 }
0x1b9f   :  { %5365 = vpow2.f32 %v3219_v55 }
0x1ba5   :  { %v5366_v56 = vpop.eup %5365 }
0x1ba6   :  { %v3223_v57 = vsel %vm180_vm8, %v5366_v56, 0.0 }
0x1ba7   :  { %3224 = vadd.xlane.f32.xlu1 %v3223_v57 }
0x1bb4   :  { %v3216_v53 = vpop.xlane.xlu1 %3215 }
0x1bb5   :  { %v3218_v5 = vsub.f32 %v3207_v26, %v3216_v53 }
0x1bb7   :  { %v3221_v58 = vmul.f32 1.442695, %v3218_v5 }
0x1bb9   :  { %5367 = vpow2.f32 %v3221_v58 }
0x1bbc   :  { %v3331_v46 = vpop.xlane.xlu1 %3330 }
0x1bbd   :  { %v3335_v9 = vsub.f32 %v6342_v43, %v3331_v46 }
0x1bbf   :  { %v6361_v59 = vpop.eup %5367  ;;  %v3337_v12 = vmul.f32 1.442695, %v3335_v9 }
0x1bc0   :  { %3353 = vrot.lane.b32.xlu1 %v6296_v48, %s5563_s10  ;;  %v3226_v62 = vsel %vm180_vm8, %v6361_v59, 0.0 }
0x1bc1   :  { %3227 = vadd.xlane.f32.xlu0 %v3226_v62 }
0x1bc4   :  { %v3334_v1 = vpop.xlane.xlu2 %3333 }
0x1bc5   :  { %v3336_v14 = vsub.f32 %v3325_v31, %v3334_v1 }
0x1bc7   :  { %v3339_v8 = vmul.f32 1.442695, %v3336_v14 }
0x1bc8   :  { %3486 = vrot.lane.b32.xlu1 %v6302_v63, %s5564_s11 }
0x1bcc   :  { %v3443_v2 = vpop.xlane.xlu2 %3442 }
0x1bcd   :  { %v3447_v17 = vsub.f32 %v6348_v50, %v3443_v2 }
0x1bcf   :  { %v3449_v19 = vmul.f32 1.442695, %v3447_v17 }
0x1bd4   :  { %v3446_v3 = vpop.xlane.xlu0 %3445 }
0x1bd5   :  { %v3448_v52 = vsub.f32 %v3437_v35, %v3446_v3  ;;  %3374 = vrot.lane.b32.xlu0 %v6302_v63, %s5563_s10 }
0x1bd7   :  { %v3451_v61 = vmul.f32 1.442695, %v3448_v52 }
0x1bd9   :  { %5369 = vpow2.f32 %v3451_v61 }
0x1bda   :  { %v3555_v4 = vpop.xlane.xlu2 %3554 }
0x1bdb   :  { %v3559_v6 = vsub.f32 %v3526_v41, %v3555_v4 }
0x1bdd   :  { %v3561_v37 = vmul.f32 1.442695, %v3559_v6 }
0x1bdf   :  { %v6371_v27 = vpop.eup %5369  ;;  %5371 = vpow2.f32 %v3561_v37 }
0x1be0   :  { %v3456_v10 = vsel %vm180_vm8, %v6371_v27, 0.0  ;;  %5373 = vpow2.f32 %v3337_v12 }
0x1be1   :  { %3457 = vadd.xlane.f32.xlu2 %v3456_v10  ;;  %5375 = vpow2.f32 %v3339_v8 }
0x1be2   :  { %v3236_v29 = vpop.permute.xlu2 %3235  ;;  %5377 = vpow2.f32 %v3449_v19 }
0x1be3   :  { %v3241_v11 = vsel %vm253_vm9, %v3236_v29, 0 }
0x1be4   :  { %3250 = vmatpush.bf16.msra.mxu1 %v3241_v11  ;;  %v3558_v43 = vpop.xlane.xlu1 %3557 }
0x1be5   :  { %v6377_v13 = vpop.eup %5371  ;;  %v3560_v30 = vsub.f32 %v6354_v0, %v3558_v43 }
0x1be6   :  { %v3565_v16 = vsel %vm180_vm8, %v6377_v13, 0.0  ;;  %v5374_v18 = vpop.eup %5373 }
0x1be7   :  { %v3341_v22 = vsel %vm180_vm8, %v5374_v18, 0.0  ;;  %v5376_v23 = vpop.eup %5375  ;;  %v3563_v31 = vmul.f32 1.442695, %v3560_v30 }
0x1be8   :  { %v3344_v15 = vsel %vm180_vm8, %v5376_v23, 0.0  ;;  %v5378_v24 = vpop.eup %5377 }
0x1be9   :  { %3566 = vadd.xlane.f32.xlu2 %v3565_v16  ;;  %v3453_v21 = vsel %vm180_vm8, %v5378_v24, 0.0 }
0x1bf2   :  { %3342 = vadd.xlane.f32.xlu1 %v3341_v22 }
0x1bfa   :  { %3345 = vadd.xlane.f32.xlu1 %v3344_v15 }
0x1bff   :  { %3454 = vadd.xlane.f32.xlu0 %v3453_v21 }
0x1c01   :  { %3577 = vrot.lane.b32.xlu2 %v6296_v48, %s5565_s12 }
0x1c13   :  { %3465 = vrot.lane.b32.xlu1 %v6296_v48, %s5564_s11  ;;  %3598 = vrot.lane.b32.xlu0 %v6302_v63, %s5565_s12 }
0x1c1a   :  { %v3225_v26 = vpop.xlane.xlu1 %3224 }
0x1c1b   :  { %5379 = vrcp.f32 %v3225_v26 }
0x1c1c   :  { %5381 = vpow2.f32 %v3563_v31 }
0x1c21   :  { %v5380_v49 = vpop.eup %5379 }
0x1c22   :  { %v3231_v28 = vmul.f32 %v5380_v49, %v5366_v56  ;;  %v5382_v48 = vpop.eup %5381 }
0x1c23   :  { %v3568_v36 = vsel %vm180_vm8, %v5382_v48, 0.0 }
0x1c24   :  { %v3233_v25 = vpack.c.bf16 %v3231_v28, %v3231_v28 }
0x1c26   :  { %4902 = vmatmul.msk.bf16.vlgmr.msra.gmra.mxu1 %vm180_vm8, %v3233_v25 }
0x1c32   :  { %v3354_v20 = vpop.permute.xlu1 %3353 }
0x1c33   :  { %v3359_v50 = vsel %vm253_vm9, %v3354_v20, 0 }
0x1c34   :  { %v3228_v32 = vpop.xlane.xlu0 %3227  ;;  %3368 = vmatpush.bf16.msrb.mxu1 %v3359_v50  ;;  %v5032_v50 = vld [vmem:[#allocation5 + $0x128] sm:$0xff] }
0x1c35   :  { %5383 = vrcp.f32 %v3228_v32  ;;  %3677 = vmatpush.bf16.msra.mxu3 %v5032_v50  ;;  %v5031_v32 = vld [vmem:[#allocation5 + $0x120] sm:$0xff] }
0x1c39   :  { %3678 = vmatpush.bf16.msra.mxu3 %v5031_v32  ;;  %v5191_v32 = vld [vmem:[#allocation7 + $0x118] ss:$0 sm:$0xff] }
0x1c3a   :  { %v3487_v40 = vpop.permute.xlu1 %3486 }
0x1c3b   :  { %v5384_v34 = vpop.eup %5383  ;;  %v3492_v44 = vsel %vm253_vm9, %v3487_v40, 0 }
0x1c3c   :  { %v3232_v63 = vmul.f32 %v5384_v34, %v6361_v59 }
0x1c3d   :  { %3569 = vadd.xlane.f32.xlu1 %v3568_v36 }
0x1c3e   :  { %v3234_v35 = vpack.c.bf16 %v3232_v63, %v3232_v63 }
0x1c40   :  { %4903 = vmatmul.msk.bf16.vlgmr.msra.gmra.mxu2 %vm180_vm8, %v3234_v35 }
0x1c47   :  { %v3375_v41 = vpop.permute.xlu0 %3374 }
0x1c48   :  { %v3380_v42 = vsel %vm253_vm9, %v3375_v41, 0 }
0x1c49   :  { %3389 = vmatpush.bf16.msrb.mxu2 %v3380_v42 }
0x1c4d   :  { %3501 = vmatpush.bf16.msra.mxu2 %v3492_v44 }
0x1c54   :  { %v3458_v60 = vpop.xlane.xlu2 %3457 }
0x1c5c   :  { %v3567_v5 = vpop.xlane.xlu2 %3566 }
0x1c64   :  { %v3578_v1 = vpop.permute.xlu2 %3577 }
0x1c65   :  { %v3343_v47 = vpop.xlane.xlu1 %3342  ;;  %v3583_v46 = vsel %vm253_vm9, %v3578_v1, 0 }
0x1c66   :  { %5385 = vrcp.f32 %v3343_v47 }
0x1c6c   :  { %v5386_v0 = vpop.eup %5385 }
0x1c6d   :  { %v3349_v54 = vmul.f32 %v5386_v0, %v5374_v18  ;;  %v3346_v38 = vpop.xlane.xlu1 %3345 }
0x1c6e   :  { %5387 = vrcp.f32 %v3346_v38 }
0x1c6f   :  { %v3351_v51 = vpack.c.bf16 %v3349_v54, %v3349_v54  ;;  %5389 = vrcp.f32 %v3458_v60 }
0x1c71   :  { %4906 = vmatmul.msk.bf16.vlgmr.msrb.gmra.mxu1 %vm180_vm8, %v3351_v51 }
0x1c72   :  { %v3455_v53 = vpop.xlane.xlu0 %3454 }
0x1c73   :  { %5391 = vrcp.f32 %v3455_v53 }
0x1c74   :  { %v5388_v55 = vpop.eup %5387  ;;  %5393 = vrcp.f32 %v3567_v5 }
0x1c75   :  { %v3350_v56 = vmul.f32 %v5388_v55, %v5376_v23  ;;  %v5390_v58 = vpop.eup %5389 }
0x1c76   :  { %v3462_v62 = vmul.f32 %v5390_v58, %v6371_v27 }
0x1c77   :  { %v3352_v57 = vpack.c.bf16 %v3350_v56, %v3350_v56  ;;  %v5034_v56 = vld [vmem:[#allocation5 + $0x138] sm:$0xff] }
0x1c78   :  { %v3464_v6 = vpack.c.bf16 %v3462_v62, %v3462_v62  ;;  %3767 = vmatpush.bf16.msra.mxu0 %v5034_v56 }
0x1c79   :  { %4907 = vmatmul.msk.bf16.vlgmr.msrb.gmra.mxu2 %vm180_vm8, %v3352_v57  ;;  %v5392_v59 = vpop.eup %5391  ;;  %v5189_v57 = vld [vmem:[#allocation7 + $0xe8] ss:$0 sm:$0xff] }
0x1c7a   :  { %v3461_v2 = vmul.f32 %v5392_v59, %v5378_v24  ;;  %v5394_v27 = vpop.eup %5393 }
0x1c7b   :  { %v3573_v9 = vmul.f32 %v5394_v27, %v6377_v13 }
0x1c7c   :  { %v3463_v37 = vpack.c.bf16 %v3461_v2, %v3461_v2 }
0x1c7d   :  { %v3575_v10 = vpack.c.bf16 %v3573_v9, %v3573_v9 }
0x1c85   :  { %v3466_v3 = vpop.permute.xlu1 %3465  ;;  %v3599_v52 = vpop.permute.xlu0 %3598 }
0x1c86   :  { %v3471_v61 = vsel %vm253_vm9, %v3466_v3, 0  ;;  %v3604_v4 = vsel %vm253_vm9, %v3599_v52, 0  ;;  %v5033_v52 = vld [vmem:[#allocation5 + $0x130] sm:$0xff] }
0x1c87   :  { %3480 = vmatpush.bf16.msra.mxu1 %v3471_v61  ;;  %3613 = vmatpush.bf16.msrb.mxu2 %v3604_v4 }
0x1c88   :  { %3768 = vmatpush.bf16.msra.mxu0 %v5033_v52 }
0x1c89   :  { %4911 = vmatmul.msk.bf16.vlgmr.msra.gmra.mxu2 %vm180_vm8, %v3464_v6 }
0x1c8a   :  { %4910 = vmatmul.msk.bf16.vlgmr.msra.gmra.mxu1 %vm180_vm8, %v3463_v37 }
0x1c8b   :  { %3592 = vmatpush.bf16.msrb.mxu1 %v3583_v46 }
0x1c9a   :  { %4914 = vmatmul.msk.bf16.vlgmr.msrb.gmra.mxu1 %vm180_vm8, %v3575_v10 }
0x1ca3   :  { %v3252_v29 = vpop.f32.mrf.mxu1 }
0x1cab   :  { %v3254_v11 = vpop.f32.mrf.mxu1 }
0x1cb0   :  { %v3570_v12 = vpop.xlane.xlu1 %3569 }
0x1cb1   :  { %5395 = vrcp.f32 %v3570_v12 }
0x1cb7   :  { %v5396_v14 = vpop.eup %5395 }
0x1cb8   :  { %v3574_v16 = vmul.f32 %v5396_v14, %v5382_v48 }
0x1cba   :  { %v3576_v8 = vpack.c.bf16 %v3574_v16, %v3574_v16  ;;  %v5192_v16 = vld [vmem:[#allocation7 + $0xf0] ss:$0 sm:$0xff] }
0x1cbc   :  { %4915 = vmatmul.msk.bf16.vlgmr.msrb.gmra.mxu2 %vm180_vm8, %v3576_v8 }
0x1cc3   :  { %v3273_v17 = vpop.f32.mrf.mxu2 }
0x1ccb   :  { %v3275_v18 = vpop.f32.mrf.mxu2 }
0x1cee   :  { %v3370_v19 = vpop.f32.mrf.mxu1 }
0x1cf6   :  { %v3372_v22 = vpop.f32.mrf.mxu1 }
0x1cfc   :  { %v3391_v23 = vpop.f32.mrf.mxu2 }
0x1cfd   :  { %v5128_v15 = vpack.i.bf16 %v3391_v23, %v3370_v19 }
0x1cff   :  { %5129 = vrot.lane.b32.xlu0 %v5128_v15, %s5555_s30 }
0x1d04   :  { %v3393_v13 = vpop.f32.mrf.mxu2 }
0x1d07   :  { %v3482_v24 = vpop.f32.mrf.mxu1 }
0x1d0c   :  { %v3503_v21 = vpop.f32.mrf.mxu2 }
0x1d0d   :  { %v5133_v43 = vpack.i.bf16 %v3503_v21, %v3482_v24 }
0x1d0f   :  { %v3484_v26 = vpop.f32.mrf.mxu1  ;;  %5134 = vrot.lane.b32.xlu0 %v5133_v43, %s5566_s13 }
0x1d14   :  { %v3505_v49 = vpop.f32.mrf.mxu2 }
0x1d17   :  { %v3594_v28 = vpop.f32.mrf.mxu1 }
0x1d1f   :  { %v3596_v25 = vpop.f32.mrf.mxu1 }
0x1d3f   :  { %v3615_v30 = vpop.f32.mrf.mxu2 }
0x1d40   :  { %v5138_v31 = vpack.i.bf16 %v3615_v30, %v3594_v28  ;;  %v5190_v30 = vld [vmem:[#allocation7 + $0x110] ss:$0 sm:$0xff] }
0x1d42   :  { %5139 = vrot.lane.b32.xlu2 %v5138_v31, %s5567_s14 }
0x1d47   :  { %v3617_v20 = vpop.f32.mrf.mxu2 }
0x1d71   :  { %v5130_v48 = vpop.permute.xlu0 %5129 }
0x1d72   :  { %v5132_v63 = vunpack.i.h.bf16 %v5130_v48  ;;  %v5131_v36 = vunpack.i.l.bf16 %v5130_v48 }
0x1d74   :  { %v3644_v42 = vsel %vm180_vm8, %v3273_v17, %v5132_v63  ;;  %v3643_v44 = vsel %vm180_vm8, %v3252_v29, %v5131_v36 }
0x1d81   :  { %v5135_v34 = vpop.permute.xlu0 %5134 }
0x1d82   :  { %v5137_v35 = vunpack.i.h.bf16 %v5135_v34  ;;  %v5136_v40 = vunpack.i.l.bf16 %v5135_v34 }
0x1d84   :  { %v3646_v54 = vsel %vm659_vm10, %v3644_v42, %v5137_v35  ;;  %v3645_v38 = vsel %vm659_vm10, %v3643_v44, %v5136_v40 }
0x1d9c   :  { %v5140_v41 = vpop.permute.xlu2 %5139 }
0x1d9d   :  { %v5142_v47 = vunpack.i.h.bf16 %v5140_v41  ;;  %v5141_v0 = vunpack.i.l.bf16 %v5140_v41 }
0x1d9f   :  { %v3648_v51 = vsel %vm662_vm11, %v3646_v54, %v5142_v47  ;;  %v3647_v60 = vsel %vm662_vm11, %v3645_v38, %v5141_v0 }
0x1da0   :  { %v3649_v55 = vpack.c.bf16 %v3648_v51, %v3647_v60 }
0x1da2   :  { %4924 = vmatmul.msk.bf16.vlgmr.msra.gmra.mxu3 %vm151_vm7, %v3649_v55 }
0x1e25   :  { %v3680_v53 = vpop.f32.mrf.mxu3 }
0x1e26   :  { %v3681_v5 = vadd.f32 %v5189_v57, %v3680_v53 }
0x1e28   :  { %v3685_v58 = vadd.f32 %v3681_v5, %v6289_v39 }
0x1e2a   :  { %v3689_v59 = vsel %vm151_vm7, %v3685_v58, 0.0 }
0x1e2b   :  { %3690 = vadd.xlane.f32.xlu1 %v3689_v59 }
0x1e2d   :  { %v3682_v62 = vpop.f32.mrf.mxu3 }
0x1e2e   :  { %v3683_v1 = vadd.f32 %v5189_v57, %v3682_v62 }
0x1e30   :  { %v3686_v2 = vadd.f32 %v3683_v1, %v6291_v33 }
0x1e32   :  { %v3692_v3 = vsel %vm151_vm7, %v3686_v2, 0.0 }
0x1e33   :  { %3693 = vadd.xlane.f32.xlu0 %v3692_v3 }
0x1e44   :  { %3777 = vrot.lane.b32.xlu1 %v5034_v56, %s5557_s4 }
0x1e47   :  { %3782 = vrot.lane.b32.xlu0 %v5192_v16, %s5557_s4 }
0x1e9e   :  { %v3691_v61 = vpop.xlane.xlu1 %3690 }
0x1e9f   :  { %v3695_v4 = vmul.f32 %v3691_v61, %v5765_v7 }
0x1ea1   :  { %v3697_v6 = vsub.f32 %v3685_v58, %v3695_v4 }
0x1ea3   :  { %v3699_v46 = vmul.f32 %v3697_v6, %v3697_v6 }
0x1ea5   :  { %v3701_v39 = vsel %vm151_vm7, %v3699_v46, 0.0 }
0x1ea6   :  { %v3694_v37 = vpop.xlane.xlu0 %3693  ;;  %3702 = vadd.xlane.f32.xlu2 %v3701_v39 }
0x1ea7   :  { %v3696_v27 = vmul.f32 %v3694_v37, %v5765_v7 }
0x1ea9   :  { %v3698_v9 = vsub.f32 %v3686_v2, %v3696_v27 }
0x1eab   :  { %v3700_v33 = vmul.f32 %v3698_v9, %v3698_v9 }
0x1ead   :  { %v3704_v10 = vsel %vm151_vm7, %v3700_v33, 0.0 }
0x1eae   :  { %3705 = vadd.xlane.f32.xlu1 %v3704_v10 }
0x1eb6   :  { %v3778_v29 = vpop.permute.xlu1 %3777 }
0x1eb7   :  { %3791 = vmatpush.bf16.msra.mxu1 %v3778_v29 }
0x1eb9   :  { %v3783_v42 = vpop.permute.xlu0 %3782 }
0x1ec7   :  { %3775 = vrot.lane.b32.xlu1 %v5033_v52, %s5557_s4 }
0x1f19   :  { %v3703_v11 = vpop.xlane.xlu2 %3702 }
0x1f1a   :  { %v3707_v12 = vmul.f32 %v3703_v11, %v5765_v7 }
0x1f1c   :  { %v3709_v14 = vadd.f32 1e-05, %v3707_v12 }
0x1f1e   :  { %5397 = vrsqrt.f32 %v3709_v14  ;;  %vm3717_vm12 = vweird.f32 %v3709_v14 }
0x1f21   :  { %v3706_v8 = vpop.xlane.xlu1 %3705 }
0x1f22   :  { %v3708_v17 = vmul.f32 %v3706_v8, %v5765_v7 }
0x1f24   :  { %v5398_v18 = vpop.eup %5397  ;;  %v3710_v19 = vadd.f32 1e-05, %v3708_v17 }
0x1f25   :  { %v3712_v22 = vmul.f32 %v5398_v18, %v3709_v14  ;;  %vm3718_vm6 = vweird.f32 %v5398_v18 }
0x1f26   :  { %5399 = vrsqrt.f32 %v3710_v19  ;;  %vm3719_vm13 = vmor %vm3717_vm12, %vm3718_vm6  ;;  %vm3727_vm15 = vweird.f32 %v3710_v19 }
0x1f27   :  { %v3713_v23 = vmul.f32 %v5398_v18, %v3712_v22 }
0x1f29   :  { %v3714_v15 = vmul.f32 0.5, %v3713_v23 }
0x1f2b   :  { %v3715_v13 = vsub.f32 1.5, %v3714_v15 }
0x1f2c   :  { %v5400_v24 = vpop.eup %5399 }
0x1f2d   :  { %v3716_v21 = vmul.f32 %v5398_v18, %v3715_v13  ;;  %v3722_v43 = vmul.f32 %v5400_v24, %v3710_v19  ;;  %vm3728_vm14 = vweird.f32 %v5400_v24 }
0x1f2e   :  { %vm3729_vm0 = vmor %vm3727_vm15, %vm3728_vm14 }
0x1f2f   :  { %v3723_v26 = vmul.f32 %v5400_v24, %v3722_v43  ;;  %v3720_v49 = vsel %vm3719_vm13, %v5398_v18, %v3716_v21 }
0x1f30   :  { %v3731_v31 = vmul.f32 %v3720_v49, %v3697_v6 }
0x1f31   :  { %v3724_v28 = vmul.f32 0.5, %v3723_v26 }
0x1f32   :  { %v3734_v48 = vmul.f32 %v5190_v30, %v3731_v31 }
0x1f33   :  { %v3725_v25 = vsub.f32 1.5, %v3724_v28 }
0x1f34   :  { %v6433_v35 = vadd.f32 %v5191_v32, %v3734_v48 }
0x1f35   :  { %v3726_v20 = vmul.f32 %v5400_v24, %v3725_v25 }
0x1f37   :  { %v3730_v50 = vsel %vm3729_vm0, %v5400_v24, %v3726_v20 }
0x1f38   :  { %v3732_v34 = vmul.f32 %v3730_v50, %v3698_v9 }
0x1f39   :  { %v3776_v63 = vpop.permute.xlu1 %3775 }
0x1f3a   :  { %v3735_v36 = vmul.f32 %v5190_v30, %v3732_v34  ;;  %3792 = vmatpush.bf16.msra.mxu1 %v3776_v63 }
0x1f3c   :  { %v6435_v40 = vadd.f32 %v5191_v32, %v3735_v36 }
0x1f3d   :  { %4934 = vmatmul.msk.bf16.vlgmr.msra.gmra.mxu1 %vm151_vm7, %v6130_v45 }
0x1f3e   :  { %v3744_v41 = vpack.c.bf16 %v6435_v40, %v6433_v35 }
0x1f40   :  { %4933 = vmatmul.msk.bf16.vlgmr.msra.gmra.mxu0 %vm151_vm7, %v3744_v41 }
0x1fba   :  { %v3794_v44 = vpop.f32.mrf.mxu1 }
0x1fbb   :  { %v3795_v47 = vadd.f32 %v3794_v44, %v3783_v42 }
0x1fbd   :  { %v3803_v0 = vpack.c.bf16 %v3795_v47, %v3795_v47  ;;  %v3770_v54 = vpop.f32.mrf.mxu0 }
0x1fbe   :  { %v3771_v38 = vadd.f32 %v5192_v16, %v3770_v54 }
0x1fbf   :  { %v3809_v51 = vsel %vm180_vm8, %v3803_v0, 0  ;;  %v3868_v60 = vunpack.c.l.b16 %v3803_v0 }
0x1fc0   :  { %3818 = vmatpush.bf16.xpose.msra.mxu2 %v3809_v51  ;;  %v3799_v56 = vmul.f32 0.35355338, %v3771_v38 }
0x1fc1   :  { %v6443_v55 = vpack.c.b16 %v3868_v60, %v3868_v60 }
0x1fc2   :  { %v3796_v57 = vpop.f32.mrf.mxu1  ;;  %v3801_v53 = vpack.c.bf16 %v3799_v56, %v3799_v56 }
0x1fc3   :  { %v3797_v45 = vadd.f32 %v3796_v57, %v3783_v42  ;;  %3920 = vrot.lane.b32.xlu2 %v6443_v55, %s5558_s5 }
0x1fc4   :  { %v3916_v4 = vunpack.c.l.b16 %v3801_v53 }
0x1fc5   :  { %v3804_v5 = vpack.c.bf16 %v3797_v45, %v3797_v45  ;;  %v3772_v58 = vpop.f32.mrf.mxu0 }
0x1fc6   :  { %v3773_v59 = vadd.f32 %v5192_v16, %v3772_v58  ;;  %v3917_v46 = vpack.c.b16 %v3916_v4, %v3916_v4 }
0x1fc7   :  { %v3828_v62 = vsel %vm180_vm8, %v3804_v5, 0  ;;  %v3892_v1 = vunpack.c.l.b16 %v3804_v5  ;;  %4935 = vmatmul.msk.bf16.vlgmr.msra.gmra.mxu2 %vm180_vm8, %v3801_v53 }
0x1fc8   :  { %v3800_v2 = vmul.f32 0.35355338, %v3773_v59  ;;  %3837 = vmatpush.bf16.xpose.msrb.mxu3 %v3828_v62 }
0x1fc9   :  { %v6449_v3 = vpack.c.b16 %v3892_v1, %v3892_v1 }
0x1fca   :  { %v3802_v52 = vpack.c.bf16 %v3800_v2, %v3800_v2 }
0x1fcb   :  { %3946 = vrot.lane.b32.xlu1 %v6449_v3, %s5558_s5  ;;  %4058 = vrot.lane.b32.xlu2 %v6449_v3, %s5560_s7 }
0x1fcc   :  { %v3942_v61 = vunpack.c.l.b16 %v3802_v52 }
0x1fce   :  { %v3943_v6 = vpack.c.b16 %v3942_v61, %v3942_v61 }
0x1fcf   :  { %4936 = vmatmul.msk.bf16.vlgmr.msrb.gmra.mxu3 %vm180_vm8, %v3802_v52 }
0x1fd0   :  { %3944 = vrot.lane.b32.xlu0 %v3943_v6, %s5558_s5 }
0x1fd3   :  { %3918 = vrot.lane.b32.xlu1 %v3917_v46, %s5558_s5  ;;  %4147 = vrot.lane.b32.xlu2 %v6443_v55, %s5562_s9 }
0x1fd8   :  { %4033 = vrot.lane.b32.xlu0 %v3917_v46, %s5560_s7 }
0x1fdb   :  { %4035 = vrot.lane.b32.xlu1 %v6443_v55, %s5560_s7  ;;  %4168 = vrot.lane.b32.xlu2 %v3943_v6, %s5562_s9 }
0x1fe0   :  { %4170 = vrot.lane.b32.xlu0 %v6449_v3, %s5562_s9 }
0x1fe3   :  { %4056 = vrot.lane.b32.xlu1 %v3943_v6, %s5560_s7 }
0x1feb   :  { %4145 = vrot.lane.b32.xlu1 %v3917_v46, %s5562_s9 }
0x1ff3   :  { %3870 = vrot.lane.b32.xlu1 %v6443_v55, %s5557_s4 }
0x201d   :  { %v3921_v39 = vpop.permute.xlu2 %3920 }
0x201e   :  { %v3926_v37 = vsel %vm180_vm8, %v3921_v39, 0 }
0x201f   :  { %3935 = vmatpush.bf16.xpose.msrb.mxu2 %v3926_v37 }
0x2025   :  { %v4059_v27 = vpop.permute.xlu2 %4058 }
0x2026   :  { %v4064_v10 = vsel %vm180_vm8, %v4059_v27, 0 }
0x202d   :  { %v4148_v8 = vpop.permute.xlu2 %4147 }
0x202e   :  { %v4153_v19 = vsel %vm180_vm8, %v4148_v8, 0 }
0x2035   :  { %v4169_v49 = vpop.permute.xlu2 %4168 }
0x203d   :  { %v3947_v9 = vpop.permute.xlu1 %3946 }
0x203e   :  { %v3952_v33 = vsel %vm180_vm8, %v3947_v9, 0 }
0x203f   :  { %3961 = vmatpush.bf16.xpose.msra.mxu3 %v3952_v33 }
0x2042   :  { %v3945_v29 = vpop.permute.xlu0 %3944 }
0x2045   :  { %v3919_v11 = vpop.permute.xlu1 %3918 }
0x2046   :  { %4939 = vmatmul.msk.bf16.vlgmr.msrb.gmra.mxu2 %vm180_vm8, %v3919_v11  ;;  %4940 = vmatmul.msk.bf16.vlgmr.msra.gmra.mxu3 %vm180_vm8, %v3945_v29 }
0x2047   :  { %4073 = vmatpush.bf16.xpose.msrb.mxu3 %v4064_v10 }
0x204a   :  { %v4034_v12 = vpop.permute.xlu0 %4033  ;;  %v3820_v14 = vpop.f32.mrf.mxu2 }
0x204b   :  { %v3843_v16 = vsel %vm180_vm8, %v3820_v14, -inf }
0x204c   :  { %3844 = vmax.xlane.f32.xlu0 %v3843_v16 }
0x204d   :  { %v4036_v17 = vpop.permute.xlu1 %4035 }
0x204e   :  { %v4041_v18 = vsel %vm180_vm8, %v4036_v17, 0 }
0x204f   :  { %4050 = vmatpush.bf16.xpose.msra.mxu2 %v4041_v18 }
0x2052   :  { %v4171_v22 = vpop.permute.xlu0 %4170  ;;  %v3822_v23 = vpop.f32.mrf.mxu2 }
0x2053   :  { %v4176_v15 = vsel %vm180_vm8, %v4171_v22, 0  ;;  %v3839_v13 = vpop.f32.mrf.mxu3 }
0x2054   :  { %v3846_v24 = vsel %vm180_vm8, %v3839_v13, -inf  ;;  %4185 = vmatpush.bf16.xpose.msra.mxu3 %v4176_v15 }
0x2055   :  { %3847 = vmax.xlane.f32.xlu1 %v3846_v24  ;;  %v4057_v21 = vpop.permute.xlu1 %4056 }
0x2056   :  { %4943 = vmatmul.msk.bf16.vlgmr.msra.gmra.mxu2 %vm180_vm8, %v4034_v12  ;;  %4944 = vmatmul.msk.bf16.vlgmr.msrb.gmra.mxu3 %vm180_vm8, %v4057_v21 }
0x2057   :  { %4162 = vmatpush.bf16.xpose.msrb.mxu2 %v4153_v19 }
0x205b   :  { %v3841_v43 = vpop.f32.mrf.mxu3 }
0x205d   :  { %v4146_v26 = vpop.permute.xlu1 %4145 }
0x2065   :  { %v3871_v28 = vpop.permute.xlu1 %3870 }
0x2066   :  { %v3876_v25 = vsel %vm253_vm9, %v3871_v28, 0  ;;  %4947 = vmatmul.msk.bf16.vlgmr.msrb.gmra.mxu2 %vm180_vm8, %v4146_v26  ;;  %4948 = vmatmul.msk.bf16.vlgmr.msra.gmra.mxu3 %vm180_vm8, %v4169_v49 }
0x2067   :  { %3885 = vmatpush.bf16.msrb.mxu0 %v3876_v25 }
0x20bf   :  { %v3845_v30 = vpop.xlane.xlu0 %3844 }
0x20c0   :  { %v3849_v31 = vsub.f32 %v3820_v14, %v3845_v30 }
0x20c2   :  { %v3851_v20 = vmul.f32 1.442695, %v3849_v31 }
0x20c4   :  { %5401 = vpow2.f32 %v3851_v20 }
0x20c8   :  { %v3848_v50 = vpop.xlane.xlu1 %3847 }
0x20c9   :  { %v3850_v32 = vsub.f32 %v3839_v13, %v3848_v50  ;;  %v3937_v48 = vpop.f32.mrf.mxu2  ;;  %v3963_v34 = vpop.f32.mrf.mxu3 }
0x20ca   :  { %v3970_v63 = vsel %vm180_vm8, %v3963_v34, -inf  ;;  %v3967_v36 = vsel %vm180_vm8, %v3937_v48, -inf  ;;  %v5402_v42 = vpop.eup %5401 }
0x20cb   :  { %v3853_v41 = vmul.f32 1.442695, %v3850_v32  ;;  %3971 = vmax.xlane.f32.xlu0 %v3970_v63  ;;  %3968 = vmax.xlane.f32.xlu2 %v3967_v36  ;;  %v3855_v0 = vsel %vm180_vm8, %v5402_v42, 0.0 }
0x20cd   :  { %5403 = vpow2.f32 %v3853_v41 }
0x20d1   :  { %v3939_v44 = vpop.f32.mrf.mxu2  ;;  %v3965_v47 = vpop.f32.mrf.mxu3 }
0x20d3   :  { %v5404_v54 = vpop.eup %5403  ;;  %3856 = vadd.xlane.f32.xlu2 %v3855_v0 }
0x20d4   :  { %v3858_v38 = vsel %vm180_vm8, %v5404_v54, 0.0 }
0x20d5   :  { %3859 = vadd.xlane.f32.xlu0 %v3858_v38 }
0x20d9   :  { %v4052_v51 = vpop.f32.mrf.mxu2  ;;  %v4075_v60 = vpop.f32.mrf.mxu3 }
0x20da   :  { %v4082_v56 = vsel %vm180_vm8, %v4075_v60, -inf  ;;  %v4079_v57 = vsel %vm180_vm8, %v4052_v51, -inf }
0x20db   :  { %4083 = vmax.xlane.f32.xlu2 %v4082_v56  ;;  %4080 = vmax.xlane.f32.xlu1 %v4079_v57 }
0x20e1   :  { %v4054_v45 = vpop.f32.mrf.mxu2  ;;  %v4077_v53 = vpop.f32.mrf.mxu3 }
0x20e9   :  { %3991 = vrot.lane.b32.xlu0 %v6443_v55, %s5556_s2  ;;  %v6493_v5 = vpop.f32.mrf.mxu2  ;;  %v4187_v58 = vpop.f32.mrf.mxu3 }
0x20ea   :  { %v4194_v59 = vsel %vm180_vm8, %v4187_v58, -inf  ;;  %v4191_v2 = vsel %vm180_vm8, %v6493_v5, -inf }
0x20eb   :  { %4195 = vmax.xlane.f32.xlu1 %v4194_v59 }
0x20f1   :  { %v4166_v62 = vpop.f32.mrf.mxu2  ;;  %v4189_v1 = vpop.f32.mrf.mxu3 }
0x20f3   :  { %3894 = vrot.lane.b32.xlu2 %v6449_v3, %s5557_s4 }
0x2104   :  { %4012 = vrot.lane.b32.xlu1 %v6449_v3, %s5556_s2 }
0x2113   :  { %4192 = vmax.xlane.f32.xlu0 %v4191_v2 }
0x2127   :  { %4103 = vrot.lane.b32.xlu0 %v6443_v55, %s5559_s6 }
0x213e   :  { %v3969_v52 = vpop.xlane.xlu2 %3968  ;;  %v3972_v61 = vpop.xlane.xlu0 %3971 }
0x213f   :  { %v3973_v4 = vsub.f32 %v3937_v48, %v3969_v52  ;;  %v3974_v39 = vsub.f32 %v3963_v34, %v3972_v61 }
0x2141   :  { %v3975_v6 = vmul.f32 1.442695, %v3973_v4  ;;  %v3977_v27 = vmul.f32 1.442695, %v3974_v39 }
0x2143   :  { %5405 = vpow2.f32 %v3975_v6 }
0x2146   :  { %v3857_v46 = vpop.xlane.xlu2 %3856 }
0x2147   :  { %5407 = vrcp.f32 %v3857_v46 }
0x2148   :  { %v3860_v37 = vpop.xlane.xlu0 %3859 }
0x2149   :  { %v5406_v9 = vpop.eup %5405  ;;  %5409 = vrcp.f32 %v3860_v37 }
0x214a   :  { %5411 = vpow2.f32 %v3977_v27  ;;  %v3979_v8 = vsel %vm180_vm8, %v5406_v9, 0.0 }
0x214d   :  { %v5408_v33 = vpop.eup %5407 }
0x214e   :  { %v3863_v10 = vmul.f32 %v5408_v33, %v5402_v42  ;;  %v4084_v29 = vpop.xlane.xlu2 %4083  ;;  %v4081_v11 = vpop.xlane.xlu1 %4080 }
0x214f   :  { %v4086_v12 = vsub.f32 %v4075_v60, %v4084_v29  ;;  %v4085_v14 = vsub.f32 %v4052_v51, %v4081_v11  ;;  %v5410_v19 = vpop.eup %5409 }
0x2150   :  { %v3865_v16 = vpack.c.bf16 %v3863_v10, %v3863_v10  ;;  %v5412_v22 = vpop.eup %5411  ;;  %v3864_v23 = vmul.f32 %v5410_v19, %v5404_v54 }
0x2151   :  { %v4089_v17 = vmul.f32 1.442695, %v4086_v12  ;;  %v4087_v18 = vmul.f32 1.442695, %v4085_v14  ;;  %3980 = vadd.xlane.f32.xlu0 %v3979_v8  ;;  %v3982_v24 = vsel %vm180_vm8, %v5412_v22, 0.0 }
0x2152   :  { %4937 = vmatmul.msk.bf16.vlgmr.msrb.gmra.mxu0 %vm180_vm8, %v3865_v16  ;;  %v3866_v43 = vpack.c.bf16 %v3864_v23, %v3864_v23 }
0x2153   :  { %5413 = vpow2.f32 %v4089_v17 }
0x2154   :  { %5415 = vpow2.f32 %v4087_v18 }
0x2156   :  { %v3895_v15 = vpop.permute.xlu2 %3894 }
0x2157   :  { %v3900_v13 = vsel %vm253_vm9, %v3895_v15, 0 }
0x2158   :  { %3909 = vmatpush.bf16.msrb.mxu1 %v3900_v13 }
0x2159   :  { %v6508_v21 = vpop.eup %5413  ;;  %3983 = vadd.xlane.f32.xlu0 %v3982_v24 }
0x215a   :  { %v5416_v26 = vpop.eup %5415  ;;  %v4094_v49 = vsel %vm180_vm8, %v6508_v21, 0.0 }
0x215b   :  { %v3992_v28 = vpop.permute.xlu0 %3991  ;;  %4938 = vmatmul.msk.bf16.vlgmr.msrb.gmra.mxu1 %vm180_vm8, %v3866_v43  ;;  %4095 = vadd.xlane.f32.xlu1 %v4094_v49  ;;  %v4091_v25 = vsel %vm180_vm8, %v5416_v26, 0.0 }
0x215c   :  { %v3997_v30 = vsel %vm253_vm9, %v3992_v28, 0  ;;  %4092 = vadd.xlane.f32.xlu2 %v4091_v25 }
0x215d   :  { %4006 = vmatpush.bf16.msra.mxu0 %v3997_v30 }
0x215e   :  { %v4196_v31 = vpop.xlane.xlu1 %4195 }
0x215f   :  { %v4198_v20 = vsub.f32 %v4187_v58, %v4196_v31 }
0x2161   :  { %v4201_v50 = vmul.f32 1.442695, %v4198_v20 }
0x2163   :  { %5417 = vpow2.f32 %v4201_v50  ;;  %v5036_v50 = vld [vmem:[#allocation5 + $0x148] sm:$0xff] }
0x2164   :  { %4315 = vmatpush.bf16.msra.mxu2 %v5036_v50 }
0x2169   :  { %v5418_v32 = vpop.eup %5417 }
0x216a   :  { %v4206_v48 = vsel %vm180_vm8, %v5418_v32, 0.0 }
0x216b   :  { %4207 = vadd.xlane.f32.xlu2 %v4206_v48 }
0x216d   :  { %4124 = vrot.lane.b32.xlu0 %v6449_v3, %s5559_s6 }
0x2174   :  { %4236 = vrot.lane.b32.xlu1 %v6449_v3, %s5561_s8 }
0x2176   :  { %v4013_v34 = vpop.permute.xlu1 %4012 }
0x2177   :  { %v4018_v63 = vsel %vm253_vm9, %v4013_v34, 0 }
0x2178   :  { %4027 = vmatpush.bf16.msra.mxu1 %v4018_v63 }
0x2183   :  { %4215 = vrot.lane.b32.xlu2 %v6443_v55, %s5561_s8 }
0x2186   :  { %v4193_v36 = vpop.xlane.xlu0 %4192 }
0x2187   :  { %v4197_v41 = vsub.f32 %v6493_v5, %v4193_v36 }
0x2189   :  { %v4199_v42 = vmul.f32 1.442695, %v4197_v41 }
0x218b   :  { %5419 = vpow2.f32 %v4199_v42 }
0x2191   :  { %v5420_v44 = vpop.eup %5419 }
0x2192   :  { %v4203_v47 = vsel %vm180_vm8, %v5420_v44, 0.0 }
0x2197   :  { %4204 = vadd.xlane.f32.xlu0 %v4203_v47 }
0x2199   :  { %v4104_v0 = vpop.permute.xlu0 %4103 }
0x219a   :  { %v4109_v54 = vsel %vm253_vm9, %v4104_v0, 0 }
0x219b   :  { %4118 = vmatpush.bf16.msrb.mxu0 %v4109_v54 }
0x21c4   :  { %v3981_v3 = vpop.xlane.xlu0 %3980 }
0x21c5   :  { %5421 = vrcp.f32 %v3981_v3 }
0x21cb   :  { %v5422_v38 = vpop.eup %5421 }
0x21cc   :  { %v3987_v51 = vmul.f32 %v5422_v38, %v5406_v9  ;;  %v3984_v60 = vpop.xlane.xlu0 %3983 }
0x21cd   :  { %5423 = vrcp.f32 %v3984_v60 }
0x21ce   :  { %v3989_v55 = vpack.c.bf16 %v3987_v51, %v3987_v51  ;;  %v4096_v58 = vpop.xlane.xlu1 %4095 }
0x21cf   :  { %v4093_v56 = vpop.xlane.xlu2 %4092  ;;  %v6526_v57 = vpop.f32.mrf.mxu0 }
0x21d0   :  { %4941 = vmatmul.msk.bf16.vlgmr.msra.gmra.mxu0 %vm180_vm8, %v3989_v55  ;;  %5425 = vrcp.f32 %v4093_v56 }
0x21d1   :  { %5427 = vrcp.f32 %v4096_v58 }
0x21d3   :  { %v5424_v45 = vpop.eup %5423 }
0x21d4   :  { %v3988_v53 = vmul.f32 %v5424_v45, %v5412_v22  ;;  %v5193_v45 = vld [vmem:[#allocation7 + $0xf8] ss:$0 sm:$0xff] }
0x21d6   :  { %v3990_v5 = vpack.c.bf16 %v3988_v53, %v3988_v53  ;;  %v5426_v59 = vpop.eup %5425 }
0x21d7   :  { %v3889_v62 = vpop.f32.mrf.mxu0  ;;  %v4099_v2 = vmul.f32 %v5426_v59, %v5416_v26  ;;  %v5428_v4 = vpop.eup %5427 }
0x21d8   :  { %4942 = vmatmul.msk.bf16.vlgmr.msra.gmra.mxu1 %vm180_vm8, %v3990_v5  ;;  %v3911_v1 = vpop.f32.mrf.mxu1  ;;  %v4100_v37 = vmul.f32 %v5428_v4, %v6508_v21 }
0x21d9   :  { %v4101_v52 = vpack.c.bf16 %v4099_v2, %v4099_v2 }
0x21da   :  { %v4102_v27 = vpack.c.bf16 %v4100_v37, %v4100_v37 }
0x21de   :  { %v4208_v61 = vpop.xlane.xlu2 %4207 }
0x21df   :  { %v4125_v6 = vpop.permute.xlu0 %4124  ;;  %5429 = vrcp.f32 %v4208_v61 }
0x21e0   :  { %v4130_v46 = vsel %vm253_vm9, %v4125_v6, 0  ;;  %4945 = vmatmul.msk.bf16.vlgmr.msrb.gmra.mxu0 %vm180_vm8, %v4101_v52  ;;  %v3913_v39 = vpop.f32.mrf.mxu1 }
0x21e1   :  { %4139 = vmatpush.bf16.msrb.mxu1 %v4130_v46 }
0x21e5   :  { %v5430_v11 = vpop.eup %5429 }
0x21e6   :  { %v4216_v9 = vpop.permute.xlu2 %4215  ;;  %v4237_v33 = vpop.permute.xlu1 %4236  ;;  %v4212_v12 = vmul.f32 %v5430_v11, %v5418_v32  ;;  %v5035_v32 = vld [vmem:[#allocation5 + $0x140] sm:$0xff]  ;;  %v5037_v11 = vld [vmem:[#allocation5 + $0x150] sm:$0xff] }
0x21e7   :  { %v4221_v10 = vsel %vm253_vm9, %v4216_v9, 0  ;;  %v4242_v29 = vsel %vm253_vm9, %v4237_v33, 0  ;;  %4316 = vmatpush.bf16.msra.mxu2 %v5035_v32 }
0x21e8   :  { %4946 = vmatmul.msk.bf16.vlgmr.msrb.gmra.mxu1 %vm180_vm8, %v4102_v27  ;;  %4230 = vmatpush.bf16.msra.mxu0 %v4221_v10  ;;  %v4214_v14 = vpack.c.bf16 %v4212_v12, %v4212_v12 }
0x21e9   :  { %4251 = vmatpush.bf16.msra.mxu1 %v4242_v29 }
0x21f8   :  { %4950 = vmatmul.msk.bf16.vlgmr.msra.gmra.mxu1 %vm180_vm8, %v4214_v14 }
0x220a   :  { %v4205_v16 = vpop.xlane.xlu0 %4204 }
0x220b   :  { %5431 = vrcp.f32 %v4205_v16 }
0x2211   :  { %v5432_v8 = vpop.eup %5431 }
0x2212   :  { %v4211_v17 = vmul.f32 %v5432_v8, %v5420_v44 }
0x2214   :  { %v4213_v18 = vpack.c.bf16 %v4211_v17, %v4211_v17 }
0x2216   :  { %4949 = vmatmul.msk.bf16.vlgmr.msra.gmra.mxu0 %vm180_vm8, %v4213_v18 }
0x224d   :  { %v4008_v19 = vpop.f32.mrf.mxu0 }
0x2255   :  { %v4010_v22 = vpop.f32.mrf.mxu0  ;;  %v4029_v23 = vpop.f32.mrf.mxu1 }
0x2256   :  { %v5143_v15 = vpack.i.bf16 %v4029_v23, %v4008_v19 }
0x2258   :  { %5144 = vrot.lane.b32.xlu2 %v5143_v15, %s5555_s30 }
0x225d   :  { %v4031_v13 = vpop.f32.mrf.mxu1  ;;  %v4120_v24 = vpop.f32.mrf.mxu0 }
0x2265   :  { %v4122_v21 = vpop.f32.mrf.mxu0  ;;  %v4141_v43 = vpop.f32.mrf.mxu1 }
0x2266   :  { %v5148_v26 = vpack.i.bf16 %v4141_v43, %v4120_v24 }
0x2268   :  { %5149 = vrot.lane.b32.xlu0 %v5148_v26, %s5566_s13 }
0x226d   :  { %v4143_v49 = vpop.f32.mrf.mxu1 }
0x226e   :  { %v5194_v49 = vld [vmem:[#allocation7 + $0x120] ss:$0 sm:$0xff] }
0x2275   :  { %v4253_v28 = vpop.f32.mrf.mxu1 }
0x227d   :  { %v4255_v25 = vpop.f32.mrf.mxu1 }
0x2293   :  { %v4232_v30 = vpop.f32.mrf.mxu0 }
0x2294   :  { %v5153_v31 = vpack.i.bf16 %v4253_v28, %v4232_v30 }
0x2296   :  { %5154 = vrot.lane.b32.xlu1 %v5153_v31, %s5567_s14  ;;  %v5195_v31 = vld [vmem:[#allocation7 + $0x128] ss:$0 sm:$0xff] }
0x229b   :  { %v4234_v20 = vpop.f32.mrf.mxu0 }
0x22b2   :  { %v5145_v48 = vpop.permute.xlu2 %5144 }
0x22b3   :  { %v5147_v63 = vunpack.i.h.bf16 %v5145_v48  ;;  %v5146_v36 = vunpack.i.l.bf16 %v5145_v48 }
0x22b5   :  { %v4282_v47 = vsel %vm180_vm8, %v3911_v1, %v5147_v63  ;;  %v4281_v0 = vsel %vm180_vm8, %v6526_v57, %v5146_v36  ;;  %v5042_v36 = vld [vmem:[#allocation5 + $0x178] sm:$0xff] }
0x22b6   :  { %4457 = vmatpush.bf16.msrb.mxu0 %v5042_v36 }
0x22da   :  { %v5150_v34 = vpop.permute.xlu0 %5149 }
0x22db   :  { %v5152_v41 = vunpack.i.h.bf16 %v5150_v34  ;;  %v5151_v42 = vunpack.i.l.bf16 %v5150_v34 }
0x22dd   :  { %v4284_v38 = vsel %vm659_vm10, %v4282_v47, %v5152_v41  ;;  %v4283_v51 = vsel %vm659_vm10, %v4281_v0, %v5151_v42  ;;  %v5041_v41 = vld [vmem:[#allocation5 + $0x170] sm:$0xff]  ;;  %v5040_v42 = vld [vmem:[#allocation5 + $0x168] sm:$0xff] }
0x22de   :  { %4458 = vmatpush.bf16.msrb.mxu0 %v5041_v41  ;;  %v5196_v0 = vld [vmem:[#allocation7 + $0x100] ss:$0 sm:$0xff] }
0x22e2   :  { %4459 = vmatpush.bf16.msrb.mxu0 %v5040_v42 }
0x2308   :  { %v5155_v44 = vpop.permute.xlu1 %5154 }
0x2309   :  { %v5157_v54 = vunpack.i.h.bf16 %v5155_v44  ;;  %v5156_v3 = vunpack.i.l.bf16 %v5155_v44  ;;  %v5039_v44 = vld [vmem:[#allocation5 + $0x160] sm:$0xff] }
0x230a   :  { %4460 = vmatpush.bf16.msrb.mxu0 %v5039_v44 }
0x230b   :  { %v4285_v60 = vsel %vm662_vm11, %v4283_v51, %v5156_v3  ;;  %v4286_v55 = vsel %vm662_vm11, %v4284_v38, %v5157_v54 }
0x230c   :  { %v4287_v56 = vpack.c.bf16 %v4286_v55, %v4285_v60 }
0x230e   :  { %4959 = vmatmul.msk.bf16.vlgmr.msra.gmra.mxu2 %vm151_vm7, %v4287_v56  ;;  %v5197_v56 = vld [vmem:[#allocation7 + $0x108] ss:$0 sm:$0xff] }
0x2391   :  { %v4318_v53 = vpop.f32.mrf.mxu2 }
0x2392   :  { %v4319_v5 = vadd.f32 %v5193_v45, %v4318_v53 }
0x2394   :  { %v4323_v58 = vadd.f32 %v4319_v5, %v6433_v35 }
0x2396   :  { %v4327_v57 = vsel %vm151_vm7, %v4323_v58, 0.0 }
0x2397   :  { %4328 = vadd.xlane.f32.xlu2 %v4327_v57 }
0x2399   :  { %v4320_v59 = vpop.f32.mrf.mxu2 }
0x239a   :  { %v4321_v62 = vadd.f32 %v5193_v45, %v4320_v59 }
0x239c   :  { %v4324_v1 = vadd.f32 %v4321_v62, %v6435_v40  ;;  %v5038_v40 = vld [vmem:[#allocation5 + $0x158] sm:$0xff] }
0x239d   :  { %4405 = vmatpush.bf16.msrb.mxu3 %v5038_v40 }
0x239e   :  { %v4330_v2 = vsel %vm151_vm7, %v4324_v1, 0.0 }
0x239f   :  { %4331 = vadd.xlane.f32.xlu1 %v4330_v2 }
0x23a1   :  { %4406 = vmatpush.bf16.msrb.mxu3 %v5037_v11 }
0x240a   :  { %v4329_v52 = vpop.xlane.xlu2 %4328 }
0x240b   :  { %v4333_v61 = vmul.f32 %v4329_v52, %v5765_v7 }
0x240d   :  { %v4335_v4 = vsub.f32 %v4323_v58, %v4333_v61 }
0x240f   :  { %v4337_v6 = vmul.f32 %v4335_v4, %v4335_v4 }
0x2411   :  { %v4339_v46 = vsel %vm151_vm7, %v4337_v6, 0.0 }
0x2412   :  { %v4332_v39 = vpop.xlane.xlu1 %4331  ;;  %4340 = vadd.xlane.f32.xlu0 %v4339_v46 }
0x2413   :  { %v4334_v35 = vmul.f32 %v4332_v39, %v5765_v7 }
0x2415   :  { %v4336_v37 = vsub.f32 %v4324_v1, %v4334_v35 }
0x2417   :  { %v4338_v27 = vmul.f32 %v4336_v37, %v4336_v37 }
0x2419   :  { %v4342_v9 = vsel %vm151_vm7, %v4338_v27, 0.0 }
0x241a   :  { %4343 = vadd.xlane.f32.xlu2 %v4342_v9 }
0x2485   :  { %v4341_v33 = vpop.xlane.xlu0 %4340 }
0x2486   :  { %v4345_v10 = vmul.f32 %v4341_v33, %v5765_v7 }
0x2488   :  { %v4347_v29 = vadd.f32 1e-05, %v4345_v10 }
0x248a   :  { %5433 = vrsqrt.f32 %v4347_v29  ;;  %vm4355_vm9 = vweird.f32 %v4347_v29 }
0x248d   :  { %v4344_v12 = vpop.xlane.xlu2 %4343 }
0x248e   :  { %v4346_v14 = vmul.f32 %v4344_v12, %v5765_v7 }
0x2490   :  { %v5434_v16 = vpop.eup %5433  ;;  %v4348_v8 = vadd.f32 1e-05, %v4346_v14 }
0x2491   :  { %v4350_v17 = vmul.f32 %v5434_v16, %v4347_v29  ;;  %vm4356_vm8 = vweird.f32 %v5434_v16 }
0x2492   :  { %5435 = vrsqrt.f32 %v4348_v8  ;;  %vm4357_vm10 = vmor %vm4355_vm9, %vm4356_vm8  ;;  %vm4365_vm1 = vweird.f32 %v4348_v8 }
0x2493   :  { %v4351_v18 = vmul.f32 %v5434_v16, %v4350_v17 }
0x2495   :  { %v4352_v19 = vmul.f32 0.5, %v4351_v18 }
0x2497   :  { %v4353_v22 = vsub.f32 1.5, %v4352_v19 }
0x2498   :  { %v5436_v23 = vpop.eup %5435 }
0x2499   :  { %v4354_v15 = vmul.f32 %v5434_v16, %v4353_v22  ;;  %v4360_v13 = vmul.f32 %v5436_v23, %v4348_v8  ;;  %vm4366_vm11 = vweird.f32 %v5436_v23 }
0x249a   :  { %vm4367_vm2 = vmor %vm4365_vm1, %vm4366_vm11  ;;  %vm4624_vm11 = vcmask 253952  }
0x249b   :  { %v4361_v24 = vmul.f32 %v5436_v23, %v4360_v13  ;;  %v4358_v21 = vsel %vm4357_vm10, %v5434_v16, %v4354_v15 }
0x249c   :  { %v4369_v28 = vmul.f32 %v4358_v21, %v4335_v4  ;;  %v5199_v21 = vld [vmem:[#allocation7 + $0x138] ss:$0 sm:$0xff] }
0x249d   :  { %v4362_v43 = vmul.f32 0.5, %v4361_v24 }
0x249e   :  { %v4372_v20 = vmul.f32 %v5194_v49, %v4369_v28 }
0x249f   :  { %v4363_v26 = vsub.f32 1.5, %v4362_v43 }
0x24a0   :  { %v4375_v48 = vadd.f32 %v5195_v31, %v4372_v20 }
0x24a1   :  { %v4364_v25 = vmul.f32 %v5436_v23, %v4363_v26 }
0x24a3   :  { %v4368_v30 = vsel %vm4367_vm2, %v5436_v23, %v4364_v25  ;;  %v5198_v23 = vld [vmem:[#allocation7 + $0x130] ss:$0 sm:$0xff] }
0x24a4   :  { %v4370_v50 = vmul.f32 %v4368_v30, %v4336_v37 }
0x24a6   :  { %v4373_v32 = vmul.f32 %v5194_v49, %v4370_v50 }
0x24a8   :  { %v4376_v34 = vadd.f32 %v5195_v31, %v4373_v32 }
0x24aa   :  { %v4377_v63 = vpack.c.bf16 %v4376_v34, %v4375_v48 }
0x24ac   :  { %4968 = vmatmul.msk.bf16.vlgmr.msrb.gmra.mxu3 %vm151_vm7, %v4377_v63 }
0x252f   :  { %v4408_v47 = vpop.f32.mrf.mxu3 }
0x2530   :  { %v4409_v54 = vadd.f32 %v5196_v0, %v4408_v47 }
0x2532   :  { %v4413_v51 = vmax.f32 %v4409_v54, 0.0 }
0x2537   :  { %v4410_v3 = vpop.f32.mrf.mxu3 }
0x2538   :  { %v4411_v38 = vadd.f32 %v5196_v0, %v4410_v3 }
0x253a   :  { %v4414_v60 = vmax.f32 %v4411_v38, 0.0  ;;  %v5044_v38 = vld [vmem:[#allocation5 + $0x188] sm:$0xff] }
0x253b   :  { %4601 = vmatpush.bf16.msrb.mxu1 %v5044_v38 }
0x253c   :  { %v4415_v55 = vpack.c.bf16 %v4414_v60, %v4413_v51 }
0x253e   :  { %4985 = vmatmul.msk.bf16.vlgmr.msrb.gmra.mxu0 %vm835_vm3, %v4415_v55 }
0x25bb   :  { %v4462_v45 = vpop.f32.mrf.mxu0 }
0x25bc   :  { %v4463_v53 = vadd.f32 %v5197_v56, %v4462_v45 }
0x25be   :  { %v4467_v5 = vadd.f32 %v4463_v53, %v4375_v48 }
0x25c0   :  { %v4471_v58 = vsel %vm151_vm7, %v4467_v5, 0.0 }
0x25c1   :  { %4472 = vadd.xlane.f32.xlu1 %v4471_v58 }
0x25c3   :  { %v4464_v57 = vpop.f32.mrf.mxu0 }
0x25c4   :  { %v4465_v59 = vadd.f32 %v5197_v56, %v4464_v57  ;;  %v5043_v56 = vld [vmem:[#allocation5 + $0x180] sm:$0xff] }
0x25c5   :  { %4602 = vmatpush.bf16.msrb.mxu1 %v5043_v56 }
0x25c6   :  { %v4468_v62 = vadd.f32 %v4465_v59, %v4376_v34 }
0x25c8   :  { %v4474_v1 = vsel %vm151_vm7, %v4468_v62, 0.0 }
0x25c9   :  { %4475 = vadd.xlane.f32.xlu2 %v4474_v1 }
0x2634   :  { %v4473_v2 = vpop.xlane.xlu1 %4472 }
0x2635   :  { %v4477_v52 = vmul.f32 %v4473_v2, %v5765_v7 }
0x2637   :  { %v4479_v61 = vsub.f32 %v4467_v5, %v4477_v52 }
0x2639   :  { %v4481_v4 = vmul.f32 %v4479_v61, %v4479_v61 }
0x263b   :  { %v4483_v6 = vsel %vm151_vm7, %v4481_v4, 0.0 }
0x263c   :  { %v4476_v46 = vpop.xlane.xlu2 %4475  ;;  %4484 = vadd.xlane.f32.xlu1 %v4483_v6 }
0x263d   :  { %v4478_v39 = vmul.f32 %v4476_v46, %v5765_v7 }
0x263f   :  { %v4480_v35 = vsub.f32 %v4468_v62, %v4478_v39 }
0x2641   :  { %v4482_v37 = vmul.f32 %v4480_v35, %v4480_v35 }
0x2643   :  { %v4486_v27 = vsel %vm151_vm7, %v4482_v37, 0.0 }
0x2644   :  { %4487 = vadd.xlane.f32.xlu0 %v4486_v27 }
0x26af   :  { %v4485_v9 = vpop.xlane.xlu1 %4484 }
0x26b0   :  { %v4489_v40 = vmul.f32 %v4485_v9, %v5765_v7  ;;  %v5201_v9 = vld [vmem:[#allocation7 + $0x158] ss:$0 sm:$0xff] }
0x26b2   :  { %v4491_v33 = vadd.f32 1e-05, %v4489_v40 }
0x26b4   :  { %5437 = vrsqrt.f32 %v4491_v33  ;;  %vm4499_vm4 = vweird.f32 %v4491_v33 }
0x26b7   :  { %v4488_v10 = vpop.xlane.xlu0 %4487 }
0x26b8   :  { %v4490_v29 = vmul.f32 %v4488_v10, %v5765_v7 }
0x26ba   :  { %v5438_v11 = vpop.eup %5437  ;;  %v4492_v12 = vadd.f32 1e-05, %v4490_v29 }
0x26bb   :  { %v4494_v14 = vmul.f32 %v5438_v11, %v4491_v33  ;;  %vm4500_vm3 = vweird.f32 %v5438_v11 }
0x26bc   :  { %5439 = vrsqrt.f32 %v4492_v12  ;;  %vm4501_vm5 = vmor %vm4499_vm4, %vm4500_vm3  ;;  %vm4509_vm12 = vweird.f32 %v4492_v12 }
0x26bd   :  { %v4495_v16 = vmul.f32 %v5438_v11, %v4494_v14  ;;  %v5202_v14 = vld [vmem:[#allocation7 + $0x160] ss:$0 sm:$0xff] }
0x26bf   :  { %v4496_v8 = vmul.f32 0.5, %v4495_v16 }
0x26c1   :  { %v4497_v17 = vsub.f32 1.5, %v4496_v8 }
0x26c2   :  { %v5440_v18 = vpop.eup %5439 }
0x26c3   :  { %v4498_v19 = vmul.f32 %v5438_v11, %v4497_v17  ;;  %v4504_v22 = vmul.f32 %v5440_v18, %v4492_v12  ;;  %vm4510_vm6 = vweird.f32 %v5440_v18 }
0x26c4   :  { %vm4511_vm13 = vmor %vm4509_vm12, %vm4510_vm6 }
0x26c5   :  { %v4505_v15 = vmul.f32 %v5440_v18, %v4504_v22  ;;  %v4502_v13 = vsel %vm4501_vm5, %v5438_v11, %v4498_v19 }
0x26c6   :  { %v4513_v24 = vmul.f32 %v4502_v13, %v4479_v61 }
0x26c7   :  { %v4506_v43 = vmul.f32 0.5, %v4505_v15 }
0x26c8   :  { %v4516_v26 = vmul.f32 %v5198_v23, %v4513_v24 }
0x26c9   :  { %v4507_v49 = vsub.f32 1.5, %v4506_v43 }
0x26ca   :  { %v4519_v28 = vadd.f32 %v5199_v21, %v4516_v26 }
0x26cb   :  { %v4508_v25 = vmul.f32 %v5440_v18, %v4507_v49 }
0x26cc   :  { %v4523_v30 = vsel %vm151_vm7, %v4519_v28, 0.0 }
0x26cd   :  { %4524 = vadd.xlane.f32.xlu2 %v4523_v30  ;;  %v4512_v31 = vsel %vm4511_vm13, %v5440_v18, %v4508_v25 }
0x26ce   :  { %v4514_v20 = vmul.f32 %v4512_v31, %v4480_v35  ;;  %v5200_v35 = vld [vmem:[#allocation7 + $0x150] ss:$0 sm:$0xff] }
0x26d0   :  { %v4517_v50 = vmul.f32 %v5198_v23, %v4514_v20 }
0x26d2   :  { %v4520_v32 = vadd.f32 %v5199_v21, %v4517_v50 }
0x26d4   :  { %v4526_v48 = vsel %vm151_vm7, %v4520_v32, 0.0 }
0x26d5   :  { %4527 = vadd.xlane.f32.xlu1 %v4526_v48 }
0x2740   :  { %v4525_v34 = vpop.xlane.xlu2 %4524 }
0x2741   :  { %v4529_v63 = vmul.f32 %v4525_v34, %v5765_v7 }
0x2743   :  { %v4531_v36 = vsub.f32 %v4519_v28, %v4529_v63 }
0x2745   :  { %v4533_v41 = vmul.f32 %v4531_v36, %v4531_v36 }
0x2747   :  { %v4535_v42 = vsel %vm151_vm7, %v4533_v41, 0.0 }
0x2748   :  { %4536 = vadd.xlane.f32.xlu0 %v4535_v42  ;;  %v4528_v44 = vpop.xlane.xlu1 %4527 }
0x2749   :  { %v4530_v47 = vmul.f32 %v4528_v44, %v5765_v7 }
0x274b   :  { %v4532_v0 = vsub.f32 %v4520_v32, %v4530_v47 }
0x274d   :  { %v4534_v54 = vmul.f32 %v4532_v0, %v4532_v0 }
0x274f   :  { %v4538_v3 = vsel %vm151_vm7, %v4534_v54, 0.0 }
0x2750   :  { %4539 = vadd.xlane.f32.xlu2 %v4538_v3 }
0x27bb   :  { %v4537_v51 = vpop.xlane.xlu0 %4536 }
0x27bc   :  { %v4541_v60 = vmul.f32 %v4537_v51, %v5765_v7 }
0x27be   :  { %v4543_v55 = vadd.f32 1e-05, %v4541_v60 }
0x27c0   :  { %5441 = vrsqrt.f32 %v4543_v55  ;;  %vm4551_vm15 = vweird.f32 %v4543_v55 }
0x27c3   :  { %v4540_v45 = vpop.xlane.xlu2 %4539 }
0x27c4   :  { %v4542_v53 = vmul.f32 %v4540_v45, %v5765_v7 }
0x27c6   :  { %v5442_v5 = vpop.eup %5441  ;;  %v4544_v58 = vadd.f32 1e-05, %v4542_v53 }
0x27c7   :  { %v4546_v57 = vmul.f32 %v5442_v5, %v4543_v55  ;;  %vm4552_vm14 = vweird.f32 %v5442_v5 }
0x27c8   :  { %5443 = vrsqrt.f32 %v4544_v58  ;;  %vm4553_vm0 = vmor %vm4551_vm15, %vm4552_vm14  ;;  %vm4561_vm9 = vweird.f32 %v4544_v58 }
0x27c9   :  { %v4547_v59 = vmul.f32 %v5442_v5, %v4546_v57 }
0x27cb   :  { %v4548_v62 = vmul.f32 0.5, %v4547_v59 }
0x27cd   :  { %v4549_v1 = vsub.f32 1.5, %v4548_v62 }
0x27ce   :  { %v5444_v2 = vpop.eup %5443 }
0x27cf   :  { %v4550_v52 = vmul.f32 %v5442_v5, %v4549_v1  ;;  %v4556_v61 = vmul.f32 %v5444_v2, %v4544_v58  ;;  %vm4562_vm8 = vweird.f32 %v5444_v2 }
0x27d0   :  { %vm4563_vm10 = vmor %vm4561_vm9, %vm4562_vm8 }
0x27d1   :  { %v4557_v4 = vmul.f32 %v5444_v2, %v4556_v61  ;;  %v4554_v6 = vsel %vm4553_vm0, %v5442_v5, %v4550_v52 }
0x27d2   :  { %v4565_v7 = vmul.f32 %v4554_v6, %v4531_v36 }
0x27d3   :  { %v4558_v46 = vmul.f32 0.5, %v4557_v4 }
0x27d4   :  { %v4568_v40 = vmul.f32 %v5200_v35, %v4565_v7 }
0x27d5   :  { %v4559_v39 = vsub.f32 1.5, %v4558_v46 }
0x27d6   :  { %v4571_v29 = vadd.f32 %v5201_v9, %v4568_v40 }
0x27d7   :  { %v4560_v37 = vmul.f32 %v5444_v2, %v4559_v39 }
0x27d9   :  { %v4564_v27 = vsel %vm4563_vm10, %v5444_v2, %v4560_v37 }
0x27da   :  { %v4566_v33 = vmul.f32 %v4564_v27, %v4532_v0 }
0x27dc   :  { %v4569_v10 = vmul.f32 %v5200_v35, %v4566_v33 }
0x27de   :  { %v4572_v11 = vadd.f32 %v5201_v9, %v4569_v10 }
0x27e0   :  { %v4573_v12 = vpack.c.bf16 %v4572_v11, %v4571_v29 }
0x27e2   :  { %4994 = vmatmul.msk.bf16.vlgmr.msrb.gmra.mxu1 %vm151_vm7, %v4573_v12 }
0x285f   :  { %v4604_v16 = vpop.f32.mrf.mxu1 }
0x2860   :  { %v4605_v8 = vadd.f32 %v5202_v14, %v4604_v16 }
0x2862   :  { %v4610_v17 = vrot.slane %v4605_v8, 1  ;;  %v4611_v18 = vrot.slane %v4605_v8, 2  ;;  %v4612_v19 = vrot.slane %v4605_v8, 3  ;;  %4625 = vst.msk [vmem:[#allocation8] sm:$0x1] %vm4624_vm11, %v4605_v8  ;;  %v4613_v22 = vrot.slane %v4605_v8, 4 }
0x2863   :  { %v4614_v23 = vrot.slane %v4605_v8, 5  ;;  %v4615_v15 = vrot.slane %v4605_v8, 6  ;;  %v4616_v13 = vrot.slane %v4605_v8, 7 }
0x2864   :  { %4626 = vst.msk [vmem:[#allocation8 + $0x2] sm:$0x1] %vm4624_vm11, %v4610_v17 }
0x2865   :  { %4627 = vst.msk [vmem:[#allocation8 + $0x4] sm:$0x1] %vm4624_vm11, %v4611_v18 }
0x2866   :  { %4628 = vst.msk [vmem:[#allocation8 + $0x6] sm:$0x1] %vm4624_vm11, %v4612_v19 }
0x2867   :  { %4629 = vst.msk [vmem:[#allocation8 + $0x8] sm:$0x1] %vm4624_vm11, %v4613_v22  ;;  %v4606_v24 = vpop.f32.mrf.mxu1 }
0x2868   :  { %4630 = vst.msk [vmem:[#allocation8 + $0xa] sm:$0x1] %vm4624_vm11, %v4614_v23  ;;  %v4607_v21 = vadd.f32 %v5202_v14, %v4606_v24 }
0x2869   :  { %4631 = vst.msk [vmem:[#allocation8 + $0xc] sm:$0x1] %vm4624_vm11, %v4615_v15 }
0x286a   :  { %4632 = vst.msk [vmem:[#allocation8 + $0xe] sm:$0x1] %vm4624_vm11, %v4616_v13  ;;  %v4634_v43 = vrot.slane %v4607_v21, 1  ;;  %v4635_v26 = vrot.slane %v4607_v21, 2  ;;  %v4636_v49 = vrot.slane %v4607_v21, 3  ;;  %v4637_v28 = vrot.slane %v4607_v21, 4 }
0x286b   :  { %4648 = vst.msk [vmem:[#allocation8 + $0x1] sm:$0x1] %vm4624_vm11, %v4607_v21  ;;  %v4638_v25 = vrot.slane %v4607_v21, 5  ;;  %v4639_v30 = vrot.slane %v4607_v21, 6  ;;  %v4640_v31 = vrot.slane %v4607_v21, 7 }
0x286c   :  { %4649 = vst.msk [vmem:[#allocation8 + $0x3] sm:$0x1] %vm4624_vm11, %v4634_v43 }
0x286d   :  { %4650 = vst.msk [vmem:[#allocation8 + $0x5] sm:$0x1] %vm4624_vm11, %v4635_v26 }
0x286e   :  { %4651 = vst.msk [vmem:[#allocation8 + $0x7] sm:$0x1] %vm4624_vm11, %v4636_v49 }
0x286f   :  { %4652 = vst.msk [vmem:[#allocation8 + $0x9] sm:$0x1] %vm4624_vm11, %v4637_v28 }
0x2870   :  { %4653 = vst.msk [vmem:[#allocation8 + $0xb] sm:$0x1] %vm4624_vm11, %v4638_v25 }
0x2871   :  { %4654 = vst.msk [vmem:[#allocation8 + $0xd] sm:$0x1] %vm4624_vm11, %v4639_v30 }
0x2872   :  { %4655 = vst.msk [vmem:[#allocation8 + $0xf] sm:$0x1] %vm4624_vm11, %v4640_v31 }
0x2873   :  { %4668 = dma.vmem_to_hbm [thread:$0]  %s4661_s16, 256, %s4663_s19, [#allocation4], %s5551_s24, %s5551_s24, %s5552_s1  }
0x2874   :  { %5545 = dma.done.wait [#allocation4], 256  }
0x2875   :  { %5546 = vsyncadd [#allocation4], 4294967040 }
0x2876   :  { %4673 = vsyncpa [#allocation3], 1 }
0x2877   :  { %4674 = vsyncpa [#allocation6], 1 }
0x2878   :  { %4675 = vsyncpa [#allocation4], 1 }

</bundles_post_ra>
